<compile_context>
chip_gen: v7x
topology: tpu7x:2x2x1
jax: 0.10.0
libtpu: 0.0.40
codegen_flags: <defaults>
</compile_context>

<pallas_src>
import functools

import jax
import jax.numpy as jnp
from jax import lax
from jax.experimental import pallas as pl
from jax.experimental.pallas import tpu as pltpu


# ----------------------------------------------------------------------------
# In-kernel helpers
# ----------------------------------------------------------------------------
def _conv_same_flat(a, w_r, H, W, K):
    """'same' KxK conv (odd K, stride 1, no bias) on a flattened activation.

    a   : (H*W, Cin) bf16, row-major over (y, x).
    w_r : (K*Cin, K*Cout) bf16; rows ordered (kx, ci), cols ordered (ky, co).
    Returns (H*W, Cout) float32.

    Builds only K dx-shifted columns (edge masks hoisted out of the ky loop),
    runs ONE deep MXU matmul (depth K*Cin) producing all ky blocks at once,
    then combines them with K-1 sublane-aligned row shifts (by multiples of W).
    """
    HW, C = a.shape
    Cout = w_r.shape[1] // K
    if K == 1:
        return jnp.dot(a, w_r, preferred_element_type=jnp.float32)
    rad = K // 2
    x_idx = lax.broadcasted_iota(jnp.int32, (HW, 1), 0) % W

    # dx taps: value at row p is a[p + dx], zeroed where x + dx is off-image.
    cols = []
    for kx in range(K):
        dx = kx - rad
        if dx == 0:
            cols.append(a)
            continue
        if dx < 0:
            t = jnp.concatenate(
                [jnp.zeros((-dx, C), a.dtype), a[:HW + dx, :]], axis=0)
        else:
            t = jnp.concatenate(
                [a[dx:, :], jnp.zeros((dx, C), a.dtype)], axis=0)
        valid = jnp.logical_and(x_idx + dx >= 0, x_idx + dx < W)
        cols.append(jnp.where(valid, t, jnp.zeros_like(t)))
    cat = jnp.concatenate(cols, axis=-1)                          # (HW, K*C)

    # One deep matmul: column block ky holds that row's contribution.
    rmat = jnp.dot(cat, w_r, preferred_element_type=jnp.float32)  # (HW, K*Cout)

    # out[p] = sum_ky rmat[p + (ky - rad) * W, ky-block]  (zero off-image).
    out = rmat[:, rad * Cout:(rad + 1) * Cout]
    for ky in range(K):
        dy = ky - rad
        if dy == 0:
            continue
        blk = rmat[:, ky * Cout:(ky + 1) * Cout]
        s = dy * W
        if dy < 0:
            shifted = jnp.concatenate(
                [jnp.zeros((-s, Cout), jnp.float32), blk[:HW + s, :]], axis=0)
        else:
            shifted = jnp.concatenate(
                [blk[s:, :], jnp.zeros((s, Cout), jnp.float32)], axis=0)
        out = out + shifted
    return out


# ----------------------------------------------------------------------------
# Fused SNDisBlock kernel:  relu -> c1 -> relu -> c2 [-> pool]  +  shortcut
# ----------------------------------------------------------------------------
def _sn_dis_block_kernel(x_ref, w1_ref, w2_ref, *rest, H, W, K, B_TILE,
                         downsample, learnable_sc):
    rest = list(rest)
    o_ref = rest.pop()                          # output ref is last
    wsc_ref = rest.pop(0) if learnable_sc else None
    pool_ref = rest.pop(0) if downsample else None

    # Hoist weight loads out of the per-image loop.
    w1 = w1_ref[...]
    w2 = w2_ref[...]
    wsc = wsc_ref[...] if learnable_sc else None
    pool = pool_ref[...] if downsample else None

    def per_image(b, carry):
        x = x_ref[b]                                        # (H*W, Cin)
        # Residual path: pre-activation ReLU applied once on the resident tile.
        a = jnp.maximum(x, 0).astype(jnp.bfloat16)
        h = _conv_same_flat(a, w1, H, W, K)                 # (H*W, Ch)   f32
        h = jnp.maximum(h, 0.0).astype(jnp.bfloat16)
        h = _conv_same_flat(h, w2, H, W, K)                 # (H*W, Cout) f32
        # Shortcut path (1x1 conv on raw x, or identity in full f32).
        if learnable_sc:
            sc = jnp.dot(x.astype(jnp.bfloat16), wsc,
                         preferred_element_type=jnp.float32)
        else:
            sc = x.astype(jnp.float32)
        out = h + sc
        if downsample:
            # Pooling is linear, so pooling the sum equals the module's
            # pool-each-branch order.  bf16 x bf16 MXU matmul, f32 accumulate.
            out = jnp.dot(pool, out.astype(jnp.bfloat16),
                          preferred_element_type=jnp.float32)
        o_ref[b] = out
        return carry

    lax.fori_loop(0, B_TILE, per_image, 0, unroll=True)


# ----------------------------------------------------------------------------
# Host-side wrappers
# ----------------------------------------------------------------------------
def _fold_conv_weight(w):
    """(K, K, Cin, Cout) HWIO -> (K*Cin, K*Cout) bf16, rows (kx,ci), cols (ky,co)."""
    K = w.shape[0]
    Cin, Cout = w.shape[2], w.shape[3]
    return jnp.transpose(w, (1, 2, 0, 3)).reshape(K * Cin, K * Cout).astype(jnp.bfloat16)


def _pool2_matrix(H, W):
    """(H//2*W//2, H*W) bf16 matrix P with P @ flat(x) == flat(2x2 avg-pool(x))."""
    Hp, Wp = H // 2, W // 2
    r = jnp.arange(H * W)
    cell = (r // W // 2) * Wp + (r % W) // 2
    P = (jnp.arange(Hp * Wp)[:, None] == cell[None, :]).astype(jnp.float32) * 0.25
    return P.astype(jnp.bfloat16)         # 0.25 is exact in bf16


def sn_dis_block_flat(x_flat, params, *, H, W, downsample=False, ksize=3,
                      batch_tile=1):
    """Core fused forward on flattened-NHWC input.

    x_flat: (N, H*W, Cin).  Pass bf16 when the shortcut is learnable (x only
    feeds MXU matmuls); pass f32 when the shortcut is the identity so the
    residual add keeps full precision.
    Returns (N, H'*W', Cout) float32.
    """
    N, HW, Cin = x_flat.shape
    K = ksize
    assert K % 2 == 1, "only odd ksize with 'same' padding is supported"
    assert HW == H * W
    assert N % batch_tile == 0
    w1, w2 = params['c1'], params['c2']
    Ch, Cout = w1.shape[-1], w2.shape[-1]
    learnable_sc = (Cin != Cout) or downsample

    w1f = _fold_conv_weight(w1)                 # (K*Cin, K*Ch)   bf16
    w2f = _fold_conv_weight(w2)                 # (K*Ch,  K*Cout) bf16

    args = [x_flat, w1f, w2f]
    in_specs = [
        pl.BlockSpec((batch_tile, HW, Cin), lambda n: (n, 0, 0)),
        pl.BlockSpec(w1f.shape, lambda n: (0, 0)),
        pl.BlockSpec(w2f.shape, lambda n: (0, 0)),
    ]
    if learnable_sc:
        wscf = params['c_sc'].reshape(Cin, Cout).astype(jnp.bfloat16)
        args.append(wscf)
        in_specs.append(pl.BlockSpec(wscf.shape, lambda n: (0, 0)))
    if downsample:
        P = _pool2_matrix(H, W)
        args.append(P)
        in_specs.append(pl.BlockSpec(P.shape, lambda n: (0, 0)))

    Ho, Wo = (H // 2, W // 2) if downsample else (H, W)
    kernel = functools.partial(_sn_dis_block_kernel, H=H, W=W, K=K,
                               B_TILE=batch_tile, downsample=downsample,
                               learnable_sc=learnable_sc)
    return pl.pallas_call(
        kernel,
        out_shape=jax.ShapeDtypeStruct((N, Ho * Wo, Cout), jnp.float32),
        grid=(N // batch_tile,),
        in_specs=in_specs,
        out_specs=pl.BlockSpec((batch_tile, Ho * Wo, Cout), lambda n: (n, 0, 0)),
        compiler_params=pltpu.CompilerParams(
            dimension_semantics=("parallel",),       # images across TCs on v7x
            vmem_limit_bytes=32 * 1024 * 1024),
    )(*args)


def sn_dis_block(x, params, *, downsample=False, ksize=3, batch_tile=1):
    """NCHW adapter matching the PyTorch module.  x: (N, Cin, H, W) float32.

    NOTE: the NCHW<->NHWC transposes here are pure layout plumbing outside the
    kernel; callers already holding NHWC / (N, H*W, C) activations should call
    sn_dis_block_flat directly and skip the extra HBM passes.
    """
    N, Cin, H, W = x.shape
    Cout = params['c2'].shape[-1]
    learnable_sc = (Cin != Cout) or downsample
    xf = jnp.transpose(x, (0, 2, 3, 1)).reshape(N, H * W, Cin)
    if learnable_sc:
        xf = xf.astype(jnp.bfloat16)     # x only feeds MXU matmuls
    # else: keep f32 so the identity-shortcut residual add is full precision.
    out = sn_dis_block_flat(xf, params, H=H, W=W, downsample=downsample,
                            ksize=ksize, batch_tile=batch_tile)
    Ho, Wo = (H // 2, W // 2) if downsample else (H, W)
    return jnp.transpose(out.reshape(N, Ho, Wo, Cout), (0, 3, 1, 2))


# ----------------------------------------------------------------------------
# Pure-JAX reference (f32) and deterministic synthetic parameters
# ----------------------------------------------------------------------------
def _ref_sn_dis_block(x, params, *, downsample=False):
    def conv(h, w, padding):
        return lax.conv_general_dilated(h, w, (1, 1), padding,
                                        dimension_numbers=('NCHW', 'HWIO', 'NCHW'))

    def pool(h):
        n, c, hh, ww = h.shape
        return h.reshape(n, c, hh // 2, 2, ww // 2, 2).mean(axis=(3, 5))

    Cin, Cout = x.shape[1], params['c2'].shape[-1]
    learnable_sc = (Cin != Cout) or downsample
    h = jax.nn.relu(x)
    h = conv(h, params['c1'], 'SAME')
    h = jax.nn.relu(h)
    h = conv(h, params['c2'], 'SAME')
    if downsample:
        h = pool(h)
    if learnable_sc:
        sc = conv(x, params['c_sc'], 'VALID')
        if downsample:
            sc = pool(sc)
    else:
        sc = x
    return h + sc


def init_params(key, in_ch, out_ch, hidden_ch=None, *, ksize=3, downsample=False):
    hidden_ch = in_ch if hidden_ch is None else hidden_ch
    learnable_sc = (in_ch != out_ch) or downsample

    def conv_w(k, K, cin, cout):
        fan_in = K * K * cin
        return jax.random.normal(k, (K, K, cin, cout), jnp.float32) * (2.0 / fan_in) ** 0.5

    k1, k2, k3 = jax.random.split(key, 3)
    p = {'c1': conv_w(k1, ksize, in_ch, hidden_ch),
         'c2': conv_w(k2, ksize, hidden_ch, out_ch)}
    if learnable_sc:
        p['c_sc'] = conv_w(k3, 1, in_ch, out_ch)
    return p


if __name__ == "__main__":
    key = jax.random.PRNGKey(0)
    kx1, kx2, kp1, kp2 = jax.random.split(key, 4)
    C, Hs, Ws = 128, 16, 16

    # Config A: downsample=True -> learnable 1x1 shortcut + fused bf16 2x2
    # avg-pool; two images per grid step (batch_tile=2).
    NA = 4
    xA = jax.random.normal(kx1, (NA, C, Hs, Ws), jnp.float32)
    pA = init_params(kp1, C, C, downsample=True)
    fA = jax.jit(functools.partial(sn_dis_block, downsample=True, batch_tile=2))
    outA = jax.block_until_ready(fA(xA, pA))
    refA = _ref_sn_dis_block(xA, pA, downsample=True)
    assert outA.shape == (NA, C, Hs // 2, Ws // 2) and outA.dtype == jnp.float32
    assert jnp.allclose(outA, refA, rtol=5e-2, atol=1e-1), \
        float(jnp.max(jnp.abs(outA - refA)))

    # Config B: downsample=False, in_ch == out_ch -> identity shortcut (f32 x).
    NB = 2
    xB = jax.random.normal(kx2, (NB, C, Hs, Ws), jnp.float32)
    pB = init_params(kp2, C, C, downsample=False)
    fB = jax.jit(functools.partial(sn_dis_block, downsample=False))
    outB = jax.block_until_ready(fB(xB, pB))
    refB = _ref_sn_dis_block(xB, pB, downsample=False)
    assert outB.shape == (NB, C, Hs, Ws) and outB.dtype == jnp.float32
    assert jnp.allclose(outB, refB, rtol=5e-2, atol=1e-1), \
        float(jnp.max(jnp.abs(outB - refB)))

    print("KERNEL_OK")
</pallas_src>

<mosaic_0001>
module attributes {stable_mosaic.version = 11 : i64} {
  func.func @_sn_dis_block_kernel(%arg0: i32, %arg1: memref<2x256x128xbf16, #tpu.memory_space<vmem>>, %arg2: memref<384x384xbf16, #tpu.memory_space<vmem>>, %arg3: memref<384x384xbf16, #tpu.memory_space<vmem>>, %arg4: memref<128x128xbf16, #tpu.memory_space<vmem>>, %arg5: memref<64x256xbf16, #tpu.memory_space<vmem>>, %arg6: memref<2x64x128xf32, #tpu.memory_space<vmem>>) attributes {dimension_semantics = [#tpu.dimension_semantics<parallel>], iteration_bounds = array<i64: 2>, scalar_prefetch = 0 : i64, scratch_operands = 0 : i64, tpu.core_type = #tpu.core_type<tc>, window_params = [{transform_indices = @transform_0, window_bounds = array<i64: 2, 256, 128>}, {pipeline_mode = #tpu.pipeline_mode<synchronous>, transform_indices = @transform_1, window_bounds = array<i64: 384, 384>}, {pipeline_mode = #tpu.pipeline_mode<synchronous>, transform_indices = @transform_2, window_bounds = array<i64: 384, 384>}, {pipeline_mode = #tpu.pipeline_mode<synchronous>, transform_indices = @transform_3, window_bounds = array<i64: 128, 128>}, {pipeline_mode = #tpu.pipeline_mode<synchronous>, transform_indices = @transform_4, window_bounds = array<i64: 64, 256>}, {transform_indices = @transform_5, window_bounds = array<i64: 2, 64, 128>}]} {
    %c0 = arith.constant 0 : index
    %c0_0 = arith.constant 0 : index
    %0 = vector.load %arg2[%c0, %c0_0] : memref<384x384xbf16, #tpu.memory_space<vmem>>, vector<384x384xbf16>
    %c0_1 = arith.constant 0 : index
    %c0_2 = arith.constant 0 : index
    %1 = vector.load %arg3[%c0_1, %c0_2] : memref<384x384xbf16, #tpu.memory_space<vmem>>, vector<384x384xbf16>
    %c0_3 = arith.constant 0 : index
    %c0_4 = arith.constant 0 : index
    %2 = vector.load %arg4[%c0_3, %c0_4] : memref<128x128xbf16, #tpu.memory_space<vmem>>, vector<128x128xbf16>
    %c0_5 = arith.constant 0 : index
    %c0_6 = arith.constant 0 : index
    %3 = vector.load %arg5[%c0_5, %c0_6] : memref<64x256xbf16, #tpu.memory_space<vmem>>, vector<64x256xbf16>
    %c0_i32 = arith.constant 0 : i32
    %4 = arith.index_cast %c0_i32 : i32 to index
    %c0_7 = arith.constant 0 : index
    %c0_8 = arith.constant 0 : index
    %5 = vector.load %arg1[%4, %c0_7, %c0_8] : memref<2x256x128xbf16, #tpu.memory_space<vmem>>, vector<1x256x128xbf16>
    %6 = vector.shape_cast %5 : vector<1x256x128xbf16> to vector<256x128xbf16>
    %cst = arith.constant 0.000000e+00 : bf16
    %7 = vector.broadcast %cst : bf16 to vector<256x128xbf16>
    %8 = arith.maximumf %6, %7 : vector<256x128xbf16>
    %9 = tpu.iota {dimensions = array<i32: 0>} : vector<256x1xi32>
    %c16_i32 = arith.constant 16 : i32
    %c0_i32_9 = arith.constant 0 : i32
    %10 = arith.cmpi eq, %c16_i32, %c0_i32_9 : i32
    %c1_i32 = arith.constant 1 : i32
    %11 = arith.select %10, %c1_i32, %c16_i32 : i32
    %12 = vector.broadcast %11 : i32 to vector<256x1xi32>
    %13 = arith.remsi %9, %12 : vector<256x1xi32>
    %c0_i32_10 = arith.constant 0 : i32
    %14 = vector.broadcast %c0_i32_10 : i32 to vector<256x1xi32>
    %15 = arith.cmpi ne, %13, %14 : vector<256x1xi32>
    %c0_i32_11 = arith.constant 0 : i32
    %16 = vector.broadcast %c0_i32_11 : i32 to vector<256x1xi32>
    %17 = arith.cmpi slt, %13, %16 : vector<256x1xi32>
    %c0_i32_12 = arith.constant 0 : i32
    %18 = arith.cmpi slt, %11, %c0_i32_12 : i32
    %19 = vector.broadcast %18 : i1 to vector<256x1xi1>
    %20 = vector.broadcast %19 : vector<256x1xi1> to vector<256x1xi1>
    %21 = arith.xori %17, %20 : vector<256x1xi1>
    %22 = arith.andi %21, %15 : vector<256x1xi1>
    %23 = vector.broadcast %11 : i32 to vector<256x1xi32>
    %24 = arith.addi %13, %23 : vector<256x1xi32>
    %25 = arith.select %22, %24, %13 : vector<256x1xi1>, vector<256x1xi32>
    %cst_13 = arith.constant 0.000000e+00 : bf16
    %26 = vector.broadcast %cst_13 : bf16 to vector<1x128xbf16>
    %27 = vector.extract_strided_slice %8 {offsets = [0, 0], sizes = [255, 128], strides = [1, 1]} : vector<256x128xbf16> to vector<255x128xbf16>
    %28 = tpu.concatenate %26, %27 in 0 : vector<1x128xbf16>, vector<255x128xbf16> -> vector<256x128xbf16>
    %c-1_i32 = arith.constant -1 : i32
    %29 = vector.broadcast %c-1_i32 : i32 to vector<256x1xi32>
    %30 = arith.addi %25, %29 : vector<256x1xi32>
    %c0_i32_14 = arith.constant 0 : i32
    %31 = vector.broadcast %c0_i32_14 : i32 to vector<256x1xi32>
    %32 = arith.cmpi sge, %30, %31 : vector<256x1xi32>
    %c-1_i32_15 = arith.constant -1 : i32
    %33 = vector.broadcast %c-1_i32_15 : i32 to vector<256x1xi32>
    %34 = arith.addi %25, %33 : vector<256x1xi32>
    %c16_i32_16 = arith.constant 16 : i32
    %35 = vector.broadcast %c16_i32_16 : i32 to vector<256x1xi32>
    %36 = arith.cmpi slt, %34, %35 : vector<256x1xi32>
    %37 = arith.andi %32, %36 : vector<256x1xi1>
    %cst_17 = arith.constant 0.000000e+00 : bf16
    %38 = vector.broadcast %cst_17 : bf16 to vector<256x128xbf16>
    %39 = vector.shape_cast %37 : vector<256x1xi1> to vector<256x1xi1>
    %40 = vector.broadcast %39 : vector<256x1xi1> to vector<256x128xi1>
    %41 = arith.select %40, %28, %38 : vector<256x128xi1>, vector<256x128xbf16>
    %42 = vector.extract_strided_slice %8 {offsets = [1, 0], sizes = [255, 128], strides = [1, 1]} : vector<256x128xbf16> to vector<255x128xbf16>
    %cst_18 = arith.constant 0.000000e+00 : bf16
    %43 = vector.broadcast %cst_18 : bf16 to vector<1x128xbf16>
    %44 = tpu.concatenate %42, %43 in 0 : vector<255x128xbf16>, vector<1x128xbf16> -> vector<256x128xbf16>
    %c1_i32_19 = arith.constant 1 : i32
    %45 = vector.broadcast %c1_i32_19 : i32 to vector<256x1xi32>
    %46 = arith.addi %25, %45 : vector<256x1xi32>
    %c0_i32_20 = arith.constant 0 : i32
    %47 = vector.broadcast %c0_i32_20 : i32 to vector<256x1xi32>
    %48 = arith.cmpi sge, %46, %47 : vector<256x1xi32>
    %c1_i32_21 = arith.constant 1 : i32
    %49 = vector.broadcast %c1_i32_21 : i32 to vector<256x1xi32>
    %50 = arith.addi %25, %49 : vector<256x1xi32>
    %c16_i32_22 = arith.constant 16 : i32
    %51 = vector.broadcast %c16_i32_22 : i32 to vector<256x1xi32>
    %52 = arith.cmpi slt, %50, %51 : vector<256x1xi32>
    %53 = arith.andi %48, %52 : vector<256x1xi1>
    %cst_23 = arith.constant 0.000000e+00 : bf16
    %54 = vector.broadcast %cst_23 : bf16 to vector<256x128xbf16>
    %55 = vector.shape_cast %53 : vector<256x1xi1> to vector<256x1xi1>
    %56 = vector.broadcast %55 : vector<256x1xi1> to vector<256x128xi1>
    %57 = arith.select %56, %44, %54 : vector<256x128xi1>, vector<256x128xbf16>
    %58 = tpu.concatenate %41, %8, %57 in 1 : vector<256x128xbf16>, vector<256x128xbf16>, vector<256x128xbf16> -> vector<256x384xbf16>
    %cst_24 = arith.constant dense<0.000000e+00> : vector<256x384xf32>
    %59 = tpu.matmul %58, %0, %cst_24 {dimension_numbers = #tpu.dot_dimension_numbers<[1], [0], [0], [1], [0, 0, 1, 1], [], []>} : vector<256x384xbf16>, vector<384x384xbf16>, vector<256x384xf32> -> vector<256x384xf32>
    %60 = vector.extract_strided_slice %59 {offsets = [0, 128], sizes = [256, 128], strides = [1, 1]} : vector<256x384xf32> to vector<256x128xf32>
    %61 = vector.extract_strided_slice %59 {offsets = [0, 0], sizes = [256, 128], strides = [1, 1]} : vector<256x384xf32> to vector<256x128xf32>
    %cst_25 = arith.constant 0.000000e+00 : f32
    %62 = vector.broadcast %cst_25 : f32 to vector<16x128xf32>
    %63 = vector.extract_strided_slice %61 {offsets = [0, 0], sizes = [240, 128], strides = [1, 1]} : vector<256x128xf32> to vector<240x128xf32>
    %64 = tpu.concatenate %62, %63 in 0 : vector<16x128xf32>, vector<240x128xf32> -> vector<256x128xf32>
    %65 = arith.addf %60, %64 : vector<256x128xf32>
    %66 = vector.extract_strided_slice %59 {offsets = [0, 256], sizes = [256, 128], strides = [1, 1]} : vector<256x384xf32> to vector<256x128xf32>
    %67 = vector.extract_strided_slice %66 {offsets = [16, 0], sizes = [240, 128], strides = [1, 1]} : vector<256x128xf32> to vector<240x128xf32>
    %cst_26 = arith.constant 0.000000e+00 : f32
    %68 = vector.broadcast %cst_26 : f32 to vector<16x128xf32>
    %69 = tpu.concatenate %67, %68 in 0 : vector<240x128xf32>, vector<16x128xf32> -> vector<256x128xf32>
    %70 = arith.addf %65, %69 : vector<256x128xf32>
    %cst_27 = arith.constant 0.000000e+00 : f32
    %71 = vector.broadcast %cst_27 : f32 to vector<256x128xf32>
    %72 = arith.maximumf %70, %71 : vector<256x128xf32>
    %73 = arith.truncf %72 : vector<256x128xf32> to vector<256x128xbf16>
    %74 = tpu.iota {dimensions = array<i32: 0>} : vector<256x1xi32>
    %c16_i32_28 = arith.constant 16 : i32
    %c0_i32_29 = arith.constant 0 : i32
    %75 = arith.cmpi eq, %c16_i32_28, %c0_i32_29 : i32
    %c1_i32_30 = arith.constant 1 : i32
    %76 = arith.select %75, %c1_i32_30, %c16_i32_28 : i32
    %77 = vector.broadcast %76 : i32 to vector<256x1xi32>
    %78 = arith.remsi %74, %77 : vector<256x1xi32>
    %c0_i32_31 = arith.constant 0 : i32
    %79 = vector.broadcast %c0_i32_31 : i32 to vector<256x1xi32>
    %80 = arith.cmpi ne, %78, %79 : vector<256x1xi32>
    %c0_i32_32 = arith.constant 0 : i32
    %81 = vector.broadcast %c0_i32_32 : i32 to vector<256x1xi32>
    %82 = arith.cmpi slt, %78, %81 : vector<256x1xi32>
    %c0_i32_33 = arith.constant 0 : i32
    %83 = arith.cmpi slt, %76, %c0_i32_33 : i32
    %84 = vector.broadcast %83 : i1 to vector<256x1xi1>
    %85 = vector.broadcast %84 : vector<256x1xi1> to vector<256x1xi1>
    %86 = arith.xori %82, %85 : vector<256x1xi1>
    %87 = arith.andi %86, %80 : vector<256x1xi1>
    %88 = vector.broadcast %76 : i32 to vector<256x1xi32>
    %89 = arith.addi %78, %88 : vector<256x1xi32>
    %90 = arith.select %87, %89, %78 : vector<256x1xi1>, vector<256x1xi32>
    %cst_34 = arith.constant 0.000000e+00 : bf16
    %91 = vector.broadcast %cst_34 : bf16 to vector<1x128xbf16>
    %92 = vector.extract_strided_slice %73 {offsets = [0, 0], sizes = [255, 128], strides = [1, 1]} : vector<256x128xbf16> to vector<255x128xbf16>
    %93 = tpu.concatenate %91, %92 in 0 : vector<1x128xbf16>, vector<255x128xbf16> -> vector<256x128xbf16>
    %c-1_i32_35 = arith.constant -1 : i32
    %94 = vector.broadcast %c-1_i32_35 : i32 to vector<256x1xi32>
    %95 = arith.addi %90, %94 : vector<256x1xi32>
    %c0_i32_36 = arith.constant 0 : i32
    %96 = vector.broadcast %c0_i32_36 : i32 to vector<256x1xi32>
    %97 = arith.cmpi sge, %95, %96 : vector<256x1xi32>
    %c-1_i32_37 = arith.constant -1 : i32
    %98 = vector.broadcast %c-1_i32_37 : i32 to vector<256x1xi32>
    %99 = arith.addi %90, %98 : vector<256x1xi32>
    %c16_i32_38 = arith.constant 16 : i32
    %100 = vector.broadcast %c16_i32_38 : i32 to vector<256x1xi32>
    %101 = arith.cmpi slt, %99, %100 : vector<256x1xi32>
    %102 = arith.andi %97, %101 : vector<256x1xi1>
    %cst_39 = arith.constant 0.000000e+00 : bf16
    %103 = vector.broadcast %cst_39 : bf16 to vector<256x128xbf16>
    %104 = vector.shape_cast %102 : vector<256x1xi1> to vector<256x1xi1>
    %105 = vector.broadcast %104 : vector<256x1xi1> to vector<256x128xi1>
    %106 = arith.select %105, %93, %103 : vector<256x128xi1>, vector<256x128xbf16>
    %107 = vector.extract_strided_slice %73 {offsets = [1, 0], sizes = [255, 128], strides = [1, 1]} : vector<256x128xbf16> to vector<255x128xbf16>
    %cst_40 = arith.constant 0.000000e+00 : bf16
    %108 = vector.broadcast %cst_40 : bf16 to vector<1x128xbf16>
    %109 = tpu.concatenate %107, %108 in 0 : vector<255x128xbf16>, vector<1x128xbf16> -> vector<256x128xbf16>
    %c1_i32_41 = arith.constant 1 : i32
    %110 = vector.broadcast %c1_i32_41 : i32 to vector<256x1xi32>
    %111 = arith.addi %90, %110 : vector<256x1xi32>
    %c0_i32_42 = arith.constant 0 : i32
    %112 = vector.broadcast %c0_i32_42 : i32 to vector<256x1xi32>
    %113 = arith.cmpi sge, %111, %112 : vector<256x1xi32>
    %c1_i32_43 = arith.constant 1 : i32
    %114 = vector.broadcast %c1_i32_43 : i32 to vector<256x1xi32>
    %115 = arith.addi %90, %114 : vector<256x1xi32>
    %c16_i32_44 = arith.constant 16 : i32
    %116 = vector.broadcast %c16_i32_44 : i32 to vector<256x1xi32>
    %117 = arith.cmpi slt, %115, %116 : vector<256x1xi32>
    %118 = arith.andi %113, %117 : vector<256x1xi1>
    %cst_45 = arith.constant 0.000000e+00 : bf16
    %119 = vector.broadcast %cst_45 : bf16 to vector<256x128xbf16>
    %120 = vector.shape_cast %118 : vector<256x1xi1> to vector<256x1xi1>
    %121 = vector.broadcast %120 : vector<256x1xi1> to vector<256x128xi1>
    %122 = arith.select %121, %109, %119 : vector<256x128xi1>, vector<256x128xbf16>
    %123 = tpu.concatenate %106, %73, %122 in 1 : vector<256x128xbf16>, vector<256x128xbf16>, vector<256x128xbf16> -> vector<256x384xbf16>
    %cst_46 = arith.constant dense<0.000000e+00> : vector<256x384xf32>
    %124 = tpu.matmul %123, %1, %cst_46 {dimension_numbers = #tpu.dot_dimension_numbers<[1], [0], [0], [1], [0, 0, 1, 1], [], []>} : vector<256x384xbf16>, vector<384x384xbf16>, vector<256x384xf32> -> vector<256x384xf32>
    %125 = vector.extract_strided_slice %124 {offsets = [0, 128], sizes = [256, 128], strides = [1, 1]} : vector<256x384xf32> to vector<256x128xf32>
    %126 = vector.extract_strided_slice %124 {offsets = [0, 0], sizes = [256, 128], strides = [1, 1]} : vector<256x384xf32> to vector<256x128xf32>
    %cst_47 = arith.constant 0.000000e+00 : f32
    %127 = vector.broadcast %cst_47 : f32 to vector<16x128xf32>
    %128 = vector.extract_strided_slice %126 {offsets = [0, 0], sizes = [240, 128], strides = [1, 1]} : vector<256x128xf32> to vector<240x128xf32>
    %129 = tpu.concatenate %127, %128 in 0 : vector<16x128xf32>, vector<240x128xf32> -> vector<256x128xf32>
    %130 = arith.addf %125, %129 : vector<256x128xf32>
    %131 = vector.extract_strided_slice %124 {offsets = [0, 256], sizes = [256, 128], strides = [1, 1]} : vector<256x384xf32> to vector<256x128xf32>
    %132 = vector.extract_strided_slice %131 {offsets = [16, 0], sizes = [240, 128], strides = [1, 1]} : vector<256x128xf32> to vector<240x128xf32>
    %cst_48 = arith.constant 0.000000e+00 : f32
    %133 = vector.broadcast %cst_48 : f32 to vector<16x128xf32>
    %134 = tpu.concatenate %132, %133 in 0 : vector<240x128xf32>, vector<16x128xf32> -> vector<256x128xf32>
    %135 = arith.addf %130, %134 : vector<256x128xf32>
    %cst_49 = arith.constant dense<0.000000e+00> : vector<256x128xf32>
    %136 = tpu.matmul %6, %2, %cst_49 {dimension_numbers = #tpu.dot_dimension_numbers<[1], [0], [0], [1], [0, 0, 1, 1], [], []>} : vector<256x128xbf16>, vector<128x128xbf16>, vector<256x128xf32> -> vector<256x128xf32>
    %137 = arith.addf %135, %136 : vector<256x128xf32>
    %138 = arith.truncf %137 : vector<256x128xf32> to vector<256x128xbf16>
    %cst_50 = arith.constant dense<0.000000e+00> : vector<64x128xf32>
    %139 = tpu.matmul %3, %138, %cst_50 {dimension_numbers = #tpu.dot_dimension_numbers<[1], [0], [0], [1], [0, 0, 1, 1], [], []>} : vector<64x256xbf16>, vector<256x128xbf16>, vector<64x128xf32> -> vector<64x128xf32>
    %140 = arith.index_cast %c0_i32 : i32 to index
    %c0_51 = arith.constant 0 : index
    %c0_52 = arith.constant 0 : index
    %141 = vector.load %arg6[%140, %c0_51, %c0_52] : memref<2x64x128xf32, #tpu.memory_space<vmem>>, vector<1x64x128xf32>
    %142 = vector.shape_cast %141 : vector<1x64x128xf32> to vector<64x128xf32>
    %143 = vector.shape_cast %139 : vector<64x128xf32> to vector<1x64x128xf32>
    tpu.vector_store %arg6[%140, %c0_51, %c0_52], %143 {strides = array<i32>} : memref<2x64x128xf32, #tpu.memory_space<vmem>>, vector<1x64x128xf32>,
    %c1_i32_53 = arith.constant 1 : i32
    %144 = arith.index_cast %c1_i32_53 : i32 to index
    %c0_54 = arith.constant 0 : index
    %c0_55 = arith.constant 0 : index
    %145 = vector.load %arg1[%144, %c0_54, %c0_55] : memref<2x256x128xbf16, #tpu.memory_space<vmem>>, vector<1x256x128xbf16>
    %146 = vector.shape_cast %145 : vector<1x256x128xbf16> to vector<256x128xbf16>
    %cst_56 = arith.constant 0.000000e+00 : bf16
    %147 = vector.broadcast %cst_56 : bf16 to vector<256x128xbf16>
    %148 = arith.maximumf %146, %147 : vector<256x128xbf16>
    %149 = tpu.iota {dimensions = array<i32: 0>} : vector<256x1xi32>
    %c16_i32_57 = arith.constant 16 : i32
    %c0_i32_58 = arith.constant 0 : i32
    %150 = arith.cmpi eq, %c16_i32_57, %c0_i32_58 : i32
    %c1_i32_59 = arith.constant 1 : i32
    %151 = arith.select %150, %c1_i32_59, %c16_i32_57 : i32
    %152 = vector.broadcast %151 : i32 to vector<256x1xi32>
    %153 = arith.remsi %149, %152 : vector<256x1xi32>
    %c0_i32_60 = arith.constant 0 : i32
    %154 = vector.broadcast %c0_i32_60 : i32 to vector<256x1xi32>
    %155 = arith.cmpi ne, %153, %154 : vector<256x1xi32>
    %c0_i32_61 = arith.constant 0 : i32
    %156 = vector.broadcast %c0_i32_61 : i32 to vector<256x1xi32>
    %157 = arith.cmpi slt, %153, %156 : vector<256x1xi32>
    %c0_i32_62 = arith.constant 0 : i32
    %158 = arith.cmpi slt, %151, %c0_i32_62 : i32
    %159 = vector.broadcast %158 : i1 to vector<256x1xi1>
    %160 = vector.broadcast %159 : vector<256x1xi1> to vector<256x1xi1>
    %161 = arith.xori %157, %160 : vector<256x1xi1>
    %162 = arith.andi %161, %155 : vector<256x1xi1>
    %163 = vector.broadcast %151 : i32 to vector<256x1xi32>
    %164 = arith.addi %153, %163 : vector<256x1xi32>
    %165 = arith.select %162, %164, %153 : vector<256x1xi1>, vector<256x1xi32>
    %cst_63 = arith.constant 0.000000e+00 : bf16
    %166 = vector.broadcast %cst_63 : bf16 to vector<1x128xbf16>
    %167 = vector.extract_strided_slice %148 {offsets = [0, 0], sizes = [255, 128], strides = [1, 1]} : vector<256x128xbf16> to vector<255x128xbf16>
    %168 = tpu.concatenate %166, %167 in 0 : vector<1x128xbf16>, vector<255x128xbf16> -> vector<256x128xbf16>
    %c-1_i32_64 = arith.constant -1 : i32
    %169 = vector.broadcast %c-1_i32_64 : i32 to vector<256x1xi32>
    %170 = arith.addi %165, %169 : vector<256x1xi32>
    %c0_i32_65 = arith.constant 0 : i32
    %171 = vector.broadcast %c0_i32_65 : i32 to vector<256x1xi32>
    %172 = arith.cmpi sge, %170, %171 : vector<256x1xi32>
    %c-1_i32_66 = arith.constant -1 : i32
    %173 = vector.broadcast %c-1_i32_66 : i32 to vector<256x1xi32>
    %174 = arith.addi %165, %173 : vector<256x1xi32>
    %c16_i32_67 = arith.constant 16 : i32
    %175 = vector.broadcast %c16_i32_67 : i32 to vector<256x1xi32>
    %176 = arith.cmpi slt, %174, %175 : vector<256x1xi32>
    %177 = arith.andi %172, %176 : vector<256x1xi1>
    %cst_68 = arith.constant 0.000000e+00 : bf16
    %178 = vector.broadcast %cst_68 : bf16 to vector<256x128xbf16>
    %179 = vector.shape_cast %177 : vector<256x1xi1> to vector<256x1xi1>
    %180 = vector.broadcast %179 : vector<256x1xi1> to vector<256x128xi1>
    %181 = arith.select %180, %168, %178 : vector<256x128xi1>, vector<256x128xbf16>
    %182 = vector.extract_strided_slice %148 {offsets = [1, 0], sizes = [255, 128], strides = [1, 1]} : vector<256x128xbf16> to vector<255x128xbf16>
    %cst_69 = arith.constant 0.000000e+00 : bf16
    %183 = vector.broadcast %cst_69 : bf16 to vector<1x128xbf16>
    %184 = tpu.concatenate %182, %183 in 0 : vector<255x128xbf16>, vector<1x128xbf16> -> vector<256x128xbf16>
    %c1_i32_70 = arith.constant 1 : i32
    %185 = vector.broadcast %c1_i32_70 : i32 to vector<256x1xi32>
    %186 = arith.addi %165, %185 : vector<256x1xi32>
    %c0_i32_71 = arith.constant 0 : i32
    %187 = vector.broadcast %c0_i32_71 : i32 to vector<256x1xi32>
    %188 = arith.cmpi sge, %186, %187 : vector<256x1xi32>
    %c1_i32_72 = arith.constant 1 : i32
    %189 = vector.broadcast %c1_i32_72 : i32 to vector<256x1xi32>
    %190 = arith.addi %165, %189 : vector<256x1xi32>
    %c16_i32_73 = arith.constant 16 : i32
    %191 = vector.broadcast %c16_i32_73 : i32 to vector<256x1xi32>
    %192 = arith.cmpi slt, %190, %191 : vector<256x1xi32>
    %193 = arith.andi %188, %192 : vector<256x1xi1>
    %cst_74 = arith.constant 0.000000e+00 : bf16
    %194 = vector.broadcast %cst_74 : bf16 to vector<256x128xbf16>
    %195 = vector.shape_cast %193 : vector<256x1xi1> to vector<256x1xi1>
    %196 = vector.broadcast %195 : vector<256x1xi1> to vector<256x128xi1>
    %197 = arith.select %196, %184, %194 : vector<256x128xi1>, vector<256x128xbf16>
    %198 = tpu.concatenate %181, %148, %197 in 1 : vector<256x128xbf16>, vector<256x128xbf16>, vector<256x128xbf16> -> vector<256x384xbf16>
    %cst_75 = arith.constant dense<0.000000e+00> : vector<256x384xf32>
    %199 = tpu.matmul %198, %0, %cst_75 {dimension_numbers = #tpu.dot_dimension_numbers<[1], [0], [0], [1], [0, 0, 1, 1], [], []>} : vector<256x384xbf16>, vector<384x384xbf16>, vector<256x384xf32> -> vector<256x384xf32>
    %200 = vector.extract_strided_slice %199 {offsets = [0, 128], sizes = [256, 128], strides = [1, 1]} : vector<256x384xf32> to vector<256x128xf32>
    %201 = vector.extract_strided_slice %199 {offsets = [0, 0], sizes = [256, 128], strides = [1, 1]} : vector<256x384xf32> to vector<256x128xf32>
    %cst_76 = arith.constant 0.000000e+00 : f32
    %202 = vector.broadcast %cst_76 : f32 to vector<16x128xf32>
    %203 = vector.extract_strided_slice %201 {offsets = [0, 0], sizes = [240, 128], strides = [1, 1]} : vector<256x128xf32> to vector<240x128xf32>
    %204 = tpu.concatenate %202, %203 in 0 : vector<16x128xf32>, vector<240x128xf32> -> vector<256x128xf32>
    %205 = arith.addf %200, %204 : vector<256x128xf32>
    %206 = vector.extract_strided_slice %199 {offsets = [0, 256], sizes = [256, 128], strides = [1, 1]} : vector<256x384xf32> to vector<256x128xf32>
    %207 = vector.extract_strided_slice %206 {offsets = [16, 0], sizes = [240, 128], strides = [1, 1]} : vector<256x128xf32> to vector<240x128xf32>
    %cst_77 = arith.constant 0.000000e+00 : f32
    %208 = vector.broadcast %cst_77 : f32 to vector<16x128xf32>
    %209 = tpu.concatenate %207, %208 in 0 : vector<240x128xf32>, vector<16x128xf32> -> vector<256x128xf32>
    %210 = arith.addf %205, %209 : vector<256x128xf32>
    %cst_78 = arith.constant 0.000000e+00 : f32
    %211 = vector.broadcast %cst_78 : f32 to vector<256x128xf32>
    %212 = arith.maximumf %210, %211 : vector<256x128xf32>
    %213 = arith.truncf %212 : vector<256x128xf32> to vector<256x128xbf16>
    %214 = tpu.iota {dimensions = array<i32: 0>} : vector<256x1xi32>
    %c16_i32_79 = arith.constant 16 : i32
    %c0_i32_80 = arith.constant 0 : i32
    %215 = arith.cmpi eq, %c16_i32_79, %c0_i32_80 : i32
    %c1_i32_81 = arith.constant 1 : i32
    %216 = arith.select %215, %c1_i32_81, %c16_i32_79 : i32
    %217 = vector.broadcast %216 : i32 to vector<256x1xi32>
    %218 = arith.remsi %214, %217 : vector<256x1xi32>
    %c0_i32_82 = arith.constant 0 : i32
    %219 = vector.broadcast %c0_i32_82 : i32 to vector<256x1xi32>
    %220 = arith.cmpi ne, %218, %219 : vector<256x1xi32>
    %c0_i32_83 = arith.constant 0 : i32
    %221 = vector.broadcast %c0_i32_83 : i32 to vector<256x1xi32>
    %222 = arith.cmpi slt, %218, %221 : vector<256x1xi32>
    %c0_i32_84 = arith.constant 0 : i32
    %223 = arith.cmpi slt, %216, %c0_i32_84 : i32
    %224 = vector.broadcast %223 : i1 to vector<256x1xi1>
    %225 = vector.broadcast %224 : vector<256x1xi1> to vector<256x1xi1>
    %226 = arith.xori %222, %225 : vector<256x1xi1>
    %227 = arith.andi %226, %220 : vector<256x1xi1>
    %228 = vector.broadcast %216 : i32 to vector<256x1xi32>
    %229 = arith.addi %218, %228 : vector<256x1xi32>
    %230 = arith.select %227, %229, %218 : vector<256x1xi1>, vector<256x1xi32>
    %cst_85 = arith.constant 0.000000e+00 : bf16
    %231 = vector.broadcast %cst_85 : bf16 to vector<1x128xbf16>
    %232 = vector.extract_strided_slice %213 {offsets = [0, 0], sizes = [255, 128], strides = [1, 1]} : vector<256x128xbf16> to vector<255x128xbf16>
    %233 = tpu.concatenate %231, %232 in 0 : vector<1x128xbf16>, vector<255x128xbf16> -> vector<256x128xbf16>
    %c-1_i32_86 = arith.constant -1 : i32
    %234 = vector.broadcast %c-1_i32_86 : i32 to vector<256x1xi32>
    %235 = arith.addi %230, %234 : vector<256x1xi32>
    %c0_i32_87 = arith.constant 0 : i32
    %236 = vector.broadcast %c0_i32_87 : i32 to vector<256x1xi32>
    %237 = arith.cmpi sge, %235, %236 : vector<256x1xi32>
    %c-1_i32_88 = arith.constant -1 : i32
    %238 = vector.broadcast %c-1_i32_88 : i32 to vector<256x1xi32>
    %239 = arith.addi %230, %238 : vector<256x1xi32>
    %c16_i32_89 = arith.constant 16 : i32
    %240 = vector.broadcast %c16_i32_89 : i32 to vector<256x1xi32>
    %241 = arith.cmpi slt, %239, %240 : vector<256x1xi32>
    %242 = arith.andi %237, %241 : vector<256x1xi1>
    %cst_90 = arith.constant 0.000000e+00 : bf16
    %243 = vector.broadcast %cst_90 : bf16 to vector<256x128xbf16>
    %244 = vector.shape_cast %242 : vector<256x1xi1> to vector<256x1xi1>
    %245 = vector.broadcast %244 : vector<256x1xi1> to vector<256x128xi1>
    %246 = arith.select %245, %233, %243 : vector<256x128xi1>, vector<256x128xbf16>
    %247 = vector.extract_strided_slice %213 {offsets = [1, 0], sizes = [255, 128], strides = [1, 1]} : vector<256x128xbf16> to vector<255x128xbf16>
    %cst_91 = arith.constant 0.000000e+00 : bf16
    %248 = vector.broadcast %cst_91 : bf16 to vector<1x128xbf16>
    %249 = tpu.concatenate %247, %248 in 0 : vector<255x128xbf16>, vector<1x128xbf16> -> vector<256x128xbf16>
    %c1_i32_92 = arith.constant 1 : i32
    %250 = vector.broadcast %c1_i32_92 : i32 to vector<256x1xi32>
    %251 = arith.addi %230, %250 : vector<256x1xi32>
    %c0_i32_93 = arith.constant 0 : i32
    %252 = vector.broadcast %c0_i32_93 : i32 to vector<256x1xi32>
    %253 = arith.cmpi sge, %251, %252 : vector<256x1xi32>
    %c1_i32_94 = arith.constant 1 : i32
    %254 = vector.broadcast %c1_i32_94 : i32 to vector<256x1xi32>
    %255 = arith.addi %230, %254 : vector<256x1xi32>
    %c16_i32_95 = arith.constant 16 : i32
    %256 = vector.broadcast %c16_i32_95 : i32 to vector<256x1xi32>
    %257 = arith.cmpi slt, %255, %256 : vector<256x1xi32>
    %258 = arith.andi %253, %257 : vector<256x1xi1>
    %cst_96 = arith.constant 0.000000e+00 : bf16
    %259 = vector.broadcast %cst_96 : bf16 to vector<256x128xbf16>
    %260 = vector.shape_cast %258 : vector<256x1xi1> to vector<256x1xi1>
    %261 = vector.broadcast %260 : vector<256x1xi1> to vector<256x128xi1>
    %262 = arith.select %261, %249, %259 : vector<256x128xi1>, vector<256x128xbf16>
    %263 = tpu.concatenate %246, %213, %262 in 1 : vector<256x128xbf16>, vector<256x128xbf16>, vector<256x128xbf16> -> vector<256x384xbf16>
    %cst_97 = arith.constant dense<0.000000e+00> : vector<256x384xf32>
    %264 = tpu.matmul %263, %1, %cst_97 {dimension_numbers = #tpu.dot_dimension_numbers<[1], [0], [0], [1], [0, 0, 1, 1], [], []>} : vector<256x384xbf16>, vector<384x384xbf16>, vector<256x384xf32> -> vector<256x384xf32>
    %265 = vector.extract_strided_slice %264 {offsets = [0, 128], sizes = [256, 128], strides = [1, 1]} : vector<256x384xf32> to vector<256x128xf32>
    %266 = vector.extract_strided_slice %264 {offsets = [0, 0], sizes = [256, 128], strides = [1, 1]} : vector<256x384xf32> to vector<256x128xf32>
    %cst_98 = arith.constant 0.000000e+00 : f32
    %267 = vector.broadcast %cst_98 : f32 to vector<16x128xf32>
    %268 = vector.extract_strided_slice %266 {offsets = [0, 0], sizes = [240, 128], strides = [1, 1]} : vector<256x128xf32> to vector<240x128xf32>
    %269 = tpu.concatenate %267, %268 in 0 : vector<16x128xf32>, vector<240x128xf32> -> vector<256x128xf32>
    %270 = arith.addf %265, %269 : vector<256x128xf32>
    %271 = vector.extract_strided_slice %264 {offsets = [0, 256], sizes = [256, 128], strides = [1, 1]} : vector<256x384xf32> to vector<256x128xf32>
    %272 = vector.extract_strided_slice %271 {offsets = [16, 0], sizes = [240, 128], strides = [1, 1]} : vector<256x128xf32> to vector<240x128xf32>
    %cst_99 = arith.constant 0.000000e+00 : f32
    %273 = vector.broadcast %cst_99 : f32 to vector<16x128xf32>
    %274 = tpu.concatenate %272, %273 in 0 : vector<240x128xf32>, vector<16x128xf32> -> vector<256x128xf32>
    %275 = arith.addf %270, %274 : vector<256x128xf32>
    %cst_100 = arith.constant dense<0.000000e+00> : vector<256x128xf32>
    %276 = tpu.matmul %146, %2, %cst_100 {dimension_numbers = #tpu.dot_dimension_numbers<[1], [0], [0], [1], [0, 0, 1, 1], [], []>} : vector<256x128xbf16>, vector<128x128xbf16>, vector<256x128xf32> -> vector<256x128xf32>
    %277 = arith.addf %275, %276 : vector<256x128xf32>
    %278 = arith.truncf %277 : vector<256x128xf32> to vector<256x128xbf16>
    %cst_101 = arith.constant dense<0.000000e+00> : vector<64x128xf32>
    %279 = tpu.matmul %3, %278, %cst_101 {dimension_numbers = #tpu.dot_dimension_numbers<[1], [0], [0], [1], [0, 0, 1, 1], [], []>} : vector<64x256xbf16>, vector<256x128xbf16>, vector<64x128xf32> -> vector<64x128xf32>
    %280 = arith.index_cast %c1_i32_53 : i32 to index
    %c0_102 = arith.constant 0 : index
    %c0_103 = arith.constant 0 : index
    %281 = vector.load %arg6[%280, %c0_102, %c0_103] : memref<2x64x128xf32, #tpu.memory_space<vmem>>, vector<1x64x128xf32>
    %282 = vector.shape_cast %281 : vector<1x64x128xf32> to vector<64x128xf32>
    %283 = vector.shape_cast %279 : vector<64x128xf32> to vector<1x64x128xf32>
    tpu.vector_store %arg6[%280, %c0_102, %c0_103], %283 {strides = array<i32>} : memref<2x64x128xf32, #tpu.memory_space<vmem>>, vector<1x64x128xf32>,
    %c2_i32 = arith.constant 2 : i32
    return
  }
  func.func @transform_0(%arg0: i32) -> (i32, i32, i32) {
    %c0_i32 = arith.constant 0 : i32
    %c0_i32_0 = arith.constant 0 : i32
    %c0_i32_1 = arith.constant 0 : i32
    return %arg0, %c0_i32, %c0_i32_0 : i32, i32, i32
  }
  func.func @transform_1(%arg0: i32) -> (i32, i32) {
    %c0_i32 = arith.constant 0 : i32
    %c0_i32_0 = arith.constant 0 : i32
    %c0_i32_1 = arith.constant 0 : i32
    return %c0_i32, %c0_i32_0 : i32, i32
  }
  func.func @transform_2(%arg0: i32) -> (i32, i32) {
    %c0_i32 = arith.constant 0 : i32
    %c0_i32_0 = arith.constant 0 : i32
    %c0_i32_1 = arith.constant 0 : i32
    return %c0_i32, %c0_i32_0 : i32, i32
  }
  func.func @transform_3(%arg0: i32) -> (i32, i32) {
    %c0_i32 = arith.constant 0 : i32
    %c0_i32_0 = arith.constant 0 : i32
    %c0_i32_1 = arith.constant 0 : i32
    return %c0_i32, %c0_i32_0 : i32, i32
  }
  func.func @transform_4(%arg0: i32) -> (i32, i32) {
    %c0_i32 = arith.constant 0 : i32
    %c0_i32_0 = arith.constant 0 : i32
    %c0_i32_1 = arith.constant 0 : i32
    return %c0_i32, %c0_i32_0 : i32, i32
  }
  func.func @transform_5(%arg0: i32) -> (i32, i32, i32) {
    %c0_i32 = arith.constant 0 : i32
    %c0_i32_0 = arith.constant 0 : i32
    %c0_i32_1 = arith.constant 0 : i32
    return %arg0, %c0_i32, %c0_i32_0 : i32, i32, i32
  }
}

</mosaic_0001>

<bundles_post_ra>
// kernel: sn_dis_block.1
= control target key start
LH: loop header
LB: loop body
LE: loop exit
PB: predicated region body
PF: predicated region fallthrough
CT: control target
= control target key end

     0   :  { %10 = vsyncpa [#allocation3], 0  ;;  %s14242_s0 = inlined_call_operand.vmem [shape: bf16[4,256,128], index: 0, kind: input, shape index: {}]   ;;  %s14243_s1 = inlined_call_operand.vmem [shape: bf16[384,384], index: 1, kind: input, shape index: {}]   ;;  %s14244_s2 = inlined_call_operand.vmem [shape: bf16[384,384], index: 2, kind: input, shape index: {}]   ;;  %s14245_s3 = inlined_call_operand.vmem [shape: bf16[128,128], index: 3, kind: input, shape index: {}]   ;;  %s14246_s4 = inlined_call_operand.vmem [shape: bf16[64,256], index: 4, kind: input, shape index: {}]   ;;  %s14247_s5 = inlined_call_operand.hbm [shape: f32[4,64,128], index: 5, kind: output, shape index: {}]  }
   0x1   :  { %12 = vsyncpa [#allocation3 + $0x1], 0  ;;  %s10012_s18 = smov 0   ;;  %s10014_s19 = smov 0  }
   0x2   :  { %s10016_s20 = smov 0   ;;  %s10018_s21 = smov 0  }
   0x3 LB: > { %s10033_s22 = sadd.s32 4294967295, %s9975_s21   ;;  %s7634_s23 = sadd.s32 4294967294, %s9975_s21   ;;  %s9975_s21 = sphi %s10018_s21, %s15050_s21   ;;  %s9971_s20 = sphi %s10016_s20, %s15049_s20   ;;  %s9967_s19 = sphi %s10014_s19, %s15048_s19   ;;  %s9963_s18 = sphi %s10012_s18, %s15047_s18  }
   0x4   : > { %s10037_s24 = sadd.s32 1, %s9975_s21   ;;  %s135_s25 = sadd.s32 1, %s9971_s20 }
   0x5   : > { %s132_s26 = ssub.s32 %s9975_s21, %s10037_s24  ;;  %p145_p0 = scmp.ne.s32.totalorder %s9971_s20, %s9967_s19 }
   0x6   : > { %p133_p1 = scmp.eq.s32.totalorder %s132_s26, 0  ;;  %p146_p2 = scmp.eq.s32.totalorder %s10033_s22, 1 }
   0x7   : > { %p151_p3 = scmp.ne.s32.totalorder %s9967_s19, %s9963_s18  ;;  %p152_p4 = scmp.eq.s32.totalorder %s7634_s23, 1 }
   0x8   : > { %s10048_s27 = scalar_select %p133_p1, %s9971_s20, %s135_s25  }
   0x9   : > { %p10050_p5 = por %p146_p2, %p145_p0  ;;  %p10054_p6 = por %p152_p4, %p151_p3 }
   0xa   : > { %p7637_p7 = scmp.ge.s32.totalorder %s9975_s21, 1  ;;  %p192_p8 = scmp.lt.s32.totalorder %s9975_s21, 3 }
   0xc   : > { %p193_p9 = pnand %p7637_p7, %p192_p8 }
   0xe   : > { %196 = sbr.rel (%p193_p9) target bundleno = 2168 (0x878), region = 40 }
  0x15   : > { %v9462_v0 = vld [vmem:[%s14243_s1 + $0x4] ss:$12 sps:$4 sm:$0xff]   ;;  %v9464_v1 = vld [vmem:[%s14243_s1 + $0xc8] ss:$12 sps:$4 sm:$0xff]   ;;  %v9465_v2 = vld [vmem:[%s14243_s1] ss:$12 sps:$4 sm:$0xff]   ;;  %v512_v8 = vlaneseq }
  0x16   : > { %2295 = vmatprep.subr.bf16.mxu0 %v9462_v0  ;;  %8203 = vmatprep.subr.bf16.mxu1 %v9464_v1  ;;  %v9466_v3 = vld [vmem:[%s14243_s1 + $0x8] ss:$12 sps:$4 sm:$0xff]   ;;  %s7639_s13 = sshll.u32 %s10033_s22, 1  ;;  %v9469_v5 = vld [vmem:[%s14243_s1 + $0xe0] ss:$12 sps:$4 sm:$0xff]   ;;  %v14290_v39 = vmov 0  }
  0x17   : > { %2296 = vmatpush1.bf16.msra.mxu0 %v9465_v2  ;;  %v9467_v4 = vld [vmem:[%s14243_s1 + $0x1c] ss:$12 sps:$4 sm:$0xff]   ;;  %8204 = vmatpush3.bf16.msra.mxu1 %v9466_v3  ;;  %v9470_v6 = vld [vmem:[%s14243_s1 + $0x18] ss:$12 sps:$4 sm:$0xff]   ;;  %v9471_v7 = vld [vmem:[%s14243_s1 + $0x20] ss:$12 sps:$4 sm:$0xff]  }
  0x18   : > { %2297 = vmatprep.subr.bf16.mxu0 %v9467_v4  ;;  %8205 = vmatprep.subr.bf16.mxu1 %v9469_v5  ;;  %v9472_v9 = vld [vmem:[%s14243_s1 + $0x34] ss:$12 sps:$4 sm:$0xff]   ;;  %p10088_p10 = scmp.lt.s32.totalorder %s7639_s13, 3  ;;  %v9474_v10 = vld [vmem:[%s14243_s1 + $0xf8] ss:$12 sps:$4 sm:$0xff]   ;;  %v10104_v14 = vshrl.u32 %v512_v8, 7 }
  0x19   : > { %v9475_v11 = vld [vmem:[%s14243_s1 + $0x30] ss:$12 sps:$4 sm:$0xff]   ;;  %v9476_v12 = vld [vmem:[%s14243_s1 + $0x38] ss:$12 sps:$4 sm:$0xff]   ;;  %v9480_v16 = vld [vmem:[%s14243_s1 + $0x48] ss:$12 sps:$4 sm:$0xff]  }
  0x1a   : > { %v9477_v13 = vld [vmem:[%s14243_s1 + $0x4c] ss:$12 sps:$4 sm:$0xff]   ;;  %v9479_v15 = vld [vmem:[%s14243_s1 + $0x110] ss:$12 sps:$4 sm:$0xff]   ;;  %s15052_s13 = smov (!%p10088_p10, %s7639_s13), 3  ;;  %v549_v22 = vand.u32 15, %v10104_v14 }
  0x1b   : > { %2298 = vmatpush1.bf16.msra.mxu0 %v9470_v6  ;;  %8206 = vmatpush3.bf16.msra.mxu1 %v9471_v7  ;;  %v9481_v17 = vld [vmem:[%s14243_s1 + $0x50] ss:$12 sps:$4 sm:$0xff]   ;;  %v9484_v19 = vld [vmem:[%s14243_s1 + $0x128] ss:$12 sps:$4 sm:$0xff]   ;;  %v9485_v20 = vld [vmem:[%s14243_s1 + $0x60] ss:$12 sps:$4 sm:$0xff]  }
  0x1c   : > { %2299 = vmatprep.subr.bf16.mxu0 %v9472_v9  ;;  %8207 = vmatprep.subr.bf16.mxu1 %v9474_v10  ;;  %v9482_v18 = vld [vmem:[%s14243_s1 + $0x64] ss:$12 sps:$4 sm:$0xff]   ;;  %v9486_v21 = vld [vmem:[%s14243_s1 + $0x68] ss:$12 sps:$4 sm:$0xff]   ;;  %v9489_v24 = vld [vmem:[%s14243_s1 + $0x140] ss:$12 sps:$4 sm:$0xff]  }
  0x1d   : > { %v9487_v23 = vld [vmem:[%s14243_s1 + $0x7c] ss:$12 sps:$4 sm:$0xff]   ;;  %s8200_s30 = sshll.u32 %s15052_s13, 7  ;;  %v9490_v25 = vld [vmem:[%s14243_s1 + $0x78] ss:$12 sps:$4 sm:$0xff]   ;;  %v1156_v27 = vadd.s32 4294967295, %v549_v22 }
  0x1e   : > { %v9491_v26 = vld [vmem:[%s14243_s1 + $0x80] ss:$12 sps:$4 sm:$0xff]   ;;  %v515_v28 = vadd.s32 16, %v10104_v14  ;;  %v9494_v30 = vld [vmem:[%s14243_s1 + $0x158] ss:$12 sps:$4 sm:$0xff]   ;;  %s10155_s23 = scalar_lea.vmem %s14242_s0, %s8200_s30  ;;  %v517_v35 = vadd.s32 32, %v10104_v14 }
  0x1f   : > { %2300 = vmatpush1.bf16.msra.mxu0 %v9475_v11  ;;  %8208 = vmatpush3.bf16.msra.mxu1 %v9476_v12  ;;  %v9492_v29 = vld [vmem:[%s14243_s1 + $0x94] ss:$12 sps:$4 sm:$0xff]   ;;  %v9495_v31 = vld [vmem:[%s14243_s1 + $0x90] ss:$12 sps:$4 sm:$0xff]   ;;  %v9496_v33 = vld [vmem:[%s14243_s1 + $0x98] ss:$12 sps:$4 sm:$0xff]  }
  0x20   : > { %2301 = vmatprep.subr.bf16.mxu0 %v9477_v13  ;;  %8209 = vmatprep.subr.bf16.mxu1 %v9479_v15  ;;  %v563_v32 = vand.u32 15, %v515_v28  ;;  %v9497_v34 = vld [vmem:[%s14243_s1 + $0xac] ss:$12 sps:$4 sm:$0xff]   ;;  %vm1188_vm0 = vcmp.ge.s32.totalorder %v1156_v27, 0  ;;  %v9499_v36 = vld [vmem:[%s14243_s1 + $0x170] ss:$12 sps:$4 sm:$0xff]  }
  0x21   : > { %v448_v37 = vld [vmem:[%s10155_s23] sm:$0xf]  ;;  %v449_v38 = vld [vmem:[%s10155_s23 + $0x4] sm:$0xf]  ;;  %v9500_v42 = vld [vmem:[%s14243_s1 + $0xa8] ss:$12 sps:$4 sm:$0xff]  }
  0x22   : > { %v480_v40 = vmax.bf16 %v14290_v39, %v448_v37  ;;  %v1158_v41 = vadd.s32 4294967295, %v563_v32  ;;  %v9501_v43 = vld [vmem:[%s14243_s1 + $0xb0] ss:$12 sps:$4 sm:$0xff]   ;;  %v481_v44 = vmax.bf16 %v14290_v39, %v449_v38  ;;  %vm1153_vm1 = vcmask 1040384   ;;  %vm1348_vm2 = vmpackc.low %vm1188_vm0, %vm1188_vm0  ;;  %v10188_v51 = vld [vmem:[%s10155_s23 + $0x8] sm:$0xf] }
  0x23   : > { %2302 = vmatpush1.bf16.msra.mxu0 %v9480_v16  ;;  %8210 = vmatpush3.bf16.msra.mxu1 %v9481_v17  ;;  %v9502_v45 = vld [vmem:[%s14243_s1 + $0xc4] ss:$12 sps:$4 sm:$0xff]   ;;  %v577_v46 = vand.u32 15, %v517_v35  ;;  %vm14249_vm4 = vsmask.f32 256  ;;  %vm9978_vm5 = vmmov 1   ;;  %v482_v57 = vmax.bf16 %v14290_v39, %v10188_v51 }
  0x24   : > { %2303 = vmatprep.subr.bf16.mxu0 %v9482_v18  ;;  %8211 = vmatprep.subr.bf16.mxu1 %v9484_v19  ;;  %vm1190_vm3 = vcmp.ge.s32.totalorder %v1158_v41, 0  ;;  %v7642_v47 = vcombine.low %v480_v40, %v481_v44  ;;  %vm1349_vm6 = vmpackc.low %vm9978_vm5, %vm9978_vm5  ;;  %v1380_v48 = vsel %vm1348_vm2, 65537, %v14290_v39  ;;  %v519_v49 = vadd.s32 48, %v10104_v14  ;;  %14513 = vst [vmem:[#allocation5_spill] sm:$0xff] %v10188_v51  ;;  %v10191_v52 = vld [vmem:[%s10155_s23 + $0xc] sm:$0xf] }
  0x25   : > { %v10185_v50 = vsel %vm1349_vm6, 65537, %v14290_v39  ;;  %14514 = vst [vmem:[#allocation6_spill] sm:$0xff] %v10191_v52  ;;  %v9504_v56 = vld [vmem:[%s14243_s1 + $0xc0] ss:$12 sps:$4 sm:$0xff]   ;;  %vm1350_vm7 = vmpackc.low %vm1190_vm3, %vm1190_vm3  ;;  %v9505_v58 = vld [vmem:[%s14243_s1 + $0xdc] ss:$12 sps:$4 sm:$0xff]   ;;  %v483_v59 = vmax.bf16 %v14290_v39, %v10191_v52 }
  0x26   : > { %2709 = vmatprep.mubr.bf16.mxu1 %v7642_v47  ;;  %v1011_v53 = vshrl.u32 %v7642_v47, 16  ;;  %v1014_v54 = vshll.u32 %v7642_v47, 16  ;;  %v7658_v55 = vcombine.low %v1380_v48, %v10185_v50  ;;  %v1160_v61 = vadd.s32 4294967295, %v577_v46  ;;  %2327 = vmatprep.mubr.bf16.mxu0 %v7642_v47  ;;  %vm10210_vm8 = vmand %vm1153_vm1, %vm14249_vm4  ;;  %v452_v3 = vld [vmem:[%s10155_s23 + $0x10] sm:$0xf]  ;;  %s218_s16 = sand.u32 1, %s9967_s19  }
  0x27   : > { %2304 = vmatpush1.bf16.msra.mxu0 %v9485_v20  ;;  %8212 = vmatpush3.bf16.msra.mxu1 %v9486_v21  ;;  %v14515_v0 = vmov 0  ;;  %v10214_v1 = vcombine.low %v482_v57, %v483_v59  ;;  %v1382_v2 = vsel %vm1350_vm7, 65537, %v14290_v39  ;;  %v453_v4 = vld [vmem:[%s10155_s23 + $0x14] sm:$0xf]  ;;  %v591_v5 = vand.u32 15, %v519_v49  ;;  %s7638_s25 = sshll.u32 %s218_s16, 7 }
  0x28   : > { %2305 = vmatprep.subr.bf16.mxu0 %v9487_v23  ;;  %8213 = vmatprep.subr.bf16.mxu1 %v9489_v24  ;;  %v1013_v62 = vrot.slane %v1011_v53, 7  ;;  %v1493_v63 = vrot.slane %v1014_v54, 1  ;;  %v14516_v0 = vsel %vm10210_vm8, 4294967295, %v14515_v0  ;;  %vm10219_vm9 = vcmp.ne.s16.totalorder %v7658_v55, 0  ;;  %v9507_v8 = vld [vmem:[%s14243_s1 + $0xd8] ss:$12 sps:$4 sm:$0xff]  }
  0x29   : > { %14517 = vst [vmem:[#allocation7_spill] sm:$0xff] %v14516_v0  ;;  %v14518_v7 = vmov 0  ;;  %v9509_v9 = vld [vmem:[%s14243_s1 + $0xf4] ss:$12 sps:$4 sm:$0xff]   ;;  %v484_v10 = vmax.bf16 %v14290_v39, %v452_v3  ;;  %v485_v11 = vmax.bf16 %v14290_v39, %v453_v4  ;;  %v1018_v12 = vshrl.u32 %v10214_v1, 16  ;;  %s13251_s13 = scalar_lea.vmem [#allocation2], %s7638_s25 }
  0x2a   : > { %v1016_v6 = vor.u32 %v1014_v54, %v1013_v62  ;;  %v14519_v7 = vsel %vm10219_vm9, 4294967295, %v14518_v7  ;;  %v1021_v13 = vshll.u32 %v10214_v1, 16  ;;  %vm1192_vm10 = vcmp.ge.s32.totalorder %v1160_v61, 0  ;;  %v454_v20 = vld [vmem:[%s10155_s23 + $0x18] sm:$0xf]  ;;  %s7572_s7 = sshll.u32 %s13251_s13, 4  ;;  %s14195_s7 = int_to_ptr.vmem [resolvable:$true] %s7572_s7 }
  0x2b   : > { %2306 = vmatpush1.bf16.msra.mxu0 %v9490_v25  ;;  %8214 = vmatpush3.bf16.msra.mxu1 %v9491_v26  ;;  %14520 = vst [vmem:[#allocation8_spill] sm:$0xff] %v14519_v7  ;;  %v10233_v15 = vor.u32 %v1493_v63, %v1011_v53  ;;  %v10239_v17 = vcombine.low %v484_v10, %v485_v11  ;;  %v1020_v18 = vrot.slane %v1018_v12, 7  ;;  %v455_v21 = vld [vmem:[%s10155_s23 + $0x1c] sm:$0xf]  ;;  %vm1352_vm11 = vmpackc.low %vm1192_vm10, %vm1192_vm10  ;;  %v9512_v26 = vld [vmem:[%s14243_s1 + $0x10c] ss:$12 sps:$4 sm:$0xff]  }
  0x2c   : > { %2307 = vmatprep.subr.bf16.mxu0 %v9492_v29  ;;  %8215 = vmatprep.subr.bf16.mxu1 %v9494_v30  ;;  %v10237_v16 = vsel %vm10210_vm8, 0, %v1016_v6  ;;  %v7659_v19 = vcombine.low %v1382_v2, %v10185_v50  ;;  %v9511_v22 = vld [vmem:[%s14243_s1 + $0xf0] ss:$12 sps:$4 sm:$0xff]   ;;  %v486_v24 = vmax.bf16 %v14290_v39, %v454_v20  ;;  %v487_v27 = vmax.bf16 %v14290_v39, %v455_v21  ;;  %v456_v38 = vld [vmem:[%s10155_s23 + $0x20] sm:$0xf]  ;;  %s9913_s11 = scalar_lea.vmem %s14195_s7, 2048 }
  0x2d   : > { %v1026_v23 = vshrl.u32 %v10239_v17, 16  ;;  %v1023_v25 = vor.u32 %v1021_v13, %v1020_v18  ;;  %v1162_v28 = vadd.s32 4294967295, %v591_v5  ;;  %v521_v29 = vadd.s32 64, %v10104_v14  ;;  %v457_v40 = vld [vmem:[%s10155_s23 + $0x24] sm:$0xf]  ;;  %p9914_p11 = scmp.ne.s32.totalorder %s14195_s7, %s9913_s11  ;;  %s9979_s12 = smov [#allocation2]  }
  0x2e   : > { %vm10262_vm12 = vcmp.ne.s16.totalorder %v7659_v19, 0  ;;  %v14521_v30 = vmov 0  ;;  %v1384_v32 = vsel %vm1352_vm11, 65537, %v14290_v39  ;;  %v10279_v37 = vcombine.low %v486_v24, %v487_v27  ;;  %v9517_v44 = vld [vmem:[%s14243_s1 + $0x120] ss:$12 sps:$4 sm:$0xff]   ;;  %s9917_s14 = sshll.u32 %s9979_s12, 4  ;;  %s9918_s14 = int_to_ptr.vmem [resolvable:$false] %s9917_s14 }
  0x2f   : > { %2308 = vmatpush1.bf16.msra.mxu0 %v9495_v31  ;;  %8216 = vmatpush3.bf16.msra.mxu1 %v9496_v33  ;;  %v14522_v30 = vsel %vm10262_vm12, 4294967295, %v14521_v30  ;;  %v9514_v31 = vld [vmem:[%s14243_s1 + $0x108] ss:$12 sps:$4 sm:$0xff]   ;;  %v10271_v33 = vsel %vm14249_vm4, %v1013_v62, %v1023_v25  ;;  %v1028_v35 = vrot.slane %v1026_v23, 7  ;;  %vm1194_vm13 = vcmp.ge.s32.totalorder %v1162_v28, 0  ;;  %p9915_p12 = pnand %p9914_p11, %p10050_p5  ;;  %s9919_s15 = scalar_lea.vmem %s9918_s14, 4096 }
  0x30   : > { %2309 = vmatprep.subr.bf16.mxu0 %v9497_v34  ;;  %8217 = vmatprep.subr.bf16.mxu1 %v9499_v36  ;;  %14523 = vst [vmem:[#allocation9_spill] sm:$0xff] %v14522_v30  ;;  %v9515_v34 = vld [vmem:[%s14243_s1 + $0x124] ss:$12 sps:$4 sm:$0xff]   ;;  %v1029_v36 = vshll.u32 %v10239_v17, 16  ;;  %v605_v41 = vand.u32 15, %v521_v29  ;;  %vm1354_vm14 = vmpackc.low %vm1194_vm13, %vm1194_vm13  ;;  %v488_v46 = vmax.bf16 %v14290_v39, %v456_v38  ;;  %v489_v47 = vmax.bf16 %v14290_v39, %v457_v40  ;;  %p9920_p0 = scmp.lt.s32.totalorder %s14195_s7, %s9918_s14  ;;  %p9921_p1 = scmp.lt.s32.totalorder %s9919_s15, %s9913_s11 }
  0x31   : > { %v9518_v48 = vld [vmem:[%s14243_s1 + $0x13c] ss:$12 sps:$4 sm:$0xff]   ;;  %v523_v49 = vadd.s32 80, %v10104_v14  ;;  %v9520_v53 = vld [vmem:[%s14243_s1 + $0x138] ss:$12 sps:$4 sm:$0xff]   ;;  %v14524_v55 = vmov 0  ;;  %p9916_p13 = pneg %p9915_p12 }
  0x32   : > { %v1164_v54 = vadd.s32 4294967295, %v605_v41  ;;  %v458_v57 = vld [vmem:[%s10155_s23 + $0x28] sm:$0xf]  ;;  %v1037_v62 = vshll.u32 %v10279_v37, 16  ;;  %v10320_v63 = vcombine.low %v488_v46, %v489_v47  ;;  %v459_v2 = vld [vmem:[%s10155_s23 + $0x2c] sm:$0xf]  ;;  %p9922_p2 = por %p9921_p1, %p9920_p0 }
  0x33   : > { %2310 = vmatpush1.bf16.msra.mxu0 %v9500_v42  ;;  %8218 = vmatpush3.bf16.msra.mxu1 %v9501_v43  ;;  %v7660_v42 = vcombine.low %v1384_v32, %v10185_v50  ;;  %v1031_v43 = vor.u32 %v1029_v36, %v1028_v35  ;;  %v9521_v3 = vld [vmem:[%s14243_s1 + $0x154] ss:$12 sps:$4 sm:$0xff]   ;;  %v490_v5 = vmax.bf16 %v14290_v39, %v458_v57  ;;  %v9523_v10 = vld [vmem:[%s14243_s1 + $0x150] ss:$12 sps:$4 sm:$0xff]   ;;  %v9524_v19 = vld [vmem:[%s14243_s1 + $0x16c] ss:$12 sps:$4 sm:$0xff]  }
  0x34   : > { %2311 = vmatprep.subr.bf16.mxu0 %v9502_v45  ;;  %v1034_v45 = vshrl.u32 %v10279_v37, 16  ;;  %vm1196_vm0 = vcmp.ge.s32.totalorder %v1164_v54, 0  ;;  %v491_v6 = vmax.bf16 %v14290_v39, %v459_v2  ;;  %v1042_v11 = vshrl.u32 %v10320_v63, 16  ;;  %v9526_v21 = vld [vmem:[%s14243_s1 + $0x168] ss:$12 sps:$4 sm:$0xff]   ;;  %p9923_p3 = pnand %p9922_p2, %p9916_p13 }
  0x35   : > { %vm10303_vm15 = vcmp.ne.s16.totalorder %v7660_v42, 0  ;;  %v10313_v59 = vsel %vm14249_vm4, %v1020_v18, %v1031_v43  ;;  %v9534_v18 = vld [vmem:[%s14243_s1 + $0x1a0] ss:$12 sps:$4 sm:$0xff]   ;;  %vm1356_vm1 = vmpackc.low %vm1196_vm0, %vm1196_vm0  ;;  %v525_v20 = vadd.s32 96, %v10104_v14  ;;  %v14527_v24 = vmov 0 }
  0x36   : > { %7794 = vmatmul.mubr.msk.bf16.vlgmr.msra.gmra.mrb[0].mxu1 %vm10219_vm9, %v10237_v16  ;;  %v14525_v55 = vsel %vm10303_vm15, 4294967295, %v14524_v55  ;;  %v10317_v61 = vrot.slane %v1034_v45, 7  ;;  %v10355_v25 = vcombine.low %v490_v5, %v491_v6  ;;  %v461_v27 = vld [vmem:[%s10155_s23 + $0x34] sm:$0xf]  ;;  %v10363_v29 = vrot.slane %v1042_v11, 7 }
  0x37   : > { %2312 = vmatpush1.bf16.msra.mxu0 %v9504_v56  ;;  %2715 = vmatprep.mubr.bf16.mxu1 %v10214_v1  ;;  %14526 = vst [vmem:[#allocation10_spill] sm:$0xff] %v14525_v55  ;;  %v1386_v56 = vsel %vm1354_vm14, 65537, %v14290_v39  ;;  %v1388_v32 = vsel %vm1356_vm1, 65537, %v14290_v39  ;;  %v9529_v38 = vld [vmem:[%s14243_s1 + $0x184] ss:$12 sps:$4 sm:$0xff]   ;;  %v493_v43 = vmax.bf16 %v14290_v39, %v461_v27  ;;  %v14530_v54 = vmov 0 }
  0x38   : > { %2313 = vmatprep.subr.bf16.mxu0 %v9505_v58  ;;  %v9530_v58 = vld [vmem:[%s14243_s1 + $0x188] ss:$12 sps:$4 sm:$0xff]   ;;  %v7661_v4 = vcombine.low %v1386_v56, %v10185_v50  ;;  %v7662_v41 = vcombine.low %v1388_v32, %v10185_v50  ;;  %v1050_v42 = vshrl.u32 %v10355_v25, 16  ;;  %v9527_v46 = vld [vmem:[%s14243_s1 + $0x180] ss:$12 sps:$4 sm:$0xff]  }
  0x39   : > { %8875 = vmatprep.subr.bf16.mxu1 %v9530_v58  ;;  %v9539_v47 = vld [vmem:[%s14243_s1 + $0x1d0] ss:$12 sps:$4 sm:$0xff]   ;;  %v9543_v5 = vld [vmem:[%s14243_s1 + $0x1e8] ss:$12 sps:$4 sm:$0xff]   ;;  %v9542_v32 = vld [vmem:[%s14243_s1 + $0x1cc] ss:$12 sps:$4 sm:$0xff]  }
  0x3a   : > { %8876 = vmatpush3.bf16.msra.mxu1 %v9530_v58  ;;  %vm10351_vm2 = vcmp.ne.s16.totalorder %v7661_v4, 0  ;;  %vm10397_vm6 = vcmp.ne.s16.totalorder %v7662_v41, 0  ;;  %v10403_v56 = vrot.slane %v1050_v42, 7  ;;  %v462_v58 = vld [vmem:[%s10155_s23 + $0x38] sm:$0xf] }
  0x3b   : > { %2314 = vmatpush1.bf16.msra.mxu0 %v9507_v8  ;;  %v619_v8 = vand.u32 15, %v523_v49  ;;  %8877 = vmatprep.subr.bf16.mxu1 %v9534_v18  ;;  %v14528_v24 = vsel %vm10351_vm2, 4294967295, %v14527_v24  ;;  %v9533_v49 = vld [vmem:[%s14243_s1 + $0x19c] ss:$12 sps:$4 sm:$0xff]   ;;  %v14531_v54 = vsel %vm10397_vm6, 4294967295, %v14530_v54 }
  0x3c   : > { %2315 = vmatprep.subr.bf16.mxu0 %v9509_v9  ;;  %v1039_v9 = vor.u32 %v1037_v62, %v10317_v61  ;;  %14529 = vst [vmem:[#allocation11_spill] sm:$0xff] %v14528_v24  ;;  %14532 = vst [vmem:[#allocation12_spill] sm:$0xff] %v14531_v54  ;;  %v463_v2 = vld [vmem:[%s10155_s23 + $0x3c] sm:$0xf] }
  0x3d   : > { %v9535_v27 = vld [vmem:[%s14243_s1 + $0x1b0] ss:$12 sps:$4 sm:$0xff]  }
  0x3e   : > { %7795 = vmatmul.mubr.msk.bf16.gmra.mrb[4].mxu1 %vm10262_vm12, %v10271_v33  ;;  %v10359_v28 = vsel %vm14249_vm4, %v1028_v35, %v1039_v9  ;;  %v9538_v35 = vld [vmem:[%s14243_s1 + $0x1b8] ss:$12 sps:$4 sm:$0xff]  }
  0x3f   : > { %2316 = vmatpush1.bf16.msra.mxu0 %v9511_v22  ;;  %2723 = vmatprep.mubr.bf16.mxu1 %v10239_v17  ;;  %v460_v22 = vld [vmem:[%s10155_s23 + $0x30] sm:$0xf] }
  0x40   : > { %2317 = vmatprep.subr.bf16.mxu0 %v9512_v26  ;;  %v1166_v26 = vadd.s32 4294967295, %v619_v8  ;;  %8878 = vmatpush3.bf16.msra.mxu1 %v9534_v18  ;;  %v492_v40 = vmax.bf16 %v14290_v39, %v460_v22  ;;  %v9544_v8 = vld [vmem:[%s14243_s1 + $0x200] ss:$12 sps:$4 sm:$0xff]   ;;  %v495_v22 = vmax.bf16 %v14290_v39, %v463_v2  ;;  %v9546_v2 = vld [vmem:[%s14243_s1 + $0x230] ss:$12 sps:$4 sm:$0xff]  }
  0x41   : > { %8879 = vmatprep.subr.bf16.mxu1 %v9538_v35 }
  0x42   : > { %vm1198_vm3 = vcmp.ge.s32.totalorder %v1166_v26, 0  ;;  %v10405_v57 = vcombine.low %v492_v40, %v493_v43  ;;  %v529_v26 = vadd.s32 128, %v10104_v14 }
  0x43   : > { %2318 = vmatpush1.bf16.msra.mxu0 %v9514_v31  ;;  %v1045_v31 = vshll.u32 %v10320_v63, 16  ;;  %vm1358_vm5 = vmpackc.low %vm1198_vm3, %vm1198_vm3 }
  0x44   : > { %2319 = vmatprep.subr.bf16.mxu0 %v9515_v34  ;;  %v633_v34 = vand.u32 15, %v525_v20  ;;  %8880 = vmatpush3.bf16.msra.mxu1 %v9538_v35  ;;  %v1390_v6 = vsel %vm1358_vm5, 65537, %v14290_v39  ;;  %v9545_v35 = vld [vmem:[%s14243_s1 + $0x218] ss:$12 sps:$4 sm:$0xff]   ;;  %v1061_v41 = vshll.u32 %v10405_v57, 16 }
  0x45   : > { %8881 = vmatprep.subr.bf16.mxu1 %v9539_v47  ;;  %v467_v20 = vld [vmem:[%s10155_s23 + $0x4c] sm:$0xf]  ;;  %vm14248_vm5 = vsmask.f32 7424 }
  0x46   : > { %7796 = vmatmul.mubr.msk.bf16.gmra.mrb[8].mxu1 %vm10303_vm15, %v10313_v59 }
  0x47   : > { %2320 = vmatpush1.bf16.msra.mxu0 %v9517_v44  ;;  %2731 = vmatprep.mubr.bf16.mxu1 %v10279_v37  ;;  %v1047_v44 = vor.u32 %v1045_v31, %v10363_v29 }
  0x48   : > { %2321 = vmatprep.subr.bf16.mxu0 %v9518_v48  ;;  %v1168_v48 = vadd.s32 4294967295, %v633_v34  ;;  %8882 = vmatpush3.bf16.msra.mxu1 %v9539_v47  ;;  %v464_v34 = vld [vmem:[%s10155_s23 + $0x40] sm:$0xf]  ;;  %v14535_v47 = vmov 0 }
  0x49   : > { %v10412_v4 = vsel %vm14249_vm4, %v10317_v61, %v1047_v44  ;;  %v9537_v61 = vld [vmem:[%s14243_s1 + $0x1b4] ss:$12 sps:$4 sm:$0xff]   ;;  %8883 = vmatprep.subr.bf16.mxu1 %v9543_v5 }
  0x4a   : > { %vm1200_vm7 = vcmp.ge.s32.totalorder %v1168_v48, 0  ;;  %v661_v48 = vand.u32 15, %v529_v26  ;;  %v531_v26 = vadd.s32 144, %v10104_v14 }
  0x4b   : > { %2322 = vmatpush1.bf16.msra.mxu0 %v9520_v53  ;;  %v1053_v53 = vshll.u32 %v10355_v25, 16  ;;  %vm10437_vm10 = vmpackc.low %vm1200_vm7, %vm1200_vm7 }
  0x4c   : > { %2323 = vmatprep.subr.bf16.mxu0 %v9521_v3  ;;  %v527_v3 = vadd.s32 112, %v10104_v14  ;;  %8884 = vmatpush3.bf16.msra.mxu1 %v9543_v5  ;;  %v1392_v43 = vsel %vm10437_vm10, 65537, %v14290_v39 }
  0x4d   : > { %v1055_v9 = vor.u32 %v1053_v53, %v10403_v56  ;;  %8885 = vmatprep.subr.bf16.mxu1 %v9544_v8 }
  0x4e   : > { %7797 = vmatmul.mubr.msk.bf16.gmra.mrb[12].mxu1 %vm10351_vm2, %v10359_v28  ;;  %v647_v18 = vand.u32 15, %v527_v3  ;;  %v496_v3 = vmax.bf16 %v14290_v39, %v464_v34  ;;  %v9555_v34 = vld [vmem:[%s14243_s1 + $0x214] ss:$12 sps:$4 sm:$0xff]  }
  0x4f   : > { %2324 = vmatpush1.bf16.msra.mxu0 %v9523_v10  ;;  %2739 = vmatprep.mubr.bf16.mxu1 %v10320_v63  ;;  %v1058_v10 = vshrl.u32 %v10405_v57, 16 }
  0x50   : > { %2325 = vmatprep.subr.bf16.mxu0 %v9524_v19  ;;  %v7663_v19 = vcombine.low %v1390_v6, %v10185_v50  ;;  %v1170_v44 = vadd.s32 4294967295, %v647_v18  ;;  %8886 = vmatpush3.bf16.msra.mxu1 %v9544_v8  ;;  %v9547_v8 = vld [vmem:[%s14243_s1 + $0x1e0] ss:$12 sps:$4 sm:$0xff]   ;;  %v14538_v18 = vmov 0 }
  0x51   : > { %v10460_v40 = vrot.slane %v1058_v10, 7  ;;  %8887 = vmatprep.subr.bf16.mxu1 %v9545_v35 }
  0x52   : > { %vm10470_vm11 = vcmp.ne.s16.totalorder %v7663_v19, 0  ;;  %vm1202_vm13 = vcmp.ge.s32.totalorder %v1170_v44, 0  ;;  %v466_v19 = vld [vmem:[%s10155_s23 + $0x48] sm:$0xf]  ;;  %v469_v44 = vld [vmem:[%s10155_s23 + $0x54] sm:$0xf] }
  0x53   : > { %2326 = vmatpush1.bf16.msra.mxu0 %v9526_v21  ;;  %v494_v21 = vmax.bf16 %v14290_v39, %v462_v58  ;;  %v14536_v47 = vsel %vm10470_vm11, 4294967295, %v14535_v47  ;;  %v7664_v58 = vcombine.low %v1392_v43, %v10185_v50  ;;  %v1063_v5 = vor.u32 %v1061_v41, %v10460_v40  ;;  %vm1362_vm0 = vmpackc.low %vm1202_vm13, %vm1202_vm13  ;;  %v468_v43 = vld [vmem:[%s10155_s23 + $0x50] sm:$0xf] }
  0x54   : > { %2486 = vmatprep.subr.bf16.mxu0 %v9529_v38  ;;  %v465_v38 = vld [vmem:[%s10155_s23 + $0x44] sm:$0xf]  ;;  %14537 = vst [vmem:[#allocation13_spill] sm:$0xff] %v14536_v47  ;;  %8888 = vmatpush3.bf16.msra.mxu1 %v9545_v35  ;;  %v498_v35 = vmax.bf16 %v14290_v39, %v466_v19 }
  0x55   : > { %vm10503_vm14 = vcmp.ne.s16.totalorder %v7664_v58, 0  ;;  %8889 = vmatprep.subr.bf16.mxu1 %v9546_v2  ;;  %v1498_v58 = vrot.slane %v1029_v36, 1  ;;  %v9558_v36 = vld [vmem:[%s14243_s1 + $0x22c] ss:$12 sps:$4 sm:$0xff]  }
  0x56   : > { %7762 = vmatmul.mubr.msk.bf16.vlgmr.msra.gmra.mrb[0].mxu0 %vm10219_vm9, %v10237_v16  ;;  %v9531_v16 = vld [vmem:[%s14243_s1 + $0x198] ss:$12 sps:$4 sm:$0xff]   ;;  %7798 = vmatmul.mubr.msk.bf16.gmra.mrb[16].mxu1 %vm10397_vm6, %v10412_v4  ;;  %v14539_v18 = vsel %vm10503_vm14, 4294967295, %v14538_v18 }
  0x57   : > { %2337 = vmatprep.mubr.bf16.mxu0 %v10214_v1  ;;  %2487 = vmatpush1.bf16.msra.mxu0 %v9527_v46  ;;  %v10468_v46 = vsel %vm14249_vm4, %v10363_v29, %v1055_v9  ;;  %v9549_v29 = vld [vmem:[%s14243_s1 + $0x1e4] ss:$12 sps:$4 sm:$0xff]   ;;  %v9552_v9 = vld [vmem:[%s14243_s1 + $0x1fc] ss:$12 sps:$4 sm:$0xff]   ;;  %14540 = vst [vmem:[#allocation14_spill] sm:$0xff] %v14539_v18  ;;  %v14543_v1 = vmov 0 }
  0x58   : > { %2488 = vmatprep.subr.bf16.mxu0 %v9533_v49  ;;  %2747 = vmatprep.mubr.bf16.mxu1 %v10355_v25  ;;  %v9540_v49 = vld [vmem:[%s14243_s1 + $0x1c8] ss:$12 sps:$4 sm:$0xff]  }
  0x59   : > { %8890 = vmatpush3.bf16.msra.mxu1 %v9546_v2 }
  0x5b   : > { %2489 = vmatpush1.bf16.msra.mxu0 %v9531_v16  ;;  %v497_v16 = vmax.bf16 %v14290_v39, %v465_v38  ;;  %v1394_v38 = vsel %vm1362_vm0, 65537, %v14290_v39 }
  0x5c   : > { %2490 = vmatprep.subr.bf16.mxu0 %v9537_v61  ;;  %v1172_v61 = vadd.s32 4294967295, %v661_v48 }
  0x5e   : > { %7763 = vmatmul.mubr.msk.bf16.gmra.mrb[4].mxu0 %vm10262_vm12, %v10271_v33  ;;  %v10475_v33 = vcombine.low %v494_v21, %v495_v22  ;;  %7799 = vmatmul.mubr.msk.bf16.gmra.mrb[20].mxu1 %vm10470_vm11, %v10468_v46  ;;  %v10513_v22 = vcombine.low %v496_v3, %v497_v16  ;;  %vm1204_vm1 = vcmp.ge.s32.totalorder %v1172_v61, 0  ;;  %v7665_v3 = vcombine.low %v1394_v38, %v10185_v50  ;;  %v9556_v38 = vld [vmem:[%s14243_s1 + $0x228] ss:$12 sps:$4 sm:$0xff]  }
  0x5f   : > { %2347 = vmatprep.mubr.bf16.mxu0 %v10239_v17  ;;  %2491 = vmatpush1.bf16.msra.mxu0 %v9535_v27  ;;  %v9550_v27 = vld [vmem:[%s14243_s1 + $0x1f8] ss:$12 sps:$4 sm:$0xff]   ;;  %vm10540_vm3 = vmpackc.low %vm1204_vm1, %vm1204_vm1  ;;  %v1495_v16 = vrot.slane %v1021_v13, 1 }
  0x60   : > { %2492 = vmatprep.subr.bf16.mxu0 %v9542_v32  ;;  %2755 = vmatprep.mubr.bf16.mxu1 %v10405_v57  ;;  %v1066_v6 = vshrl.u32 %v10475_v33, 16  ;;  %v1069_v21 = vshll.u32 %v10475_v33, 16  ;;  %v10521_v32 = vsel %vm14249_vm4, %v10403_v56, %v1063_v5  ;;  %v499_v56 = vmax.bf16 %v14290_v39, %v467_v20  ;;  %v9553_v5 = vld [vmem:[%s14243_s1 + $0x210] ss:$12 sps:$4 sm:$0xff]  }
  0x61   : > { %v1074_v48 = vshrl.u32 %v10513_v22, 16  ;;  %v1077_v61 = vshll.u32 %v10513_v22, 16  ;;  %v10565_v19 = vsel %vm14248_vm5, %v10233_v15, %v1495_v16  ;;  %v1497_v13 = vor.u32 %v1495_v16, %v1018_v12 }
  0x62   : > { %vm10582_vm7 = vcmp.ne.s16.totalorder %v7665_v3, 0  ;;  %v535_v16 = vadd.s32 176, %v10104_v14 }
  0x63   : > { %2493 = vmatpush1.bf16.msra.mxu0 %v9540_v49  ;;  %v10574_v20 = vrot.slane %v1074_v48, 7  ;;  %v14544_v1 = vsel %vm10582_vm7, 4294967295, %v14543_v1  ;;  %v10588_v12 = vsel %vm14248_vm5, %v1497_v13, %v1498_v58 }
  0x64   : > { %2494 = vmatprep.subr.bf16.mxu0 %v9549_v29  ;;  %v675_v29 = vand.u32 15, %v531_v26  ;;  %14545 = vst [vmem:[#allocation15_spill] sm:$0xff] %v14544_v1 }
  0x65   : > { %v1079_v17 = vor.u32 %v1077_v61, %v10574_v20 }
  0x66   : > { %7764 = vmatmul.mubr.msk.bf16.gmra.mrb[8].mxu0 %vm10303_vm15, %v10313_v59  ;;  %v10526_v59 = vrot.slane %v1066_v6, 7  ;;  %7800 = vmatmul.mubr.msk.bf16.gmra.mrb[24].mxu1 %vm10503_vm14, %v10521_v32  ;;  %v1174_v26 = vadd.s32 4294967295, %v675_v29 }
  0x67   : > { %2357 = vmatprep.mubr.bf16.mxu0 %v10279_v37  ;;  %2495 = vmatpush1.bf16.msra.mxu0 %v9547_v8  ;;  %v10560_v8 = vcombine.low %v498_v35, %v499_v56  ;;  %v1501_v56 = vrot.slane %v1037_v62, 1  ;;  %v470_v62 = vld [vmem:[%s10155_s23 + $0x58] sm:$0xf] }
  0x68   : > { %2496 = vmatprep.subr.bf16.mxu0 %v9552_v9  ;;  %2763 = vmatprep.mubr.bf16.mxu1 %v10475_v33  ;;  %v1071_v2 = vor.u32 %v1069_v21, %v10526_v59  ;;  %v533_v9 = vadd.s32 160, %v10104_v14  ;;  %vm1206_vm10 = vcmp.ge.s32.totalorder %v1174_v26, 0  ;;  %v502_v26 = vmax.bf16 %v14290_v39, %v470_v62 }
  0x69   : > { %vm1366_vm13 = vmpackc.low %vm1206_vm10, %vm1206_vm10 }
  0x6a   : > { %v10580_v15 = vsel %vm14249_vm4, %v10460_v40, %v1071_v2  ;;  %v1396_v40 = vsel %vm10540_vm3, 65537, %v14290_v39  ;;  %v689_v35 = vand.u32 15, %v533_v9  ;;  %v1503_v2 = vor.u32 %v1501_v56, %v1034_v45 }
  0x6b   : > { %2497 = vmatpush1.bf16.msra.mxu0 %v9550_v27  ;;  %v500_v27 = vmax.bf16 %v14290_v39, %v468_v43  ;;  %v1504_v43 = vrot.slane %v1045_v31, 1  ;;  %v1085_v45 = vshll.u32 %v10560_v8, 16  ;;  %v1398_v13 = vsel %vm1366_vm13, 65537, %v14290_v39 }
  0x6c   : > { %2498 = vmatprep.subr.bf16.mxu0 %v9555_v34  ;;  %v501_v34 = vmax.bf16 %v14290_v39, %v469_v44  ;;  %v7666_v44 = vcombine.low %v1396_v40, %v10185_v50  ;;  %v1176_v31 = vadd.s32 4294967295, %v689_v35  ;;  %v1513_v40 = vrot.slane %v1069_v21, 1 }
  0x6d   : > { %v1506_v3 = vor.u32 %v1504_v43, %v1042_v11  ;;  %v14546_v11 = vmov 0 }
  0x6e   : > { %7765 = vmatmul.mubr.msk.bf16.gmra.mrb[12].mxu0 %vm10351_vm2, %v10359_v28  ;;  %v1500_v28 = vor.u32 %v1498_v58, %v1026_v23  ;;  %7801 = vmatmul.mubr.msk.bf16.gmra.mrb[28].mxu1 %vm10582_vm7, %v10580_v15  ;;  %v1082_v23 = vshrl.u32 %v10560_v8, 16  ;;  %v10611_v49 = vcombine.low %v500_v27, %v501_v34  ;;  %v471_v58 = vld [vmem:[%s10155_s23 + $0x5c] sm:$0xf]  ;;  %vm10640_vm0 = vcmp.ne.s16.totalorder %v7666_v44, 0  ;;  %v473_v27 = vld [vmem:[%s10155_s23 + $0x64] sm:$0xf] }
  0x6f   : > { %2367 = vmatprep.mubr.bf16.mxu0 %v10320_v63  ;;  %2499 = vmatpush1.bf16.msra.mxu0 %v9553_v5  ;;  %v1507_v5 = vrot.slane %v1053_v53, 1  ;;  %v10638_v63 = vsel %vm14248_vm5, %v1503_v2, %v1504_v43  ;;  %v14547_v11 = vsel %vm10640_vm0, 4294967295, %v14546_v11  ;;  %v1510_v34 = vrot.slane %v1061_v41, 1 }
  0x70   : > { %2500 = vmatprep.subr.bf16.mxu0 %v9558_v36  ;;  %2771 = vmatprep.mubr.bf16.mxu1 %v10513_v22  ;;  %v10615_v29 = vsel %vm14248_vm5, %v1500_v28, %v1501_v56  ;;  %v10630_v36 = vsel %vm14249_vm4, %v10526_v59, %v1079_v17  ;;  %v10634_v37 = vrot.slane %v1082_v23, 7  ;;  %14548 = vst [vmem:[#allocation16_spill] sm:$0xff] %v14547_v11  ;;  %v1090_v53 = vshrl.u32 %v10611_v49, 16  ;;  %v474_v17 = vld [vmem:[%s10155_s23 + $0x68] sm:$0xf] }
  0x71   : > { %v10648_v59 = vsel %vm14248_vm5, %v1506_v3, %v1507_v5  ;;  %v1509_v9 = vor.u32 %v1507_v5, %v1050_v42  ;;  %vm1208_vm1 = vcmp.ge.s32.totalorder %v1176_v31, 0  ;;  %v503_v28 = vmax.bf16 %v14290_v39, %v471_v58  ;;  %v475_v5 = vld [vmem:[%s10155_s23 + $0x6c] sm:$0xf] }
  0x72   : > { %v537_v42 = vadd.s32 192, %v10104_v14  ;;  %v7667_v41 = vcombine.low %v1398_v13, %v10185_v50  ;;  %v10670_v56 = vrot.slane %v1090_v53, 7  ;;  %v1093_v21 = vshll.u32 %v10611_v49, 16  ;;  %vm10676_vm3 = vmpackc.low %vm1208_vm1, %vm1208_vm1 }
  0x73   : > { %2501 = vmatpush1.bf16.msra.mxu0 %v9556_v38  ;;  %v703_v38 = vand.u32 15, %v535_v16  ;;  %v10666_v35 = vsel %vm14248_vm5, %v1509_v9, %v1510_v34  ;;  %v1512_v43 = vor.u32 %v1510_v34, %v1058_v10  ;;  %v505_v58 = vmax.bf16 %v14290_v39, %v473_v27  ;;  %v476_v9 = vld [vmem:[%s10155_s23 + $0x70] sm:$0xf] }
  0x74   : > { %v1515_v2 = vor.u32 %v1513_v40, %v1066_v6  ;;  %v1516_v3 = vrot.slane %v1077_v61, 1  ;;  %v10686_v31 = vcombine.low %v502_v26, %v503_v28  ;;  %v717_v6 = vand.u32 15, %v537_v42 }
  0x75   : > { %v1178_v16 = vadd.s32 4294967295, %v703_v38  ;;  %v10690_v10 = vsel %vm14248_vm5, %v1512_v43, %v1513_v40  ;;  %vm10705_vm10 = vcmp.ne.s16.totalorder %v7667_v41, 0  ;;  %v14551_v26 = vmov 0 }
  0x76   : > { %7766 = vmatmul.mubr.msk.bf16.gmra.mrb[16].mxu0 %vm10397_vm6, %v10412_v4  ;;  %v472_v4 = vld [vmem:[%s10155_s23 + $0x60] sm:$0xf]  ;;  %7802 = vmatmul.mubr.msk.bf16.gmra.mrb[32].mxu1 %vm10640_vm0, %v10630_v36  ;;  %v10701_v61 = vsel %vm14248_vm5, %v1515_v2, %v1516_v3  ;;  %v1518_v13 = vor.u32 %v1516_v3, %v1074_v48  ;;  %v14552_v26 = vsel %vm10705_vm10, 4294967295, %v14551_v26  ;;  %v1519_v27 = vrot.slane %v1085_v45, 1  ;;  %v477_v48 = vld [vmem:[%s10155_s23 + $0x74] sm:$0xf] }
  0x77   : > { %2377 = vmatprep.mubr.bf16.mxu0 %v10355_v25  ;;  %v1087_v25 = vor.u32 %v1085_v45, %v10634_v37  ;;  %2779 = vmatprep.mubr.bf16.mxu1 %v10560_v8  ;;  %v504_v62 = vmax.bf16 %v14290_v39, %v472_v4  ;;  %14553 = vst [vmem:[#allocation17_spill] sm:$0xff] %v14552_v26  ;;  %v1522_v40 = vrot.slane %v1093_v21, 1  ;;  %vm1210_vm13 = vcmp.ge.s32.totalorder %v1178_v16, 0 }
  0x78   : > { %v506_v28 = vmax.bf16 %v14290_v39, %v474_v17  ;;  %v507_v38 = vmax.bf16 %v14290_v39, %v475_v5  ;;  %v1521_v42 = vor.u32 %v1519_v27, %v1082_v23  ;;  %v1101_v41 = vshll.u32 %v10686_v31, 16  ;;  %vm1370_vm1 = vmpackc.low %vm1210_vm13, %vm1210_vm13 }
  0x79   : > { %v10697_v4 = vsel %vm14249_vm4, %v10574_v20, %v1087_v25  ;;  %v1400_v20 = vsel %vm10676_vm3, 65537, %v14290_v39  ;;  %v10714_v34 = vcombine.low %v504_v62, %v505_v58  ;;  %v1098_v25 = vshrl.u32 %v10686_v31, 16 }
  0x7a   : > { %v7668_v45 = vcombine.low %v1400_v20, %v10185_v50  ;;  %v508_v43 = vmax.bf16 %v14290_v39, %v476_v9  ;;  %v509_v44 = vmax.bf16 %v14290_v39, %v477_v48  ;;  %v10735_v62 = vsel %vm14248_vm5, %v1521_v42, %v1522_v40 }
  0x7b   : > { %v1109_v17 = vshll.u32 %v10714_v34, 16  ;;  %v1524_v23 = vor.u32 %v1522_v40, %v1090_v53  ;;  %v10737_v58 = vcombine.low %v506_v28, %v507_v38  ;;  %v539_v2 = vadd.s32 208, %v10104_v14 }
  0x7c   : > { %v1525_v3 = vrot.slane %v1101_v41, 1  ;;  %v1100_v5 = vrot.slane %v1098_v25, 7  ;;  %v1106_v9 = vshrl.u32 %v10714_v34, 16  ;;  %vm10752_vm3 = vcmp.ne.s16.totalorder %v7668_v45, 0 }
  0x7d   : > { %v1117_v53 = vshll.u32 %v10737_v58, 16  ;;  %v1114_v40 = vshrl.u32 %v10737_v58, 16 }
  0x7e   : > { %7767 = vmatmul.mubr.msk.bf16.gmra.mrb[20].mxu0 %vm10470_vm11, %v10468_v46  ;;  %v1095_v46 = vor.u32 %v1093_v21, %v10670_v56  ;;  %7803 = vmatmul.mubr.msk.bf16.gmra.mrb[36].mxu1 %vm10705_vm10, %v10697_v4  ;;  %v1180_v21 = vadd.s32 4294967295, %v717_v6  ;;  %v1528_v6 = vrot.slane %v1109_v17, 1  ;;  %v1527_v20 = vor.u32 %v1525_v3, %v1098_v25 }
  0x7f   : > { %2387 = vmatprep.mubr.bf16.mxu0 %v10405_v57  ;;  %v10721_v57 = vsel %vm14248_vm5, %v1518_v13, %v1519_v27  ;;  %2787 = vmatprep.mubr.bf16.mxu1 %v10611_v49  ;;  %v10750_v13 = vsel %vm14248_vm5, %v1524_v23, %v1525_v3  ;;  %v14554_v27 = vmov 0  ;;  %v1531_v48 = vrot.slane %v1117_v53, 1 }
  0x80   : > { %v10742_v16 = vsel %vm14249_vm4, %v10634_v37, %v1095_v46  ;;  %v14555_v27 = vsel %vm10752_vm3, 4294967295, %v14554_v27  ;;  %v1402_v37 = vsel %vm1370_vm1, 65537, %v14290_v39  ;;  %vm1212_vm13 = vcmp.ge.s32.totalorder %v1180_v21, 0 }
  0x81   : > { %14556 = vst [vmem:[#allocation18_spill] sm:$0xff] %v14555_v27  ;;  %v10758_v46 = vcombine.low %v508_v43, %v509_v44  ;;  %v10761_v28 = vsel %vm14248_vm5, %v1527_v20, %v1528_v6  ;;  %v1530_v38 = vor.u32 %v1528_v6, %v1106_v9  ;;  %v7669_v45 = vcombine.low %v1402_v37, %v10185_v50  ;;  %vm1372_vm1 = vmpackc.low %vm1212_vm13, %vm1212_vm13 }
  0x82   : > { %v1533_v43 = vor.u32 %v1531_v48, %v1114_v40  ;;  %v541_v6 = vadd.s32 224, %v10104_v14  ;;  %v14557_v37 = vmov 0 }
  0x83   : > { %v1125_v25 = vshll.u32 %v10758_v46, 16  ;;  %v10769_v42 = vsel %vm14248_vm5, %v1530_v38, %v1531_v48  ;;  %v1122_v21 = vshrl.u32 %v10758_v46, 16  ;;  %vm10788_vm13 = vcmp.ne.s16.totalorder %v7669_v45, 0 }
  0x84   : > { %v14558_v37 = vsel %vm10788_vm13, 4294967295, %v14557_v37  ;;  %v745_v38 = vand.u32 15, %v541_v6  ;;  %v543_v48 = vadd.s32 240, %v10104_v14 }
  0x85   : > { %v1534_v44 = vrot.slane %v1125_v25, 1  ;;  %14559 = vst [vmem:[#allocation19_spill] sm:$0xff] %v14558_v37 }
  0x86   : > { %7768 = vmatmul.mubr.msk.bf16.gmra.mrb[24].mxu0 %vm10503_vm14, %v10521_v32  ;;  %v731_v32 = vand.u32 15, %v539_v2  ;;  %7804 = vmatmul.mubr.msk.bf16.gmra.mrb[40].mxu1 %vm10752_vm3, %v10742_v16  ;;  %v1184_v45 = vadd.s32 4294967295, %v745_v38  ;;  %v1124_v38 = vrot.slane %v1122_v21, 7 }
  0x87   : > { %2397 = vmatprep.mubr.bf16.mxu0 %v10475_v33  ;;  %v1103_v33 = vor.u32 %v1101_v41, %v1100_v5  ;;  %2795 = vmatprep.mubr.bf16.mxu1 %v10686_v31  ;;  %v10775_v2 = vsel %vm14248_vm5, %v1533_v43, %v1534_v44  ;;  %v10777_v3 = vor.u32 %v1534_v44, %v1122_v21  ;;  %v1404_v41 = vsel %vm1372_vm1, 65537, %v14290_v39  ;;  %v478_v43 = vld [vmem:[%s10155_s23 + $0x78] sm:$0xf]  ;;  %v479_v44 = vld [vmem:[%s10155_s23 + $0x7c] sm:$0xf] }
  0x88   : > { %v1182_v23 = vadd.s32 4294967295, %v731_v32  ;;  %v1108_v32 = vrot.slane %v1106_v9, 7  ;;  %v510_v6 = vmax.bf16 %v14290_v39, %v478_v43  ;;  %v518_v43 = vadd.s32 40, %v10104_v14 }
  0x89   : > { %v10786_v20 = vsel %vm14249_vm4, %v10670_v56, %v1103_v33  ;;  %v14560_v33 = vmov 0  ;;  %v1127_v21 = vor.u32 %v1125_v25, %v1124_v38 }
  0x8a   : > { %vm1214_vm5 = vcmp.ge.s32.totalorder %v1182_v23, 0  ;;  %v1111_v56 = vor.u32 %v1109_v17, %v1108_v32  ;;  %v759_v17 = vand.u32 15, %v543_v48  ;;  %v14565_v48 = vmov 0 }
  0x8b   : > { %vm1374_vm1 = vmpackc.low %vm1214_vm5, %vm1214_vm5  ;;  %vm1216_vm5 = vcmp.ge.s32.totalorder %v1184_v45, 0 }
  0x8c   : > { %v1406_v9 = vsel %vm1374_vm1, 65537, %v14290_v39  ;;  %vm14564_vm1 = vsmask.f32 256 }
  0x8e   : > { %7769 = vmatmul.mubr.msk.bf16.gmra.mrb[28].mxu0 %vm10582_vm7, %v10580_v15  ;;  %v7670_v15 = vcombine.low %v1404_v41, %v10185_v50  ;;  %7805 = vmatmul.mubr.msk.bf16.gmra.mrb[44].mxu1 %vm10788_vm13, %v10786_v20  ;;  %vm14563_vm7 = vsmask.f32 256  ;;  %v514_v41 = vadd.s32 8, %v10104_v14 }
  0x8f   : > { %2407 = vmatprep.mubr.bf16.mxu0 %v10513_v22  ;;  %2803 = vmatprep.mubr.bf16.mxu1 %v10714_v34  ;;  %v1116_v22 = vrot.slane %v1114_v40, 7  ;;  %v10810_v23 = vsel %vm14563_vm7, %v1100_v5, %v1111_v56  ;;  %v511_v5 = vmax.bf16 %v14290_v39, %v479_v44  ;;  %vm1376_vm7 = vmpackc.low %vm1216_vm5, %vm1216_vm5  ;;  %v516_v56 = vadd.s32 24, %v10104_v14 }
  0x90   : > { %vm10799_vm4 = vcmp.ne.s16.totalorder %v7670_v15, 0  ;;  %v556_v15 = vand.u32 15, %v514_v41 }
  0x91   : > { %v14561_v33 = vsel %vm10799_vm4, 4294967295, %v14560_v33  ;;  %v1119_v40 = vor.u32 %v1117_v53, %v1116_v22  ;;  %v1186_v53 = vadd.s32 4294967295, %v759_v17  ;;  %v584_v17 = vand.u32 15, %v518_v43 }
  0x92   : > { %14562 = vst [vmem:[#allocation20_spill] sm:$0xff] %v14561_v33  ;;  %v1560_v45 = vadd.s32 1, %v556_v15 }
  0x93   : > { %vm1218_vm5 = vcmp.ge.s32.totalorder %v1186_v53, 0  ;;  %v1564_v15 = vadd.s32 1, %v584_v17  ;;  %v14572_v17 = vmov 0 }
  0x96   : > { %7770 = vmatmul.mubr.msk.bf16.gmra.mrb[32].mxu0 %vm10640_vm0, %v10630_v36  ;;  %7806 = vmatmul.mubr.msk.bf16.gmra.mrb[48].mxu1 %vm10799_vm4, %v10810_v23  ;;  %v7671_v36 = vcombine.low %v1406_v9, %v10185_v50  ;;  %v10833_v9 = vcombine.low %v510_v6, %v511_v5  ;;  %v14569_v6 = vmov 0 }
  0x97   : > { %2417 = vmatprep.mubr.bf16.mxu0 %v10560_v8  ;;  %2811 = vmatprep.mubr.bf16.mxu1 %v10737_v58  ;;  %v10825_v8 = vsel %vm14564_vm1, %v1108_v32, %v1119_v40  ;;  %v570_v32 = vand.u32 15, %v516_v56  ;;  %vm1624_vm1 = vcmp.lt.s32.totalorder %v1560_v45, 16 }
  0x98   : > { %vm10828_vm0 = vcmp.ne.s16.totalorder %v7671_v36, 0  ;;  %v1133_v25 = vshll.u32 %v10833_v9, 16  ;;  %vm1752_vm14 = vmpackc.low %vm1624_vm1, %vm1624_vm1  ;;  %v520_v36 = vadd.s32 56, %v10104_v14  ;;  %vm1628_vm1 = vcmp.lt.s32.totalorder %v1564_v15, 16 }
  0x99   : > { %v14566_v48 = vsel %vm10828_vm0, 4294967295, %v14565_v48  ;;  %v1562_v40 = vadd.s32 1, %v570_v32  ;;  %v1784_v53 = vsel %vm1752_vm14, 65537, %v14290_v39  ;;  %vm1756_vm14 = vmpackc.low %vm1628_vm1, %vm1628_vm1  ;;  %v524_v32 = vadd.s32 88, %v10104_v14 }
  0x9a   : > { %14567 = vst [vmem:[#allocation21_spill] sm:$0xff] %v14566_v48  ;;  %v598_v56 = vand.u32 15, %v520_v36  ;;  %v526_v36 = vadd.s32 104, %v10104_v14  ;;  %v1788_v15 = vsel %vm1756_vm14, 65537, %v14290_v39 }
  0x9e   : > { %7771 = vmatmul.mubr.msk.bf16.gmra.mrb[36].mxu0 %vm10705_vm10, %v10697_v4  ;;  %v1408_v4 = vsel %vm1376_vm7, 65537, %v14290_v39  ;;  %7807 = vmatmul.mubr.msk.bf16.gmra.mrb[52].mxu1 %vm10828_vm0, %v10825_v8  ;;  %vm1378_vm10 = vmpackc.low %vm1218_vm5, %vm1218_vm5  ;;  %vm14568_vm7 = vsmask.f32 256  ;;  %vm1626_vm5 = vcmp.lt.s32.totalorder %v1562_v40, 16 }
  0x9f   : > { %2427 = vmatprep.mubr.bf16.mxu0 %v10611_v49  ;;  %2819 = vmatprep.mubr.bf16.mxu1 %v10758_v46  ;;  %v7672_v44 = vcombine.low %v1408_v4, %v10185_v50  ;;  %v1130_v49 = vshrl.u32 %v10833_v9, 16  ;;  %v10847_v41 = vsel %vm14568_vm7, %v1116_v22, %v1127_v21  ;;  %v1410_v22 = vsel %vm1378_vm10, 65537, %v14290_v39  ;;  %vm1754_vm10 = vmpackc.low %vm1626_vm5, %vm1626_vm5 }
  0xa0   : > { %v7673_v45 = vcombine.low %v1410_v22, %v10185_v50  ;;  %v7674_v4 = vcombine.low %v10185_v50, %v1784_v53  ;;  %v1566_v21 = vadd.s32 1, %v598_v56  ;;  %v7676_v22 = vcombine.low %v10185_v50, %v1788_v15 }
  0xa1   : > { %vm10851_vm11 = vcmp.ne.s16.totalorder %v7672_v44, 0  ;;  %v1132_v5 = vrot.slane %v1130_v49, 7  ;;  %v528_v56 = vadd.s32 120, %v10104_v14  ;;  %v532_v15 = vadd.s32 152, %v10104_v14 }
  0xa2   : > { %v14570_v6 = vsel %vm10851_vm11, 4294967295, %v14569_v6  ;;  %vm10882_vm5 = vcmp.ne.s16.totalorder %v7674_v4, 0  ;;  %vm1630_vm1 = vcmp.lt.s32.totalorder %v1566_v21, 16  ;;  %vm10906_vm6 = vcmp.ne.s16.totalorder %v7676_v22, 0 }
  0xa3   : > { %14571 = vst [vmem:[#allocation22_spill] sm:$0xff] %v14570_v6  ;;  %v14581_v4 = vmov 0  ;;  %v14587_v22 = vmov 0 }
  0xa4   : > { %v14582_v4 = vsel %vm10906_vm6, 4294967295, %v14581_v4 }
  0xa5   : > { %14583 = vst [vmem:[#allocation26_spill] sm:$0xff] %v14582_v4 }
  0xa6   : > { %7772 = vmatmul.mubr.msk.bf16.gmra.mrb[40].mxu0 %vm10752_vm3, %v10742_v16  ;;  %v522_v16 = vadd.s32 72, %v10104_v14  ;;  %7808 = vmatmul.mubr.msk.bf16.gmra.mrb[56].mxu1 %vm10851_vm11, %v10847_v41  ;;  %vm10876_vm3 = vcmp.ne.s16.totalorder %v7673_v45, 0 }
  0xa7   : > { %2437 = vmatprep.mubr.bf16.mxu0 %v10686_v31  ;;  %2827 = vmatprep.mubr.bf16.mxu1 %v10833_v9  ;;  %v1135_v31 = vor.u32 %v1133_v25, %v1132_v5  ;;  %v14573_v17 = vsel %vm10876_vm3, 4294967295, %v14572_v17  ;;  %v14575_v5 = vmov 0 }
  0xa8   : > { %v612_v43 = vand.u32 15, %v522_v16  ;;  %14574 = vst [vmem:[#allocation23_spill] sm:$0xff] %v14573_v17  ;;  %v14576_v5 = vsel %vm10882_vm5, 4294967295, %v14575_v5  ;;  %v640_v16 = vand.u32 15, %v526_v36 }
  0xa9   : > { %v10874_v44 = vsel %vm14568_vm7, %v1124_v38, %v1135_v31  ;;  %14577 = vst [vmem:[#allocation24_spill] sm:$0xff] %v14576_v5  ;;  %v626_v38 = vand.u32 15, %v524_v32  ;;  %v14578_v31 = vmov 0  ;;  %v654_v32 = vand.u32 15, %v528_v56 }
  0xaa   : > { %v1568_v40 = vadd.s32 1, %v612_v43  ;;  %v1572_v45 = vadd.s32 1, %v640_v16  ;;  %v530_v43 = vadd.s32 136, %v10104_v14  ;;  %v534_v16 = vadd.s32 168, %v10104_v14 }
  0xab   : > { %v1570_v53 = vadd.s32 1, %v626_v38  ;;  %v14584_v38 = vmov 0  ;;  %v682_v56 = vand.u32 15, %v532_v15 }
  0xac   : > { %vm1632_vm7 = vcmp.lt.s32.totalorder %v1568_v40, 16  ;;  %v668_v40 = vand.u32 15, %v530_v43 }
  0xae   : > { %7773 = vmatmul.mubr.msk.bf16.gmra.mrb[44].mxu0 %vm10788_vm13, %v10786_v20  ;;  %v1786_v20 = vsel %vm1754_vm10, 65537, %v14290_v39  ;;  %7809 = vmatmul.mubr.msk.bf16.gmra.mrb[60].mxu1 %vm10876_vm3, %v10874_v44  ;;  %vm1758_vm13 = vmpackc.low %vm1630_vm1, %vm1630_vm1  ;;  %vm1634_vm1 = vcmp.lt.s32.totalorder %v1570_v53, 16 }
  0xaf   : > { %2447 = vmatprep.mubr.bf16.mxu0 %v10714_v34  ;;  %8891 = vmatprep.mubr.msk.bf16.mxu1 %vm10882_vm5, %v10565_v19  ;;  %v7675_v34 = vcombine.low %v10185_v50, %v1786_v20  ;;  %vm1760_vm10 = vmpackc.low %vm1632_vm7, %vm1632_vm7  ;;  %v1790_v21 = vsel %vm1758_vm13, 65537, %v14290_v39  ;;  %vm1636_vm7 = vcmp.lt.s32.totalorder %v1572_v45, 16  ;;  %v1574_v20 = vadd.s32 1, %v654_v32 }
  0xb0   : > { %vm1764_vm13 = vmpackc.low %vm1636_vm7, %vm1636_vm7  ;;  %v696_v45 = vand.u32 15, %v534_v16  ;;  %v14590_v32 = vmov 0 }
  0xb1   : > { %vm10900_vm14 = vcmp.ne.s16.totalorder %v7675_v34, 0  ;;  %v1576_v34 = vadd.s32 1, %v668_v40  ;;  %v538_v40 = vadd.s32 200, %v10104_v14 }
  0xb2   : > { %v14579_v31 = vsel %vm10900_vm14, 4294967295, %v14578_v31 }
  0xb3   : > { %14580 = vst [vmem:[#allocation25_spill] sm:$0xff] %v14579_v31  ;;  %vm1640_vm7 = vcmp.lt.s32.totalorder %v1576_v34, 16  ;;  %v724_v16 = vand.u32 15, %v538_v40 }
  0xb6   : > { %7774 = vmatmul.mubr.msk.bf16.gmra.mrb[48].mxu0 %vm10799_vm4, %v10810_v23  ;;  %v1792_v23 = vsel %vm1760_vm10, 65537, %v14290_v39  ;;  %8892 = vmatmul.mubr.msk.bf16.vlgmr.msra.gmra.mrb[64].mxu1 %vm10900_vm14, %v10588_v12  ;;  %vm1762_vm4 = vmpackc.low %vm1634_vm1, %vm1634_vm1  ;;  %vm1638_vm1 = vcmp.lt.s32.totalorder %v1574_v20, 16 }
  0xb7   : > { %2457 = vmatprep.mubr.bf16.mxu0 %v10737_v58  ;;  %8895 = vmatprep.mubr.msk.bf16.mxu1 %vm10906_vm6, %v10615_v29  ;;  %v7677_v58 = vcombine.low %v10185_v50, %v1790_v21  ;;  %v7678_v36 = vcombine.low %v10185_v50, %v1792_v23  ;;  %v1794_v53 = vsel %vm1762_vm4, 65537, %v14290_v39  ;;  %vm1768_vm4 = vmpackc.low %vm1640_vm7, %vm1640_vm7  ;;  %v1578_v21 = vadd.s32 1, %v682_v56 }
  0xb8   : > { %v536_v23 = vadd.s32 184, %v10104_v14  ;;  %v540_v56 = vadd.s32 216, %v10104_v14 }
  0xb9   : > { %vm10924_vm10 = vcmp.ne.s16.totalorder %v7677_v58, 0  ;;  %vm10930_vm2 = vcmp.ne.s16.totalorder %v7678_v36, 0  ;;  %v1580_v58 = vadd.s32 1, %v696_v45  ;;  %v14593_v36 = vmov 0 }
  0xba   : > { %v14585_v38 = vsel %vm10924_vm10, 4294967295, %v14584_v38  ;;  %v14588_v22 = vsel %vm10930_vm2, 4294967295, %v14587_v22  ;;  %v710_v15 = vand.u32 15, %v536_v23  ;;  %v1584_v45 = vadd.s32 1, %v724_v16 }
  0xbb   : > { %14586 = vst [vmem:[#allocation27_spill] sm:$0xff] %v14585_v38  ;;  %14589 = vst [vmem:[#allocation28_spill] sm:$0xff] %v14588_v22  ;;  %vm1644_vm7 = vcmp.lt.s32.totalorder %v1580_v58, 16  ;;  %v738_v58 = vand.u32 15, %v540_v56  ;;  %v14602_v16 = vmov 0 }
  0xbe   : > { %7775 = vmatmul.mubr.msk.bf16.gmra.mrb[52].mxu0 %vm10828_vm0, %v10825_v8  ;;  %v1796_v8 = vsel %vm1764_vm13, 65537, %v14290_v39  ;;  %8896 = vmatmul.mubr.msk.bf16.gmra.mrb[68].mxu1 %vm10924_vm10, %v10638_v63  ;;  %vm1766_vm0 = vmpackc.low %vm1638_vm1, %vm1638_vm1  ;;  %vm1642_vm1 = vcmp.lt.s32.totalorder %v1578_v21, 16  ;;  %v14599_v21 = vmov 0 }
  0xbf   : > { %2467 = vmatprep.mubr.bf16.mxu0 %v10758_v46  ;;  %8899 = vmatprep.mubr.msk.bf16.mxu1 %vm10930_vm2, %v10648_v59  ;;  %v7679_v46 = vcombine.low %v10185_v50, %v1794_v53  ;;  %v7680_v43 = vcombine.low %v10185_v50, %v1796_v8  ;;  %v1798_v20 = vsel %vm1766_vm0, 65537, %v14290_v39  ;;  %vm1772_vm0 = vmpackc.low %vm1644_vm7, %vm1644_vm7  ;;  %v1582_v8 = vadd.s32 1, %v710_v15 }
  0xc0   : > { %v7681_v34 = vcombine.low %v10185_v50, %v1798_v20  ;;  %vm1648_vm7 = vcmp.lt.s32.totalorder %v1584_v45, 16  ;;  %v1586_v15 = vadd.s32 1, %v738_v58  ;;  %v14611_v58 = vmov 0 }
  0xc1   : > { %vm10948_vm13 = vcmp.ne.s16.totalorder %v7679_v46, 0  ;;  %vm10954_vm15 = vcmp.ne.s16.totalorder %v7680_v43, 0  ;;  %v14596_v46 = vmov 0  ;;  %v542_v43 = vadd.s32 232, %v10104_v14 }
  0xc2   : > { %v14591_v32 = vsel %vm10948_vm13, 4294967295, %v14590_v32  ;;  %v14594_v36 = vsel %vm10954_vm15, 4294967295, %v14593_v36 }
  0xc3   : > { %14592 = vst [vmem:[#allocation29_spill] sm:$0xff] %v14591_v32  ;;  %14595 = vst [vmem:[#allocation30_spill] sm:$0xff] %v14594_v36  ;;  %v752_v20 = vand.u32 15, %v542_v43 }
  0xc6   : > { %7776 = vmatmul.mubr.msk.bf16.gmra.mrb[56].mxu0 %vm10851_vm11, %v10847_v41  ;;  %v1800_v41 = vsel %vm1768_vm4, 65537, %v14290_v39  ;;  %8900 = vmatmul.mubr.msk.bf16.gmra.mrb[72].mxu1 %vm10948_vm13, %v10666_v35  ;;  %vm1770_vm11 = vmpackc.low %vm1642_vm1, %vm1642_vm1  ;;  %vm10972_vm4 = vcmp.ne.s16.totalorder %v7681_v34, 0  ;;  %vm1646_vm1 = vcmp.lt.s32.totalorder %v1582_v8, 16  ;;  %v544_v34 = vadd.s32 248, %v10104_v14 }
  0xc7   : > { %2477 = vmatprep.mubr.bf16.mxu0 %v10833_v9  ;;  %8903 = vmatprep.mubr.msk.bf16.mxu1 %vm10954_vm15, %v10690_v10  ;;  %v7682_v53 = vcombine.low %v10185_v50, %v1800_v41  ;;  %v14597_v46 = vsel %vm10972_vm4, 4294967295, %v14596_v46  ;;  %v1802_v23 = vsel %vm1770_vm11, 65537, %v14290_v39  ;;  %vm1776_vm11 = vmpackc.low %vm1648_vm7, %vm1648_vm7  ;;  %v14605_v8 = vmov 0  ;;  %v9561_v9 = vld [vmem:[%s14244_s2 + $0x4] ss:$12 sps:$4 sm:$0xff]  }
  0xc8   : > { %14598 = vst [vmem:[#allocation31_spill] sm:$0xff] %v14597_v46  ;;  %v7683_v40 = vcombine.low %v10185_v50, %v1802_v23  ;;  %v1808_v45 = vsel %vm1776_vm11, 65537, %v14290_v39  ;;  %v766_v14 = vand.u32 15, %v544_v34  ;;  %v14614_v34 = vmov 0  ;;  %3731 = vmatprep.subr.bf16.mxu1 %v9561_v9 }
  0xc9   : > { %vm10978_vm12 = vcmp.ne.s16.totalorder %v7682_v53, 0  ;;  %v1588_v53 = vadd.s32 1, %v752_v20  ;;  %v7686_v43 = vcombine.low %v10185_v50, %v1808_v45  ;;  %v14621_v45 = vmov 0 }
  0xca   : > { %v14600_v21 = vsel %vm10978_vm12, 4294967295, %v14599_v21  ;;  %v1590_v23 = vadd.s32 1, %v766_v14 }
  0xcb   : > { %14601 = vst [vmem:[#allocation32_spill] sm:$0xff] %v14600_v21  ;;  %vm1652_vm7 = vcmp.lt.s32.totalorder %v1588_v53, 16  ;;  %vm11023_vm8 = vcmp.ne.s16.totalorder %v7686_v43, 0  ;;  %v9567_v43 = vld [vmem:[%s14244_s2 + $0x34] ss:$12 sps:$4 sm:$0xff]  }
  0xcc   : > { %v14612_v58 = vsel %vm11023_vm8, 4294967295, %v14611_v58 }
  0xcd   : > { %14613 = vst [vmem:[#allocation36_spill] sm:$0xff] %v14612_v58 }
  0xce   : > { %7777 = vmatmul.mubr.msk.bf16.gmra.mrb[60].mxu0 %vm10876_vm3, %v10874_v44  ;;  %v1804_v44 = vsel %vm1772_vm0, 65537, %v14290_v39  ;;  %8904 = vmatmul.mubr.msk.bf16.gmra.mrb[76].mxu1 %vm10972_vm4, %v10701_v61  ;;  %vm1774_vm3 = vmpackc.low %vm1646_vm1, %vm1646_vm1  ;;  %vm10996_vm0 = vcmp.ne.s16.totalorder %v7683_v40, 0  ;;  %vm1650_vm1 = vcmp.lt.s32.totalorder %v1586_v15, 16 }
  0xcf   : > { %2518 = vmatprep.mubr.bf16.mxu0 %v14290_v39  ;;  %8907 = vmatprep.mubr.msk.bf16.mxu1 %vm10978_vm12, %v10721_v57  ;;  %v7684_v41 = vcombine.low %v10185_v50, %v1804_v44  ;;  %v14603_v16 = vsel %vm10996_vm0, 4294967295, %v14602_v16  ;;  %v1806_v56 = vsel %vm1774_vm3, 65537, %v14290_v39  ;;  %vm1780_vm3 = vmpackc.low %vm1652_vm7, %vm1652_vm7  ;;  %v14608_v44 = vmov 0 }
  0xd0   : > { %14604 = vst [vmem:[#allocation33_spill] sm:$0xff] %v14603_v16  ;;  %v1812_v20 = vsel %vm1780_vm3, 65537, %v14290_v39  ;;  %vm14617_vm3 = vsmask.f32 7424 }
  0xd1   : > { %vm11001_vm9 = vcmp.ne.s16.totalorder %v7684_v41, 0  ;;  %v1537_v41 = vrot.slane %v1133_v25, 1  ;;  %v7688_v15 = vcombine.low %v10185_v50, %v1812_v20 }
  0xd2   : > { %v14606_v8 = vsel %vm11001_vm9, 4294967295, %v14605_v8 }
  0xd3   : > { %14607 = vst [vmem:[#allocation34_spill] sm:$0xff] %v14606_v8  ;;  %v11049_v53 = vsel %vm14617_vm3, %v10777_v3, %v1537_v41 }
  0xd6   : > { %7778 = vmatmul.mubr.msk.bf16.vlgmr.msra.gmra.mrb[0].mxu0 %vm10882_vm5, %v10565_v19  ;;  %8908 = vmatmul.mubr.msk.bf16.gmra.mrb[80].mxu1 %vm10996_vm0, %v10735_v62  ;;  %v7685_v19 = vcombine.low %v10185_v50, %v1806_v56  ;;  %vm1778_vm5 = vmpackc.low %vm1650_vm1, %vm1650_vm1  ;;  %vm1654_vm1 = vcmp.lt.s32.totalorder %v1590_v23, 16  ;;  %v14618_v56 = vmov 0  ;;  %v9570_v23 = vld [vmem:[%s14244_s2 + $0x4c] ss:$12 sps:$4 sm:$0xff]  }
  0xd7   : > { %2528 = vmatprep.mubr.bf16.mxu0 %v14290_v39  ;;  %8911 = vmatprep.mubr.msk.bf16.mxu1 %vm11001_vm9, %v10750_v13  ;;  %v1810_v40 = vsel %vm1778_vm5, 65537, %v14290_v39  ;;  %vm1782_vm7 = vmpackc.low %vm1654_vm1, %vm1654_vm1  ;;  %vm1556_vm1 = vcmask 1047552  }
  0xd8   : > { %vm11018_vm11 = vcmp.ne.s16.totalorder %v7685_v19, 0  ;;  %v1814_v25 = vsel %vm1782_vm7, 65537, %v14290_v39  ;;  %v14624_v19 = vmov 0 }
  0xd9   : > { %v14609_v44 = vsel %vm11018_vm11, 4294967295, %v14608_v44  ;;  %v7689_v3 = vcombine.low %v10185_v50, %v1814_v25  ;;  %v9574_v25 = vld [vmem:[%s14244_s2 + $0x78] ss:$12 sps:$4 sm:$0xff]  }
  0xda   : > { %14610 = vst [vmem:[#allocation35_spill] sm:$0xff] %v14609_v44 }
  0xdb   : > { %vm11077_vm7 = vcmp.ne.s16.totalorder %v7689_v3, 0 }
  0xdc   : > { %v14625_v19 = vsel %vm11077_vm7, 4294967295, %v14624_v19 }
  0xdd   : > { %14626 = vst [vmem:[#allocation40_spill] sm:$0xff] %v14625_v19 }
  0xde   : > { %7779 = vmatmul.mubr.msk.bf16.gmra.mrb[4].mxu0 %vm10900_vm14, %v10588_v12  ;;  %8912 = vmatmul.mubr.msk.bf16.gmra.mrb[84].mxu1 %vm11018_vm11, %v10761_v28  ;;  %v7687_v12 = vcombine.low %v10185_v50, %v1810_v40  ;;  %vm11051_vm14 = vcmp.ne.s16.totalorder %v7688_v15, 0  ;;  %v9559_v50 = vld [vmem:[%s14244_s2] ss:$12 sps:$4 sm:$0xff]   ;;  %v9573_v40 = vld [vmem:[%s14244_s2 + $0x64] ss:$12 sps:$4 sm:$0xff]  }
  0xdf   : > { %2538 = vmatprep.mubr.bf16.mxu0 %v14290_v39  ;;  %8915 = vmatprep.mubr.msk.bf16.mxu1 %vm11023_vm8, %v10769_v42  ;;  %v14619_v56 = vsel %vm11051_vm14, 4294967295, %v14618_v56 }
  0xe0   : > { %vm11042_vm5 = vcmp.ne.s16.totalorder %v7687_v12, 0  ;;  %14620 = vst [vmem:[#allocation38_spill] sm:$0xff] %v14619_v56  ;;  %3732 = vmatpush1.bf16.msra.mxu1 %v9559_v50  ;;  %v9577_v50 = vld [vmem:[%s14244_s2 + $0x90] ss:$12 sps:$4 sm:$0xff]  }
  0xe1   : > { %v14615_v34 = vsel %vm11042_vm5, 4294967295, %v14614_v34 }
  0xe2   : > { %14616 = vst [vmem:[#allocation37_spill] sm:$0xff] %v14615_v34 }
  0xe6   : > { %7780 = vmatmul.mubr.msk.bf16.gmra.mrb[8].mxu0 %vm10906_vm6, %v10615_v29  ;;  %8916 = vmatmul.mubr.msk.bf16.gmra.mrb[88].mxu1 %vm11042_vm5, %v10775_v2  ;;  %v1539_v29 = vor.u32 %v1537_v41, %v1130_v49  ;;  %vm11066_vm6 = vmand %vm1556_vm1, %vm14617_vm3  ;;  %v9564_v49 = vld [vmem:[%s14244_s2 + $0x1c] ss:$12 sps:$4 sm:$0xff]   ;;  %vm14627_vm1 = vnez %v14516_v0  ;;  %vm14628_vm3 = vnez %v14519_v7 }
  0xe7   : > { %2548 = vmatprep.mubr.bf16.mxu0 %v14290_v39  ;;  %8919 = vmatprep.mubr.msk.bf16.mxu1 %vm11051_vm14, %v11049_v53  ;;  %v14622_v45 = vsel %vm11066_vm6, 4294967295, %v14621_v45 }
  0xe8   : > { %14623 = vst [vmem:[#allocation39_spill] sm:$0xff] %v14622_v45  ;;  %v11075_v14 = vsel %vm11066_vm6, %v1539_v29, 0  ;;  %3733 = vmatprep.subr.bf16.mxu1 %v9564_v49  ;;  %v9576_v29 = vld [vmem:[%s14244_s2 + $0x7c] ss:$12 sps:$4 sm:$0xff]  }
  0xee   : > { %7781 = vmatmul.mubr.msk.bf16.gmra.mrb[12].mxu0 %vm10924_vm10, %v10638_v63  ;;  %8920 = vmatmul.mubr.msk.bf16.gmra.mrb[92].mxu1 %vm11077_vm7, %v11075_v14  ;;  %v9562_v63 = vld [vmem:[%s14244_s2 + $0x18] ss:$12 sps:$4 sm:$0xff]  }
  0xef   : > { %2558 = vmatprep.mubr.bf16.mxu0 %v14290_v39  ;;  %3734 = vmatpush1.bf16.msra.mxu1 %v9562_v63 }
  0xf0   : > { %3735 = vmatprep.subr.bf16.mxu1 %v9567_v43  ;;  %v9582_v43 = vld [vmem:[%s14244_s2 + $0xac] ss:$12 sps:$4 sm:$0xff]  }
  0xf6   : > { %7782 = vmatmul.mubr.msk.bf16.gmra.mrb[16].mxu0 %vm10930_vm2, %v10648_v59  ;;  %v9565_v59 = vld [vmem:[%s14244_s2 + $0x30] ss:$12 sps:$4 sm:$0xff]  }
  0xf7   : > { %2568 = vmatprep.mubr.bf16.mxu0 %v14290_v39  ;;  %3736 = vmatpush1.bf16.msra.mxu1 %v9565_v59 }
  0xf8   : > { %3737 = vmatprep.subr.bf16.mxu1 %v9570_v23  ;;  %v9580_v23 = vld [vmem:[%s14244_s2 + $0xa8] ss:$12 sps:$4 sm:$0xff]  }
  0xfe   : > { %7783 = vmatmul.mubr.msk.bf16.gmra.mrb[20].mxu0 %vm10948_vm13, %v10666_v35  ;;  %v9568_v35 = vld [vmem:[%s14244_s2 + $0x48] ss:$12 sps:$4 sm:$0xff]  }
  0xff   : > { %2578 = vmatprep.mubr.bf16.mxu0 %v14290_v39  ;;  %3738 = vmatpush1.bf16.msra.mxu1 %v9568_v35 }
 0x100   : > { %3739 = vmatprep.subr.bf16.mxu1 %v9573_v40  ;;  %v9586_v40 = vld [vmem:[%s14244_s2 + $0xc8] ss:$12 sps:$4 sm:$0xff]  }
 0x101   : > { %8339 = vmatprep.subr.bf16.mxu0 %v9586_v40 }
 0x106   : > { %7784 = vmatmul.mubr.msk.bf16.gmra.mrb[24].mxu0 %vm10954_vm15, %v10690_v10  ;;  %v9571_v10 = vld [vmem:[%s14244_s2 + $0x60] ss:$12 sps:$4 sm:$0xff]  }
 0x107   : > { %2588 = vmatprep.mubr.bf16.mxu0 %v14290_v39  ;;  %3740 = vmatpush1.bf16.msra.mxu1 %v9571_v10  ;;  %v9583_v10 = vld [vmem:[%s14244_s2 + $0xc0] ss:$12 sps:$4 sm:$0xff]  }
 0x108   : > { %3741 = vmatprep.subr.bf16.mxu1 %v9576_v29 }
 0x109   : > { %v8219_v20 = vpop.f32.mrb[0].mxu1 }
 0x10a   : > { %v8220_v12 = vpop.f32.mrb[1].mxu1 }
 0x10b   : > { %v8222_v41 = vpop.f32.mrb[2].mxu1  ;;  %3742 = vmatpush1.bf16.msra.mxu1 %v9574_v25  ;;  %v9587_v12 = vld [vmem:[%s14244_s2 + $0x8] ss:$12 sps:$4 sm:$0xff]  }
 0x10c   : > { %v8223_v15 = vpop.f32.mrb[3].mxu1  ;;  %8340 = vmatpush3.bf16.msra.mxu0 %v9587_v12 }
 0x10e   : > { %7785 = vmatmul.mubr.msk.bf16.gmra.mrb[28].mxu0 %vm10972_vm4, %v10701_v61  ;;  %v9579_v61 = vld [vmem:[%s14244_s2 + $0x94] ss:$12 sps:$4 sm:$0xff]  }
 0x10f   : > { %2598 = vmatprep.mubr.bf16.mxu0 %v14290_v39  ;;  %3743 = vmatprep.subr.bf16.mxu1 %v9579_v61  ;;  %v9590_v61 = vld [vmem:[%s14244_s2 + $0xdc] ss:$12 sps:$4 sm:$0xff]  }
 0x110   : > { %3744 = vmatpush1.bf16.msra.mxu1 %v9577_v50  ;;  %v9588_v50 = vld [vmem:[%s14244_s2 + $0xd8] ss:$12 sps:$4 sm:$0xff]  }
 0x111   : > { %v8225_v3 = vpop.f32.mrb[4].mxu1  ;;  %3745 = vmatprep.subr.bf16.mxu1 %v9582_v43 }
 0x112   : > { %v8226_v9 = vpop.f32.mrb[5].mxu1 }
 0x113   : > { %v11147_v63 = vadd.f32 %v8226_v9, %v8225_v3  ;;  %v8228_v49 = vpop.f32.mrb[6].mxu1  ;;  %v9591_v3 = vld [vmem:[%s14244_s2 + $0xe0] ss:$12 sps:$4 sm:$0xff]  }
 0x114   : > { %v8229_v59 = vpop.f32.mrb[7].mxu1  ;;  %3746 = vmatpush1.bf16.msra.mxu1 %v9580_v23  ;;  %v9592_v9 = vld [vmem:[%s14244_s2 + $0x20] ss:$12 sps:$4 sm:$0xff]   ;;  %8341 = vmatprep.subr.bf16.mxu0 %v9591_v3  ;;  %v9593_v23 = vld [vmem:[%s14244_s2 + $0xf0] ss:$12 sps:$4 sm:$0xff]  }
 0x115   : > { %v11152_v35 = vadd.f32 %v8229_v59, %v8228_v49  ;;  %8342 = vmatpush3.bf16.msra.mxu0 %v9592_v9  ;;  %v9595_v49 = vld [vmem:[%s14244_s2 + $0xf4] ss:$12 sps:$4 sm:$0xff]   ;;  %v9596_v59 = vld [vmem:[%s14244_s2 + $0xf8] ss:$12 sps:$4 sm:$0xff]  }
 0x116   : > { %7786 = vmatmul.mubr.msk.bf16.gmra.mrb[32].mxu0 %vm10978_vm12, %v10721_v57  ;;  %v9585_v57 = vld [vmem:[%s14244_s2 + $0xc4] ss:$12 sps:$4 sm:$0xff]   ;;  %8343 = vmatprep.subr.bf16.mxu0 %v9596_v59  ;;  %v9607_v59 = vld [vmem:[%s14244_s2 + $0x68] ss:$12 sps:$4 sm:$0xff]  }
 0x117   : > { %2608 = vmatprep.mubr.bf16.mxu0 %v14290_v39  ;;  %3747 = vmatprep.subr.bf16.mxu1 %v9585_v57  ;;  %v9597_v57 = vld [vmem:[%s14244_s2 + $0x38] ss:$12 sps:$4 sm:$0xff]  }
 0x118   : > { %3748 = vmatpush1.bf16.msra.mxu1 %v9583_v10  ;;  %v9605_v3 = vld [vmem:[%s14244_s2 + $0x124] ss:$12 sps:$4 sm:$0xff]  }
 0x119   : > { %v8231_v20 = vpop.f32.mrb[8].mxu1  ;;  %3749 = vmatprep.subr.bf16.mxu1 %v9590_v61  ;;  %8344 = vmatpush3.bf16.msra.mxu0 %v9597_v57  ;;  %v9602_v61 = vld [vmem:[%s14244_s2 + $0x50] ss:$12 sps:$4 sm:$0xff]  }
 0x11a   : > { %v8232_v41 = vpop.f32.mrb[9].mxu1 }
 0x11b   : > { %v11173_v15 = vadd.f32 %v8232_v41, %v8231_v20  ;;  %v8234_v25 = vpop.f32.mrb[10].mxu1  ;;  %v9600_v41 = vld [vmem:[%s14244_s2 + $0x10c] ss:$12 sps:$4 sm:$0xff]  }
 0x11c   : > { %v8235_v29 = vpop.f32.mrb[11].mxu1  ;;  %3750 = vmatpush1.bf16.msra.mxu1 %v9588_v50  ;;  %v9606_v50 = vld [vmem:[%s14244_s2 + $0x128] ss:$12 sps:$4 sm:$0xff]  }
 0x11d   : > { %3751 = vmatprep.subr.bf16.mxu1 %v9595_v49  ;;  %v9603_v49 = vld [vmem:[%s14244_s2 + $0x120] ss:$12 sps:$4 sm:$0xff]  }
 0x11e   : > { %7787 = vmatmul.mubr.msk.bf16.gmra.mrb[36].mxu0 %vm10996_vm0, %v10735_v62  ;;  %v11181_v62 = vadd.f32 %v8235_v29, %v8234_v25  ;;  %v9601_v25 = vld [vmem:[%s14244_s2 + $0x110] ss:$12 sps:$4 sm:$0xff]   ;;  %v9598_v29 = vld [vmem:[%s14244_s2 + $0x108] ss:$12 sps:$4 sm:$0xff]  }
 0x11f   : > { %2618 = vmatprep.mubr.bf16.mxu0 %v14290_v39  ;;  %8345 = vmatprep.subr.bf16.mxu0 %v9601_v25  ;;  %v9612_v25 = vld [vmem:[%s14244_s2 + $0x80] ss:$12 sps:$4 sm:$0xff]  }
 0x120   : > { %3752 = vmatpush1.bf16.msra.mxu1 %v9593_v23  ;;  %8346 = vmatpush3.bf16.msra.mxu0 %v9602_v61  ;;  %v9616_v61 = vld [vmem:[%s14244_s2 + $0x158] ss:$12 sps:$4 sm:$0xff]  }
 0x121   : > { %v8237_v43 = vpop.f32.mrb[12].mxu1  ;;  %3753 = vmatprep.subr.bf16.mxu1 %v9600_v41  ;;  %8347 = vmatprep.subr.bf16.mxu0 %v9606_v50  ;;  %v9608_v41 = vld [vmem:[%s14244_s2 + $0x138] ss:$12 sps:$4 sm:$0xff]   ;;  %v9613_v50 = vld [vmem:[%s14244_s2 + $0x150] ss:$12 sps:$4 sm:$0xff]  }
 0x122   : > { %v8238_v40 = vpop.f32.mrb[13].mxu1 }
 0x123   : > { %v11205_v20 = vadd.f32 %v8238_v40, %v8237_v43  ;;  %v8240_v10 = vpop.f32.mrb[14].mxu1 }
 0x124   : > { %v8241_v12 = vpop.f32.mrb[15].mxu1  ;;  %3754 = vmatpush1.bf16.msra.mxu1 %v9598_v29  ;;  %8348 = vmatpush3.bf16.msra.mxu0 %v9607_v59  ;;  %v9615_v29 = vld [vmem:[%s14244_s2 + $0x154] ss:$12 sps:$4 sm:$0xff]  }
 0x125   : > { %3755 = vmatprep.subr.bf16.mxu1 %v9605_v3 }
 0x126   : > { %7788 = vmatmul.mubr.msk.bf16.gmra.mrb[40].mxu0 %vm11001_vm9, %v10750_v13  ;;  %v11213_v13 = vadd.f32 %v8241_v12, %v8240_v10  ;;  %v9610_v10 = vld [vmem:[%s14244_s2 + $0x13c] ss:$12 sps:$4 sm:$0xff]   ;;  %v9611_v12 = vld [vmem:[%s14244_s2 + $0x140] ss:$12 sps:$4 sm:$0xff]  }
 0x127   : > { %2628 = vmatprep.mubr.bf16.mxu0 %v14290_v39  ;;  %8349 = vmatprep.subr.bf16.mxu0 %v9611_v12  ;;  %v9618_v12 = vld [vmem:[%s14244_s2 + $0x168] ss:$12 sps:$4 sm:$0xff]  }
 0x128   : > { %3756 = vmatpush1.bf16.msra.mxu1 %v9603_v49  ;;  %8350 = vmatpush3.bf16.msra.mxu0 %v9612_v25 }
 0x129   : > { %v8243_v9 = vpop.f32.mrb[16].mxu1  ;;  %3757 = vmatprep.subr.bf16.mxu1 %v9610_v10  ;;  %8351 = vmatprep.subr.bf16.mxu0 %v9616_v61  ;;  %v9621_v10 = vld [vmem:[%s14244_s2 + $0x170] ss:$12 sps:$4 sm:$0xff]  }
 0x12a   : > { %v8244_v43 = vpop.f32.mrb[17].mxu1 }
 0x12b   : > { %v11237_v23 = vadd.f32 %v8244_v43, %v8243_v9  ;;  %v8246_v57 = vpop.f32.mrb[18].mxu1  ;;  %v9617_v9 = vld [vmem:[%s14244_s2 + $0x98] ss:$12 sps:$4 sm:$0xff]  }
 0x12c   : > { %v8247_v40 = vpop.f32.mrb[19].mxu1  ;;  %3758 = vmatpush1.bf16.msra.mxu1 %v9608_v41  ;;  %8352 = vmatpush3.bf16.msra.mxu0 %v9617_v9  ;;  %v9622_v41 = vld [vmem:[%s14244_s2 + $0xb0] ss:$12 sps:$4 sm:$0xff]  }
 0x12d   : > { %3759 = vmatprep.subr.bf16.mxu1 %v9615_v29  ;;  %8353 = vmatprep.subr.bf16.mxu0 %v9621_v10 }
 0x12e   : > { %7789 = vmatmul.mubr.msk.bf16.gmra.mrb[44].mxu0 %vm11018_vm11, %v10761_v28  ;;  %v11245_v28 = vadd.f32 %v8247_v40, %v8246_v57  ;;  %v9620_v40 = vld [vmem:[%s14244_s2 + $0x16c] ss:$12 sps:$4 sm:$0xff]  }
 0x12f   : > { %2638 = vmatprep.mubr.bf16.mxu0 %v14290_v39 }
 0x130   : > { %3760 = vmatpush1.bf16.msra.mxu1 %v9613_v50  ;;  %8354 = vmatpush3.bf16.msra.mxu0 %v9622_v41 }
 0x131   : > { %v8249_v3 = vpop.f32.mrb[20].mxu1  ;;  %3761 = vmatprep.subr.bf16.mxu1 %v9620_v40 }
 0x132   : > { %v8250_v49 = vpop.f32.mrb[21].mxu1 }
 0x133   : > { %v11269_v59 = vadd.f32 %v8250_v49, %v8249_v3  ;;  %v8252_v43 = vpop.f32.mrb[22].mxu1 }
 0x134   : > { %v8253_v57 = vpop.f32.mrb[23].mxu1  ;;  %3762 = vmatpush1.bf16.msra.mxu1 %v9618_v12 }
 0x136   : > { %7790 = vmatmul.mubr.msk.bf16.gmra.mrb[48].mxu0 %vm11023_vm8, %v10769_v42  ;;  %v11277_v42 = vadd.f32 %v8253_v57, %v8252_v43 }
 0x137   : > { %2648 = vmatprep.mubr.bf16.mxu0 %v14290_v39 }
 0x139   : > { %v8255_v25 = vpop.f32.mrb[24].mxu1 }
 0x13a   : > { %v8256_v29 = vpop.f32.mrb[25].mxu1 }
 0x13b   : > { %v11289_v61 = vadd.f32 %v8256_v29, %v8255_v25  ;;  %v8258_v3 = vpop.f32.mrb[26].mxu1 }
 0x13c   : > { %v8259_v50 = vpop.f32.mrb[27].mxu1 }
 0x13d   : > { %v11291_v9 = vadd.f32 %v8259_v50, %v8258_v3 }
 0x13e   : > { %7791 = vmatmul.mubr.msk.bf16.gmra.mrb[52].mxu0 %vm11042_vm5, %v10775_v2 }
 0x13f   : > { %2658 = vmatprep.mubr.bf16.mxu0 %v14290_v39 }
 0x141   : > { %v8261_v49 = vpop.f32.mrb[28].mxu1 }
 0x142   : > { %v8262_v43 = vpop.f32.mrb[29].mxu1 }
 0x143   : > { %v11297_v57 = vadd.f32 %v8262_v43, %v8261_v49  ;;  %v8264_v2 = vpop.f32.mrb[30].mxu1 }
 0x144   : > { %v8265_v40 = vpop.f32.mrb[31].mxu1 }
 0x145   : > { %v11299_v10 = vadd.f32 %v8265_v40, %v8264_v2 }
 0x146   : > { %7792 = vmatmul.mubr.msk.bf16.gmra.mrb[56].mxu0 %vm11051_vm14, %v11049_v53 }
 0x147   : > { %2668 = vmatprep.mubr.bf16.mxu0 %v14290_v39 }
 0x149   : > { %v8267_v12 = vpop.f32.mrb[32].mxu1 }
 0x14a   : > { %v8268_v41 = vpop.f32.mrb[33].mxu1 }
 0x14b   : > { %v11304_v25 = vadd.f32 %v8268_v41, %v8267_v12  ;;  %v8270_v29 = vpop.f32.mrb[34].mxu1  ;;  %v9625_v41 = vld [vmem:[%s14244_s2 + $0x184] ss:$12 sps:$4 sm:$0xff]  }
 0x14c   : > { %v8271_v3 = vpop.f32.mrb[35].mxu1  ;;  %3922 = vmatprep.subr.bf16.mxu1 %v9625_v41 }
 0x14d   : > { %v11306_v53 = vadd.f32 %v8271_v3, %v8270_v29 }
 0x14e   : > { %7793 = vmatmul.mubr.msk.bf16.gmra.mrb[60].mxu0 %vm11077_vm7, %v11075_v14  ;;  %vm14631_vm7 = vnez %v14522_v30 }
 0x151   : > { %v8273_v50 = vpop.f32.mrb[36].mxu1 }
 0x152   : > { %v8274_v60 = vpop.f32.mrb[37].mxu1 }
 0x153   : > { %v11308_v49 = vadd.f32 %v8274_v60, %v8273_v50  ;;  %v8276_v43 = vpop.f32.mrb[38].mxu1 }
 0x154   : > { %v8277_v39 = vpop.f32.mrb[39].mxu1 }
 0x155   : > { %v11310_v2 = vadd.f32 %v8277_v39, %v8276_v43 }
 0x159   : > { %v8279_v40 = vpop.f32.mrb[40].mxu1 }
 0x15a   : > { %v8280_v52 = vpop.f32.mrb[41].mxu1 }
 0x15b   : > { %v11312_v51 = vadd.f32 %v8280_v52, %v8279_v40  ;;  %v8282_v14 = vpop.f32.mrb[42].mxu1 }
 0x15c   : > { %v8283_v19 = vpop.f32.mrb[43].mxu1 }
 0x15d   : > { %v11314_v12 = vadd.f32 %v8283_v19, %v8282_v14 }
 0x161   : > { %v8285_v29 = vpop.f32.mrb[44].mxu1 }
 0x162   : > { %v8286_v60 = vpop.f32.mrb[45].mxu1 }
 0x163   : > { %v11319_v3 = vadd.f32 %v8286_v60, %v8285_v29  ;;  %v8288_v50 = vpop.f32.mrb[46].mxu1 }
 0x164   : > { %v8289_v39 = vpop.f32.mrb[47].mxu1 }
 0x165   : > { %v11321_v43 = vadd.f32 %v8289_v39, %v8288_v50 }
 0x169   : > { %v8291_v45 = vpop.f32.mrb[48].mxu1 }
 0x16a   : > { %v8292_v52 = vpop.f32.mrb[49].mxu1 }
 0x16b   : > { %v11323_v40 = vadd.f32 %v8292_v52, %v8291_v45  ;;  %v8294_v56 = vpop.f32.mrb[50].mxu1 }
 0x16c   : > { %v8295_v19 = vpop.f32.mrb[51].mxu1 }
 0x16d   : > { %v11325_v14 = vadd.f32 %v8295_v19, %v8294_v56 }
 0x171   : > { %v8297_v34 = vpop.f32.mrb[52].mxu1 }
 0x172   : > { %v8298_v58 = vpop.f32.mrb[53].mxu1 }
 0x173   : > { %v11327_v44 = vadd.f32 %v8298_v58, %v8297_v34  ;;  %v8300_v41 = vpop.f32.mrb[54].mxu1 }
 0x174   : > { %v8301_v8 = vpop.f32.mrb[55].mxu1 }
 0x175   : > { %v11329_v29 = vadd.f32 %v8301_v8, %v8300_v41 }
 0x179   : > { %v8303_v60 = vpop.f32.mrb[56].mxu1 }
 0x17a   : > { %v8304_v16 = vpop.f32.mrb[57].mxu1 }
 0x17b   : > { %v11331_v50 = vadd.f32 %v8304_v16, %v8303_v60  ;;  %v8306_v39 = vpop.f32.mrb[58].mxu1 }
 0x17c   : > { %v8307_v21 = vpop.f32.mrb[59].mxu1 }
 0x17d   : > { %v11333_v45 = vadd.f32 %v8307_v21, %v8306_v39 }
 0x181   : > { %v8309_v52 = vpop.f32.mrb[60].mxu1 }
 0x182   : > { %v8310_v46 = vpop.f32.mrb[61].mxu1 }
 0x183   : > { %v11335_v56 = vadd.f32 %v8310_v46, %v8309_v52  ;;  %v8312_v19 = vpop.f32.mrb[62].mxu1 }
 0x184   : > { %v8313_v36 = vpop.f32.mrb[63].mxu1 }
 0x185   : > { %v11337_v58 = vadd.f32 %v8313_v36, %v8312_v19 }
 0x189   : > { %v8893_v34 = vpop.f32.mrb[64].mxu1 }
 0x18a   : > { %v2877_v8 = vadd.f32 %v8893_v34, %v11147_v63  ;;  %v2870_v41 = vpop.f32.mrb[65].mxu1 }
 0x18b   : > { %v8894_v32 = vpop.f32.mrb[66].mxu1 }
 0x18c   : > { %v2880_v16 = vadd.f32 %v8894_v32, %v11152_v35  ;;  %v2872_v60 = vpop.f32.mrb[67].mxu1 }
 0x191   : > { %v8897_v22 = vpop.f32.mrb[68].mxu1 }
 0x192   : > { %v11342_v21 = vadd.f32 %v8897_v22, %v11205_v20  ;;  %v2884_v39 = vpop.f32.mrb[69].mxu1  ;;  %v11355_v22 = vld [vmem:[%s14244_s2 + $0x188] ss:$12 sps:$4 sm:$0xff]  }
 0x193   : > { %v2885_v46 = vadd.f32 %v11173_v15, %v2884_v39  ;;  %v8898_v52 = vpop.f32.mrb[70].mxu1  ;;  %8923 = vmatprep.subr.bf16.mxu0 %v11355_v22 }
 0x194   : > { %v11346_v38 = vadd.f32 %v8898_v52, %v11213_v13  ;;  %v2887_v36 = vpop.f32.mrb[71].mxu1 }
 0x195   : > { %v2888_v19 = vadd.f32 %v11181_v62, %v2887_v36 }
 0x199   : > { %v8901_v63 = vpop.f32.mrb[72].mxu1 }
 0x19a   : > { %v11350_v34 = vadd.f32 %v8901_v63, %v11269_v59  ;;  %v2900_v32 = vpop.f32.mrb[73].mxu1 }
 0x19b   : > { %v11358_v35 = vadd.f32 %v11237_v23, %v2900_v32  ;;  %v8902_v15 = vpop.f32.mrb[74].mxu1 }
 0x19c   : > { %v11361_v20 = vadd.f32 %v8902_v15, %v11277_v42  ;;  %v2903_v13 = vpop.f32.mrb[75].mxu1 }
 0x19d   : > { %v11365_v62 = vadd.f32 %v11245_v28, %v2903_v13 }
 0x1a1   : > { %v8905_v59 = vpop.f32.mrb[76].mxu1 }
 0x1a2   : > { %v11368_v41 = vadd.f32 %v8905_v59, %v11297_v57  ;;  %v2916_v60 = vpop.f32.mrb[77].mxu1 }
 0x1a3   : > { %v11371_v39 = vadd.f32 %v11289_v61, %v2916_v60  ;;  %v8906_v23 = vpop.f32.mrb[78].mxu1 }
 0x1a4   : > { %v11374_v52 = vadd.f32 %v8906_v23, %v11299_v10  ;;  %v2919_v42 = vpop.f32.mrb[79].mxu1 }
 0x1a5   : > { %v11377_v36 = vadd.f32 %v11291_v9, %v2919_v42 }
 0x1a9   : > { %v2520_v63 = vpop.f32.mrb[0].mxu0  ;;  %v8909_v4 = vpop.f32.mrb[80].mxu1 }
 0x1aa   : > { %v2522_v32 = vpop.f32.mrb[1].mxu0  ;;  %v11380_v59 = vadd.f32 %v8909_v4, %v11308_v49  ;;  %v2932_v61 = vpop.f32.mrb[81].mxu1 }
 0x1ab   : > { %v3027_v28 = vadd.f32 %v2877_v8, %v2522_v32  ;;  %v2524_v15 = vpop.f32.mrb[2].mxu0  ;;  %v11383_v31 = vadd.f32 %v11304_v25, %v2932_v61  ;;  %v8910_v10 = vpop.f32.mrb[82].mxu1 }
 0x1ac   : > { %v2526_v13 = vpop.f32.mrb[3].mxu0  ;;  %v11386_v9 = vadd.f32 %v8910_v10, %v11310_v2  ;;  %v2935_v42 = vpop.f32.mrb[83].mxu1 }
 0x1ad   : > { %v3028_v57 = vadd.f32 %v2880_v16, %v2526_v13  ;;  %v3059_v60 = vmax.f32 %v3027_v28, 0.0  ;;  %v11389_v8 = vadd.f32 %v11306_v53, %v2935_v42 }
 0x1af   : > { %v3060_v23 = vmax.f32 %v3028_v57, 0.0 }
 0x1b1   : > { %v3091_v5 = vpack.c.bf16 %v3060_v23, %v3059_v60  ;;  %v2530_v32 = vpop.f32.mrb[4].mxu0  ;;  %v8913_v61 = vpop.f32.mrb[84].mxu1 }
 0x1b2   : > { %v2532_v16 = vpop.f32.mrb[5].mxu0  ;;  %v11394_v60 = vadd.f32 %v8913_v61, %v11319_v3  ;;  %v2948_v53 = vpop.f32.mrb[85].mxu1  ;;  %v9628_v3 = vld [vmem:[%s14244_s2 + $0x19c] ss:$12 sps:$4 sm:$0xff]  }
 0x1b3   : > { %v3108_v13 = vshrl.u32 %v3091_v5, 16  ;;  %v2997_v4 = vadd.f32 %v2532_v16, %v2520_v63  ;;  %v2534_v49 = vpop.f32.mrb[6].mxu0  ;;  %3763 = vmatprep.mubr.bf16.mxu1 %v3091_v5  ;;  %4145 = vmatprep.mubr.bf16.mxu0 %v3091_v5  ;;  %v3111_v28 = vshll.u32 %v3091_v5, 16  ;;  %v11397_v10 = vadd.f32 %v11312_v51, %v2948_v53  ;;  %v8914_v23 = vpop.f32.mrb[86].mxu1  ;;  %v9623_v5 = vld [vmem:[%s14244_s2 + $0x180] ss:$12 sps:$4 sm:$0xff]  }
 0x1b4   : > { %v2536_v25 = vpop.f32.mrb[7].mxu0  ;;  %v9639_v51 = vld [vmem:[%s14244_s2 + $0x1a0] ss:$12 sps:$4 sm:$0xff]  }
 0x1b5   : > { %v3029_v17 = vadd.f32 %v2997_v4, %v2885_v46  ;;  %v2998_v57 = vadd.f32 %v2536_v25, %v2524_v15  ;;  %v11391_v6 = vrot.slane %v3108_v13, 7  ;;  %v3267_v2 = vrot.slane %v3111_v28, 1  ;;  %v2951_v15 = vpop.f32.mrb[87].mxu1 }
 0x1b6   : > { %v11404_v46 = vadd.f32 %v8914_v23, %v11321_v43 }
 0x1b7   : > { %v3030_v63 = vadd.f32 %v2998_v57, %v2888_v19  ;;  %v3113_v42 = vor.u32 %v3111_v28, %v11391_v6  ;;  %v3268_v16 = vor.u32 %v3267_v2, %v3108_v13  ;;  %v3061_v19 = vmax.f32 %v3029_v17, 0.0  ;;  %v9626_v17 = vld [vmem:[%s14244_s2 + $0x198] ss:$12 sps:$4 sm:$0xff]   ;;  %v9631_v13 = vld [vmem:[%s14244_s2 + $0x1b4] ss:$12 sps:$4 sm:$0xff]  }
 0x1b8   : > { %v11413_v28 = vadd.f32 %v11314_v12, %v2951_v15 }
 0x1b9   : > { %v3062_v4 = vmax.f32 %v3030_v63, 0.0  ;;  %v2540_v25 = vpop.f32.mrb[8].mxu0  ;;  %v3250_v43 = vsel %vm14627_vm1, 0, %v3113_v42  ;;  %v8917_v2 = vpop.f32.mrb[88].mxu1  ;;  %vm14630_vm1 = vsmask.f32 256 }
 0x1ba   : > { %v2542_v61 = vpop.f32.mrb[9].mxu0  ;;  %7898 = vmatmul.mubr.msk.bf16.vlgmr.msra.gmra.mrb[96].mxu1 %vm14628_vm3, %v3250_v43  ;;  %7930 = vmatmul.mubr.msk.bf16.vlgmr.msra.gmra.mrb[64].mxu0 %vm14628_vm3, %v3250_v43  ;;  %vm14629_vm3 = vsmask.f32 7424 }
 0x1bb   : > { %v2999_v57 = vadd.f32 %v2542_v61, %v2530_v32  ;;  %v2544_v53 = vpop.f32.mrb[10].mxu0  ;;  %v3092_v23 = vpack.c.bf16 %v3062_v4, %v3061_v19  ;;  %3923 = vmatpush1.bf16.msra.mxu1 %v9623_v5  ;;  %8924 = vmatpush3.bf16.msra.mxu0 %v11355_v22  ;;  %v9640_v32 = vld [vmem:[%s14244_s2 + $0x1b8] ss:$12 sps:$4 sm:$0xff]   ;;  %v11433_v22 = vadd.f32 %v8917_v2, %v11327_v44 }
 0x1bc   : > { %v2546_v12 = vpop.f32.mrb[11].mxu0  ;;  %3924 = vmatprep.subr.bf16.mxu1 %v9628_v3  ;;  %8925 = vmatprep.subr.bf16.mxu0 %v9639_v51  ;;  %v2964_v3 = vpop.f32.mrb[89].mxu1 }
 0x1bd   : > { %v3031_v63 = vadd.f32 %v2999_v57, %v11342_v21  ;;  %v3000_v42 = vadd.f32 %v2546_v12, %v2534_v49  ;;  %3773 = vmatprep.mubr.bf16.mxu1 %v3092_v23  ;;  %4151 = vmatprep.mubr.bf16.mxu0 %v3092_v23  ;;  %v3115_v5 = vshrl.u32 %v3092_v23, 16  ;;  %v3118_v15 = vshll.u32 %v3092_v23, 16  ;;  %v8918_v4 = vpop.f32.mrb[90].mxu1  ;;  %v9629_v21 = vld [vmem:[%s14244_s2 + $0x1b0] ss:$12 sps:$4 sm:$0xff]  }
 0x1be   : > { %v11436_v19 = vadd.f32 %v11323_v40, %v2964_v3  ;;  %v11445_v49 = vadd.f32 %v8918_v4, %v11329_v29  ;;  %v2967_v44 = vpop.f32.mrb[91].mxu1  ;;  %v9641_v29 = vld [vmem:[%s14244_s2 + $0x1d0] ss:$12 sps:$4 sm:$0xff]  }
 0x1bf   : > { %v3032_v43 = vadd.f32 %v3000_v42, %v11346_v38  ;;  %v11439_v61 = vrot.slane %v3115_v5, 7  ;;  %3925 = vmatpush1.bf16.msra.mxu1 %v9626_v17  ;;  %8926 = vmatpush3.bf16.msra.mxu0 %v9639_v51  ;;  %v3269_v57 = vrot.slane %v3118_v15, 1  ;;  %v3063_v40 = vmax.f32 %v3031_v63, 0.0  ;;  %v9634_v51 = vld [vmem:[%s14244_s2 + $0x1cc] ss:$12 sps:$4 sm:$0xff]  }
 0x1c0   : > { %3926 = vmatprep.subr.bf16.mxu1 %v9631_v13  ;;  %8927 = vmatprep.subr.bf16.mxu0 %v9640_v32  ;;  %v11448_v12 = vadd.f32 %v11325_v14, %v2967_v44 }
 0x1c1   : > { %v3064_v23 = vmax.f32 %v3032_v43, 0.0  ;;  %v2550_v38 = vpop.f32.mrb[12].mxu0  ;;  %v3120_v17 = vor.u32 %v3118_v15, %v11439_v61  ;;  %v11458_v13 = vsel %vm14629_vm3, %v3268_v16, %v3269_v57  ;;  %v3271_v63 = vor.u32 %v3269_v57, %v3115_v5  ;;  %v9632_v15 = vld [vmem:[%s14244_s2 + $0x1c8] ss:$12 sps:$4 sm:$0xff]   ;;  %v9637_v16 = vld [vmem:[%s14244_s2 + $0x1e4] ss:$12 sps:$4 sm:$0xff]  }
 0x1c2   : > { %v2552_v2 = vpop.f32.mrb[13].mxu0 }
 0x1c3   : > { %v3001_v42 = vadd.f32 %v2552_v2, %v2540_v25  ;;  %v2554_v3 = vpop.f32.mrb[14].mxu0  ;;  %v3121_v14 = vsel %vm14630_vm1, %v11391_v6, %v3120_v17  ;;  %v3093_v4 = vpack.c.bf16 %v3064_v23, %v3063_v40  ;;  %3927 = vmatpush1.bf16.msra.mxu1 %v9629_v21  ;;  %8928 = vmatpush3.bf16.msra.mxu0 %v9640_v32  ;;  %v9645_v6 = vld [vmem:[%s14244_s2 + $0x1e8] ss:$12 sps:$4 sm:$0xff]   ;;  %v8921_v25 = vpop.f32.mrb[92].mxu1  ;;  %vm14632_vm1 = vmmov %vm14629_vm3  ;;  %vm14633_vm3 = vsmask.f32 256 }
 0x1c4   : > { %v2556_v43 = vpop.f32.mrb[15].mxu0  ;;  %7899 = vmatmul.mubr.msk.bf16.gmra.mrb[100].mxu1 %vm14631_vm7, %v3121_v14  ;;  %7931 = vmatmul.mubr.msk.bf16.gmra.mrb[68].mxu0 %vm14631_vm7, %v3121_v14  ;;  %v11477_v57 = vadd.f32 %v8921_v25, %v11335_v56  ;;  %v2980_v40 = vpop.f32.mrb[93].mxu1  ;;  %v9644_v25 = vld [vmem:[%s14244_s2 + $0x1fc] ss:$12 sps:$4 sm:$0xff]   ;;  %vm14634_vm7 = vnez %v14525_v55 }
 0x1c5   : > { %v3033_v5 = vadd.f32 %v3001_v42, %v11358_v35  ;;  %v3002_v21 = vadd.f32 %v2556_v43, %v2544_v53  ;;  %3783 = vmatprep.mubr.bf16.mxu1 %v3093_v4  ;;  %4159 = vmatprep.mubr.bf16.mxu0 %v3093_v4  ;;  %v3123_v32 = vshrl.u32 %v3093_v4, 16  ;;  %v3126_v44 = vshll.u32 %v3093_v4, 16  ;;  %v8922_v17 = vpop.f32.mrb[94].mxu1  ;;  %v9635_v35 = vld [vmem:[%s14244_s2 + $0x1e0] ss:$12 sps:$4 sm:$0xff]  }
 0x1c6   : > { %3928 = vmatprep.subr.bf16.mxu1 %v9634_v51  ;;  %8929 = vmatprep.subr.bf16.mxu0 %v9641_v29  ;;  %v11480_v23 = vadd.f32 %v11331_v50, %v2980_v40  ;;  %v11487_v53 = vadd.f32 %v8922_v17, %v11337_v58  ;;  %v2983_v56 = vpop.f32.mrb[95].mxu1  ;;  %v9646_v58 = vld [vmem:[%s14244_s2 + $0x200] ss:$12 sps:$4 sm:$0xff]  }
 0x1c7   : > { %v3034_v2 = vadd.f32 %v3002_v21, %v11365_v62  ;;  %v3125_v14 = vrot.slane %v3123_v32, 7  ;;  %3929 = vmatpush1.bf16.msra.mxu1 %v9632_v15  ;;  %8930 = vmatpush3.bf16.msra.mxu0 %v9641_v29  ;;  %v3272_v42 = vrot.slane %v3126_v44, 1  ;;  %v3065_v51 = vmax.f32 %v3033_v5, 0.0 }
 0x1c8   : > { %3930 = vmatprep.subr.bf16.mxu1 %v9637_v16  ;;  %8931 = vmatprep.subr.bf16.mxu0 %v9645_v6  ;;  %v11490_v4 = vadd.f32 %v11333_v45, %v2983_v56 }
 0x1c9   : > { %v3066_v50 = vmax.f32 %v3034_v2, 0.0  ;;  %v2560_v62 = vpop.f32.mrb[16].mxu0  ;;  %v3128_v43 = vor.u32 %v3126_v44, %v3125_v14  ;;  %v11499_v29 = vsel %vm14632_vm1, %v3271_v63, %v3272_v42  ;;  %v3274_v16 = vor.u32 %v3272_v42, %v3123_v32  ;;  %v9642_v44 = vld [vmem:[%s14244_s2 + $0x1f8] ss:$12 sps:$4 sm:$0xff]   ;;  %v9647_v42 = vld [vmem:[%s14244_s2 + $0x210] ss:$12 sps:$4 sm:$0xff]  }
 0x1ca   : > { %v2562_v15 = vpop.f32.mrb[17].mxu0 }
 0x1cb   : > { %v3003_v5 = vadd.f32 %v2562_v15, %v2550_v38  ;;  %v2564_v21 = vpop.f32.mrb[18].mxu0  ;;  %v3129_v45 = vsel %vm14633_vm3, %v11439_v61, %v3128_v43  ;;  %v3094_v40 = vpack.c.bf16 %v3066_v50, %v3065_v51  ;;  %3931 = vmatpush1.bf16.msra.mxu1 %v9635_v35  ;;  %8932 = vmatpush3.bf16.msra.mxu0 %v9645_v6  ;;  %v9649_v38 = vld [vmem:[%s14244_s2 + $0x214] ss:$12 sps:$4 sm:$0xff]   ;;  %v9650_v61 = vld [vmem:[%s14244_s2 + $0x218] ss:$12 sps:$4 sm:$0xff]  }
 0x1cc   : > { %v2566_v17 = vpop.f32.mrb[19].mxu0  ;;  %7900 = vmatmul.mubr.msk.bf16.gmra.mrb[104].mxu1 %vm14634_vm7, %v3129_v45  ;;  %7932 = vmatmul.mubr.msk.bf16.gmra.mrb[72].mxu0 %vm14634_vm7, %v3129_v45  ;;  %vm14638_vm7 = vnez %v14531_v54 }
 0x1cd   : > { %v3035_v63 = vadd.f32 %v3003_v5, %v11350_v34  ;;  %v3004_v32 = vadd.f32 %v2566_v17, %v2554_v3  ;;  %3793 = vmatprep.mubr.bf16.mxu1 %v3094_v40  ;;  %4167 = vmatprep.mubr.bf16.mxu0 %v3094_v40  ;;  %v3131_v6 = vshrl.u32 %v3094_v40, 16  ;;  %v3134_v2 = vshll.u32 %v3094_v40, 16 }
 0x1ce   : > { %3932 = vmatprep.subr.bf16.mxu1 %v9644_v25  ;;  %8933 = vmatprep.subr.bf16.mxu0 %v9646_v58 }
 0x1cf   : > { %v3036_v35 = vadd.f32 %v3004_v32, %v11361_v20  ;;  %v3133_v56 = vrot.slane %v3131_v6, 7  ;;  %3933 = vmatpush1.bf16.msra.mxu1 %v9642_v44  ;;  %8934 = vmatpush3.bf16.msra.mxu0 %v9646_v58  ;;  %v3275_v51 = vrot.slane %v3134_v2, 1  ;;  %v3067_v50 = vmax.f32 %v3035_v63, 0.0  ;;  %v9653_v20 = vld [vmem:[%s14244_s2 + $0x22c] ss:$12 sps:$4 sm:$0xff]  }
 0x1d0   : > { %3934 = vmatprep.subr.bf16.mxu1 %v9649_v38  ;;  %8935 = vmatprep.subr.bf16.mxu0 %v9650_v61  ;;  %v9654_v58 = vld [vmem:[%s14244_s2 + $0x230] ss:$12 sps:$4 sm:$0xff]  }
 0x1d1   : > { %v3068_v34 = vmax.f32 %v3036_v35, 0.0  ;;  %v2570_v3 = vpop.f32.mrb[20].mxu0  ;;  %v3136_v43 = vor.u32 %v3134_v2, %v3133_v56  ;;  %v11522_v15 = vsel %vm14632_vm1, %v3274_v16, %v3275_v51  ;;  %v3277_v25 = vor.u32 %v3275_v51, %v3131_v6  ;;  %v9651_v16 = vld [vmem:[%s14244_s2 + $0x228] ss:$12 sps:$4 sm:$0xff]  }
 0x1d2   : > { %v2572_v5 = vpop.f32.mrb[21].mxu0  ;;  %vm14635_vm1 = vnez %v14528_v24 }
 0x1d3   : > { %v3005_v45 = vadd.f32 %v2572_v5, %v2560_v62  ;;  %v2574_v40 = vpop.f32.mrb[22].mxu0  ;;  %v3137_v44 = vsel %vm14633_vm3, %v3125_v14, %v3136_v43  ;;  %v3095_v17 = vpack.c.bf16 %v3068_v34, %v3067_v50  ;;  %3935 = vmatpush1.bf16.msra.mxu1 %v9647_v42  ;;  %8936 = vmatpush3.bf16.msra.mxu0 %v9650_v61  ;;  %vm14636_vm3 = vsmask.f32 7424 }
 0x1d4   : > { %v2576_v38 = vpop.f32.mrb[23].mxu0  ;;  %7901 = vmatmul.mubr.msk.bf16.gmra.mrb[108].mxu1 %vm14635_vm1, %v3137_v44  ;;  %7933 = vmatmul.mubr.msk.bf16.gmra.mrb[76].mxu0 %vm14635_vm1, %v3137_v44  ;;  %vm14637_vm1 = vsmask.f32 256 }
 0x1d5   : > { %v3037_v63 = vadd.f32 %v3005_v45, %v11371_v39  ;;  %v3006_v62 = vadd.f32 %v2576_v38, %v2564_v21  ;;  %3803 = vmatprep.mubr.bf16.mxu1 %v3095_v17  ;;  %4175 = vmatprep.mubr.bf16.mxu0 %v3095_v17  ;;  %v3139_v14 = vshrl.u32 %v3095_v17, 16  ;;  %v3142_v32 = vshll.u32 %v3095_v17, 16 }
 0x1d6   : > { %3936 = vmatprep.subr.bf16.mxu1 %v9653_v20  ;;  %8937 = vmatprep.subr.bf16.mxu0 %v9654_v58 }
 0x1d7   : > { %v3038_v61 = vadd.f32 %v3006_v62, %v11377_v36  ;;  %v3141_v6 = vrot.slane %v3139_v14, 7  ;;  %3937 = vmatpush1.bf16.msra.mxu1 %v9651_v16  ;;  %8938 = vmatpush3.bf16.msra.mxu0 %v9654_v58  ;;  %v3278_v2 = vrot.slane %v3142_v32, 1  ;;  %v3069_v35 = vmax.f32 %v3037_v63, 0.0  ;;  %v11551_v36 = vld [vmem:[%s14245_s3] sm:$0xff]  }
 0x1d8   : > { %8971 = vmatprep.subr.bf16.mxu1 %v11551_v36 }
 0x1d9   : > { %v3070_v42 = vmax.f32 %v3038_v61, 0.0  ;;  %v2580_v51 = vpop.f32.mrb[24].mxu0  ;;  %v3144_v50 = vor.u32 %v3142_v32, %v3141_v6  ;;  %v11541_v34 = vsel %vm14636_vm3, %v3277_v25, %v3278_v2  ;;  %v3280_v39 = vor.u32 %v3278_v2, %v3139_v14 }
 0x1da   : > { %v2582_v21 = vpop.f32.mrb[25].mxu0 }
 0x1db   : > { %v3007_v43 = vadd.f32 %v2582_v21, %v2570_v3  ;;  %v2584_v5 = vpop.f32.mrb[26].mxu0  ;;  %v3145_v20 = vsel %vm14637_vm1, %v3133_v56, %v3144_v50  ;;  %v3096_v45 = vpack.c.bf16 %v3070_v42, %v3069_v35  ;;  %vm14639_vm1 = vmmov %vm14636_vm3  ;;  %vm14640_vm3 = vsmask.f32 256 }
 0x1dc   : > { %v2586_v44 = vpop.f32.mrb[27].mxu0  ;;  %7902 = vmatmul.mubr.msk.bf16.gmra.mrb[112].mxu1 %vm14638_vm7, %v3145_v20  ;;  %7934 = vmatmul.mubr.msk.bf16.gmra.mrb[80].mxu0 %vm14638_vm7, %v3145_v20  ;;  %vm14641_vm7 = vnez %v14536_v47  ;;  %vm14652_vm6 = vmmov %vm14639_vm1 }
 0x1dd   : > { %v3039_v25 = vadd.f32 %v3007_v43, %v11368_v41  ;;  %v3008_v58 = vadd.f32 %v2586_v44, %v2574_v40  ;;  %3813 = vmatprep.mubr.bf16.mxu1 %v3096_v45  ;;  %4183 = vmatprep.mubr.bf16.mxu0 %v3096_v45  ;;  %v3147_v3 = vshrl.u32 %v3096_v45, 16  ;;  %v3150_v56 = vshll.u32 %v3096_v45, 16 }
 0x1df   : > { %v3040_v17 = vadd.f32 %v3008_v58, %v11374_v52  ;;  %v3149_v16 = vrot.slane %v3147_v3, 7  ;;  %v3281_v38 = vrot.slane %v3150_v56, 1  ;;  %v3071_v63 = vmax.f32 %v3039_v25, 0.0 }
 0x1e1   : > { %v3072_v62 = vmax.f32 %v3040_v17, 0.0  ;;  %v2590_v14 = vpop.f32.mrb[28].mxu0  ;;  %v3152_v32 = vor.u32 %v3150_v56, %v3149_v16  ;;  %v11557_v61 = vsel %vm14639_vm1, %v3280_v39, %v3281_v38  ;;  %v3283_v2 = vor.u32 %v3281_v38, %v3147_v3 }
 0x1e2   : > { %v2592_v41 = vpop.f32.mrb[29].mxu0 }
 0x1e3   : > { %v3009_v40 = vadd.f32 %v2592_v41, %v2580_v51  ;;  %v2594_v35 = vpop.f32.mrb[30].mxu0  ;;  %v3153_v42 = vsel %vm14640_vm3, %v3141_v6, %v3152_v32  ;;  %v3097_v50 = vpack.c.bf16 %v3072_v62, %v3071_v63 }
 0x1e4   : > { %v2596_v21 = vpop.f32.mrb[31].mxu0  ;;  %7903 = vmatmul.mubr.msk.bf16.gmra.mrb[116].mxu1 %vm14641_vm7, %v3153_v42  ;;  %7935 = vmatmul.mubr.msk.bf16.gmra.mrb[84].mxu0 %vm14641_vm7, %v3153_v42  ;;  %vm14642_vm7 = vnez %v14539_v18 }
 0x1e5   : > { %v3041_v52 = vadd.f32 %v3009_v40, %v11383_v31  ;;  %v3010_v43 = vadd.f32 %v2596_v21, %v2584_v5  ;;  %3823 = vmatprep.mubr.bf16.mxu1 %v3097_v50  ;;  %4191 = vmatprep.mubr.bf16.mxu0 %v3097_v50  ;;  %v3155_v39 = vshrl.u32 %v3097_v50, 16  ;;  %v3158_v20 = vshll.u32 %v3097_v50, 16 }
 0x1e7   : > { %v3042_v51 = vadd.f32 %v3010_v43, %v11389_v8  ;;  %v3157_v45 = vrot.slane %v3155_v39, 7  ;;  %v3284_v44 = vrot.slane %v3158_v20, 1  ;;  %v3073_v6 = vmax.f32 %v3041_v52, 0.0 }
 0x1e9   : > { %v3074_v25 = vmax.f32 %v3042_v51, 0.0  ;;  %v2600_v58 = vpop.f32.mrb[32].mxu0  ;;  %v3160_v3 = vor.u32 %v3158_v20, %v3157_v45  ;;  %v11567_v56 = vsel %vm14639_vm1, %v3283_v2, %v3284_v44  ;;  %v3286_v17 = vor.u32 %v3284_v44, %v3155_v39 }
 0x1ea   : > { %v2602_v38 = vpop.f32.mrb[33].mxu0 }
 0x1eb   : > { %v3011_v63 = vadd.f32 %v2602_v38, %v2590_v14  ;;  %v2604_v31 = vpop.f32.mrb[34].mxu0  ;;  %v3161_v5 = vsel %vm14640_vm3, %v3149_v16, %v3160_v3  ;;  %v3098_v62 = vpack.c.bf16 %v3074_v25, %v3073_v6 }
 0x1ec   : > { %v2606_v32 = vpop.f32.mrb[35].mxu0  ;;  %7904 = vmatmul.mubr.msk.bf16.gmra.mrb[120].mxu1 %vm14642_vm7, %v3161_v5  ;;  %7936 = vmatmul.mubr.msk.bf16.gmra.mrb[88].mxu0 %vm14642_vm7, %v3161_v5  ;;  %vm14643_vm7 = vnez %v14544_v1 }
 0x1ed   : > { %v3043_v8 = vadd.f32 %v3011_v63, %v11380_v59  ;;  %v3012_v41 = vadd.f32 %v2606_v32, %v2594_v35  ;;  %3833 = vmatprep.mubr.bf16.mxu1 %v3098_v62  ;;  %4199 = vmatprep.mubr.bf16.mxu0 %v3098_v62  ;;  %v3163_v2 = vshrl.u32 %v3098_v62, 16  ;;  %v3166_v40 = vshll.u32 %v3098_v62, 16 }
 0x1ef   : > { %v3044_v14 = vadd.f32 %v3012_v41, %v11386_v9  ;;  %v3165_v42 = vrot.slane %v3163_v2, 7  ;;  %v3287_v50 = vrot.slane %v3166_v40, 1  ;;  %v3075_v16 = vmax.f32 %v3043_v8, 0.0 }
 0x1f1   : > { %v3076_v21 = vmax.f32 %v3044_v14, 0.0  ;;  %v2610_v52 = vpop.f32.mrb[36].mxu0  ;;  %v3168_v43 = vor.u32 %v3166_v40, %v3165_v42  ;;  %v11577_v39 = vsel %vm14639_vm1, %v3286_v17, %v3287_v50  ;;  %v3289_v20 = vor.u32 %v3287_v50, %v3163_v2 }
 0x1f2   : > { %v2612_v51 = vpop.f32.mrb[37].mxu0 }
 0x1f3   : > { %v3013_v44 = vadd.f32 %v2612_v51, %v2600_v58  ;;  %v2614_v59 = vpop.f32.mrb[38].mxu0  ;;  %v3169_v35 = vsel %vm14640_vm3, %v3157_v45, %v3168_v43  ;;  %v3099_v6 = vpack.c.bf16 %v3076_v21, %v3075_v16 }
 0x1f4   : > { %v2616_v25 = vpop.f32.mrb[39].mxu0  ;;  %7905 = vmatmul.mubr.msk.bf16.gmra.mrb[124].mxu1 %vm14643_vm7, %v3169_v35  ;;  %7937 = vmatmul.mubr.msk.bf16.gmra.mrb[92].mxu0 %vm14643_vm7, %v3169_v35  ;;  %vm14644_vm7 = vnez %v14547_v11 }
 0x1f5   : > { %v3045_v9 = vadd.f32 %v3013_v44, %v11397_v10  ;;  %v3014_v3 = vadd.f32 %v2616_v25, %v2604_v31  ;;  %3843 = vmatprep.mubr.bf16.mxu1 %v3099_v6  ;;  %4207 = vmatprep.mubr.bf16.mxu0 %v3099_v6  ;;  %v3171_v17 = vshrl.u32 %v3099_v6, 16  ;;  %v3174_v38 = vshll.u32 %v3099_v6, 16 }
 0x1f7   : > { %v3046_v58 = vadd.f32 %v3014_v3, %v11413_v28  ;;  %v3173_v63 = vrot.slane %v3171_v17, 7  ;;  %v3290_v5 = vrot.slane %v3174_v38, 1  ;;  %v3077_v45 = vmax.f32 %v3045_v9, 0.0 }
 0x1f9   : > { %v3078_v62 = vmax.f32 %v3046_v58, 0.0  ;;  %v2620_v32 = vpop.f32.mrb[40].mxu0  ;;  %v3176_v8 = vor.u32 %v3174_v38, %v3173_v63  ;;  %v11587_v41 = vsel %vm14639_vm1, %v3289_v20, %v3290_v5  ;;  %v3292_v2 = vor.u32 %v3290_v5, %v3171_v17 }
 0x1fa   : > { %v2622_v40 = vpop.f32.mrb[41].mxu0 }
 0x1fb   : > { %v3015_v14 = vadd.f32 %v2622_v40, %v2610_v52  ;;  %v2624_v10 = vpop.f32.mrb[42].mxu0  ;;  %v3177_v31 = vsel %vm14640_vm3, %v3165_v42, %v3176_v8  ;;  %v3100_v50 = vpack.c.bf16 %v3078_v62, %v3077_v45 }
 0x1fc   : > { %v2626_v16 = vpop.f32.mrb[43].mxu0  ;;  %7906 = vmatmul.mubr.msk.bf16.gmra.mrb[128].mxu1 %vm14644_vm7, %v3177_v31  ;;  %7938 = vmatmul.mubr.msk.bf16.gmra.mrb[96].mxu0 %vm14644_vm7, %v3177_v31  ;;  %vm14645_vm7 = vnez %v14552_v26 }
 0x1fd   : > { %v3047_v28 = vadd.f32 %v3015_v14, %v11394_v60  ;;  %v3016_v21 = vadd.f32 %v2626_v16, %v2614_v59  ;;  %3853 = vmatprep.mubr.bf16.mxu1 %v3100_v50  ;;  %4215 = vmatprep.mubr.bf16.mxu0 %v3100_v50  ;;  %v3179_v43 = vshrl.u32 %v3100_v50, 16  ;;  %v3182_v20 = vshll.u32 %v3100_v50, 16 }
 0x1ff   : > { %v3048_v52 = vadd.f32 %v3016_v21, %v11404_v46  ;;  %v3181_v51 = vrot.slane %v3179_v43, 7  ;;  %v3293_v44 = vrot.slane %v3182_v20, 1  ;;  %v3079_v42 = vmax.f32 %v3047_v28, 0.0 }
 0x201   : > { %v3080_v35 = vmax.f32 %v3048_v52, 0.0  ;;  %v2630_v6 = vpop.f32.mrb[44].mxu0  ;;  %v3184_v25 = vor.u32 %v3182_v20, %v3181_v51  ;;  %v11597_v9 = vsel %vm14639_vm1, %v3292_v2, %v3293_v44  ;;  %v3295_v3 = vor.u32 %v3293_v44, %v3179_v43 }
 0x202   : > { %v2632_v17 = vpop.f32.mrb[45].mxu0 }
 0x203   : > { %v3017_v38 = vadd.f32 %v2632_v17, %v2620_v32  ;;  %v2634_v60 = vpop.f32.mrb[46].mxu0  ;;  %v3185_v59 = vsel %vm14640_vm3, %v3173_v63, %v3184_v25  ;;  %v3101_v58 = vpack.c.bf16 %v3080_v35, %v3079_v42 }
 0x204   : > { %v2636_v5 = vpop.f32.mrb[47].mxu0  ;;  %7907 = vmatmul.mubr.msk.bf16.gmra.mrb[132].mxu1 %vm14645_vm7, %v3185_v59  ;;  %7939 = vmatmul.mubr.msk.bf16.gmra.mrb[100].mxu0 %vm14645_vm7, %v3185_v59  ;;  %vm14646_vm7 = vnez %v14555_v27 }
 0x205   : > { %v3049_v46 = vadd.f32 %v3017_v38, %v11436_v19  ;;  %v3018_v45 = vadd.f32 %v2636_v5, %v2624_v10  ;;  %3863 = vmatprep.mubr.bf16.mxu1 %v3101_v58  ;;  %4223 = vmatprep.mubr.bf16.mxu0 %v3101_v58  ;;  %v3187_v62 = vshrl.u32 %v3101_v58, 16  ;;  %v3190_v8 = vshll.u32 %v3101_v58, 16 }
 0x207   : > { %v3050_v32 = vadd.f32 %v3018_v45, %v11448_v12  ;;  %v3189_v2 = vrot.slane %v3187_v62, 7  ;;  %v3296_v40 = vrot.slane %v3190_v8, 1  ;;  %v3081_v63 = vmax.f32 %v3049_v46, 0.0 }
 0x209   : > { %v3082_v14 = vmax.f32 %v3050_v32, 0.0  ;;  %v2640_v31 = vpop.f32.mrb[48].mxu0  ;;  %v3192_v50 = vor.u32 %v3190_v8, %v3189_v2  ;;  %v11607_v16 = vsel %vm14639_vm1, %v3295_v3, %v3296_v40  ;;  %v3298_v28 = vor.u32 %v3296_v40, %v3187_v62 }
 0x20a   : > { %v2642_v21 = vpop.f32.mrb[49].mxu0 }
 0x20b   : > { %v3019_v43 = vadd.f32 %v2642_v21, %v2630_v6  ;;  %v2644_v19 = vpop.f32.mrb[50].mxu0  ;;  %v3193_v10 = vsel %vm14640_vm3, %v3181_v51, %v3192_v50  ;;  %v3102_v20 = vpack.c.bf16 %v3082_v14, %v3081_v63 }
 0x20c   : > { %v2646_v52 = vpop.f32.mrb[51].mxu0  ;;  %7908 = vmatmul.mubr.msk.bf16.gmra.mrb[136].mxu1 %vm14646_vm7, %v3193_v10  ;;  %7940 = vmatmul.mubr.msk.bf16.gmra.mrb[104].mxu0 %vm14646_vm7, %v3193_v10  ;;  %vm14647_vm7 = vnez %v14558_v37 }
 0x20d   : > { %v3051_v12 = vadd.f32 %v3019_v43, %v11433_v22  ;;  %v3020_v44 = vadd.f32 %v2646_v52, %v2634_v60  ;;  %3873 = vmatprep.mubr.bf16.mxu1 %v3102_v20  ;;  %4231 = vmatprep.mubr.bf16.mxu0 %v3102_v20  ;;  %v3195_v42 = vshrl.u32 %v3102_v20, 16  ;;  %v3198_v35 = vshll.u32 %v3102_v20, 16 }
 0x20f   : > { %v3052_v6 = vadd.f32 %v3020_v44, %v11445_v49  ;;  %v3197_v25 = vrot.slane %v3195_v42, 7  ;;  %v3299_v3 = vrot.slane %v3198_v35, 1  ;;  %v3083_v51 = vmax.f32 %v3051_v12, 0.0 }
 0x211   : > { %v3084_v17 = vmax.f32 %v3052_v6, 0.0  ;;  %v2650_v38 = vpop.f32.mrb[52].mxu0  ;;  %v3200_v59 = vor.u32 %v3198_v35, %v3197_v25  ;;  %v11617_v58 = vsel %vm14639_vm1, %v3298_v28, %v3299_v3  ;;  %v3301_v5 = vor.u32 %v3299_v3, %v3195_v42 }
 0x212   : > { %v2652_v46 = vpop.f32.mrb[53].mxu0 }
 0x213   : > { %v3021_v45 = vadd.f32 %v2652_v46, %v2640_v31  ;;  %v2654_v22 = vpop.f32.mrb[54].mxu0  ;;  %v3201_v60 = vsel %vm14640_vm3, %v3189_v2, %v3200_v59  ;;  %v3103_v62 = vpack.c.bf16 %v3084_v17, %v3083_v51 }
 0x214   : > { %v2656_v8 = vpop.f32.mrb[55].mxu0  ;;  %7909 = vmatmul.mubr.msk.bf16.gmra.mrb[140].mxu1 %vm14647_vm7, %v3201_v60  ;;  %7941 = vmatmul.mubr.msk.bf16.gmra.mrb[108].mxu0 %vm14647_vm7, %v3201_v60  ;;  %vm14648_vm7 = vnez %v14561_v33 }
 0x215   : > { %v3053_v49 = vadd.f32 %v3021_v45, %v11480_v23  ;;  %v3022_v32 = vadd.f32 %v2656_v8, %v2644_v19  ;;  %3883 = vmatprep.mubr.bf16.mxu1 %v3103_v62  ;;  %4239 = vmatprep.mubr.bf16.mxu0 %v3103_v62  ;;  %v3203_v40 = vshrl.u32 %v3103_v62, 16  ;;  %v3206_v63 = vshll.u32 %v3103_v62, 16 }
 0x217   : > { %v3054_v14 = vadd.f32 %v3022_v32, %v11490_v4  ;;  %v3205_v31 = vrot.slane %v3203_v40, 7  ;;  %v3302_v50 = vrot.slane %v3206_v63, 1  ;;  %v3085_v2 = vmax.f32 %v3053_v49, 0.0 }
 0x219   : > { %v3086_v28 = vmax.f32 %v3054_v14, 0.0  ;;  %v2660_v21 = vpop.f32.mrb[56].mxu0  ;;  %v3208_v43 = vor.u32 %v3206_v63, %v3205_v31  ;;  %v11627_v10 = vsel %vm14639_vm1, %v3301_v5, %v3302_v50  ;;  %v3304_v20 = vor.u32 %v3302_v50, %v3203_v40 }
 0x21a   : > { %v2662_v52 = vpop.f32.mrb[57].mxu0 }
 0x21b   : > { %v3023_v12 = vadd.f32 %v2662_v52, %v2650_v38  ;;  %v2664_v23 = vpop.f32.mrb[58].mxu0  ;;  %v3209_v19 = vsel %vm14640_vm3, %v3197_v25, %v3208_v43  ;;  %v3104_v44 = vpack.c.bf16 %v3086_v28, %v3085_v2 }
 0x21c   : > { %v2666_v42 = vpop.f32.mrb[59].mxu0  ;;  %7910 = vmatmul.mubr.msk.bf16.gmra.mrb[144].mxu1 %vm14648_vm7, %v3209_v19  ;;  %7942 = vmatmul.mubr.msk.bf16.gmra.mrb[112].mxu0 %vm14648_vm7, %v3209_v19  ;;  %vm14649_vm7 = vnez %v14566_v48  ;;  %v8007_v48 = vld [vmem:[%s10155_s23 + $0xb4] sm:$0xf] }
 0x21d   : > { %v3055_v4 = vadd.f32 %v3023_v12, %v11477_v57  ;;  %v3024_v35 = vadd.f32 %v2666_v42, %v2654_v22  ;;  %3893 = vmatprep.mubr.bf16.mxu1 %v3104_v44  ;;  %4247 = vmatprep.mubr.bf16.mxu0 %v3104_v44  ;;  %v3211_v6 = vshrl.u32 %v3104_v44, 16  ;;  %v3214_v3 = vshll.u32 %v3104_v44, 16  ;;  %v14650_v44 = vld [vmem:[#allocation22_spill] sm:$0xff] }
 0x21f   : > { %v3056_v51 = vadd.f32 %v3024_v35, %v11487_v53  ;;  %v3213_v17 = vrot.slane %v3211_v6, 7  ;;  %v3305_v38 = vrot.slane %v3214_v3, 1  ;;  %v3087_v25 = vmax.f32 %v3055_v4, 0.0 }
 0x221   : > { %v3088_v59 = vmax.f32 %v3056_v51, 0.0  ;;  %v2670_v5 = vpop.f32.mrb[60].mxu0  ;;  %v3216_v46 = vor.u32 %v3214_v3, %v3213_v17  ;;  %v11637_v45 = vsel %vm14639_vm1, %v3304_v20, %v3305_v38  ;;  %v3307_v60 = vor.u32 %v3305_v38, %v3211_v6  ;;  %v14654_v51 = vld [vmem:[#allocation23_spill] sm:$0xff] }
 0x222   : > { %v2671_v62 = vpop.f32.mrb[61].mxu0  ;;  %v14658_v38 = vmov 0   ;;  %v14661_v5 = vld [vmem:[#allocation26_spill] sm:$0xff] }
 0x223   : > { %v3025_v8 = vadd.f32 %v2671_v62, %v2660_v21  ;;  %v2673_v57 = vpop.f32.mrb[62].mxu0  ;;  %v3217_v22 = vsel %vm14640_vm3, %v3205_v31, %v3216_v46  ;;  %v3105_v49 = vpack.c.bf16 %v3088_v59, %v3087_v25  ;;  %v9656_v25 = vld [vmem:[%s14245_s3 + $0x8] sm:$0xff]   ;;  %v14659_v59 = vld [vmem:[#allocation25_spill] sm:$0xff]  ;;  %v9657_v46 = vld [vmem:[%s14245_s3 + $0x10] sm:$0xff]  }
 0x224   : > { %v2674_v32 = vpop.f32.mrb[63].mxu0  ;;  %7911 = vmatmul.mubr.msk.bf16.gmra.mrb[148].mxu1 %vm14649_vm7, %v3217_v22  ;;  %7943 = vmatmul.mubr.msk.bf16.gmra.mrb[116].mxu0 %vm14649_vm7, %v3217_v22  ;;  %vm14651_vm7 = vnez %v14650_v44  ;;  %v9659_v62 = vld [vmem:[%s14245_s3 + $0x20] sm:$0xff]   ;;  %v9661_v22 = vld [vmem:[%s14245_s3 + $0x30] sm:$0xff]  }
 0x225   : > { %v3026_v53 = vadd.f32 %v2674_v32, %v2664_v23  ;;  %3903 = vmatprep.mubr.bf16.mxu1 %v3105_v49  ;;  %4255 = vmatprep.mubr.bf16.mxu0 %v3105_v49  ;;  %v3219_v40 = vshrl.u32 %v3105_v49, 16  ;;  %v3222_v63 = vshll.u32 %v3105_v49, 16  ;;  %v3089_v14 = vmax.f32 %v3025_v8, 0.0  ;;  %v9763_v32 = vld [vmem:[%s14243_s1 + $0x138] ss:$12 sps:$4 sm:$0xff]  }
 0x226   : > { %v9767_v57 = vld [vmem:[%s14243_s1 + $0x168] ss:$12 sps:$4 sm:$0xff]  }
 0x227   : > { %v3090_v50 = vmax.f32 %v3026_v53, 0.0  ;;  %v3221_v2 = vrot.slane %v3219_v40, 7  ;;  %v3308_v28 = vrot.slane %v3222_v63, 1  ;;  %v9706_v53 = vld [vmem:[%s14243_s1 + $0x4] ss:$12 sps:$4 sm:$0xff]  }
 0x229   : > { %v3224_v21 = vor.u32 %v3222_v63, %v3221_v2  ;;  %v3106_v43 = vpack.c.bf16 %v3090_v50, %v3089_v14  ;;  %v11645_v31 = vsel %vm14639_vm1, %v3307_v60, %v3308_v28  ;;  %v3310_v20 = vor.u32 %v3308_v28, %v3219_v40  ;;  %vm14653_vm1 = vmmov %vm14640_vm3  ;;  %v14675_v50 = vld [vmem:[#allocation39_spill] sm:$0xff]  ;;  %v14677_v28 = vld [vmem:[#allocation40_spill] sm:$0xff] }
 0x22a   : > { %v9756_v14 = vld [vmem:[%s10155_s23 + $0x74] sm:$0xf]  ;;  %v9758_v40 = vld [vmem:[%s14243_s1 + $0x124] ss:$12 sps:$4 sm:$0xff]  }
 0x22b   : > { %v3225_v52 = vsel %vm14640_vm3, %v3213_v17, %v3224_v21  ;;  %v3227_v12 = vshrl.u32 %v3106_v43, 16  ;;  %v3230_v19 = vshll.u32 %v3106_v43, 16  ;;  %vm14655_vm3 = vnez %v14654_v51  ;;  %v14656_v17 = vld [vmem:[#allocation24_spill] sm:$0xff]  ;;  %v8003_v51 = vld [vmem:[%s10155_s23 + $0xa4] sm:$0xf] }
 0x22c   : > { %7912 = vmatmul.mubr.msk.bf16.gmra.mrb[152].mxu1 %vm14651_vm7, %v3225_v52  ;;  %7944 = vmatmul.mubr.msk.bf16.gmra.mrb[120].mxu0 %vm14651_vm7, %v3225_v52  ;;  %vm14657_vm7 = vnez %v14656_v17 }
 0x22d   : > { %3913 = vmatprep.mubr.bf16.mxu1 %v3106_v43  ;;  %4263 = vmatprep.mubr.bf16.mxu0 %v3106_v43  ;;  %v3229_v23 = vrot.slane %v3227_v12, 7  ;;  %v3311_v42 = vrot.slane %v3230_v19, 1 }
 0x22f   : > { %v3232_v4 = vor.u32 %v3230_v19, %v3229_v23  ;;  %v11653_v35 = vsel %vm14652_vm6, %v3310_v20, %v3311_v42  ;;  %v3313_v6 = vor.u32 %v3311_v42, %v3227_v12  ;;  %vm14660_vm6 = vnez %v14659_v59 }
 0x231   : > { %v3233_v3 = vsel %vm14653_vm1, %v3221_v2, %v3232_v4  ;;  %vm14662_vm1 = vnez %v14661_v5 }
 0x234   : > { %7913 = vmatmul.mubr.msk.bf16.gmra.mrb[156].mxu1 %vm14655_vm3, %v3233_v3  ;;  %7945 = vmatmul.mubr.msk.bf16.gmra.mrb[124].mxu0 %vm14655_vm3, %v3233_v3 }
 0x235   : > { %8939 = vmatprep.mubr.msk.bf16.mxu0 %vm14657_vm7, %v11458_v13  ;;  %3954 = vmatprep.mubr.bf16.mxu1 %v14658_v38 }
 0x23c   : > { %7914 = vmatmul.mubr.msk.bf16.vlgmr.msra.gmra.mrb[96].mxu1 %vm14657_vm7, %v11458_v13  ;;  %8940 = vmatmul.mubr.msk.bf16.vlgmr.msra.gmra.mrb[128].mxu0 %vm14660_vm6, %v11499_v29  ;;  %v9658_v13 = vld [vmem:[%s14245_s3 + $0x18] sm:$0xff]  }
 0x23d   : > { %8943 = vmatprep.mubr.msk.bf16.mxu0 %vm14662_vm1, %v11522_v15  ;;  %3964 = vmatprep.mubr.bf16.mxu1 %v14658_v38 }
 0x23e   : > { %8972 = vmatpush3.bf16.msra.mxu1 %v11551_v36 }
 0x23f   : > { %8973 = vmatprep.subr.bf16.mxu1 %v9656_v25 }
 0x242   : > { %8974 = vmatpush3.bf16.msra.mxu1 %v9656_v25 }
 0x243   : > { %8975 = vmatprep.subr.bf16.mxu1 %v9657_v46 }
 0x244   : > { %7915 = vmatmul.mubr.msk.bf16.gmra.mrb[100].mxu1 %vm14660_vm6, %v11499_v29  ;;  %8944 = vmatmul.mubr.msk.bf16.gmra.mrb[132].mxu0 %vm10924_vm10, %v11541_v34  ;;  %v9660_v29 = vld [vmem:[%s14245_s3 + $0x28] sm:$0xff]  }
 0x245   : > { %8947 = vmatprep.mubr.msk.bf16.mxu0 %vm10930_vm2, %v11557_v61  ;;  %3974 = vmatprep.mubr.bf16.mxu1 %v14658_v38 }
 0x246   : > { %8976 = vmatpush3.bf16.msra.mxu1 %v9657_v46 }
 0x247   : > { %8977 = vmatprep.subr.bf16.mxu1 %v9658_v13 }
 0x24a   : > { %8978 = vmatpush3.bf16.msra.mxu1 %v9658_v13 }
 0x24b   : > { %8979 = vmatprep.subr.bf16.mxu1 %v9659_v62 }
 0x24c   : > { %7916 = vmatmul.mubr.msk.bf16.gmra.mrb[104].mxu1 %vm14662_vm1, %v11522_v15  ;;  %8948 = vmatmul.mubr.msk.bf16.gmra.mrb[136].mxu0 %vm10948_vm13, %v11567_v56  ;;  %v9662_v15 = vld [vmem:[%s14245_s3 + $0x38] sm:$0xff]  }
 0x24d   : > { %8951 = vmatprep.mubr.msk.bf16.mxu0 %vm10954_vm15, %v11577_v39  ;;  %3984 = vmatprep.mubr.bf16.mxu1 %v14658_v38 }
 0x24e   : > { %8980 = vmatpush3.bf16.msra.mxu1 %v9659_v62 }
 0x24f   : > { %8981 = vmatprep.subr.bf16.mxu1 %v9660_v29 }
 0x252   : > { %8982 = vmatpush3.bf16.msra.mxu1 %v9660_v29 }
 0x253   : > { %8983 = vmatprep.subr.bf16.mxu1 %v9661_v22 }
 0x254   : > { %7917 = vmatmul.mubr.msk.bf16.gmra.mrb[108].mxu1 %vm10924_vm10, %v11541_v34  ;;  %8952 = vmatmul.mubr.msk.bf16.gmra.mrb[140].mxu0 %vm10972_vm4, %v11587_v41 }
 0x255   : > { %8955 = vmatprep.mubr.msk.bf16.mxu0 %vm10978_vm12, %v11597_v9  ;;  %3994 = vmatprep.mubr.bf16.mxu1 %v14658_v38 }
 0x256   : > { %8984 = vmatpush3.bf16.msra.mxu1 %v9661_v22 }
 0x257   : > { %8985 = vmatprep.subr.bf16.mxu1 %v9662_v15 }
 0x25a   : > { %8986 = vmatpush3.bf16.msra.mxu1 %v9662_v15  ;;  %v9707_v15 = vld [vmem:[%s10155_s23] sm:$0xf] }
 0x25b   : > { %5362 = vmatprep.subr.bf16.mxu1 %v9706_v53  ;;  %v9708_v53 = vld [vmem:[%s10155_s23 + $0x4] sm:$0xf] }
 0x25c   : > { %7918 = vmatmul.mubr.msk.bf16.gmra.mrb[112].mxu1 %vm10930_vm2, %v11557_v61  ;;  %8956 = vmatmul.mubr.msk.bf16.gmra.mrb[144].mxu0 %vm10996_vm0, %v11607_v16  ;;  %vm14678_vm2 = vnez %v14677_v28 }
 0x25d   : > { %8959 = vmatprep.mubr.msk.bf16.mxu0 %vm11001_vm9, %v11617_v58  ;;  %4004 = vmatprep.mubr.bf16.mxu1 %v14658_v38 }
 0x264   : > { %7919 = vmatmul.mubr.msk.bf16.gmra.mrb[116].mxu1 %vm10948_vm13, %v11567_v56  ;;  %8960 = vmatmul.mubr.msk.bf16.gmra.mrb[148].mxu0 %vm11018_vm11, %v11627_v10  ;;  %vm14676_vm13 = vnez %v14675_v50 }
 0x265   : > { %8963 = vmatprep.mubr.msk.bf16.mxu0 %vm11023_vm8, %v11637_v45  ;;  %4014 = vmatprep.mubr.bf16.mxu1 %v14658_v38  ;;  %v3330_v2 = vsel %vm14676_vm13, %v3313_v6, 0  ;;  %vm14750_vm13 = vnez %v14561_v33 }
 0x26c   : > { %7920 = vmatmul.mubr.msk.bf16.gmra.mrb[120].mxu1 %vm10954_vm15, %v11577_v39  ;;  %8964 = vmatmul.mubr.msk.bf16.gmra.mrb[152].mxu0 %vm11042_vm5, %v11645_v31 }
 0x26d   : > { %8967 = vmatprep.mubr.msk.bf16.mxu0 %vm11051_vm14, %v11653_v35  ;;  %4024 = vmatprep.mubr.bf16.mxu1 %v14658_v38 }
 0x274   : > { %7921 = vmatmul.mubr.msk.bf16.gmra.mrb[124].mxu1 %vm10972_vm4, %v11587_v41  ;;  %8968 = vmatmul.mubr.msk.bf16.gmra.mrb[156].mxu0 %vm14678_vm2, %v3330_v2 }
 0x275   : > { %4034 = vmatprep.mubr.bf16.mxu1 %v14658_v38 }
 0x27c   : > { %7922 = vmatmul.mubr.msk.bf16.gmra.mrb[128].mxu1 %vm10978_vm12, %v11597_v9 }
 0x27d   : > { %4044 = vmatprep.mubr.bf16.mxu1 %v14658_v38 }
 0x284   : > { %7923 = vmatmul.mubr.msk.bf16.gmra.mrb[132].mxu1 %vm10996_vm0, %v11607_v16 }
 0x285   : > { %4054 = vmatprep.mubr.bf16.mxu1 %v14658_v38 }
 0x28c   : > { %7924 = vmatmul.mubr.msk.bf16.gmra.mrb[136].mxu1 %vm11001_vm9, %v11617_v58 }
 0x28d   : > { %v8355_v39 = vpop.f32.mrb[64].mxu0  ;;  %4064 = vmatprep.mubr.bf16.mxu1 %v14658_v38 }
 0x28e   : > { %v8356_v41 = vpop.f32.mrb[65].mxu0  ;;  %v7962_v39 = vcombine.low %v9707_v15, %v9708_v53  ;;  %v9714_v15 = vld [vmem:[%s10155_s23 + $0x1c] sm:$0xf] }
 0x28f   : > { %v8358_v21 = vpop.f32.mrb[66].mxu0 }
 0x290   : > { %v8359_v43 = vpop.f32.mrb[67].mxu0 }
 0x294   : > { %7925 = vmatmul.mubr.msk.bf16.gmra.mrb[140].mxu1 %vm11018_vm11, %v11627_v10 }
 0x295   : > { %4074 = vmatprep.mubr.bf16.mxu1 %v14658_v38 }
 0x297   : > { %v8361_v9 = vpop.f32.mrb[68].mxu0 }
 0x298   : > { %v8362_v16 = vpop.f32.mrb[69].mxu0 }
 0x299   : > { %v8364_v20 = vpop.f32.mrb[70].mxu0  ;;  %v11783_v52 = vadd.f32 %v8362_v16, %v8361_v9 }
 0x29a   : > { %v8365_v12 = vpop.f32.mrb[71].mxu0 }
 0x29b   : > { %v11785_v19 = vadd.f32 %v8365_v12, %v8364_v20  ;;  %v9709_v20 = vld [vmem:[%s10155_s23 + $0x10] sm:$0xf]  ;;  %v9710_v12 = vld [vmem:[%s10155_s23 + $0x14] sm:$0xf] }
 0x29c   : > { %7926 = vmatmul.mubr.msk.bf16.gmra.mrb[144].mxu1 %vm11023_vm8, %v11637_v45 }
 0x29d   : > { %4084 = vmatprep.mubr.bf16.mxu1 %v14658_v38 }
 0x29f   : > { %v8367_v58 = vpop.f32.mrb[72].mxu0 }
 0x2a0   : > { %v8368_v23 = vpop.f32.mrb[73].mxu0 }
 0x2a1   : > { %v8370_v42 = vpop.f32.mrb[74].mxu0  ;;  %v11791_v10 = vadd.f32 %v8368_v23, %v8367_v58  ;;  %v7964_v58 = vcombine.low %v9709_v20, %v9710_v12  ;;  %v9717_v20 = vld [vmem:[%s14243_s1 + $0x18] ss:$12 sps:$4 sm:$0xff]  }
 0x2a2   : > { %v8371_v4 = vpop.f32.mrb[75].mxu0 }
 0x2a3   : > { %v11793_v6 = vadd.f32 %v8371_v4, %v8370_v42 }
 0x2a4   : > { %7927 = vmatmul.mubr.msk.bf16.gmra.mrb[148].mxu1 %vm11042_vm5, %v11645_v31 }
 0x2a5   : > { %4094 = vmatprep.mubr.bf16.mxu1 %v14658_v38 }
 0x2a7   : > { %v8373_v3 = vpop.f32.mrb[76].mxu0 }
 0x2a8   : > { %v8374_v45 = vpop.f32.mrb[77].mxu0 }
 0x2a9   : > { %v8376_v25 = vpop.f32.mrb[78].mxu0  ;;  %v11799_v46 = vadd.f32 %v8374_v45, %v8373_v3  ;;  %v14679_v3 = vld [vmem:[#allocation5_spill] sm:$0xff]  ;;  %v14680_v45 = vld [vmem:[#allocation6_spill] sm:$0xff] }
 0x2aa   : > { %v8377_v13 = vpop.f32.mrb[79].mxu0 }
 0x2ab   : > { %v11801_v62 = vadd.f32 %v8377_v13, %v8376_v25  ;;  %v14681_v25 = vcombine.low %v14679_v3, %v14680_v45  ;;  %v9712_v13 = vld [vmem:[%s14243_s1 + $0x1c] ss:$12 sps:$4 sm:$0xff]   ;;  %v9720_v45 = vld [vmem:[%s14243_s1 + $0x4c] ss:$12 sps:$4 sm:$0xff]  }
 0x2ac   : > { %7928 = vmatmul.mubr.msk.bf16.gmra.mrb[152].mxu1 %vm11051_vm14, %v11653_v35  ;;  %v9719_v3 = vld [vmem:[%s14243_s1 + $0x30] ss:$12 sps:$4 sm:$0xff]  }
 0x2ad   : > { %4104 = vmatprep.mubr.bf16.mxu1 %v14658_v38 }
 0x2af   : > { %v8379_v29 = vpop.f32.mrb[80].mxu0 }
 0x2b0   : > { %v8380_v31 = vpop.f32.mrb[81].mxu0 }
 0x2b1   : > { %v8382_v22 = vpop.f32.mrb[82].mxu0  ;;  %v11809_v41 = vadd.f32 %v8380_v31, %v8379_v29 }
 0x2b2   : > { %v8383_v21 = vpop.f32.mrb[83].mxu0 }
 0x2b3   : > { %v11811_v43 = vadd.f32 %v8383_v21, %v8382_v22  ;;  %v9713_v22 = vld [vmem:[%s10155_s23 + $0x18] sm:$0xf]  ;;  %v9715_v21 = vld [vmem:[%s10155_s23 + $0x20] sm:$0xf] }
 0x2b4   : > { %7929 = vmatmul.mubr.msk.bf16.gmra.mrb[156].mxu1 %vm14678_vm2, %v3330_v2  ;;  %v9711_v2 = vld [vmem:[%s14243_s1] ss:$12 sps:$4 sm:$0xff]   ;;  %v7965_v53 = vcombine.low %v9713_v22, %v9714_v15  ;;  %v9723_v15 = vld [vmem:[%s10155_s23 + $0x30] sm:$0xf]  ;;  %vm14686_vm2 = vnez %v14516_v0 }
 0x2b5   : > { %8987 = vmatprep.mubr.bf16.mxu1 %v7962_v39 }
 0x2b7   : > { %v8385_v35 = vpop.f32.mrb[84].mxu0 }
 0x2b8   : > { %v8386_v9 = vpop.f32.mrb[85].mxu0 }
 0x2b9   : > { %v8388_v16 = vpop.f32.mrb[86].mxu0  ;;  %v11817_v23 = vadd.f32 %v8386_v9, %v8385_v35  ;;  %v9716_v35 = vld [vmem:[%s10155_s23 + $0x24] sm:$0xf] }
 0x2ba   : > { %v8389_v42 = vpop.f32.mrb[87].mxu0  ;;  %v7966_v9 = vcombine.low %v9715_v21, %v9716_v35  ;;  %v9725_v35 = vld [vmem:[%s14243_s1 + $0x48] ss:$12 sps:$4 sm:$0xff]  }
 0x2bb   : > { %v11819_v4 = vadd.f32 %v8389_v42, %v8388_v16 }
 0x2bc   : > { %8988 = vmatmul.mubr.bf16.vlgmr.msra.gmra.mrb[160].mxu1 %v14681_v25 }
 0x2bd   : > { %8991 = vmatprep.mubr.bf16.mxu1 %v7964_v58  ;;  %5363 = vmatpush1.bf16.msra.mxu1 %v9711_v2  ;;  %v9718_v58 = vld [vmem:[%s14243_s1 + $0x34] ss:$12 sps:$4 sm:$0xff]  }
 0x2be   : > { %5364 = vmatprep.subr.bf16.mxu1 %v9712_v13  ;;  %v9721_v13 = vld [vmem:[%s10155_s23 + $0x28] sm:$0xf] }
 0x2bf   : > { %v8391_v29 = vpop.f32.mrb[88].mxu0 }
 0x2c0   : > { %v8392_v31 = vpop.f32.mrb[89].mxu0 }
 0x2c1   : > { %v8394_v39 = vpop.f32.mrb[90].mxu0  ;;  %v11834_v16 = vadd.f32 %v8392_v31, %v8391_v29  ;;  %5365 = vmatpush1.bf16.msra.mxu1 %v9717_v20  ;;  %v9722_v29 = vld [vmem:[%s10155_s23 + $0x2c] sm:$0xf]  ;;  %v9726_v20 = vld [vmem:[%s14243_s1 + $0x64] ss:$12 sps:$4 sm:$0xff]  }
 0x2c2   : > { %v8395_v12 = vpop.f32.mrb[91].mxu0  ;;  %5366 = vmatprep.subr.bf16.mxu1 %v9718_v58  ;;  %v7967_v31 = vcombine.low %v9721_v13, %v9722_v29  ;;  %v9727_v58 = vld [vmem:[%s14243_s1 + $0x60] ss:$12 sps:$4 sm:$0xff]   ;;  %v9730_v13 = vld [vmem:[%s10155_s23 + $0x3c] sm:$0xf] }
 0x2c3   : > { %v11842_v42 = vadd.f32 %v8395_v12, %v8394_v39  ;;  %v9724_v39 = vld [vmem:[%s10155_s23 + $0x34] sm:$0xf] }
 0x2c4   : > { %8992 = vmatmul.mubr.bf16.gmra.mrb[164].mxu1 %v7965_v53  ;;  %v7968_v53 = vcombine.low %v9723_v15, %v9724_v39  ;;  %v9732_v39 = vld [vmem:[%s10155_s23 + $0x44] sm:$0xf] }
 0x2c5   : > { %8995 = vmatprep.mubr.bf16.mxu1 %v7966_v9  ;;  %5367 = vmatpush1.bf16.msra.mxu1 %v9719_v3  ;;  %v9728_v3 = vld [vmem:[%s14243_s1 + $0x7c] ss:$12 sps:$4 sm:$0xff]  }
 0x2c6   : > { %5368 = vmatprep.subr.bf16.mxu1 %v9720_v45 }
 0x2c7   : > { %v8397_v25 = vpop.f32.mrb[92].mxu0 }
 0x2c8   : > { %v8398_v2 = vpop.f32.mrb[93].mxu0 }
 0x2c9   : > { %v8400_v22 = vpop.f32.mrb[94].mxu0  ;;  %v11854_v21 = vadd.f32 %v8398_v2, %v8397_v25  ;;  %5369 = vmatpush1.bf16.msra.mxu1 %v9725_v35  ;;  %v9729_v2 = vld [vmem:[%s10155_s23 + $0x38] sm:$0xf] }
 0x2ca   : > { %v8401_v9 = vpop.f32.mrb[95].mxu0  ;;  %5370 = vmatprep.subr.bf16.mxu1 %v9726_v20  ;;  %v7969_v29 = vcombine.low %v9729_v2, %v9730_v13  ;;  %v9733_v35 = vld [vmem:[%s14243_s1 + $0x78] ss:$12 sps:$4 sm:$0xff]   ;;  %v9734_v20 = vld [vmem:[%s14243_s1 + $0x94] ss:$12 sps:$4 sm:$0xff]  }
 0x2cb   : > { %v11862_v12 = vadd.f32 %v8401_v9, %v8400_v22  ;;  %v9731_v22 = vld [vmem:[%s10155_s23 + $0x40] sm:$0xf]  ;;  %v9737_v13 = vld [vmem:[%s10155_s23 + $0x48] sm:$0xf] }
 0x2cc   : > { %8996 = vmatmul.mubr.bf16.gmra.mrb[168].mxu1 %v7967_v31  ;;  %v7970_v31 = vcombine.low %v9731_v22, %v9732_v39  ;;  %v9738_v22 = vld [vmem:[%s10155_s23 + $0x4c] sm:$0xf] }
 0x2cd   : > { %8999 = vmatprep.mubr.bf16.mxu1 %v7968_v53  ;;  %5371 = vmatpush1.bf16.msra.mxu1 %v9727_v58  ;;  %v7971_v39 = vcombine.low %v9737_v13, %v9738_v22 }
 0x2ce   : > { %5372 = vmatprep.subr.bf16.mxu1 %v9728_v3  ;;  %v9735_v3 = vld [vmem:[%s14243_s1 + $0x90] ss:$12 sps:$4 sm:$0xff]  }
 0x2cf   : > { %v8403_v45 = vpop.f32.mrb[96].mxu0 }
 0x2d0   : > { %v8404_v25 = vpop.f32.mrb[97].mxu0 }
 0x2d1   : > { %v8406_v15 = vpop.f32.mrb[98].mxu0  ;;  %v11874_v53 = vadd.f32 %v8404_v25, %v8403_v45  ;;  %5373 = vmatpush1.bf16.msra.mxu1 %v9733_v35  ;;  %v9736_v45 = vld [vmem:[%s14243_s1 + $0xac] ss:$12 sps:$4 sm:$0xff]  }
 0x2d2   : > { %v8407_v9 = vpop.f32.mrb[99].mxu0  ;;  %5374 = vmatprep.subr.bf16.mxu1 %v9734_v20  ;;  %v9741_v20 = vld [vmem:[%s14243_s1 + $0xa8] ss:$12 sps:$4 sm:$0xff]  }
 0x2d3   : > { %v11882_v58 = vadd.f32 %v8407_v9, %v8406_v15  ;;  %v9739_v15 = vld [vmem:[%s10155_s23 + $0x50] sm:$0xf]  ;;  %v9740_v9 = vld [vmem:[%s10155_s23 + $0x54] sm:$0xf] }
 0x2d4   : > { %9000 = vmatmul.mubr.bf16.gmra.mrb[172].mxu1 %v7969_v29  ;;  %v7972_v29 = vcombine.low %v9739_v15, %v9740_v9  ;;  %v9745_v9 = vld [vmem:[%s10155_s23 + $0x58] sm:$0xf] }
 0x2d5   : > { %9003 = vmatprep.mubr.bf16.mxu1 %v7970_v31  ;;  %5375 = vmatpush1.bf16.msra.mxu1 %v9735_v3 }
 0x2d6   : > { %5376 = vmatprep.subr.bf16.mxu1 %v9736_v45  ;;  %v9742_v45 = vld [vmem:[%s14243_s1 + $0xc4] ss:$12 sps:$4 sm:$0xff]  }
 0x2d7   : > { %v8409_v25 = vpop.f32.mrb[100].mxu0 }
 0x2d8   : > { %v8410_v2 = vpop.f32.mrb[101].mxu0 }
 0x2d9   : > { %v8412_v35 = vpop.f32.mrb[102].mxu0  ;;  %v11894_v31 = vadd.f32 %v8410_v2, %v8409_v25  ;;  %5377 = vmatpush1.bf16.msra.mxu1 %v9741_v20  ;;  %v9743_v25 = vld [vmem:[%s14243_s1 + $0xc0] ss:$12 sps:$4 sm:$0xff]   ;;  %v9744_v2 = vld [vmem:[%s14243_s1 + $0xdc] ss:$12 sps:$4 sm:$0xff]  }
 0x2da   : > { %v8413_v3 = vpop.f32.mrb[103].mxu0  ;;  %5378 = vmatprep.subr.bf16.mxu1 %v9742_v45  ;;  %v9746_v20 = vld [vmem:[%s10155_s23 + $0x5c] sm:$0xf] }
 0x2db   : > { %v11902_v13 = vadd.f32 %v8413_v3, %v8412_v35  ;;  %v7973_v35 = vcombine.low %v9745_v9, %v9746_v20  ;;  %v7994_v9 = vld [vmem:[%s10155_s23 + $0x80] sm:$0xf]  ;;  %v7995_v20 = vld [vmem:[%s10155_s23 + $0x84] sm:$0xf] }
 0x2dc   : > { %9004 = vmatmul.mubr.bf16.gmra.mrb[176].mxu1 %v7971_v39  ;;  %v9747_v39 = vld [vmem:[%s10155_s23 + $0x60] sm:$0xf] }
 0x2dd   : > { %9007 = vmatprep.mubr.bf16.mxu1 %v7972_v29  ;;  %5379 = vmatpush1.bf16.msra.mxu1 %v9743_v25  ;;  %v9748_v29 = vld [vmem:[%s10155_s23 + $0x64] sm:$0xf] }
 0x2de   : > { %5380 = vmatprep.subr.bf16.mxu1 %v9744_v2  ;;  %v7974_v45 = vcombine.low %v9747_v39, %v9748_v29  ;;  %v9749_v25 = vld [vmem:[%s14243_s1 + $0xd8] ss:$12 sps:$4 sm:$0xff]   ;;  %v9750_v2 = vld [vmem:[%s14243_s1 + $0xf4] ss:$12 sps:$4 sm:$0xff]   ;;  %v9751_v39 = vld [vmem:[%s14243_s1 + $0xf0] ss:$12 sps:$4 sm:$0xff]  }
 0x2df   : > { %v8415_v22 = vpop.f32.mrb[104].mxu0  ;;  %v9752_v29 = vld [vmem:[%s14243_s1 + $0x10c] ss:$12 sps:$4 sm:$0xff]  }
 0x2e0   : > { %v8416_v15 = vpop.f32.mrb[105].mxu0 }
 0x2e1   : > { %v8418_v3 = vpop.f32.mrb[106].mxu0  ;;  %v11914_v28 = vadd.f32 %v8416_v15, %v8415_v22  ;;  %5381 = vmatpush1.bf16.msra.mxu1 %v9749_v25  ;;  %v4994_v22 = vmax.bf16 %v14658_v38, %v7994_v9  ;;  %v4995_v15 = vmax.bf16 %v14658_v38, %v7995_v20  ;;  %v9754_v25 = vld [vmem:[%s10155_s23 + $0x6c] sm:$0xf]  ;;  %v9755_v20 = vld [vmem:[%s10155_s23 + $0x70] sm:$0xf] }
 0x2e2   : > { %v8419_v50 = vpop.f32.mrb[107].mxu0  ;;  %5382 = vmatprep.subr.bf16.mxu1 %v9750_v2  ;;  %v7976_v61 = vcombine.low %v9755_v20, %v9756_v14  ;;  %v9762_v20 = vld [vmem:[%s10155_s23 + $0x7c] sm:$0xf] }
 0x2e3   : > { %v11924_v56 = vadd.f32 %v8419_v50, %v8418_v3  ;;  %v11936_v9 = vcombine.low %v4994_v22, %v4995_v15  ;;  %v11949_v22 = vld [vmem:[%s10155_s23 + $0x88] sm:$0xf]  ;;  %v11952_v15 = vld [vmem:[%s10155_s23 + $0x8c] sm:$0xf] }
 0x2e4   : > { %9008 = vmatmul.mubr.bf16.gmra.mrb[180].mxu1 %v7973_v35  ;;  %v9753_v35 = vld [vmem:[%s10155_s23 + $0x68] sm:$0xf]  ;;  %14682 = vst [vmem:[#allocation5_spill] sm:$0xff] %v11949_v22  ;;  %14683 = vst [vmem:[#allocation6_spill] sm:$0xff] %v11952_v15 }
 0x2e5   : > { %9011 = vmatprep.mubr.bf16.mxu1 %v7974_v45  ;;  %5383 = vmatpush1.bf16.msra.mxu1 %v9751_v39  ;;  %v7975_v2 = vcombine.low %v9753_v35, %v9754_v25  ;;  %v9757_v39 = vld [vmem:[%s14243_s1 + $0x108] ss:$12 sps:$4 sm:$0xff]   ;;  %v4996_v35 = vmax.bf16 %v14658_v38, %v11949_v22 }
 0x2e6   : > { %5384 = vmatprep.subr.bf16.mxu1 %v9752_v29  ;;  %v9760_v25 = vld [vmem:[%s14243_s1 + $0x13c] ss:$12 sps:$4 sm:$0xff]  }
 0x2e7   : > { %v8421_v50 = vpop.f32.mrb[108].mxu0 }
 0x2e8   : > { %v8422_v3 = vpop.f32.mrb[109].mxu0 }
 0x2e9   : > { %v8424_v45 = vpop.f32.mrb[110].mxu0  ;;  %v11940_v63 = vadd.f32 %v8422_v3, %v8421_v50  ;;  %5385 = vmatpush1.bf16.msra.mxu1 %v9757_v39  ;;  %v14366_v50 = vshrl.u32 %v11936_v9, 16  ;;  %v9759_v3 = vld [vmem:[%s14243_s1 + $0x120] ss:$12 sps:$4 sm:$0xff]  }
 0x2ea   : > { %v8425_v29 = vpop.f32.mrb[111].mxu0  ;;  %5386 = vmatprep.subr.bf16.mxu1 %v9758_v40  ;;  %v4997_v40 = vmax.bf16 %v14658_v38, %v11952_v15 }
 0x2eb   : > { %v11954_v14 = vadd.f32 %v8425_v29, %v8424_v45  ;;  %v5109_v29 = vrot.slane %v14366_v50, 7 }
 0x2ec   : > { %9012 = vmatmul.mubr.bf16.gmra.mrb[184].mxu1 %v7975_v2  ;;  %v11977_v49 = vcombine.low %v4996_v35, %v4997_v40  ;;  %v9765_v35 = vld [vmem:[%s14243_s1 + $0x150] ss:$12 sps:$4 sm:$0xff]  }
 0x2ed   : > { %9015 = vmatprep.mubr.bf16.mxu1 %v7976_v61  ;;  %5387 = vmatpush1.bf16.msra.mxu1 %v9759_v3  ;;  %v9761_v61 = vld [vmem:[%s10155_s23 + $0x78] sm:$0xf] }
 0x2ee   : > { %5388 = vmatprep.subr.bf16.mxu1 %v9760_v25  ;;  %v7977_v39 = vcombine.low %v9761_v61, %v9762_v20  ;;  %v14368_v25 = vshll.u32 %v11936_v9, 16  ;;  %14684 = vst [vmem:[#allocation41_spill] sm:$0xff] %v11977_v49  ;;  %v9764_v61 = vld [vmem:[%s14243_s1 + $0x154] ss:$12 sps:$4 sm:$0xff]  }
 0x2ef   : > { %v8427_v2 = vpop.f32.mrb[112].mxu0 }
 0x2f0   : > { %v8428_v45 = vpop.f32.mrb[113].mxu0  ;;  %v5112_v40 = vor.u32 %v14368_v25, %v5109_v29 }
 0x2f1   : > { %v11971_v3 = vadd.f32 %v8428_v45, %v8427_v2  ;;  %v8430_v34 = vpop.f32.mrb[114].mxu0  ;;  %5389 = vmatpush1.bf16.msra.mxu1 %v9763_v32  ;;  %v7998_v2 = vld [vmem:[%s10155_s23 + $0x90] sm:$0xf]  ;;  %v7999_v45 = vld [vmem:[%s10155_s23 + $0x94] sm:$0xf] }
 0x2f2   : > { %v8431_v8 = vpop.f32.mrb[115].mxu0  ;;  %5390 = vmatprep.subr.bf16.mxu1 %v9764_v61  ;;  %v4998_v32 = vmax.bf16 %v14658_v38, %v7998_v2  ;;  %v4999_v50 = vmax.bf16 %v14658_v38, %v7999_v45  ;;  %v12009_v25 = vsel %vm14686_vm2, 0, %v5112_v40  ;;  %vm14690_vm2 = vnez %v14519_v7 }
 0x2f3   : > { %v11986_v20 = vadd.f32 %v8431_v8, %v8430_v34  ;;  %v14371_v8 = vshrl.u32 %v11977_v49, 16  ;;  %v9766_v34 = vld [vmem:[%s14243_s1 + $0x16c] ss:$12 sps:$4 sm:$0xff]   ;;  %14687 = vst [vmem:[#allocation43_spill] sm:$0xff] %v12009_v25 }
 0x2f4   : > { %9016 = vmatmul.mubr.bf16.gmra.mrb[188].mxu1 %v7977_v39  ;;  %v12000_v2 = vcombine.low %v4998_v32, %v4999_v50  ;;  %v12015_v50 = vld [vmem:[%s10155_s23 + $0x98] sm:$0xf]  ;;  %v12018_v32 = vld [vmem:[%s10155_s23 + $0x9c] sm:$0xf] }
 0x2f5   : > { %5391 = vmatpush1.bf16.msra.mxu1 %v9765_v35  ;;  %5394 = vmatprep.mubr.bf16.mxu1 %v11936_v9  ;;  %v5116_v15 = vrot.slane %v14371_v8, 7  ;;  %14688 = vst [vmem:[#allocation44_spill] sm:$0xff] %v12015_v50  ;;  %14689 = vst [vmem:[#allocation45_spill] sm:$0xff] %v12018_v32  ;;  %v5000_v8 = vmax.bf16 %v14658_v38, %v12015_v50  ;;  %v5001_v0 = vmax.bf16 %v14658_v38, %v12018_v32 }
 0x2f6   : > { %5392 = vmatprep.subr.bf16.mxu1 %v9766_v34  ;;  %14685 = vst [vmem:[#allocation42_spill] sm:$0xff] %v12000_v2  ;;  %v14373_v34 = vshll.u32 %v11977_v49, 16  ;;  %v14382_v40 = vshrl.u32 %v12000_v2, 16 }
 0x2f7   : > { %v8433_v39 = vpop.f32.mrb[116].mxu0 }
 0x2f8   : > { %v8434_v61 = vpop.f32.mrb[117].mxu0  ;;  %v5124_v7 = vrot.slane %v14382_v40, 7  ;;  %v8002_v40 = vld [vmem:[%s10155_s23 + $0xa0] sm:$0xf] }
 0x2f9   : > { %v12002_v45 = vadd.f32 %v8434_v61, %v8433_v39  ;;  %v8436_v35 = vpop.f32.mrb[118].mxu0  ;;  %5393 = vmatpush1.bf16.msra.mxu1 %v9767_v57  ;;  %v9768_v39 = vld [vmem:[%s14243_s1 + $0x184] ss:$12 sps:$4 sm:$0xff]   ;;  %v5119_v61 = vor.u32 %v14373_v34, %v5116_v15 }
 0x2fa   : > { %v8437_v22 = vpop.f32.mrb[119].mxu0  ;;  %5553 = vmatprep.subr.bf16.mxu1 %v9768_v39 }
 0x2fb   : > { %v12023_v57 = vadd.f32 %v8437_v22, %v8436_v35  ;;  %v9769_v22 = vld [vmem:[%s14243_s1 + $0x180] ss:$12 sps:$4 sm:$0xff]   ;;  %v9770_v35 = vld [vmem:[%s14243_s1 + $0x19c] ss:$12 sps:$4 sm:$0xff]  }
 0x2fc   : > { %8042 = vmatmul.mubr.msk.bf16.vlgmr.msra.gmra.mrb[192].mxu1 %vm14690_vm2, %v12009_v25  ;;  %v14384_v25 = vshll.u32 %v12000_v2, 16  ;;  %vm14691_vm2 = vsmask.f32 256 }
 0x2fd   : > { %5404 = vmatprep.mubr.bf16.mxu1 %v11977_v49  ;;  %5554 = vmatpush1.bf16.msra.mxu1 %v9769_v22  ;;  %v12048_v5 = vsel %vm14691_vm2, %v5109_v29, %v5119_v61  ;;  %v12050_v22 = vcombine.low %v5000_v8, %v5001_v0  ;;  %vm14694_vm2 = vnez %v14522_v30  ;;  %v5002_v61 = vmax.bf16 %v14658_v38, %v8002_v40  ;;  %v12095_v30 = vld [vmem:[%s10155_s23 + $0xa8] sm:$0xf]  ;;  %v9779_v49 = vld [vmem:[%s14243_s1 + $0x1f8] ss:$12 sps:$4 sm:$0xff]  }
 0x2fe   : > { %5555 = vmatprep.subr.bf16.mxu1 %v9770_v35  ;;  %14692 = vst [vmem:[#allocation46_spill] sm:$0xff] %v12048_v5  ;;  %v9771_v35 = vld [vmem:[%s14243_s1 + $0x198] ss:$12 sps:$4 sm:$0xff]   ;;  %v5127_v0 = vor.u32 %v14384_v25, %v5124_v7  ;;  %14697 = vst [vmem:[#allocation49_spill] sm:$0xff] %v12095_v30 }
 0x2ff   : > { %v8439_v39 = vpop.f32.mrb[120].mxu0  ;;  %14693 = vst [vmem:[#allocation47_spill] sm:$0xff] %v12050_v22  ;;  %v14389_v8 = vshrl.u32 %v12050_v22, 16  ;;  %v14393_v32 = vshll.u32 %v12050_v22, 16 }
 0x300   : > { %v8440_v34 = vpop.f32.mrb[121].mxu0 }
 0x301   : > { %v12045_v36 = vadd.f32 %v8440_v34, %v8439_v39  ;;  %v8442_v60 = vpop.f32.mrb[122].mxu0  ;;  %5556 = vmatpush1.bf16.msra.mxu1 %v9771_v35  ;;  %v9772_v34 = vld [vmem:[%s14243_s1 + $0x1b4] ss:$12 sps:$4 sm:$0xff]   ;;  %v5003_v39 = vmax.bf16 %v14658_v38, %v8003_v51  ;;  %v12086_v25 = vrot.slane %v14389_v8, 7 }
 0x302   : > { %v8443_v17 = vpop.f32.mrb[123].mxu0  ;;  %5557 = vmatprep.subr.bf16.mxu1 %v9772_v34 }
 0x303   : > { %v12062_v29 = vadd.f32 %v8443_v17, %v8442_v60  ;;  %v9773_v17 = vld [vmem:[%s14243_s1 + $0x1b0] ss:$12 sps:$4 sm:$0xff]   ;;  %v9774_v60 = vld [vmem:[%s14243_s1 + $0x1cc] ss:$12 sps:$4 sm:$0xff]  }
 0x304   : > { %8043 = vmatmul.mubr.msk.bf16.gmra.mrb[196].mxu1 %vm14694_vm2, %v12048_v5  ;;  %vm14695_vm2 = vsmask.f32 256 }
 0x305   : > { %5414 = vmatprep.mubr.bf16.mxu1 %v12000_v2  ;;  %5558 = vmatpush1.bf16.msra.mxu1 %v9773_v17  ;;  %v12080_v59 = vsel %vm14695_vm2, %v5116_v15, %v5127_v0  ;;  %v12089_v17 = vcombine.low %v5002_v61, %v5003_v39  ;;  %v12098_v15 = vld [vmem:[%s10155_s23 + $0xac] sm:$0xf]  ;;  %v9776_v0 = vld [vmem:[%s14243_s1 + $0x1e4] ss:$12 sps:$4 sm:$0xff]   ;;  %vm14699_vm2 = vnez %v14525_v55  ;;  %v5004_v61 = vmax.bf16 %v14658_v38, %v12095_v30 }
 0x306   : > { %5559 = vmatprep.subr.bf16.mxu1 %v9774_v60  ;;  %14696 = vst [vmem:[#allocation48_spill] sm:$0xff] %v12080_v59  ;;  %v9775_v60 = vld [vmem:[%s14243_s1 + $0x1c8] ss:$12 sps:$4 sm:$0xff]   ;;  %14698 = vst [vmem:[#allocation50_spill] sm:$0xff] %v12098_v15  ;;  %v5005_v39 = vmax.bf16 %v14658_v38, %v12098_v15 }
 0x307   : > { %v8445_v35 = vpop.f32.mrb[124].mxu0 }
 0x308   : > { %v8446_v34 = vpop.f32.mrb[125].mxu0  ;;  %v12124_v5 = vcombine.low %v5004_v61, %v5005_v39  ;;  %v8006_v39 = vld [vmem:[%s10155_s23 + $0xb0] sm:$0xf] }
 0x309   : > { %v12082_v40 = vadd.f32 %v8446_v34, %v8445_v35  ;;  %v8448_v51 = vpop.f32.mrb[126].mxu0  ;;  %5560 = vmatpush1.bf16.msra.mxu1 %v9775_v60  ;;  %v5135_v34 = vor.u32 %v14393_v32, %v12086_v25 }
 0x30a   : > { %v8449_v50 = vpop.f32.mrb[127].mxu0  ;;  %5561 = vmatprep.subr.bf16.mxu1 %v9776_v0  ;;  %14700 = vst [vmem:[#allocation51_spill] sm:$0xff] %v12124_v5 }
 0x30b   : > { %v12103_v35 = vadd.f32 %v8449_v50, %v8448_v51  ;;  %v9777_v50 = vld [vmem:[%s14243_s1 + $0x1e0] ss:$12 sps:$4 sm:$0xff]   ;;  %v9778_v51 = vld [vmem:[%s14243_s1 + $0x1fc] ss:$12 sps:$4 sm:$0xff]  }
 0x30c   : > { %8044 = vmatmul.mubr.msk.bf16.gmra.mrb[200].mxu1 %vm14699_vm2, %v12080_v59  ;;  %vm14701_vm2 = vsmask.f32 256 }
 0x30d   : > { %5424 = vmatprep.mubr.bf16.mxu1 %v12050_v22  ;;  %5562 = vmatpush1.bf16.msra.mxu1 %v9777_v50  ;;  %v12127_v2 = vsel %vm14701_vm2, %v5124_v7, %v5135_v34  ;;  %v14703_v50 = vshrl.u32 %v12089_v17, 16  ;;  %v9780_v7 = vld [vmem:[%s14243_s1 + $0x214] ss:$12 sps:$4 sm:$0xff]   ;;  %vm14705_vm2 = vnez %v14528_v24 }
 0x30e   : > { %5563 = vmatprep.subr.bf16.mxu1 %v9778_v51  ;;  %14702 = vst [vmem:[#allocation52_spill] sm:$0xff] %v12127_v2  ;;  %v14404_v51 = vshll.u32 %v12089_v17, 16 }
 0x30f   : > { %v3956_v0 = vpop.f32.mrb[96].mxu1  ;;  %v8941_v8 = vpop.f32.mrb[128].mxu0  ;;  %v5140_v44 = vrot.slane %v14703_v50, 7  ;;  %v9781_v50 = vld [vmem:[%s14243_s1 + $0x210] ss:$12 sps:$4 sm:$0xff]  }
 0x310   : > { %v4313_v55 = vadd.f32 %v8941_v8, %v11783_v52  ;;  %v3958_v59 = vpop.f32.mrb[97].mxu1  ;;  %v4306_v32 = vpop.f32.mrb[129].mxu0 }
 0x311   : > { %v3960_v60 = vpop.f32.mrb[98].mxu1  ;;  %v8942_v22 = vpop.f32.mrb[130].mxu0  ;;  %5564 = vmatpush1.bf16.msra.mxu1 %v9779_v49 }
 0x312   : > { %v4316_v52 = vadd.f32 %v8942_v22, %v11785_v19  ;;  %v3962_v32 = vpop.f32.mrb[99].mxu1  ;;  %v4308_v8 = vpop.f32.mrb[131].mxu0  ;;  %v12136_v61 = vadd.f32 %v4313_v55, %v3958_v59  ;;  %5565 = vmatprep.subr.bf16.mxu1 %v9780_v7  ;;  %v14409_v19 = vshrl.u32 %v12124_v5, 16  ;;  %v5143_v55 = vor.u32 %v14404_v51, %v5140_v44 }
 0x313   : > { %v5006_v59 = vmax.bf16 %v14658_v38, %v8006_v39  ;;  %v5007_v22 = vmax.bf16 %v14658_v38, %v8007_v48 }
 0x314   : > { %14704 = vst [vmem:[#allocation53_spill] sm:$0xff] %v12136_v61  ;;  %8045 = vmatmul.mubr.msk.bf16.gmra.mrb[204].mxu1 %vm14705_vm2, %v12127_v2  ;;  %v12148_v34 = vadd.f32 %v4316_v52, %v3962_v32  ;;  %v9782_v52 = vld [vmem:[%s14243_s1 + $0x22c] ss:$12 sps:$4 sm:$0xff]   ;;  %v12165_v48 = vrot.slane %v14409_v19, 7  ;;  %vm14707_vm2 = vsmask.f32 256 }
 0x315   : > { %5434 = vmatprep.mubr.bf16.mxu1 %v12089_v17  ;;  %5566 = vmatpush1.bf16.msra.mxu1 %v9781_v50  ;;  %v8010_v61 = vld [vmem:[%s10155_s23 + $0xc0] sm:$0xf] }
 0x316   : > { %14706 = vst [vmem:[#allocation54_spill] sm:$0xff] %v12148_v34  ;;  %5567 = vmatprep.subr.bf16.mxu1 %v9782_v52  ;;  %v12171_v52 = vsel %vm14707_vm2, %v12086_v25, %v5143_v55  ;;  %v9784_v25 = vld [vmem:[%s14244_s2 + $0xc8] ss:$12 sps:$4 sm:$0xff]   ;;  %vm14711_vm2 = vnez %v14531_v54 }
 0x317   : > { %v3966_v32 = vpop.f32.mrb[100].mxu1  ;;  %v8945_v8 = vpop.f32.mrb[132].mxu0  ;;  %14708 = vst [vmem:[#allocation55_spill] sm:$0xff] %v12171_v52 }
 0x318   : > { %v4329_v7 = vadd.f32 %v8945_v8, %v11799_v46  ;;  %v3968_v49 = vpop.f32.mrb[101].mxu1  ;;  %v4320_v39 = vpop.f32.mrb[133].mxu0  ;;  %v12173_v46 = vcombine.low %v5006_v59, %v5007_v22  ;;  %v9783_v8 = vld [vmem:[%s14243_s1 + $0x228] ss:$12 sps:$4 sm:$0xff]  }
 0x319   : > { %v4433_v50 = vadd.f32 %v3968_v49, %v3956_v0  ;;  %v4321_v15 = vadd.f32 %v11791_v10, %v4320_v39  ;;  %v3970_v30 = vpop.f32.mrb[102].mxu1  ;;  %v8946_v24 = vpop.f32.mrb[134].mxu0  ;;  %5568 = vmatpush1.bf16.msra.mxu1 %v9783_v8  ;;  %v12180_v0 = vld [vmem:[%s10155_s23 + $0xb8] sm:$0xf]  ;;  %v12183_v10 = vld [vmem:[%s10155_s23 + $0xbc] sm:$0xf] }
 0x31a   : > { %v4332_v19 = vadd.f32 %v8946_v24, %v11801_v62  ;;  %v3972_v2 = vpop.f32.mrb[103].mxu1  ;;  %v4323_v51 = vpop.f32.mrb[135].mxu0  ;;  %14709 = vst [vmem:[#allocation56_spill] sm:$0xff] %v12180_v0  ;;  %14710 = vst [vmem:[#allocation57_spill] sm:$0xff] %v12183_v10  ;;  %8675 = vmatprep.subr.bf16.mxu1 %v9784_v25  ;;  %v14712_v24 = vshll.u32 %v12124_v5, 16  ;;  %v5008_v22 = vmax.bf16 %v14658_v38, %v12180_v0  ;;  %v14417_v34 = vshll.u32 %v12173_v46, 16 }
 0x31b   : > { %v4434_v49 = vadd.f32 %v3972_v2, %v3960_v60  ;;  %v4324_v55 = vadd.f32 %v11793_v6, %v4323_v51  ;;  %v12189_v59 = vadd.f32 %v4433_v50, %v4321_v15  ;;  %v5009_v39 = vmax.bf16 %v14658_v38, %v12183_v10  ;;  %v12259_v10 = vld [vmem:[%s10155_s23 + $0xc8] sm:$0xf] }
 0x31c   : > { %8046 = vmatmul.mubr.msk.bf16.gmra.mrb[208].mxu1 %vm14711_vm2, %v12171_v52  ;;  %v5151_v62 = vor.u32 %v14712_v24, %v12165_v48  ;;  %v14416_v6 = vshrl.u32 %v12173_v46, 16  ;;  %vm14714_vm2 = vsmask.f32 256  ;;  %14719 = vst [vmem:[#allocation61_spill] sm:$0xff] %v12259_v10 }
 0x31d   : > { %v12201_v8 = vadd.f32 %v4434_v49, %v4324_v55  ;;  %5444 = vmatprep.mubr.bf16.mxu1 %v12124_v5  ;;  %v12211_v24 = vcombine.low %v5008_v22, %v5009_v39 }
 0x31e   : > { %v12209_v25 = vsel %vm14714_vm2, %v5140_v44, %v5151_v62  ;;  %v5156_v5 = vrot.slane %v14416_v6, 7  ;;  %vm14716_vm2 = vnez %v14536_v47 }
 0x31f   : > { %14713 = vst [vmem:[#allocation58_spill] sm:$0xff] %v12201_v8  ;;  %v3976_v2 = vpop.f32.mrb[104].mxu1  ;;  %v8949_v15 = vpop.f32.mrb[136].mxu0  ;;  %14715 = vst [vmem:[#allocation59_spill] sm:$0xff] %v12211_v24  ;;  %v14418_v39 = vshrl.u32 %v12211_v24, 16 }
 0x320   : > { %v12206_v60 = vadd.f32 %v8949_v15, %v11817_v23  ;;  %v3978_v51 = vpop.f32.mrb[105].mxu1  ;;  %v4336_v50 = vpop.f32.mrb[137].mxu0 }
 0x321   : > { %v4435_v49 = vadd.f32 %v3978_v51, %v3966_v32  ;;  %v4337_v55 = vadd.f32 %v11809_v41, %v4336_v50  ;;  %v3980_v54 = vpop.f32.mrb[106].mxu1  ;;  %v8950_v52 = vpop.f32.mrb[138].mxu0  ;;  %v8011_v32 = vld [vmem:[%s10155_s23 + $0xc4] sm:$0xf] }
 0x322   : > { %v12218_v23 = vadd.f32 %v8950_v52, %v11819_v4  ;;  %v3982_v15 = vpop.f32.mrb[107].mxu1  ;;  %v4339_v8 = vpop.f32.mrb[139].mxu0 }
 0x323   : > { %v4436_v44 = vadd.f32 %v3982_v15, %v3970_v30  ;;  %v4340_v62 = vadd.f32 %v11811_v43, %v4339_v8  ;;  %v12222_v22 = vadd.f32 %v4435_v49, %v4329_v7  ;;  %v5159_v30 = vor.u32 %v14417_v34, %v5156_v5 }
 0x324   : > { %8047 = vmatmul.mubr.msk.bf16.gmra.mrb[212].mxu1 %vm14716_vm2, %v12209_v25  ;;  %v5010_v43 = vmax.bf16 %v14658_v38, %v8010_v61  ;;  %v5011_v7 = vmax.bf16 %v14658_v38, %v8011_v32  ;;  %vm14717_vm2 = vsmask.f32 256 }
 0x325   : > { %5454 = vmatprep.mubr.bf16.mxu1 %v12173_v46  ;;  %v12232_v4 = vadd.f32 %v4436_v44, %v4332_v19  ;;  %v12243_v19 = vrot.slane %v14418_v39, 7  ;;  %v12251_v6 = vsel %vm14717_vm2, %v12165_v48, %v5159_v30  ;;  %vm14721_vm2 = vnez %v14539_v18 }
 0x326   : > { %14718 = vst [vmem:[#allocation60_spill] sm:$0xff] %v12251_v6 }
 0x327   : > { %v3986_v52 = vpop.f32.mrb[108].mxu1  ;;  %v8953_v8 = vpop.f32.mrb[140].mxu0 }
 0x328   : > { %v12239_v51 = vadd.f32 %v8953_v8, %v11854_v21  ;;  %v3988_v50 = vpop.f32.mrb[109].mxu1  ;;  %v4352_v49 = vpop.f32.mrb[141].mxu0  ;;  %v12253_v21 = vcombine.low %v5010_v43, %v5011_v7 }
 0x329   : > { %v4437_v44 = vadd.f32 %v3988_v50, %v3976_v2  ;;  %v12247_v61 = vadd.f32 %v11834_v16, %v4352_v49  ;;  %v3990_v32 = vpop.f32.mrb[110].mxu1  ;;  %v8954_v41 = vpop.f32.mrb[142].mxu0  ;;  %v12267_v50 = vld [vmem:[%s10155_s23 + $0xcc] sm:$0xf] }
 0x32a   : > { %v12256_v8 = vadd.f32 %v8954_v41, %v11862_v12  ;;  %v3992_v34 = vpop.f32.mrb[111].mxu1  ;;  %v4355_v39 = vpop.f32.mrb[143].mxu0  ;;  %14720 = vst [vmem:[#allocation62_spill] sm:$0xff] %v12267_v50  ;;  %v14722_v12 = vshll.u32 %v12211_v24, 16  ;;  %v5012_v41 = vmax.bf16 %v14658_v38, %v12259_v10  ;;  %v14725_v0 = vshrl.u32 %v12253_v21, 16 }
 0x32b   : > { %v4438_v15 = vadd.f32 %v3992_v34, %v3980_v54  ;;  %v12262_v2 = vadd.f32 %v11842_v42, %v4355_v39  ;;  %v12264_v16 = vadd.f32 %v4437_v44, %v4337_v55  ;;  %v5013_v54 = vmax.bf16 %v14658_v38, %v12267_v50  ;;  %v12343_v10 = vld [vmem:[%s10155_s23 + $0xd8] sm:$0xf] }
 0x32c   : > { %8048 = vmatmul.mubr.msk.bf16.gmra.mrb[216].mxu1 %vm14721_vm2, %v12251_v6  ;;  %v5167_v48 = vor.u32 %v14722_v12, %v12243_v19  ;;  %vm14723_vm2 = vsmask.f32 256  ;;  %v5172_v18 = vrot.slane %v14725_v0, 7  ;;  %14729 = vst [vmem:[#allocation65_spill] sm:$0xff] %v12343_v10 }
 0x32d   : > { %v12279_v42 = vadd.f32 %v4438_v15, %v4340_v62  ;;  %5464 = vmatprep.mubr.bf16.mxu1 %v12211_v24  ;;  %v12289_v44 = vcombine.low %v5012_v41, %v5013_v54 }
 0x32e   : > { %v12287_v49 = vsel %vm14723_vm2, %v5156_v5, %v5167_v48  ;;  %v8014_v5 = vld [vmem:[%s10155_s23 + $0xd0] sm:$0xf]  ;;  %vm14726_vm2 = vnez %v14544_v1 }
 0x32f   : > { %v3996_v55 = vpop.f32.mrb[112].mxu1  ;;  %v8957_v39 = vpop.f32.mrb[144].mxu0  ;;  %14724 = vst [vmem:[#allocation63_spill] sm:$0xff] %v12287_v49 }
 0x330   : > { %v12284_v30 = vadd.f32 %v8957_v39, %v11894_v31  ;;  %v3998_v43 = vpop.f32.mrb[113].mxu1  ;;  %v4368_v7 = vpop.f32.mrb[145].mxu0  ;;  %v14426_v31 = vshll.u32 %v12253_v21, 16 }
 0x331   : > { %v4439_v62 = vadd.f32 %v3998_v43, %v3986_v52  ;;  %v12292_v15 = vadd.f32 %v11874_v53, %v4368_v7  ;;  %v4000_v12 = vpop.f32.mrb[114].mxu1  ;;  %v8958_v34 = vpop.f32.mrb[146].mxu0  ;;  %v8015_v52 = vld [vmem:[%s10155_s23 + $0xd4] sm:$0xf] }
 0x332   : > { %v12298_v39 = vadd.f32 %v8958_v34, %v11902_v13  ;;  %v4002_v6 = vpop.f32.mrb[115].mxu1  ;;  %v4371_v47 = vpop.f32.mrb[147].mxu0  ;;  %v14428_v13 = vshrl.u32 %v12289_v44, 16 }
 0x333   : > { %v4440_v48 = vadd.f32 %v4002_v6, %v3990_v32  ;;  %v12302_v41 = vadd.f32 %v11882_v58, %v4371_v47  ;;  %v12305_v53 = vadd.f32 %v4439_v62, %v12206_v60  ;;  %v5175_v47 = vor.u32 %v14426_v31, %v5172_v18 }
 0x334   : > { %8049 = vmatmul.mubr.msk.bf16.gmra.mrb[220].mxu1 %vm14726_vm2, %v12287_v49  ;;  %v5014_v58 = vmax.bf16 %v14658_v38, %v8014_v5  ;;  %v5015_v6 = vmax.bf16 %v14658_v38, %v8015_v52  ;;  %vm14727_vm2 = vsmask.f32 256 }
 0x335   : > { %v12315_v54 = vadd.f32 %v4440_v48, %v12218_v23  ;;  %5474 = vmatprep.mubr.bf16.mxu1 %v12253_v21  ;;  %v12327_v23 = vrot.slane %v14428_v13, 7  ;;  %v12335_v31 = vsel %vm14727_vm2, %v12243_v19, %v5175_v47  ;;  %vm14731_vm2 = vnez %v14547_v11 }
 0x336   : > { %14728 = vst [vmem:[#allocation64_spill] sm:$0xff] %v12335_v31 }
 0x337   : > { %v4006_v60 = vpop.f32.mrb[116].mxu1  ;;  %v8961_v32 = vpop.f32.mrb[148].mxu0 }
 0x338   : > { %v12323_v34 = vadd.f32 %v8961_v32, %v11940_v63  ;;  %v4008_v43 = vpop.f32.mrb[117].mxu1  ;;  %v4384_v7 = vpop.f32.mrb[149].mxu0  ;;  %v12337_v63 = vcombine.low %v5014_v58, %v5015_v6 }
 0x339   : > { %v4441_v48 = vadd.f32 %v4008_v43, %v3996_v55  ;;  %v12331_v5 = vadd.f32 %v11914_v28, %v4384_v7  ;;  %v4010_v52 = vpop.f32.mrb[118].mxu1  ;;  %v8962_v0 = vpop.f32.mrb[150].mxu0  ;;  %v12352_v43 = vld [vmem:[%s10155_s23 + $0xdc] sm:$0xf] }
 0x33a   : > { %v12340_v32 = vadd.f32 %v8962_v0, %v11954_v14  ;;  %v4012_v50 = vpop.f32.mrb[119].mxu1  ;;  %v4387_v13 = vpop.f32.mrb[151].mxu0  ;;  %14730 = vst [vmem:[#allocation66_spill] sm:$0xff] %v12352_v43  ;;  %v14732_v14 = vshll.u32 %v12289_v44, 16  ;;  %v5016_v0 = vmax.bf16 %v14658_v38, %v12343_v10  ;;  %v14735_v11 = vshrl.u32 %v12337_v63, 16 }
 0x33b   : > { %v4442_v62 = vadd.f32 %v4012_v50, %v4000_v12  ;;  %v12346_v55 = vadd.f32 %v11924_v56, %v4387_v13  ;;  %v12349_v28 = vadd.f32 %v4441_v48, %v12247_v61  ;;  %v5017_v56 = vmax.bf16 %v14658_v38, %v12352_v43 }
 0x33c   : > { %8050 = vmatmul.mubr.msk.bf16.gmra.mrb[224].mxu1 %vm14731_vm2, %v12335_v31  ;;  %v5183_v19 = vor.u32 %v14732_v14, %v12327_v23  ;;  %vm14733_vm2 = vsmask.f32 256  ;;  %v5188_v31 = vrot.slane %v14735_v11, 7 }
 0x33d   : > { %v12365_v50 = vadd.f32 %v4442_v62, %v12262_v2  ;;  %5484 = vmatprep.mubr.bf16.mxu1 %v12289_v44  ;;  %v12375_v48 = vcombine.low %v5016_v0, %v5017_v56 }
 0x33e   : > { %v12373_v7 = vsel %vm14733_vm2, %v5172_v18, %v5183_v19  ;;  %v8018_v18 = vld [vmem:[%s10155_s23 + $0xe0] sm:$0xf]  ;;  %vm14736_vm2 = vnez %v14552_v26 }
 0x33f   : > { %v4016_v12 = vpop.f32.mrb[120].mxu1  ;;  %v8965_v13 = vpop.f32.mrb[152].mxu0  ;;  %14734 = vst [vmem:[#allocation67_spill] sm:$0xff] %v12373_v7 }
 0x340   : > { %v12370_v47 = vadd.f32 %v8965_v13, %v12002_v45  ;;  %v4018_v58 = vpop.f32.mrb[121].mxu1  ;;  %v4400_v6 = vpop.f32.mrb[153].mxu0  ;;  %v14436_v45 = vshll.u32 %v12337_v63, 16 }
 0x341   : > { %v4443_v2 = vadd.f32 %v4018_v58, %v4006_v60  ;;  %v12378_v62 = vadd.f32 %v11971_v3, %v4400_v6  ;;  %v4020_v14 = vpop.f32.mrb[122].mxu1  ;;  %v8966_v61 = vpop.f32.mrb[154].mxu0  ;;  %v8019_v60 = vld [vmem:[%s10155_s23 + $0xe4] sm:$0xf] }
 0x342   : > { %v12384_v13 = vadd.f32 %v8966_v61, %v12023_v57  ;;  %v4022_v1 = vpop.f32.mrb[123].mxu1  ;;  %v4403_v49 = vpop.f32.mrb[155].mxu0  ;;  %v14439_v57 = vshrl.u32 %v12375_v48, 16 }
 0x343   : > { %v4444_v19 = vadd.f32 %v4022_v1, %v4010_v52  ;;  %v12388_v0 = vadd.f32 %v11986_v20, %v4403_v49  ;;  %v12391_v3 = vadd.f32 %v4443_v2, %v12239_v51  ;;  %v5191_v1 = vor.u32 %v14436_v45, %v5188_v31 }
 0x344   : > { %8051 = vmatmul.mubr.msk.bf16.gmra.mrb[228].mxu1 %vm14736_vm2, %v12373_v7  ;;  %v5018_v20 = vmax.bf16 %v14658_v38, %v8018_v18  ;;  %v5019_v51 = vmax.bf16 %v14658_v38, %v8019_v60  ;;  %vm14737_vm2 = vsmask.f32 256 }
 0x345   : > { %v12401_v56 = vadd.f32 %v4444_v19, %v12256_v8  ;;  %5494 = vmatprep.mubr.bf16.mxu1 %v12337_v63  ;;  %v5196_v8 = vrot.slane %v14439_v57, 7  ;;  %v12419_v45 = vsel %vm14737_vm2, %v12327_v23, %v5191_v1  ;;  %v12427_v57 = vld [vmem:[%s10155_s23 + $0xe8] sm:$0xf]  ;;  %vm14741_vm2 = vnez %v14555_v27  ;;  %v8022_v27 = vld [vmem:[%s10155_s23 + $0xf0] sm:$0xf] }
 0x346   : > { %14738 = vst [vmem:[#allocation68_spill] sm:$0xff] %v12419_v45  ;;  %14739 = vst [vmem:[#allocation69_spill] sm:$0xff] %v12427_v57  ;;  %v5020_v1 = vmax.bf16 %v14658_v38, %v12427_v57 }
 0x347   : > { %v4026_v49 = vpop.f32.mrb[124].mxu1  ;;  %v8969_v52 = vpop.f32.mrb[156].mxu0 }
 0x348   : > { %v12409_v61 = vadd.f32 %v8969_v52, %v12082_v40  ;;  %v4028_v58 = vpop.f32.mrb[125].mxu1  ;;  %v4416_v6 = vpop.f32.mrb[157].mxu0  ;;  %v12421_v40 = vcombine.low %v5018_v20, %v5019_v51 }
 0x349   : > { %v4445_v19 = vadd.f32 %v4028_v58, %v4016_v12  ;;  %v12415_v11 = vadd.f32 %v12045_v36, %v4416_v6  ;;  %v4030_v18 = vpop.f32.mrb[126].mxu1  ;;  %v8970_v60 = vpop.f32.mrb[158].mxu0  ;;  %v12436_v58 = vld [vmem:[%s10155_s23 + $0xec] sm:$0xf] }
 0x34a   : > { %v12424_v52 = vadd.f32 %v8970_v60, %v12103_v35  ;;  %v4032_v43 = vpop.f32.mrb[127].mxu1  ;;  %v4419_v10 = vpop.f32.mrb[159].mxu0  ;;  %14740 = vst [vmem:[#allocation70_spill] sm:$0xff] %v12436_v58  ;;  %v14742_v35 = vshll.u32 %v12375_v48, 16 }
 0x34b   : > { %v4446_v2 = vadd.f32 %v4032_v43, %v4020_v14  ;;  %v12430_v12 = vadd.f32 %v12062_v29, %v4419_v10  ;;  %v12433_v36 = vadd.f32 %v4445_v19, %v12292_v15  ;;  %v5021_v29 = vmax.bf16 %v14658_v38, %v12436_v58  ;;  %v12491_v58 = vld [vmem:[%s10155_s23 + $0xf8] sm:$0xf] }
 0x34c   : > { %8052 = vmatmul.mubr.msk.bf16.gmra.mrb[232].mxu1 %vm14741_vm2, %v12419_v45  ;;  %v5199_v23 = vor.u32 %v14742_v35, %v5196_v8  ;;  %v14446_v15 = vshrl.u32 %v12421_v40, 16  ;;  %vm14743_vm2 = vsmask.f32 256  ;;  %v14447_v35 = vshll.u32 %v12421_v40, 16  ;;  %v8023_v45 = vld [vmem:[%s10155_s23 + $0xf4] sm:$0xf] }
 0x34d   : > { %v12448_v10 = vadd.f32 %v4446_v2, %v12302_v41  ;;  %5504 = vmatprep.mubr.bf16.mxu1 %v12375_v48  ;;  %v12455_v51 = vcombine.low %v5020_v1, %v5021_v29  ;;  %v5023_v1 = vmax.bf16 %v14658_v38, %v8023_v45  ;;  %14748 = vst [vmem:[#allocation73_spill] sm:$0xff] %v12491_v58 }
 0x34e   : > { %v12453_v20 = vsel %vm14743_vm2, %v5188_v31, %v5199_v23  ;;  %v5204_v60 = vrot.slane %v14446_v15, 7  ;;  %vm14745_vm2 = vnez %v14558_v37  ;;  %v14753_v37 = vld [vmem:[#allocation21_spill] sm:$0xff] }
 0x34f   : > { %v4036_v43 = vpop.f32.mrb[128].mxu1  ;;  %14744 = vst [vmem:[#allocation71_spill] sm:$0xff] %v12453_v20  ;;  %v14449_v31 = vshrl.u32 %v12455_v51, 16 }
 0x350   : > { %v4038_v14 = vpop.f32.mrb[129].mxu1 }
 0x351   : > { %v4447_v6 = vadd.f32 %v4038_v14, %v4026_v49  ;;  %v4040_v19 = vpop.f32.mrb[130].mxu1  ;;  %v9687_v49 = vld [vmem:[%s14246_s4 + $0x4] ss:$8 sps:$4 sm:$0xff]  }
 0x352   : > { %v4042_v2 = vpop.f32.mrb[131].mxu1  ;;  %4920 = vmatprep.mubr.bf16.mxu0 %v9687_v49 }
 0x353   : > { %v4448_v26 = vadd.f32 %v4042_v2, %v4030_v18  ;;  %v12465_v7 = vadd.f32 %v4447_v6, %v12284_v30  ;;  %v5207_v30 = vor.u32 %v14447_v35, %v5204_v60  ;;  %v5022_v18 = vmax.bf16 %v14658_v38, %v8022_v27  ;;  %v12494_v27 = vld [vmem:[%s10155_s23 + $0xfc] sm:$0xf] }
 0x354   : > { %8053 = vmatmul.mubr.msk.bf16.gmra.mrb[236].mxu1 %vm14745_vm2, %v12453_v20  ;;  %v5212_v6 = vrot.slane %v14449_v31, 7  ;;  %v14450_v2 = vshll.u32 %v12455_v51, 16  ;;  %vm14746_vm2 = vsmask.f32 256  ;;  %14749 = vst [vmem:[#allocation74_spill] sm:$0xff] %v12494_v27 }
 0x355   : > { %v12475_v23 = vadd.f32 %v4448_v26, %v12298_v39  ;;  %5514 = vmatprep.mubr.bf16.mxu1 %v12421_v40  ;;  %v12486_v41 = vsel %vm14746_vm2, %v5196_v8, %v5207_v30  ;;  %v12488_v15 = vcombine.low %v5022_v18, %v5023_v1 }
 0x356   : > { %14747 = vst [vmem:[#allocation72_spill] sm:$0xff] %v12486_v41 }
 0x357   : > { %v4046_v29 = vpop.f32.mrb[132].mxu1  ;;  %v14457_v30 = vshrl.u32 %v12488_v15, 16  ;;  %v14459_v31 = vshll.u32 %v12488_v15, 16 }
 0x358   : > { %v4048_v14 = vpop.f32.mrb[133].mxu1 }
 0x359   : > { %v4449_v26 = vadd.f32 %v4048_v14, %v4036_v43  ;;  %v4050_v39 = vpop.f32.mrb[134].mxu1  ;;  %v5215_v43 = vor.u32 %v14450_v2, %v5212_v6 }
 0x35a   : > { %v4052_v35 = vpop.f32.mrb[135].mxu1 }
 0x35b   : > { %v4450_v45 = vadd.f32 %v4052_v35, %v4040_v19  ;;  %v12497_v49 = vadd.f32 %v4449_v26, %v12331_v5  ;;  %v5024_v19 = vmax.bf16 %v14658_v38, %v12491_v58  ;;  %v5025_v5 = vmax.bf16 %v14658_v38, %v12494_v27 }
 0x35c   : > { %8054 = vmatmul.mubr.msk.bf16.gmra.mrb[240].mxu1 %vm14750_vm13, %v12486_v41  ;;  %v12514_v1 = vsel %vm14746_vm2, %v5204_v60, %v5215_v43  ;;  %v14752_v60 = vshll.u32 %v11936_v9, 16  ;;  %vm14754_vm2 = vnez %v14753_v37  ;;  %vm14760_vm13 = vsmask.f32 7424 }
 0x35d   : > { %v12505_v8 = vadd.f32 %v4450_v45, %v12346_v55  ;;  %5524 = vmatprep.mubr.bf16.mxu1 %v12455_v51  ;;  %14751 = vst [vmem:[#allocation75_spill] sm:$0xff] %v12514_v1  ;;  %v5220_v45 = vrot.slane %v14457_v30, 7  ;;  %v12521_v2 = vcombine.low %v5024_v19, %v5025_v5 }
 0x35e   : > { %v5266_v43 = vrot.slane %v14752_v60, 1  ;;  %v14757_v60 = vshrl.u32 %v11936_v9, 16 }
 0x35f   : > { %v4056_v35 = vpop.f32.mrb[136].mxu1  ;;  %v5223_v19 = vor.u32 %v14459_v31, %v5220_v45  ;;  %v14465_v31 = vshll.u32 %v12521_v2, 16 }
 0x360   : > { %v4058_v18 = vpop.f32.mrb[137].mxu1  ;;  %v5267_v14 = vor.u32 %v5266_v43, %v14757_v60  ;;  %v14762_v43 = vld [vmem:[#allocation22_spill] sm:$0xff] }
 0x361   : > { %v4451_v55 = vadd.f32 %v4058_v18, %v4046_v29  ;;  %v4060_v26 = vpop.f32.mrb[138].mxu1  ;;  %vm14763_vm14 = vnez %v14762_v43 }
 0x362   : > { %v4062_v57 = vpop.f32.mrb[139].mxu1 }
 0x363   : > { %v4452_v33 = vadd.f32 %v4062_v57, %v4050_v39  ;;  %v12524_v41 = vadd.f32 %v4451_v55, %v12323_v34  ;;  %v14464_v57 = vshrl.u32 %v12521_v2, 16  ;;  %v14755_v39 = vld [vmem:[#allocation41_spill] sm:$0xff] }
 0x364   : > { %8055 = vmatmul.mubr.msk.bf16.gmra.mrb[244].mxu1 %vm14754_vm2, %v12514_v1  ;;  %v14756_v34 = vshll.u32 %v14755_v39, 16  ;;  %vm14758_vm2 = vsmask.f32 256 }
 0x365   : > { %v12532_v29 = vadd.f32 %v4452_v33, %v12340_v32  ;;  %5534 = vmatprep.mubr.bf16.mxu1 %v12488_v15  ;;  %v12543_v33 = vsel %vm14758_vm2, %v5212_v6, %v5223_v19  ;;  %v5228_v32 = vrot.slane %v14464_v57, 7 }
 0x366   : > { %v5268_v5 = vrot.slane %v14756_v34, 1  ;;  %14759 = vst [vmem:[#allocation41_spill] sm:$0xff] %v12543_v33 }
 0x367   : > { %v4066_v18 = vpop.f32.mrb[140].mxu1 }
 0x368   : > { %v4068_v55 = vpop.f32.mrb[141].mxu1  ;;  %v12549_v37 = vsel %vm14760_vm13, %v5267_v14, %v5268_v5  ;;  %vm14764_vm13 = vmmov %vm14758_vm2  ;;  %vm14771_vm2 = vsmask.f32 7424 }
 0x369   : > { %v4453_v30 = vadd.f32 %v4068_v55, %v4056_v35  ;;  %v4070_v27 = vpop.f32.mrb[142].mxu1  ;;  %14761 = vst [vmem:[#allocation76_spill] sm:$0xff] %v12549_v37  ;;  %v5231_v35 = vor.u32 %v14465_v31, %v5228_v32 }
 0x36a   : > { %v4072_v58 = vpop.f32.mrb[143].mxu1 }
 0x36b   : > { %v4454_v34 = vadd.f32 %v4072_v58, %v4060_v26  ;;  %v12552_v1 = vadd.f32 %v4453_v30, %v12378_v62  ;;  %v12564_v58 = vsel %vm14764_vm13, %v5220_v45, %v5231_v35  ;;  %vm14777_vm13 = vmmov %vm14771_vm2 }
 0x36c   : > { %8056 = vmatmul.mubr.msk.bf16.gmra.mrb[248].mxu1 %vm14763_vm14, %v12543_v33  ;;  %14765 = vst [vmem:[#allocation77_spill] sm:$0xff] %v12564_v58 }
 0x36d   : > { %v12558_v6 = vadd.f32 %v4454_v34, %v12388_v0  ;;  %5544 = vmatprep.mubr.bf16.mxu1 %v12521_v2 }
 0x36f   : > { %v4076_v19 = vpop.f32.mrb[144].mxu1 }
 0x370   : > { %v4078_v55 = vpop.f32.mrb[145].mxu1 }
 0x371   : > { %v4455_v14 = vadd.f32 %v4078_v55, %v4066_v18  ;;  %v4080_v60 = vpop.f32.mrb[146].mxu1 }
 0x372   : > { %v4082_v62 = vpop.f32.mrb[147].mxu1 }
 0x373   : > { %v4456_v30 = vadd.f32 %v4082_v62, %v4070_v27  ;;  %v12567_v26 = vadd.f32 %v4455_v14, %v12370_v47  ;;  %v14775_v47 = vld [vmem:[#allocation47_spill] sm:$0xff] }
 0x374   : > { %8057 = vmatmul.mubr.msk.bf16.gmra.mrb[252].mxu1 %vm14655_vm3, %v12564_v58 }
 0x375   : > { %v12573_v34 = vadd.f32 %v4456_v30, %v12384_v13  ;;  %5585 = vmatprep.mubr.bf16.mxu1 %v14658_v38  ;;  %v14768_v13 = vshrl.u32 %v14755_v39, 16  ;;  %v14769_v30 = vld [vmem:[#allocation42_spill] sm:$0xff] }
 0x377   : > { %v4086_v32 = vpop.f32.mrb[148].mxu1  ;;  %v5270_v62 = vor.u32 %v5268_v5, %v14768_v13  ;;  %v9787_v5 = vld [vmem:[%s14244_s2 + $0x20] ss:$12 sps:$4 sm:$0xff]  }
 0x378   : > { %v4088_v18 = vpop.f32.mrb[149].mxu1 }
 0x379   : > { %v4457_v55 = vadd.f32 %v4088_v18, %v4076_v19  ;;  %v4090_v57 = vpop.f32.mrb[150].mxu1  ;;  %v14770_v19 = vshll.u32 %v14769_v30, 16 }
 0x37a   : > { %v4092_v45 = vpop.f32.mrb[151].mxu1 }
 0x37b   : > { %v4458_v35 = vadd.f32 %v4092_v45, %v4080_v60  ;;  %v12577_v27 = vadd.f32 %v4457_v55, %v12415_v11  ;;  %v5271_v18 = vrot.slane %v14770_v19, 1  ;;  %v9785_v11 = vld [vmem:[%s14244_s2 + $0x8] ss:$12 sps:$4 sm:$0xff]   ;;  %v9786_v60 = vld [vmem:[%s14244_s2 + $0xe0] ss:$12 sps:$4 sm:$0xff]  }
 0x37c   : > { %8058 = vmatmul.mubr.msk.bf16.vlgmr.msra.gmra.mrb[192].mxu1 %vm14657_vm7, %v12549_v37  ;;  %v9788_v19 = vld [vmem:[%s14244_s2 + $0xf8] ss:$12 sps:$4 sm:$0xff]   ;;  %v14776_v37 = vshll.u32 %v14775_v47, 16 }
 0x37d   : > { %v12583_v14 = vadd.f32 %v4458_v35, %v12430_v12  ;;  %5595 = vmatprep.mubr.bf16.mxu1 %v14658_v38  ;;  %8676 = vmatpush3.bf16.msra.mxu1 %v9785_v11  ;;  %v12597_v31 = vsel %vm14771_vm2, %v5270_v62, %v5271_v18 }
 0x37e   : > { %8677 = vmatprep.subr.bf16.mxu1 %v9786_v60  ;;  %14772 = vst [vmem:[#allocation42_spill] sm:$0xff] %v12597_v31  ;;  %v5274_v0 = vrot.slane %v14776_v37, 1  ;;  %v9791_v37 = vld [vmem:[%s14244_s2 + $0x50] ss:$12 sps:$4 sm:$0xff]  }
 0x37f   : > { %v4096_v12 = vpop.f32.mrb[152].mxu1 }
 0x380   : > { %v4098_v55 = vpop.f32.mrb[153].mxu1 }
 0x381   : > { %v4459_v45 = vadd.f32 %v4098_v55, %v4086_v32  ;;  %v4100_v35 = vpop.f32.mrb[154].mxu1  ;;  %8678 = vmatpush3.bf16.msra.mxu1 %v9787_v5  ;;  %v14774_v55 = vshrl.u32 %v14769_v30, 16 }
 0x382   : > { %v4102_v13 = vpop.f32.mrb[155].mxu1  ;;  %8679 = vmatprep.subr.bf16.mxu1 %v9788_v19 }
 0x383   : > { %v4460_v11 = vadd.f32 %v4102_v13, %v4090_v57  ;;  %v12606_v60 = vadd.f32 %v4459_v45, %v12409_v61  ;;  %v5273_v5 = vor.u32 %v5271_v18, %v14774_v55  ;;  %v9789_v61 = vld [vmem:[%s14244_s2 + $0x38] ss:$12 sps:$4 sm:$0xff]   ;;  %v9790_v57 = vld [vmem:[%s14244_s2 + $0x110] ss:$12 sps:$4 sm:$0xff]   ;;  %v9792_v55 = vld [vmem:[%s14244_s2 + $0x128] ss:$12 sps:$4 sm:$0xff]  }
 0x384   : > { %8059 = vmatmul.mubr.msk.bf16.gmra.mrb[196].mxu1 %vm14660_vm6, %v12597_v31  ;;  %v14788_v31 = vld [vmem:[#allocation51_spill] sm:$0xff] }
 0x385   : > { %v12612_v62 = vadd.f32 %v4460_v11, %v12424_v52  ;;  %5605 = vmatprep.mubr.bf16.mxu1 %v14658_v38  ;;  %8680 = vmatpush3.bf16.msra.mxu1 %v9789_v61  ;;  %v12628_v18 = vsel %vm14777_vm13, %v5273_v5, %v5274_v0  ;;  %v14780_v5 = vshrl.u32 %v14775_v47, 16  ;;  %vm14790_vm13 = vmmov %vm14771_vm2 }
 0x386   : > { %8681 = vmatprep.subr.bf16.mxu1 %v9790_v57  ;;  %14778 = vst [vmem:[#allocation47_spill] sm:$0xff] %v12628_v18 }
 0x387   : > { %v4106_v52 = vpop.f32.mrb[156].mxu1  ;;  %v5276_v57 = vor.u32 %v5274_v0, %v14780_v5 }
 0x388   : > { %v4107_v45 = vpop.f32.mrb[157].mxu1  ;;  %v14781_v52 = vshll.u32 %v12089_v17, 16 }
 0x389   : > { %v12625_v13 = vadd.f32 %v4107_v45, %v4096_v12  ;;  %v4109_v19 = vpop.f32.mrb[158].mxu1  ;;  %8682 = vmatpush3.bf16.msra.mxu1 %v9791_v37  ;;  %v14782_v12 = vld [vmem:[#allocation53_spill] sm:$0xff] }
 0x38a   : > { %v4110_v11 = vpop.f32.mrb[159].mxu1  ;;  %8683 = vmatprep.subr.bf16.mxu1 %v9792_v55  ;;  %v5277_v45 = vrot.slane %v14781_v52, 1  ;;  %v9793_v19 = vld [vmem:[%s14244_s2 + $0x68] ss:$12 sps:$4 sm:$0xff]  }
 0x38b   : > { %v12636_v61 = vadd.f32 %v4110_v11, %v4100_v35  ;;  %v9794_v35 = vld [vmem:[%s14244_s2 + $0x140] ss:$12 sps:$4 sm:$0xff]  }
 0x38c   : > { %8060 = vmatmul.mubr.msk.bf16.gmra.mrb[200].mxu1 %vm14662_vm1, %v12628_v18  ;;  %v12659_v52 = vsel %vm14771_vm2, %v5276_v57, %v5277_v45  ;;  %v14784_v18 = vld [vmem:[#allocation58_spill] sm:$0xff] }
 0x38d   : > { %5615 = vmatprep.mubr.bf16.mxu1 %v14658_v38  ;;  %8684 = vmatpush3.bf16.msra.mxu1 %v9793_v19  ;;  %14783 = vst [vmem:[#allocation53_spill] sm:$0xff] %v12659_v52  ;;  %v9795_v19 = vld [vmem:[%s14244_s2 + $0x80] ss:$12 sps:$4 sm:$0xff]  }
 0x38e   : > { %8685 = vmatprep.subr.bf16.mxu1 %v9794_v35 }
 0x38f   : > { %v8989_v37 = vpop.f32.mrb[160].mxu1 }
 0x390   : > { %v12653_v11 = vadd.f32 %v8989_v37, %v12189_v59  ;;  %v4673_v55 = vpop.f32.mrb[161].mxu1  ;;  %v9796_v59 = vld [vmem:[%s14244_s2 + $0x158] ss:$12 sps:$4 sm:$0xff]  }
 0x391   : > { %v12656_v0 = vadd.f32 %v4673_v55, %v14782_v12  ;;  %v8990_v5 = vpop.f32.mrb[162].mxu1  ;;  %8686 = vmatpush3.bf16.msra.mxu1 %v9795_v19  ;;  %v14785_v12 = vld [vmem:[#allocation54_spill] sm:$0xff] }
 0x392   : > { %v12665_v32 = vadd.f32 %v8990_v5, %v14784_v18  ;;  %v4676_v35 = vpop.f32.mrb[163].mxu1  ;;  %8687 = vmatprep.subr.bf16.mxu1 %v9796_v59  ;;  %v14787_v5 = vshrl.u32 %v12089_v17, 16  ;;  %v14789_v59 = vshll.u32 %v14788_v31, 16 }
 0x393   : > { %v12671_v37 = vadd.f32 %v4676_v35, %v14785_v12  ;;  %v9797_v35 = vld [vmem:[%s14244_s2 + $0x98] ss:$12 sps:$4 sm:$0xff]   ;;  %v9798_v12 = vld [vmem:[%s14244_s2 + $0x170] ss:$12 sps:$4 sm:$0xff]  }
 0x394   : > { %8061 = vmatmul.mubr.msk.bf16.gmra.mrb[204].mxu1 %vm10924_vm10, %v12659_v52  ;;  %v5279_v19 = vor.u32 %v5277_v45, %v14787_v5  ;;  %v5280_v58 = vrot.slane %v14789_v59, 1 }
 0x395   : > { %5625 = vmatprep.mubr.bf16.mxu1 %v14658_v38  ;;  %8688 = vmatpush3.bf16.msra.mxu1 %v9797_v35  ;;  %v9799_v35 = vld [vmem:[%s14244_s2 + $0xb0] ss:$12 sps:$4 sm:$0xff]  }
 0x396   : > { %8689 = vmatprep.subr.bf16.mxu1 %v9798_v12  ;;  %v12698_v59 = vsel %vm14790_vm13, %v5279_v19, %v5280_v58  ;;  %v14794_v19 = vshrl.u32 %v14788_v31, 16 }
 0x397   : > { %v8993_v57 = vpop.f32.mrb[164].mxu1  ;;  %14791 = vst [vmem:[#allocation58_spill] sm:$0xff] %v12698_v59 }
 0x398   : > { %v12692_v18 = vadd.f32 %v8993_v57, %v12264_v16  ;;  %v4689_v55 = vpop.f32.mrb[165].mxu1  ;;  %v9800_v16 = vld [vmem:[%s14244_s2 + $0x188] ss:$12 sps:$4 sm:$0xff]  }
 0x399   : > { %v12695_v45 = vadd.f32 %v4689_v55, %v12222_v22  ;;  %v8994_v5 = vpop.f32.mrb[166].mxu1  ;;  %8690 = vmatpush3.bf16.msra.mxu1 %v9799_v35  ;;  %v14792_v55 = vld [vmem:[#allocation28_spill] sm:$0xff]  ;;  %v14795_v35 = vshll.u32 %v12173_v46, 16 }
 0x39a   : > { %v12704_v52 = vadd.f32 %v8994_v5, %v12279_v42  ;;  %v4692_v12 = vpop.f32.mrb[167].mxu1  ;;  %9067 = vmatprep.subr.bf16.mxu1 %v9800_v16  ;;  %vm14793_vm2 = vnez %v14792_v55  ;;  %v5282_v5 = vor.u32 %v5280_v58, %v14794_v19 }
 0x39b   : > { %v12710_v22 = vadd.f32 %v4692_v12, %v12232_v4  ;;  %v5283_v16 = vrot.slane %v14795_v35, 1 }
 0x39c   : > { %8062 = vmatmul.mubr.msk.bf16.gmra.mrb[208].mxu1 %vm14793_vm2, %v12698_v59 }
 0x39d   : > { %5635 = vmatprep.mubr.bf16.mxu1 %v14658_v38  ;;  %v12731_v59 = vsel %vm14790_vm13, %v5282_v5, %v5283_v16 }
 0x39e   : > { %14796 = vst [vmem:[#allocation54_spill] sm:$0xff] %v12731_v59 }
 0x39f   : > { %v8997_v4 = vpop.f32.mrb[168].mxu1 }
 0x3a0   : > { %v12725_v12 = vadd.f32 %v8997_v4, %v12349_v28  ;;  %v4705_v57 = vpop.f32.mrb[169].mxu1  ;;  %v14797_v28 = vld [vmem:[#allocation29_spill] sm:$0xff] }
 0x3a1   : > { %v12728_v43 = vadd.f32 %v4705_v57, %v12305_v53  ;;  %v8998_v55 = vpop.f32.mrb[170].mxu1  ;;  %vm14798_vm2 = vnez %v14797_v28  ;;  %v14799_v57 = vshrl.u32 %v12173_v46, 16 }
 0x3a2   : > { %v12734_v42 = vadd.f32 %v8998_v55, %v12365_v50  ;;  %v4708_v33 = vpop.f32.mrb[171].mxu1  ;;  %v14800_v55 = vshll.u32 %v12211_v24, 16 }
 0x3a3   : > { %v12737_v58 = vadd.f32 %v4708_v33, %v12315_v54  ;;  %v5285_v50 = vor.u32 %v5283_v16, %v14799_v57 }
 0x3a4   : > { %8063 = vmatmul.mubr.msk.bf16.gmra.mrb[212].mxu1 %vm14798_vm2, %v12731_v59  ;;  %v5286_v5 = vrot.slane %v14800_v55, 1 }
 0x3a5   : > { %5645 = vmatprep.mubr.bf16.mxu1 %v14658_v38 }
 0x3a6   : > { %v12758_v28 = vsel %vm14790_vm13, %v5285_v50, %v5286_v5  ;;  %v14803_v50 = vshrl.u32 %v12211_v24, 16 }
 0x3a7   : > { %v9001_v54 = vpop.f32.mrb[172].mxu1  ;;  %14801 = vst [vmem:[#allocation51_spill] sm:$0xff] %v12758_v28 }
 0x3a8   : > { %v12752_v33 = vadd.f32 %v9001_v54, %v12433_v36  ;;  %v4721_v35 = vpop.f32.mrb[173].mxu1 }
 0x3a9   : > { %v12755_v4 = vadd.f32 %v4721_v35, %v12391_v3  ;;  %v9002_v19 = vpop.f32.mrb[174].mxu1 }
 0x3aa   : > { %v12761_v53 = vadd.f32 %v9002_v19, %v12448_v10  ;;  %v4724_v59 = vpop.f32.mrb[175].mxu1  ;;  %v5288_v10 = vor.u32 %v5286_v5, %v14803_v50  ;;  %v14804_v19 = vshll.u32 %v12253_v21, 16 }
 0x3ab   : > { %v12764_v16 = vadd.f32 %v4724_v59, %v12401_v56 }
 0x3ac   : > { %8064 = vmatmul.mubr.msk.bf16.gmra.mrb[216].mxu1 %vm10954_vm15, %v12758_v28  ;;  %v5289_v55 = vrot.slane %v14804_v19, 1  ;;  %v14807_v19 = vshll.u32 %v12289_v44, 16 }
 0x3ad   : > { %5655 = vmatprep.mubr.bf16.mxu1 %v14658_v38 }
 0x3ae   : > { %v12781_v36 = vsel %vm14790_vm13, %v5288_v10, %v5289_v55  ;;  %v5292_v10 = vrot.slane %v14807_v19, 1 }
 0x3af   : > { %v9005_v56 = vpop.f32.mrb[176].mxu1 }
 0x3b0   : > { %v4818_v59 = vadd.f32 %v9005_v56, %v12497_v49  ;;  %v4737_v54 = vpop.f32.mrb[177].mxu1  ;;  %v14806_v49 = vshrl.u32 %v12253_v21, 16 }
 0x3b1   : > { %v4816_v35 = vadd.f32 %v4737_v54, %v12465_v7  ;;  %v9006_v57 = vpop.f32.mrb[178].mxu1 }
 0x3b2   : > { %v4819_v3 = vadd.f32 %v9006_v57, %v12505_v8  ;;  %v4740_v28 = vpop.f32.mrb[179].mxu1  ;;  %v5291_v7 = vor.u32 %v5289_v55, %v14806_v49 }
 0x3b3   : > { %v4817_v20 = vadd.f32 %v4740_v28, %v12475_v23  ;;  %v14808_v23 = vpack.c.bf16 %v12671_v37, %v12656_v0 }
 0x3b4   : > { %v4841_v24 = vpack.c.bf16 %v4819_v3, %v4818_v59  ;;  %8065 = vmatmul.mubr.msk.bf16.gmra.mrb[220].mxu1 %vm10972_vm4, %v12781_v36  ;;  %v12799_v3 = vsel %vm14790_vm13, %v5291_v7, %v5292_v10 }
 0x3b5   : > { %v4840_v50 = vpack.c.bf16 %v4817_v20, %v4816_v35  ;;  %5665 = vmatprep.mubr.bf16.mxu1 %v14658_v38 }
 0x3b7   : > { %v9009_v56 = vpop.f32.mrb[180].mxu1  ;;  %8499 = vmatprep.subr.bf16.mxu0 %v4840_v50 }
 0x3b8   : > { %v4822_v8 = vadd.f32 %v9009_v56, %v12552_v1  ;;  %v4753_v57 = vpop.f32.mrb[181].mxu1  ;;  %8500 = vmatpush3.bf16.msra.mxu0 %v14808_v23  ;;  %v14809_v1 = vpack.c.bf16 %v12665_v32, %v12653_v11  ;;  %v14813_v32 = vpack.c.bf16 %v12710_v22, %v12695_v45  ;;  %v14816_v22 = vshrl.u32 %v12337_v63, 16 }
 0x3b9   : > { %v4820_v28 = vadd.f32 %v4753_v57, %v12524_v41  ;;  %v9010_v20 = vpop.f32.mrb[182].mxu1  ;;  %8501 = vmatprep.subr.bf16.mxu0 %v4841_v24  ;;  %v14811_v24 = vshrl.u32 %v12289_v44, 16 }
 0x3ba   : > { %v4823_v55 = vadd.f32 %v9010_v20, %v12558_v6  ;;  %v4756_v59 = vpop.f32.mrb[183].mxu1  ;;  %v14812_v6 = vshll.u32 %v12337_v63, 16 }
 0x3bb   : > { %v4821_v54 = vadd.f32 %v4756_v59, %v12532_v29  ;;  %v5294_v37 = vor.u32 %v5292_v10, %v14811_v24 }
 0x3bc   : > { %v4843_v35 = vpack.c.bf16 %v4823_v55, %v4822_v8  ;;  %8502 = vmatpush3.bf16.msra.mxu0 %v14809_v1  ;;  %8066 = vmatmul.mubr.msk.bf16.gmra.mrb[224].mxu1 %vm10978_vm12, %v12799_v3  ;;  %v5295_v50 = vrot.slane %v14812_v6, 1 }
 0x3bd   : > { %v4842_v41 = vpack.c.bf16 %v4821_v54, %v4820_v28  ;;  %5675 = vmatprep.mubr.bf16.mxu1 %v14658_v38 }
 0x3be   : > { %v12820_v56 = vsel %vm14790_vm13, %v5294_v37, %v5295_v50  ;;  %v5297_v28 = vor.u32 %v5295_v50, %v14816_v22  ;;  %v14829_v22 = vshrl.u32 %v12455_v51, 16 }
 0x3bf   : > { %v9013_v49 = vpop.f32.mrb[184].mxu1  ;;  %8503 = vmatprep.subr.bf16.mxu0 %v4842_v41 }
 0x3c0   : > { %v4826_v29 = vadd.f32 %v9013_v49, %v12577_v27  ;;  %v4769_v7 = vpop.f32.mrb[185].mxu1  ;;  %8504 = vmatpush3.bf16.msra.mxu0 %v14813_v32  ;;  %v14814_v27 = vpack.c.bf16 %v12704_v52, %v12692_v18  ;;  %v14818_v52 = vpack.c.bf16 %v12737_v58, %v12728_v43  ;;  %v14821_v58 = vshrl.u32 %v12375_v48, 16 }
 0x3c1   : > { %v4824_v11 = vadd.f32 %v4769_v7, %v12567_v26  ;;  %v9014_v19 = vpop.f32.mrb[186].mxu1  ;;  %8505 = vmatprep.subr.bf16.mxu0 %v4843_v35  ;;  %v14824_v49 = vpack.c.bf16 %v12761_v53, %v12752_v33  ;;  %v14825_v7 = vld [vmem:[#allocation35_spill] sm:$0xff]  ;;  %v14827_v53 = vshll.u32 %v12455_v51, 16 }
 0x3c2   : > { %v4827_v10 = vadd.f32 %v9014_v19, %v12583_v14  ;;  %v4772_v8 = vpop.f32.mrb[187].mxu1  ;;  %v14817_v14 = vshll.u32 %v12375_v48, 16  ;;  %v9803_v19 = vld [vmem:[%s14243_s1 + $0xe0] ss:$12 sps:$4 sm:$0xff]  }
 0x3c3   : > { %v4825_v57 = vadd.f32 %v4772_v8, %v12573_v34  ;;  %v5304_v33 = vrot.slane %v14827_v53, 1  ;;  %v9690_v8 = vld [vmem:[%s14246_s4 + $0x10] ss:$8 sps:$4 sm:$0xff]  }
 0x3c4   : > { %v4845_v23 = vpack.c.bf16 %v4827_v10, %v4826_v29  ;;  %8506 = vmatpush3.bf16.msra.mxu0 %v14814_v27  ;;  %8067 = vmatmul.mubr.msk.bf16.gmra.mrb[228].mxu1 %vm10996_vm0, %v12820_v56  ;;  %v5298_v20 = vrot.slane %v14817_v14, 1  ;;  %v9688_v29 = vld [vmem:[%s14246_s4 + $0x14] ss:$8 sps:$4 sm:$0xff]   ;;  %v14830_v14 = vshll.u32 %v12488_v15, 16 }
 0x3c5   : > { %v4844_v26 = vpack.c.bf16 %v4825_v57, %v4824_v11  ;;  %5685 = vmatprep.mubr.bf16.mxu1 %v14658_v38  ;;  %v9802_v11 = vld [vmem:[%s14243_s1 + $0x8] ss:$12 sps:$4 sm:$0xff]   ;;  %v9804_v57 = vld [vmem:[%s14243_s1 + $0x20] ss:$12 sps:$4 sm:$0xff]   ;;  %v14828_v27 = vld [vmem:[#allocation36_spill] sm:$0xff] }
 0x3c6   : > { %v12841_v35 = vsel %vm14790_vm13, %v5297_v28, %v5298_v20  ;;  %v5300_v6 = vor.u32 %v5298_v20, %v14821_v58  ;;  %v5306_v28 = vor.u32 %v5304_v33, %v14829_v22  ;;  %v5307_v20 = vrot.slane %v14830_v14, 1  ;;  %v9810_v58 = vld [vmem:[%s14243_s1 + $0x68] ss:$12 sps:$4 sm:$0xff]  }
 0x3c7   : > { %v9017_v55 = vpop.f32.mrb[188].mxu1  ;;  %8507 = vmatprep.subr.bf16.mxu0 %v4844_v26  ;;  %v9805_v26 = vld [vmem:[%s14243_s1 + $0xf8] ss:$12 sps:$4 sm:$0xff]   ;;  %v14837_v53 = vld [vmem:[#allocation39_spill] sm:$0xff]  ;;  %v14844_v22 = vld [vmem:[#allocation46_spill] sm:$0xff] }
 0x3c8   : > { %v4830_v34 = vadd.f32 %v9017_v55, %v12625_v13  ;;  %v4785_v59 = vpop.f32.mrb[189].mxu1  ;;  %8508 = vmatpush3.bf16.msra.mxu0 %v14818_v52  ;;  %v14819_v13 = vpack.c.bf16 %v12734_v42, %v12725_v12  ;;  %v9685_v12 = vld [vmem:[%s14246_s4] ss:$8 sps:$4 sm:$0xff]   ;;  %v9806_v55 = vld [vmem:[%s14243_s1 + $0x38] ss:$12 sps:$4 sm:$0xff]  }
 0x3c9   : > { %v4828_v18 = vadd.f32 %v4785_v59, %v12606_v60  ;;  %v9018_v54 = vpop.f32.mrb[190].mxu1  ;;  %8509 = vmatprep.subr.bf16.mxu0 %v4845_v23  ;;  %v9692_v23 = vld [vmem:[%s14246_s4 + $0x24] ss:$8 sps:$4 sm:$0xff]   ;;  %v12918_v59 = vsel %vm14790_vm13, %v5306_v28, %v5307_v20  ;;  %v9694_v52 = vld [vmem:[%s14246_s4 + $0x20] ss:$8 sps:$4 sm:$0xff]  }
 0x3ca   : > { %v4831_v1 = vadd.f32 %v9018_v54, %v12636_v61  ;;  %v4788_v41 = vpop.f32.mrb[191].mxu1  ;;  %v14822_v61 = vshll.u32 %v12421_v40, 16  ;;  %v9695_v54 = vld [vmem:[%s14246_s4 + $0x34] ss:$8 sps:$4 sm:$0xff]   ;;  %v14845_v28 = vld [vmem:[#allocation9_spill] sm:$0xff] }
 0x3cb   : > { %v4829_v24 = vadd.f32 %v4788_v41, %v12612_v62  ;;  %v14823_v62 = vpack.c.bf16 %v12764_v16, %v12755_v4  ;;  %v9801_v4 = vld [vmem:[%s14243_s1 + $0xc8] ss:$12 sps:$4 sm:$0xff]   ;;  %v14826_v16 = vshrl.u32 %v12421_v40, 16 }
 0x3cc   : > { %v4847_v37 = vpack.c.bf16 %v4831_v1, %v4830_v34  ;;  %8510 = vmatpush3.bf16.msra.mxu0 %v14819_v13  ;;  %8068 = vmatmul.mubr.msk.bf16.gmra.mrb[232].mxu1 %vm11001_vm9, %v12841_v35  ;;  %v5301_v50 = vrot.slane %v14822_v61, 1  ;;  %v9807_v34 = vld [vmem:[%s14243_s1 + $0x110] ss:$12 sps:$4 sm:$0xff]   ;;  %v14831_v1 = vld [vmem:[#allocation37_spill] sm:$0xff]  ;;  %v9809_v41 = vld [vmem:[%s14243_s1 + $0x128] ss:$12 sps:$4 sm:$0xff]  }
 0x3cd   : > { %v4846_v60 = vpack.c.bf16 %v4829_v24, %v4828_v18  ;;  %5695 = vmatprep.mubr.bf16.mxu1 %v14658_v38  ;;  %v9808_v18 = vld [vmem:[%s14243_s1 + $0x50] ss:$12 sps:$4 sm:$0xff]   ;;  %v14832_v24 = vshrl.u32 %v12488_v15, 16  ;;  %v14833_v13 = vshll.u32 %v12521_v2, 16  ;;  %v9821_v14 = vld [vmem:[%s14243_s1 + $0x1e8] ss:$12 sps:$4 sm:$0xff]  }
 0x3ce   : > { %v12860_v42 = vsel %vm14790_vm13, %v5300_v6, %v5301_v50  ;;  %v5303_v32 = vor.u32 %v5301_v50, %v14826_v16  ;;  %v9811_v6 = vld [vmem:[%s14243_s1 + $0x140] ss:$12 sps:$4 sm:$0xff]   ;;  %v9697_v50 = vld [vmem:[%s14246_s4 + $0x30] ss:$8 sps:$4 sm:$0xff]  }
 0x3cf   : > { %8511 = vmatprep.subr.bf16.mxu0 %v4846_v60  ;;  %v5310_v60 = vrot.slane %v14833_v13, 1  ;;  %v9814_v16 = vld [vmem:[%s14243_s1 + $0x98] ss:$12 sps:$4 sm:$0xff]   ;;  %v14859_v13 = vld [vmem:[#allocation14_spill] sm:$0xff] }
 0x3d0   : > { %8512 = vmatpush3.bf16.msra.mxu0 %v14823_v62  ;;  %v12889_v10 = vsel %vm14790_vm13, %v5303_v32, %v5304_v33  ;;  %v9812_v62 = vld [vmem:[%s14243_s1 + $0x80] ss:$12 sps:$4 sm:$0xff]   ;;  %v9815_v32 = vld [vmem:[%s14243_s1 + $0x170] ss:$12 sps:$4 sm:$0xff]  }
 0x3d1   : > { %8513 = vmatprep.subr.bf16.mxu0 %v4847_v37  ;;  %v5309_v37 = vor.u32 %v5307_v20, %v14832_v24  ;;  %v14847_v20 = vld [vmem:[#allocation48_spill] sm:$0xff] }
 0x3d2   : > { %v14854_v24 = vld [vmem:[#allocation12_spill] sm:$0xff] }
 0x3d3   : > { %v12947_v61 = vsel %vm14790_vm13, %v5309_v37, %v5310_v60  ;;  %vm14838_vm13 = vnez %v14837_v53  ;;  %v14858_v37 = vld [vmem:[#allocation60_spill] sm:$0xff] }
 0x3d4   : > { %8514 = vmatpush3.bf16.msra.mxu0 %v14824_v49  ;;  %8069 = vmatmul.mubr.msk.bf16.gmra.mrb[236].mxu1 %vm11018_vm11, %v12860_v42  ;;  %v9813_v49 = vld [vmem:[%s14243_s1 + $0x158] ss:$12 sps:$4 sm:$0xff]  }
 0x3d5   : > { %8539 = vmatprep.subr.bf16.mxu0 %v9801_v4  ;;  %5705 = vmatprep.mubr.bf16.mxu1 %v14658_v38 }
 0x3d7   : > { %4921 = vmatmul.mubr.bf16.vlgmr.msra.gmra.mrb[160].mxu0 %v9685_v12  ;;  %v14834_v12 = vld [vmem:[#allocation38_spill] sm:$0xff] }
 0x3d8   : > { %8540 = vmatpush3.bf16.msra.mxu0 %v9802_v11  ;;  %4928 = vmatprep.mubr.bf16.mxu0 %v9688_v29  ;;  %v14836_v29 = vshrl.u32 %v12521_v2, 16  ;;  %v9816_v11 = vld [vmem:[%s14243_s1 + $0xb0] ss:$12 sps:$4 sm:$0xff]  }
 0x3d9   : > { %8541 = vmatprep.subr.bf16.mxu0 %v9803_v19  ;;  %v14839_v19 = vld [vmem:[#allocation40_spill] sm:$0xff] }
 0x3da   : > { %v5312_v4 = vor.u32 %v5310_v60, %v14836_v29  ;;  %v14861_v60 = vld [vmem:[#allocation59_spill] sm:$0xff] }
 0x3db   : > { %v14874_v29 = vld [vmem:[#allocation71_spill] sm:$0xff] }
 0x3dc   : > { %8542 = vmatpush3.bf16.msra.mxu0 %v9804_v57  ;;  %8070 = vmatmul.mubr.msk.bf16.gmra.mrb[240].mxu1 %vm11023_vm8, %v12889_v10  ;;  %v12973_v33 = vsel %vm14838_vm13, %v5312_v4, 0  ;;  %v14842_v57 = vld [vmem:[#allocation8_spill] sm:$0xff]  ;;  %vm14846_vm13 = vnez %v14845_v28 }
 0x3dd   : > { %8543 = vmatprep.subr.bf16.mxu0 %v9805_v26  ;;  %5715 = vmatprep.mubr.bf16.mxu1 %v14658_v38  ;;  %vm14843_vm8 = vnez %v14842_v57  ;;  %v9819_v26 = vld [vmem:[%s14243_s1 + $0x1b8] ss:$12 sps:$4 sm:$0xff]  }
 0x3df   : > { %4929 = vmatmul.mubr.bf16.gmra.mrb[164].mxu0 %v9690_v8  ;;  %v14841_v8 = vld [vmem:[#allocation43_spill] sm:$0xff] }
 0x3e0   : > { %8544 = vmatpush3.bf16.msra.mxu0 %v9806_v55  ;;  %4936 = vmatprep.mubr.bf16.mxu0 %v9692_v23  ;;  %v9818_v23 = vld [vmem:[%s14243_s1 + $0x1a0] ss:$12 sps:$4 sm:$0xff]  }
 0x3e1   : > { %8545 = vmatprep.subr.bf16.mxu0 %v9807_v34  ;;  %v14848_v55 = vld [vmem:[#allocation10_spill] sm:$0xff]  ;;  %v9823_v34 = vld [vmem:[%s14243_s1 + $0x218] ss:$12 sps:$4 sm:$0xff]  }
 0x3e4   : > { %8546 = vmatpush3.bf16.msra.mxu0 %v9808_v18  ;;  %8071 = vmatmul.mubr.msk.bf16.gmra.mrb[244].mxu1 %vm11042_vm5, %v12918_v59  ;;  %vm14835_vm5 = vnez %v14834_v12  ;;  %v14851_v18 = vld [vmem:[#allocation11_spill] sm:$0xff] }
 0x3e5   : > { %8547 = vmatprep.subr.bf16.mxu0 %v9809_v41  ;;  %5725 = vmatprep.mubr.bf16.mxu1 %v14658_v38  ;;  %v14853_v41 = vld [vmem:[#allocation55_spill] sm:$0xff] }
 0x3e7   : > { %4937 = vmatmul.mubr.bf16.gmra.mrb[168].mxu0 %v9694_v52  ;;  %v14850_v52 = vld [vmem:[#allocation52_spill] sm:$0xff] }
 0x3e8   : > { %8548 = vmatpush3.bf16.msra.mxu0 %v9810_v58  ;;  %4944 = vmatprep.mubr.bf16.mxu0 %v9695_v54  ;;  %v9825_v54 = vld [vmem:[%s14244_s2 + $0x4] ss:$12 sps:$4 sm:$0xff]  }
 0x3e9   : > { %8549 = vmatprep.subr.bf16.mxu0 %v9811_v6  ;;  %v14862_v58 = vld [vmem:[#allocation63_spill] sm:$0xff] }
 0x3ea   : > { %v14863_v6 = vld [vmem:[#allocation15_spill] sm:$0xff] }
 0x3eb   : > { %vm14864_vm11 = vnez %v14863_v6 }
 0x3ec   : > { %8550 = vmatpush3.bf16.msra.mxu0 %v9812_v62  ;;  %8072 = vmatmul.mubr.msk.bf16.gmra.mrb[248].mxu1 %vm14835_vm5, %v12947_v61  ;;  %vm14840_vm5 = vnez %v14839_v19  ;;  %v14871_v62 = vld [vmem:[#allocation68_spill] sm:$0xff] }
 0x3ed   : > { %8551 = vmatprep.subr.bf16.mxu0 %v9813_v49  ;;  %5735 = vmatprep.mubr.bf16.mxu1 %v14658_v38  ;;  %v14872_v49 = vld [vmem:[#allocation18_spill] sm:$0xff] }
 0x3ef   : > { %4945 = vmatmul.mubr.bf16.gmra.mrb[172].mxu0 %v9697_v50  ;;  %v14865_v50 = vld [vmem:[#allocation64_spill] sm:$0xff] }
 0x3f0   : > { %8552 = vmatpush3.bf16.msra.mxu0 %v9814_v16  ;;  %5776 = vmatprep.mubr.bf16.mxu0 %v11936_v9  ;;  %v9817_v9 = vld [vmem:[%s14243_s1 + $0x188] ss:$12 sps:$4 sm:$0xff]  }
 0x3f1   : > { %8553 = vmatprep.subr.bf16.mxu0 %v9815_v32 }
 0x3f4   : > { %8554 = vmatpush3.bf16.msra.mxu0 %v9816_v11  ;;  %8073 = vmatmul.mubr.msk.bf16.gmra.mrb[252].mxu1 %vm14840_vm5, %v12973_v33  ;;  %vm14860_vm5 = vnez %v14859_v13  ;;  %v14877_v11 = vld [vmem:[#allocation72_spill] sm:$0xff] }
 0x3f5   : > { %9019 = vmatprep.subr.bf16.mxu0 %v9817_v9 }
 0x3f7   : > { %8074 = vmatmul.mubr.msk.bf16.vlgmr.msra.gmra.mrb[176].mxu0 %vm14843_vm8, %v14841_v8  ;;  %vm14849_vm8 = vnez %v14848_v55 }
 0x3f8   : > { %5782 = vmatprep.mubr.bf16.mxu0 %v14755_v39  ;;  %9020 = vmatpush3.bf16.msra.mxu0 %v9817_v9  ;;  %v9820_v39 = vld [vmem:[%s14243_s1 + $0x1d0] ss:$12 sps:$4 sm:$0xff]  }
 0x3f9   : > { %9021 = vmatprep.subr.bf16.mxu0 %v9818_v23 }
 0x3fc   : > { %9022 = vmatpush3.bf16.msra.mxu0 %v9818_v23 }
 0x3fd   : > { %9023 = vmatprep.subr.bf16.mxu0 %v9819_v26 }
 0x3ff   : > { %8075 = vmatmul.mubr.msk.bf16.gmra.mrb[180].mxu0 %vm14846_vm13, %v14844_v22  ;;  %vm14852_vm13 = vnez %v14851_v18 }
 0x400   : > { %5790 = vmatprep.mubr.bf16.mxu0 %v14769_v30  ;;  %9024 = vmatpush3.bf16.msra.mxu0 %v9819_v26  ;;  %v9822_v30 = vld [vmem:[%s14243_s1 + $0x200] ss:$12 sps:$4 sm:$0xff]  }
 0x401   : > { %9025 = vmatprep.subr.bf16.mxu0 %v9820_v39 }
 0x404   : > { %9026 = vmatpush3.bf16.msra.mxu0 %v9820_v39  ;;  %v14881_v39 = vld [vmem:[#allocation21_spill] sm:$0xff] }
 0x405   : > { %9027 = vmatprep.subr.bf16.mxu0 %v9821_v14 }
 0x407   : > { %8076 = vmatmul.mubr.msk.bf16.gmra.mrb[184].mxu0 %vm14849_vm8, %v14847_v20  ;;  %vm14855_vm8 = vnez %v14854_v24 }
 0x408   : > { %5798 = vmatprep.mubr.bf16.mxu0 %v14775_v47  ;;  %9028 = vmatpush3.bf16.msra.mxu0 %v9821_v14  ;;  %v9824_v47 = vld [vmem:[%s14243_s1 + $0x230] ss:$12 sps:$4 sm:$0xff]  }
 0x409   : > { %9029 = vmatprep.subr.bf16.mxu0 %v9822_v30 }
 0x40c   : > { %9030 = vmatpush3.bf16.msra.mxu0 %v9822_v30 }
 0x40d   : > { %9031 = vmatprep.subr.bf16.mxu0 %v9823_v34 }
 0x40f   : > { %8077 = vmatmul.mubr.msk.bf16.gmra.mrb[188].mxu0 %vm14852_vm13, %v14850_v52 }
 0x410   : > { %5806 = vmatprep.mubr.bf16.mxu0 %v12089_v17  ;;  %9032 = vmatpush3.bf16.msra.mxu0 %v9823_v34  ;;  %v14856_v17 = vld [vmem:[#allocation13_spill] sm:$0xff] }
 0x411   : > { %9033 = vmatprep.subr.bf16.mxu0 %v9824_v47  ;;  %vm14857_vm13 = vnez %v14856_v17 }
 0x414   : > { %9034 = vmatpush3.bf16.msra.mxu0 %v9824_v47  ;;  %v14883_v47 = vld [vmem:[#allocation41_spill] sm:$0xff] }
 0x415   : > { %6414 = vmatprep.subr.bf16.mxu0 %v9825_v54 }
 0x417   : > { %8078 = vmatmul.mubr.msk.bf16.gmra.mrb[192].mxu0 %vm14855_vm8, %v14853_v41 }
 0x418   : > { %5814 = vmatprep.mubr.bf16.mxu0 %v14788_v31  ;;  %v14866_v31 = vld [vmem:[#allocation16_spill] sm:$0xff] }
 0x419   : > { %vm14867_vm8 = vnez %v14866_v31 }
 0x41f   : > { %8079 = vmatmul.mubr.msk.bf16.gmra.mrb[196].mxu0 %vm14857_vm13, %v12209_v25  ;;  %v14868_v25 = vld [vmem:[#allocation67_spill] sm:$0xff] }
 0x420   : > { %5822 = vmatprep.mubr.bf16.mxu0 %v12173_v46  ;;  %v14869_v46 = vld [vmem:[#allocation17_spill] sm:$0xff] }
 0x421   : > { %vm14870_vm13 = vnez %v14869_v46 }
 0x427   : > { %8080 = vmatmul.mubr.msk.bf16.gmra.mrb[200].mxu0 %vm14860_vm5, %v14858_v37  ;;  %vm14873_vm5 = vnez %v14872_v49 }
 0x428   : > { %5830 = vmatprep.mubr.bf16.mxu0 %v14861_v60 }
 0x42f   : > { %8081 = vmatmul.mubr.msk.bf16.gmra.mrb[204].mxu0 %vm14864_vm11, %v14862_v58 }
 0x430   : > { %5838 = vmatprep.mubr.bf16.mxu0 %v12253_v21  ;;  %v14875_v21 = vld [vmem:[#allocation19_spill] sm:$0xff] }
 0x431   : > { %vm14876_vm11 = vnez %v14875_v21 }
 0x437   : > { %8082 = vmatmul.mubr.msk.bf16.gmra.mrb[208].mxu0 %vm14867_vm8, %v14865_v50 }
 0x438   : > { %5846 = vmatprep.mubr.bf16.mxu0 %v12289_v44 }
 0x43f   : > { %8083 = vmatmul.mubr.msk.bf16.gmra.mrb[212].mxu0 %vm14870_vm13, %v14868_v25  ;;  %v14885_v25 = vld [vmem:[#allocation77_spill] sm:$0xff] }
 0x440   : > { %5854 = vmatprep.mubr.bf16.mxu0 %v12337_v63  ;;  %v14878_v63 = vld [vmem:[#allocation20_spill] sm:$0xff] }
 0x441   : > { %vm14879_vm13 = vnez %v14878_v63 }
 0x447   : > { %8084 = vmatmul.mubr.msk.bf16.gmra.mrb[216].mxu0 %vm14873_vm5, %v14871_v62 }
 0x448   : > { %5862 = vmatprep.mubr.bf16.mxu0 %v12375_v48 }
 0x44f   : > { %8085 = vmatmul.mubr.msk.bf16.gmra.mrb[220].mxu0 %vm14876_vm11, %v14874_v29  ;;  %v5587_v4 = vpop.f32.mrb[192].mxu1  ;;  %vm14882_vm11 = vnez %v14881_v39 }
 0x450   : > { %5870 = vmatprep.mubr.bf16.mxu0 %v12421_v40  ;;  %v13056_v44 = vpop.f32.mrb[193].mxu1  ;;  %v14880_v40 = vld [vmem:[#allocation75_spill] sm:$0xff] }
 0x451   : > { %v5591_v16 = vpop.f32.mrb[194].mxu1 }
 0x452   : > { %v13058_v32 = vpop.f32.mrb[195].mxu1 }
 0x457   : > { %8086 = vmatmul.mubr.msk.bf16.gmra.mrb[224].mxu0 %vm14879_vm13, %v14877_v11  ;;  %v5597_v9 = vpop.f32.mrb[196].mxu1 }
 0x458   : > { %5878 = vmatprep.mubr.bf16.mxu0 %v12455_v51  ;;  %v5599_v48 = vpop.f32.mrb[197].mxu1 }
 0x459   : > { %v13064_v8 = vadd.f32 %v5599_v48, %v5587_v4  ;;  %v5601_v23 = vpop.f32.mrb[198].mxu1  ;;  %v14887_v4 = vld [vmem:[#allocation76_spill] sm:$0xff] }
 0x45a   : > { %v5603_v26 = vpop.f32.mrb[199].mxu1 }
 0x45b   : > { %v13066_v22 = vadd.f32 %v5603_v26, %v5591_v16  ;;  %v14889_v26 = vld [vmem:[#allocation42_spill] sm:$0xff] }
 0x45f   : > { %8087 = vmatmul.mubr.msk.bf16.gmra.mrb[228].mxu0 %vm14882_vm11, %v14880_v40  ;;  %v5607_v14 = vpop.f32.mrb[200].mxu1 }
 0x460   : > { %5886 = vmatprep.mubr.bf16.mxu0 %v12488_v15  ;;  %v5609_v20 = vpop.f32.mrb[201].mxu1 }
 0x461   : > { %v13072_v30 = vadd.f32 %v5609_v20, %v5597_v9  ;;  %v5611_v34 = vpop.f32.mrb[202].mxu1  ;;  %v14891_v20 = vld [vmem:[#allocation47_spill] sm:$0xff] }
 0x462   : > { %v5613_v52 = vpop.f32.mrb[203].mxu1 }
 0x463   : > { %v13074_v51 = vadd.f32 %v5613_v52, %v5601_v23 }
 0x467   : > { %8088 = vmatmul.mubr.msk.bf16.gmra.mrb[232].mxu0 %vm14763_vm14, %v14883_v47  ;;  %v5617_v41 = vpop.f32.mrb[204].mxu1  ;;  %v9826_v47 = vld [vmem:[%s14244_s2] ss:$12 sps:$4 sm:$0xff]  }
 0x468   : > { %5894 = vmatprep.mubr.bf16.mxu0 %v12521_v2  ;;  %v5619_v37 = vpop.f32.mrb[205].mxu1 }
 0x469   : > { %v13080_v60 = vadd.f32 %v5619_v37, %v5607_v14  ;;  %v5621_v58 = vpop.f32.mrb[206].mxu1 }
 0x46a   : > { %v5623_v50 = vpop.f32.mrb[207].mxu1 }
 0x46b   : > { %v13082_v15 = vadd.f32 %v5623_v50, %v5611_v34 }
 0x46f   : > { %8089 = vmatmul.mubr.msk.bf16.gmra.mrb[236].mxu0 %vm14655_vm3, %v14885_v25  ;;  %v5627_v29 = vpop.f32.mrb[208].mxu1 }
 0x470   : > { %9035 = vmatprep.mubr.msk.bf16.mxu0 %vm14657_vm7, %v14887_v4  ;;  %v5629_v11 = vpop.f32.mrb[209].mxu1  ;;  %v9828_v4 = vld [vmem:[%s14244_s2 + $0x18] ss:$12 sps:$4 sm:$0xff]  }
 0x471   : > { %v13090_v9 = vadd.f32 %v5629_v11, %v5617_v41  ;;  %v5631_v2 = vpop.f32.mrb[210].mxu1  ;;  %v9829_v11 = vld [vmem:[%s14244_s2 + $0x34] ss:$12 sps:$4 sm:$0xff]  }
 0x472   : > { %v5633_v48 = vpop.f32.mrb[211].mxu1 }
 0x473   : > { %v13092_v23 = vadd.f32 %v5633_v48, %v5621_v58  ;;  %v9827_v58 = vld [vmem:[%s14244_s2 + $0x1c] ss:$12 sps:$4 sm:$0xff]  }
 0x477   : > { %9036 = vmatmul.mubr.msk.bf16.vlgmr.msra.gmra.mrb[240].mxu0 %vm14660_vm6, %v14889_v26  ;;  %v5637_v14 = vpop.f32.mrb[212].mxu1 }
 0x478   : > { %9039 = vmatprep.mubr.msk.bf16.mxu0 %vm14662_vm1, %v14891_v20  ;;  %v5639_v52 = vpop.f32.mrb[213].mxu1  ;;  %6415 = vmatpush1.bf16.msra.mxu0 %v9826_v47  ;;  %v14895_v20 = vld [vmem:[#allocation58_spill] sm:$0xff]  ;;  %v9830_v47 = vld [vmem:[%s14244_s2 + $0x30] ss:$12 sps:$4 sm:$0xff]  }
 0x479   : > { %v13103_v41 = vadd.f32 %v5639_v52, %v5627_v29  ;;  %v5641_v37 = vpop.f32.mrb[214].mxu1  ;;  %6416 = vmatprep.subr.bf16.mxu0 %v9827_v58  ;;  %v14893_v29 = vld [vmem:[#allocation53_spill] sm:$0xff]  ;;  %v14896_v52 = vld [vmem:[#allocation28_spill] sm:$0xff] }
 0x47a   : > { %v5643_v50 = vpop.f32.mrb[215].mxu1  ;;  %vm14897_vm1 = vnez %v14896_v52  ;;  %v14900_v52 = vld [vmem:[#allocation51_spill] sm:$0xff] }
 0x47b   : > { %v13108_v25 = vadd.f32 %v5643_v50, %v5631_v2 }
 0x47c   : > { %6417 = vmatpush1.bf16.msra.mxu0 %v9828_v4  ;;  %v9831_v4 = vld [vmem:[%s14244_s2 + $0x4c] ss:$12 sps:$4 sm:$0xff]  }
 0x47d   : > { %6418 = vmatprep.subr.bf16.mxu0 %v9829_v11 }
 0x47f   : > { %9040 = vmatmul.mubr.msk.bf16.gmra.mrb[244].mxu0 %vm10924_vm10, %v14893_v29  ;;  %v5647_v26 = vpop.f32.mrb[216].mxu1 }
 0x480   : > { %9043 = vmatprep.mubr.msk.bf16.mxu0 %vm14897_vm1, %v14895_v20  ;;  %v5649_v2 = vpop.f32.mrb[217].mxu1  ;;  %6419 = vmatpush1.bf16.msra.mxu0 %v9830_v47  ;;  %v9832_v20 = vld [vmem:[%s14244_s2 + $0x48] ss:$12 sps:$4 sm:$0xff]   ;;  %v9833_v47 = vld [vmem:[%s14244_s2 + $0x64] ss:$12 sps:$4 sm:$0xff]  }
 0x481   : > { %v13125_v58 = vadd.f32 %v5649_v2, %v5637_v14  ;;  %v5651_v50 = vpop.f32.mrb[218].mxu1  ;;  %6420 = vmatprep.subr.bf16.mxu0 %v9831_v4  ;;  %v14898_v14 = vld [vmem:[#allocation54_spill] sm:$0xff] }
 0x482   : > { %v5653_v11 = vpop.f32.mrb[219].mxu1 }
 0x483   : > { %v13130_v29 = vadd.f32 %v5653_v11, %v5641_v37  ;;  %v9834_v11 = vld [vmem:[%s14244_s2 + $0x60] ss:$12 sps:$4 sm:$0xff]  }
 0x484   : > { %6421 = vmatpush1.bf16.msra.mxu0 %v9832_v20 }
 0x485   : > { %6422 = vmatprep.subr.bf16.mxu0 %v9833_v47  ;;  %v9835_v47 = vld [vmem:[%s14244_s2 + $0x7c] ss:$12 sps:$4 sm:$0xff]  }
 0x487   : > { %9044 = vmatmul.mubr.msk.bf16.gmra.mrb[248].mxu0 %vm14798_vm2, %v14898_v14  ;;  %v5657_v53 = vpop.f32.mrb[220].mxu1 }
 0x488   : > { %9047 = vmatprep.mubr.msk.bf16.mxu0 %vm10954_vm15, %v14900_v52  ;;  %v5659_v37 = vpop.f32.mrb[221].mxu1  ;;  %6423 = vmatpush1.bf16.msra.mxu0 %v9834_v11  ;;  %v9836_v52 = vld [vmem:[%s14244_s2 + $0x78] ss:$12 sps:$4 sm:$0xff]   ;;  %v9837_v11 = vld [vmem:[%s14244_s2 + $0x94] ss:$12 sps:$4 sm:$0xff]  }
 0x489   : > { %v13147_v20 = vadd.f32 %v5659_v37, %v5647_v26  ;;  %v5661_v48 = vpop.f32.mrb[222].mxu1  ;;  %6424 = vmatprep.subr.bf16.mxu0 %v9835_v47  ;;  %v9838_v37 = vld [vmem:[%s14244_s2 + $0x90] ss:$12 sps:$4 sm:$0xff]  }
 0x48a   : > { %v5663_v14 = vpop.f32.mrb[223].mxu1 }
 0x48b   : > { %v13152_v2 = vadd.f32 %v5663_v14, %v5651_v50 }
 0x48c   : > { %6425 = vmatpush1.bf16.msra.mxu0 %v9836_v52  ;;  %v9839_v52 = vld [vmem:[%s14244_s2 + $0xac] ss:$12 sps:$4 sm:$0xff]  }
 0x48d   : > { %6426 = vmatprep.subr.bf16.mxu0 %v9837_v11 }
 0x48f   : > { %9048 = vmatmul.mubr.msk.bf16.gmra.mrb[252].mxu0 %vm10972_vm4, %v12781_v36  ;;  %v5667_v26 = vpop.f32.mrb[224].mxu1 }
 0x490   : > { %9051 = vmatprep.mubr.msk.bf16.mxu0 %vm10978_vm12, %v12799_v3  ;;  %v5669_v50 = vpop.f32.mrb[225].mxu1  ;;  %6427 = vmatpush1.bf16.msra.mxu0 %v9838_v37  ;;  %v9840_v3 = vld [vmem:[%s14244_s2 + $0xa8] ss:$12 sps:$4 sm:$0xff]   ;;  %v9841_v37 = vld [vmem:[%s14244_s2 + $0xc4] ss:$12 sps:$4 sm:$0xff]  }
 0x491   : > { %v13169_v47 = vadd.f32 %v5669_v50, %v5657_v53  ;;  %v5671_v14 = vpop.f32.mrb[226].mxu1  ;;  %6428 = vmatprep.subr.bf16.mxu0 %v9839_v52  ;;  %v9842_v50 = vld [vmem:[%s14244_s2 + $0xc0] ss:$12 sps:$4 sm:$0xff]  }
 0x492   : > { %v5673_v36 = vpop.f32.mrb[227].mxu1 }
 0x493   : > { %v13174_v11 = vadd.f32 %v5673_v36, %v5661_v48 }
 0x494   : > { %6429 = vmatpush1.bf16.msra.mxu0 %v9840_v3  ;;  %v9843_v3 = vld [vmem:[%s14244_s2 + $0xdc] ss:$12 sps:$4 sm:$0xff]  }
 0x495   : > { %6430 = vmatprep.subr.bf16.mxu0 %v9841_v37 }
 0x497   : > { %9052 = vmatmul.mubr.msk.bf16.gmra.mrb[0].mxu0 %vm10996_vm0, %v12820_v56  ;;  %v5677_v53 = vpop.f32.mrb[228].mxu1  ;;  %vm14904_vm0 = vnez %v14828_v27 }
 0x498   : > { %9055 = vmatprep.mubr.msk.bf16.mxu0 %vm11001_vm9, %v12841_v35  ;;  %v5679_v48 = vpop.f32.mrb[229].mxu1  ;;  %6431 = vmatpush1.bf16.msra.mxu0 %v9842_v50  ;;  %v9844_v35 = vld [vmem:[%s14244_s2 + $0xd8] ss:$12 sps:$4 sm:$0xff]   ;;  %v9845_v50 = vld [vmem:[%s14244_s2 + $0xf4] ss:$12 sps:$4 sm:$0xff]   ;;  %vm14903_vm9 = vnez %v14825_v7 }
 0x499   : > { %v13191_v52 = vadd.f32 %v5679_v48, %v5667_v26  ;;  %v5681_v36 = vpop.f32.mrb[230].mxu1  ;;  %6432 = vmatprep.subr.bf16.mxu0 %v9843_v3  ;;  %v9846_v48 = vld [vmem:[%s14244_s2 + $0xf0] ss:$12 sps:$4 sm:$0xff]   ;;  %v9852_v7 = vld [vmem:[%s14244_s2 + $0x138] ss:$12 sps:$4 sm:$0xff]  }
 0x49a   : > { %v5683_v56 = vpop.f32.mrb[231].mxu1 }
 0x49b   : > { %v13196_v37 = vadd.f32 %v5683_v56, %v5671_v14 }
 0x49c   : > { %6433 = vmatpush1.bf16.msra.mxu0 %v9844_v35  ;;  %v9847_v35 = vld [vmem:[%s14244_s2 + $0x10c] ss:$12 sps:$4 sm:$0xff]  }
 0x49d   : > { %14902 = vst [vmem:[#allocation43_spill] sm:$0xff] %v13196_v37  ;;  %6434 = vmatprep.subr.bf16.mxu0 %v9845_v50 }
 0x49f   : > { %9056 = vmatmul.mubr.msk.bf16.gmra.mrb[4].mxu0 %vm14903_vm9, %v12860_v42  ;;  %v5687_v26 = vpop.f32.mrb[232].mxu1  ;;  %vm14906_vm9 = vnez %v14834_v12 }
 0x4a0   : > { %9059 = vmatprep.mubr.msk.bf16.mxu0 %vm14904_vm0, %v12889_v10  ;;  %v5689_v14 = vpop.f32.mrb[233].mxu1  ;;  %6435 = vmatpush1.bf16.msra.mxu0 %v9846_v48  ;;  %v9848_v10 = vld [vmem:[%s14244_s2 + $0x108] ss:$12 sps:$4 sm:$0xff]   ;;  %vm14905_vm0 = vnez %v14831_v1  ;;  %v9850_v48 = vld [vmem:[%s14244_s2 + $0x120] ss:$12 sps:$4 sm:$0xff]  }
 0x4a1   : > { %v13213_v3 = vadd.f32 %v5689_v14, %v5677_v53  ;;  %v5691_v56 = vpop.f32.mrb[234].mxu1  ;;  %6436 = vmatprep.subr.bf16.mxu0 %v9847_v35  ;;  %v9849_v53 = vld [vmem:[%s14244_s2 + $0x124] ss:$12 sps:$4 sm:$0xff]  }
 0x4a2   : > { %v5693_v42 = vpop.f32.mrb[235].mxu1 }
 0x4a3   : > { %v13218_v50 = vadd.f32 %v5693_v42, %v5681_v36 }
 0x4a4   : > { %6437 = vmatpush1.bf16.msra.mxu0 %v9848_v10 }
 0x4a5   : > { %6438 = vmatprep.subr.bf16.mxu0 %v9849_v53 }
 0x4a7   : > { %9060 = vmatmul.mubr.msk.bf16.gmra.mrb[8].mxu0 %vm14905_vm0, %v12918_v59  ;;  %v5697_v14 = vpop.f32.mrb[236].mxu1  ;;  %v9851_v59 = vld [vmem:[%s14244_s2 + $0x13c] ss:$12 sps:$4 sm:$0xff]   ;;  %vm14928_vm0 = vnez %v14842_v57 }
 0x4a8   : > { %9063 = vmatprep.mubr.msk.bf16.mxu0 %vm14906_vm9, %v12947_v61  ;;  %v5699_v36 = vpop.f32.mrb[237].mxu1  ;;  %6439 = vmatpush1.bf16.msra.mxu0 %v9850_v48  ;;  %vm14909_vm9 = vnez %v14839_v19 }
 0x4a9   : > { %v13238_v35 = vadd.f32 %v5699_v36, %v5687_v26  ;;  %v5701_v42 = vpop.f32.mrb[238].mxu1  ;;  %6440 = vmatprep.subr.bf16.mxu0 %v9851_v59  ;;  %v9853_v36 = vld [vmem:[%s14244_s2 + $0x154] ss:$12 sps:$4 sm:$0xff]  }
 0x4aa   : > { %v8515_v10 = vpop.f32.mrb[160].mxu0  ;;  %v5703_v53 = vpop.f32.mrb[239].mxu1 }
 0x4ab   : > { %14907 = vst [vmem:[#allocation8_spill] sm:$0xff] %v13238_v35  ;;  %v8516_v1 = vpop.f32.mrb[161].mxu0  ;;  %v13243_v27 = vadd.f32 %v5703_v53, %v5691_v56 }
 0x4ac   : > { %v8517_v61 = vadd.f32 %v8516_v1, %v8515_v10  ;;  %v8518_v12 = vpop.f32.mrb[162].mxu0  ;;  %6441 = vmatpush1.bf16.msra.mxu0 %v9852_v7  ;;  %v9854_v7 = vld [vmem:[%s14244_s2 + $0x150] ss:$12 sps:$4 sm:$0xff]  }
 0x4ad   : > { %14908 = vst [vmem:[#allocation46_spill] sm:$0xff] %v13243_v27  ;;  %v8519_v26 = vpop.f32.mrb[163].mxu0  ;;  %6442 = vmatprep.subr.bf16.mxu0 %v9853_v36 }
 0x4ae   : > { %4953 = vst [vmem:[%s13251_s13] sm:$0xff] %v8517_v61  ;;  %v8520_v56 = vadd.f32 %v8519_v26, %v8518_v12  ;;  %v9855_v12 = vld [vmem:[%s14244_s2 + $0x16c] ss:$12 sps:$4 sm:$0xff]  }
 0x4af   : > { %9064 = vmatmul.mubr.msk.bf16.gmra.mrb[12].mxu0 %vm14909_vm9, %v12973_v33  ;;  %v5707_v1 = vpop.f32.mrb[240].mxu1 }
 0x4b0   : > { %4954 = vst [vmem:[%s13251_s13 + $0x8] sm:$0xff] %v8520_v56  ;;  %v5709_v48 = vpop.f32.mrb[241].mxu1  ;;  %6443 = vmatpush1.bf16.msra.mxu0 %v9854_v7  ;;  %v9856_v7 = vld [vmem:[%s14244_s2 + $0x168] ss:$12 sps:$4 sm:$0xff]  }
 0x4b1   : > { %v13261_v59 = vadd.f32 %v5709_v48, %v5697_v14  ;;  %v5711_v10 = vpop.f32.mrb[242].mxu1  ;;  %6444 = vmatprep.subr.bf16.mxu0 %v9855_v12  ;;  %v9857_v48 = vld [vmem:[%s14244_s2 + $0x184] ss:$12 sps:$4 sm:$0xff]  }
 0x4b2   : > { %v8521_v53 = vpop.f32.mrb[164].mxu0  ;;  %v5713_v33 = vpop.f32.mrb[243].mxu1 }
 0x4b3   : > { %14910 = vst [vmem:[#allocation9_spill] sm:$0xff] %v13261_v59  ;;  %v8522_v61 = vpop.f32.mrb[165].mxu0  ;;  %v13266_v26 = vadd.f32 %v5713_v33, %v5701_v42 }
 0x4b4   : > { %v8523_v36 = vadd.f32 %v8522_v61, %v8521_v53  ;;  %v8524_v56 = vpop.f32.mrb[166].mxu0  ;;  %6445 = vmatpush1.bf16.msra.mxu0 %v9856_v7 }
 0x4b5   : > { %14911 = vst [vmem:[#allocation48_spill] sm:$0xff] %v13266_v26  ;;  %v8525_v14 = vpop.f32.mrb[167].mxu0  ;;  %6605 = vmatprep.subr.bf16.mxu0 %v9857_v48 }
 0x4b6   : > { %4955 = vst [vmem:[%s13251_s13 + $0x10] sm:$0xff] %v8523_v36  ;;  %v8526_v12 = vadd.f32 %v8525_v14, %v8524_v56 }
 0x4b7   : > { %v5717_v19 = vpop.f32.mrb[244].mxu1 }
 0x4b8   : > { %4956 = vst [vmem:[%s13251_s13 + $0x18] sm:$0xff] %v8526_v12  ;;  %v5719_v42 = vpop.f32.mrb[245].mxu1 }
 0x4b9   : > { %v13276_v53 = vadd.f32 %v5719_v42, %v5707_v1  ;;  %v5721_v33 = vpop.f32.mrb[246].mxu1 }
 0x4ba   : > { %v8527_v61 = vpop.f32.mrb[168].mxu0  ;;  %v5723_v43 = vpop.f32.mrb[247].mxu1 }
 0x4bb   : > { %14912 = vst [vmem:[#allocation10_spill] sm:$0xff] %v13276_v53  ;;  %v8528_v45 = vpop.f32.mrb[169].mxu0  ;;  %v13278_v7 = vadd.f32 %v5723_v43, %v5711_v10 }
 0x4bc   : > { %v8529_v0 = vadd.f32 %v8528_v45, %v8527_v61  ;;  %v8530_v5 = vpop.f32.mrb[170].mxu0 }
 0x4bd   : > { %14913 = vst [vmem:[#allocation52_spill] sm:$0xff] %v13278_v7  ;;  %v8531_v4 = vpop.f32.mrb[171].mxu0 }
 0x4be   : > { %4957 = vst [vmem:[%s13251_s13 + $0x20] sm:$0xff] %v8529_v0  ;;  %v8532_v48 = vadd.f32 %v8531_v4, %v8530_v5 }
 0x4bf   : > { %v5727_v36 = vpop.f32.mrb[248].mxu1 }
 0x4c0   : > { %4958 = vst [vmem:[%s13251_s13 + $0x28] sm:$0xff] %v8532_v48  ;;  %v5729_v56 = vpop.f32.mrb[249].mxu1 }
 0x4c1   : > { %v13282_v14 = vadd.f32 %v5729_v56, %v5717_v19  ;;  %v5731_v1 = vpop.f32.mrb[250].mxu1 }
 0x4c2   : > { %v8533_v12 = vpop.f32.mrb[172].mxu0  ;;  %v5733_v42 = vpop.f32.mrb[251].mxu1 }
 0x4c3   : > { %14914 = vst [vmem:[#allocation11_spill] sm:$0xff] %v13282_v14  ;;  %v8534_v34 = vpop.f32.mrb[173].mxu0  ;;  %v13284_v40 = vadd.f32 %v5733_v42, %v5721_v33 }
 0x4c4   : > { %v8535_v43 = vadd.f32 %v8534_v34, %v8533_v12  ;;  %v8536_v10 = vpop.f32.mrb[174].mxu0 }
 0x4c5   : > { %14915 = vst [vmem:[#allocation55_spill] sm:$0xff] %v13284_v40  ;;  %v8537_v45 = vpop.f32.mrb[175].mxu0 }
 0x4c6   : > { %4959 = vst [vmem:[%s13251_s13 + $0x30] sm:$0xff] %v8535_v43  ;;  %v8538_v61 = vadd.f32 %v8537_v45, %v8536_v10 }
 0x4c7   : > { %v5737_v38 = vpop.f32.mrb[252].mxu1 }
 0x4c8   : > { %4960 = vst [vmem:[%s13251_s13 + $0x38] sm:$0xff] %v8538_v61  ;;  %v5738_v5 = vpop.f32.mrb[253].mxu1 }
 0x4c9   : > { %v6092_v0 = vadd.f32 %v5738_v5, %v5727_v36  ;;  %v5740_v4 = vpop.f32.mrb[254].mxu1 }
 0x4ca   : > { %v8555_v48 = vpop.f32.mrb[176].mxu0  ;;  %v5741_v16 = vpop.f32.mrb[255].mxu1 }
 0x4cb   : > { %v8556_v19 = vpop.f32.mrb[177].mxu0  ;;  %v6156_v56 = vmax.f32 %v6092_v0, 0.0  ;;  %v6093_v62 = vadd.f32 %v5741_v16, %v5731_v1 }
 0x4cc   : > { %v8558_v54 = vpop.f32.mrb[178].mxu0 }
 0x4cd   : > { %v8559_v39 = vpop.f32.mrb[179].mxu0  ;;  %v6157_v63 = vmax.f32 %v6093_v62, 0.0 }
 0x4cf   : > { %v13288_v33 = vpack.c.bf16 %v6157_v63, %v6156_v56 }
 0x4d1   : > { %14916 = vst [vmem:[#allocation60_spill] sm:$0xff] %v13288_v33  ;;  %v14498_v34 = vshll.u32 %v13288_v33, 16  ;;  %v14499_v38 = vshrl.u32 %v13288_v33, 16 }
 0x4d2   : > { %v8561_v12 = vpop.f32.mrb[180].mxu0 }
 0x4d3   : > { %v8562_v42 = vpop.f32.mrb[181].mxu0  ;;  %v13294_v36 = vrot.slane %v14498_v34, 1 }
 0x4d4   : > { %v13296_v43 = vadd.f32 %v8562_v42, %v8561_v12  ;;  %v8564_v10 = vpop.f32.mrb[182].mxu0 }
 0x4d5   : > { %14917 = vst [vmem:[#allocation59_spill] sm:$0xff] %v13294_v36  ;;  %v8565_v45 = vpop.f32.mrb[183].mxu0  ;;  %v13301_v39 = vor.u32 %v13294_v36, %v14499_v38 }
 0x4d6   : > { %v13303_v63 = vadd.f32 %v8565_v45, %v8564_v10 }
 0x4d7   : > { %14918 = vst [vmem:[#allocation63_spill] sm:$0xff] %v13301_v39 }
 0x4da   : > { %v8567_v54 = vpop.f32.mrb[184].mxu0 }
 0x4db   : > { %v8568_v62 = vpop.f32.mrb[185].mxu0 }
 0x4dc   : > { %v13305_v16 = vadd.f32 %v8568_v62, %v8567_v54  ;;  %v8570_v1 = vpop.f32.mrb[186].mxu0 }
 0x4dd   : > { %v8571_v61 = vpop.f32.mrb[187].mxu0 }
 0x4de   : > { %v13307_v5 = vadd.f32 %v8571_v61, %v8570_v1 }
 0x4e2   : > { %v8573_v0 = vpop.f32.mrb[188].mxu0 }
 0x4e3   : > { %v8574_v4 = vpop.f32.mrb[189].mxu0 }
 0x4e4   : > { %v13309_v48 = vadd.f32 %v8574_v4, %v8573_v0  ;;  %v8576_v19 = vpop.f32.mrb[190].mxu0 }
 0x4e5   : > { %v8577_v56 = vpop.f32.mrb[191].mxu0 }
 0x4e6   : > { %v13311_v12 = vadd.f32 %v8577_v56, %v8576_v19 }
 0x4ea   : > { %v8579_v42 = vpop.f32.mrb[192].mxu0 }
 0x4eb   : > { %v8580_v34 = vpop.f32.mrb[193].mxu0 }
 0x4ec   : > { %v13313_v10 = vadd.f32 %v8580_v34, %v8579_v42  ;;  %v8582_v45 = vpop.f32.mrb[194].mxu0 }
 0x4ed   : > { %v8583_v38 = vpop.f32.mrb[195].mxu0 }
 0x4ee   : > { %v13315_v54 = vadd.f32 %v8583_v38, %v8582_v45 }
 0x4f2   : > { %v8585_v62 = vpop.f32.mrb[196].mxu0 }
 0x4f3   : > { %v8586_v39 = vpop.f32.mrb[197].mxu0 }
 0x4f4   : > { %v13317_v1 = vadd.f32 %v8586_v39, %v8585_v62  ;;  %v8588_v61 = vpop.f32.mrb[198].mxu0 }
 0x4f5   : > { %v8589_v21 = vpop.f32.mrb[199].mxu0 }
 0x4f6   : > { %v13319_v0 = vadd.f32 %v8589_v21, %v8588_v61 }
 0x4fa   : > { %v8591_v4 = vpop.f32.mrb[200].mxu0 }
 0x4fb   : > { %v8592_v49 = vpop.f32.mrb[201].mxu0 }
 0x4fc   : > { %v13321_v19 = vadd.f32 %v8592_v49, %v8591_v4  ;;  %v8594_v56 = vpop.f32.mrb[202].mxu0 }
 0x4fd   : > { %v8595_v46 = vpop.f32.mrb[203].mxu0 }
 0x4fe   : > { %v13323_v34 = vadd.f32 %v8595_v46, %v8594_v56 }
 0x502   : > { %v8597_v42 = vpop.f32.mrb[204].mxu0 }
 0x503   : > { %v8598_v31 = vpop.f32.mrb[205].mxu0 }
 0x504   : > { %v13325_v38 = vadd.f32 %v8598_v31, %v8597_v42  ;;  %v8600_v45 = vpop.f32.mrb[206].mxu0 }
 0x505   : > { %v8601_v6 = vpop.f32.mrb[207].mxu0 }
 0x506   : > { %v13327_v39 = vadd.f32 %v8601_v6, %v8600_v45 }
 0x50a   : > { %v8603_v62 = vpop.f32.mrb[208].mxu0 }
 0x50b   : > { %v8604_v36 = vpop.f32.mrb[209].mxu0 }
 0x50c   : > { %v13329_v21 = vadd.f32 %v8604_v36, %v8603_v62  ;;  %v8606_v61 = vpop.f32.mrb[210].mxu0 }
 0x50d   : > { %v8607_v13 = vpop.f32.mrb[211].mxu0 }
 0x50e   : > { %v13331_v49 = vadd.f32 %v8607_v13, %v8606_v61 }
 0x512   : > { %v8609_v4 = vpop.f32.mrb[212].mxu0 }
 0x513   : > { %v8610_v7 = vpop.f32.mrb[213].mxu0 }
 0x514   : > { %v13333_v46 = vadd.f32 %v8610_v7, %v8609_v4  ;;  %v8612_v56 = vpop.f32.mrb[214].mxu0 }
 0x515   : > { %v8613_v40 = vpop.f32.mrb[215].mxu0 }
 0x516   : > { %v13335_v31 = vadd.f32 %v8613_v40, %v8612_v56 }
 0x51a   : > { %v8615_v42 = vpop.f32.mrb[216].mxu0 }
 0x51b   : > { %v8616_v33 = vpop.f32.mrb[217].mxu0 }
 0x51c   : > { %v13337_v6 = vadd.f32 %v8616_v33, %v8615_v42  ;;  %v8618_v45 = vpop.f32.mrb[218].mxu0 }
 0x51d   : > { %v8619_v53 = vpop.f32.mrb[219].mxu0 }
 0x51e   : > { %v13339_v36 = vadd.f32 %v8619_v53, %v8618_v45 }
 0x522   : > { %v8621_v62 = vpop.f32.mrb[220].mxu0 }
 0x523   : > { %v8622_v17 = vpop.f32.mrb[221].mxu0 }
 0x524   : > { %v13341_v13 = vadd.f32 %v8622_v17, %v8621_v62  ;;  %v8624_v61 = vpop.f32.mrb[222].mxu0 }
 0x525   : > { %v8625_v14 = vpop.f32.mrb[223].mxu0 }
 0x526   : > { %v13343_v7 = vadd.f32 %v8625_v14, %v8624_v61 }
 0x52a   : > { %v8627_v4 = vpop.f32.mrb[224].mxu0 }
 0x52b   : > { %v8628_v27 = vpop.f32.mrb[225].mxu0 }
 0x52c   : > { %v13345_v40 = vadd.f32 %v8628_v27, %v8627_v4  ;;  %v8630_v56 = vpop.f32.mrb[226].mxu0 }
 0x52d   : > { %v8631_v26 = vpop.f32.mrb[227].mxu0 }
 0x52e   : > { %14919 = vst [vmem:[#allocation64_spill] sm:$0xff] %v13345_v40  ;;  %v13347_v33 = vadd.f32 %v8631_v26, %v8630_v56 }
 0x530   : > { %14920 = vst [vmem:[#allocation67_spill] sm:$0xff] %v13347_v33 }
 0x532   : > { %v8633_v42 = vpop.f32.mrb[228].mxu0 }
 0x533   : > { %v8634_v35 = vpop.f32.mrb[229].mxu0 }
 0x534   : > { %v13349_v53 = vadd.f32 %v8634_v35, %v8633_v42  ;;  %v8636_v45 = vpop.f32.mrb[230].mxu0 }
 0x535   : > { %v8637_v24 = vpop.f32.mrb[231].mxu0 }
 0x536   : > { %v13351_v17 = vadd.f32 %v8637_v24, %v8636_v45 }
 0x538   : > { %14921 = vst [vmem:[#allocation68_spill] sm:$0xff] %v13351_v17 }
 0x53a   : > { %v8639_v62 = vpop.f32.mrb[232].mxu0 }
 0x53b   : > { %v8640_v59 = vpop.f32.mrb[233].mxu0 }
 0x53c   : > { %v13353_v14 = vadd.f32 %v8640_v59, %v8639_v62  ;;  %v8642_v61 = vpop.f32.mrb[234].mxu0 }
 0x53d   : > { %v8643_v37 = vpop.f32.mrb[235].mxu0 }
 0x53e   : > { %14922 = vst [vmem:[#allocation71_spill] sm:$0xff] %v13353_v14  ;;  %v13355_v27 = vadd.f32 %v8643_v37, %v8642_v61 }
 0x540   : > { %14923 = vst [vmem:[#allocation72_spill] sm:$0xff] %v13355_v27 }
 0x542   : > { %v8645_v4 = vpop.f32.mrb[236].mxu0 }
 0x543   : > { %v8646_v40 = vpop.f32.mrb[237].mxu0 }
 0x544   : > { %v13357_v26 = vadd.f32 %v8646_v40, %v8645_v4  ;;  %v8648_v56 = vpop.f32.mrb[238].mxu0 }
 0x545   : > { %v8649_v33 = vpop.f32.mrb[239].mxu0 }
 0x546   : > { %14924 = vst [vmem:[#allocation75_spill] sm:$0xff] %v13357_v26  ;;  %v13359_v35 = vadd.f32 %v8649_v33, %v8648_v56 }
 0x548   : > { %14925 = vst [vmem:[#allocation41_spill] sm:$0xff] %v13359_v35 }
 0x54a   : > { %v9037_v42 = vpop.f32.mrb[240].mxu0 }
 0x54b   : > { %v5944_v24 = vadd.f32 %v9037_v42, %v13296_v43  ;;  %v5937_v45 = vpop.f32.mrb[241].mxu0 }
 0x54c   : > { %v9038_v17 = vpop.f32.mrb[242].mxu0 }
 0x54d   : > { %v6094_v59 = vadd.f32 %v5944_v24, %v13056_v44  ;;  %v5947_v62 = vadd.f32 %v9038_v17, %v13303_v63  ;;  %v5939_v14 = vpop.f32.mrb[243].mxu0 }
 0x54f   : > { %v6095_v37 = vadd.f32 %v5947_v62, %v13058_v32  ;;  %v6126_v61 = vmax.f32 %v6094_v59, 0.0 }
 0x551   : > { %v6127_v27 = vmax.f32 %v6095_v37, 0.0  ;;  %v14926_v37 = vld [vmem:[#allocation7_spill] sm:$0xff] }
 0x552   : > { %v9041_v40 = vpop.f32.mrb[244].mxu0  ;;  %vm14927_vm9 = vnez %v14926_v37 }
 0x553   : > { %v6158_v4 = vpack.c.bf16 %v6127_v27, %v6126_v61  ;;  %v5960_v26 = vadd.f32 %v9041_v40, %v13309_v48  ;;  %v5951_v33 = vpop.f32.mrb[245].mxu0 }
 0x554   : > { %v5952_v56 = vadd.f32 %v13305_v16, %v5951_v33  ;;  %v9042_v35 = vpop.f32.mrb[246].mxu0 }
 0x555   : > { %v6175_v43 = vshrl.u32 %v6158_v4, 16  ;;  %v6178_v42 = vshll.u32 %v6158_v4, 16  ;;  %v6098_v45 = vadd.f32 %v13072_v30, %v5960_v26  ;;  %v5963_v44 = vadd.f32 %v9042_v35, %v13311_v12  ;;  %v5954_v63 = vpop.f32.mrb[247].mxu0  ;;  %6446 = vmatprep.mubr.bf16.mxu0 %v6158_v4  ;;  %6828 = vmatprep.mubr.bf16.mxu1 %v6158_v4 }
 0x556   : > { %v6096_v32 = vadd.f32 %v13064_v8, %v5952_v56  ;;  %v5955_v17 = vadd.f32 %v13307_v5, %v5954_v63 }
 0x557   : > { %v13371_v14 = vrot.slane %v6175_v43, 7  ;;  %v6099_v48 = vadd.f32 %v13074_v51, %v5963_v44  ;;  %v6334_v27 = vrot.slane %v6178_v42, 1  ;;  %v6130_v59 = vmax.f32 %v6098_v45, 0.0  ;;  %v9859_v45 = vld [vmem:[%s14244_s2 + $0x188] ss:$12 sps:$4 sm:$0xff]  }
 0x558   : > { %v6097_v16 = vadd.f32 %v13066_v22, %v5955_v17  ;;  %v6128_v12 = vmax.f32 %v6096_v32, 0.0 }
 0x559   : > { %v6180_v24 = vor.u32 %v6178_v42, %v13371_v14  ;;  %v6131_v30 = vmax.f32 %v6099_v48, 0.0  ;;  %v6335_v26 = vor.u32 %v6334_v27, %v6175_v43  ;;  %v9860_v48 = vld [vmem:[%s14244_s2 + $0x19c] ss:$12 sps:$4 sm:$0xff]   ;;  %v9861_v27 = vld [vmem:[%s14244_s2 + $0x1a0] ss:$12 sps:$4 sm:$0xff]  }
 0x55a   : > { %v6129_v35 = vmax.f32 %v6097_v16, 0.0  ;;  %v9045_v62 = vpop.f32.mrb[248].mxu0 }
 0x55b   : > { %v6317_v8 = vsel %vm14927_vm9, 0, %v6180_v24  ;;  %v13378_v61 = vpack.c.bf16 %v6131_v30, %v6130_v59  ;;  %v5976_v5 = vadd.f32 %v9045_v62, %v13317_v1  ;;  %v5967_v40 = vpop.f32.mrb[249].mxu0  ;;  %vm14929_vm9 = vsmask.f32 7424 }
 0x55c   : > { %v6159_v51 = vpack.c.bf16 %v6129_v35, %v6128_v12  ;;  %v5968_v4 = vadd.f32 %v13313_v10, %v5967_v40  ;;  %v9046_v22 = vpop.f32.mrb[250].mxu0  ;;  %8106 = vmatmul.mubr.msk.bf16.vlgmr.msra.gmra.mrb[16].mxu0 %vm14928_vm0, %v6317_v8  ;;  %8138 = vmatmul.mubr.msk.bf16.vlgmr.msra.gmra.mrb[0].mxu1 %vm14928_vm0, %v6317_v8  ;;  %v9858_v10 = vld [vmem:[%s14244_s2 + $0x180] ss:$12 sps:$4 sm:$0xff]   ;;  %vm14930_vm0 = vsmask.f32 256  ;;  %vm14932_vm4 = vmmov %vm14929_vm9 }
 0x55d   : > { %v6190_v33 = vshrl.u32 %v13378_v61, 16  ;;  %v6193_v56 = vshll.u32 %v13378_v61, 16  ;;  %v6102_v43 = vadd.f32 %v13090_v9, %v5976_v5  ;;  %v5979_v42 = vadd.f32 %v9046_v22, %v13319_v0  ;;  %v5970_v1 = vpop.f32.mrb[251].mxu0  ;;  %6606 = vmatpush1.bf16.msra.mxu0 %v9858_v10  ;;  %9068 = vmatpush3.bf16.msra.mxu1 %v9859_v45  ;;  %v9863_v5 = vld [vmem:[%s14244_s2 + $0x1b4] ss:$12 sps:$4 sm:$0xff]   ;;  %vm14931_vm12 = vmmov %vm14930_vm0 }
 0x55e   : > { %v6182_v57 = vshrl.u32 %v6159_v51, 16  ;;  %v6185_v44 = vshll.u32 %v6159_v51, 16  ;;  %v6100_v63 = vadd.f32 %v13080_v60, %v5968_v4  ;;  %v5971_v32 = vadd.f32 %v13315_v54, %v5970_v1  ;;  %6456 = vmatprep.mubr.bf16.mxu0 %v6159_v51  ;;  %6834 = vmatprep.mubr.bf16.mxu1 %v6159_v51 }
 0x55f   : > { %v13398_v9 = vrot.slane %v6190_v33, 7  ;;  %v6339_v0 = vrot.slane %v6193_v56, 1  ;;  %v6103_v17 = vadd.f32 %v13092_v23, %v5979_v42  ;;  %6607 = vmatprep.subr.bf16.mxu0 %v9860_v48  ;;  %9069 = vmatprep.subr.bf16.mxu1 %v9861_v27  ;;  %v6134_v16 = vmax.f32 %v6102_v43, 0.0  ;;  %v9862_v23 = vld [vmem:[%s14244_s2 + $0x198] ss:$12 sps:$4 sm:$0xff]  }
 0x560   : > { %v6184_v60 = vrot.slane %v6182_v57, 7  ;;  %v6101_v54 = vadd.f32 %v13082_v15, %v5971_v32  ;;  %v6336_v24 = vrot.slane %v6185_v44, 1  ;;  %v6132_v30 = vmax.f32 %v6100_v63, 0.0  ;;  %v9864_v15 = vld [vmem:[%s14244_s2 + $0x1b8] ss:$12 sps:$4 sm:$0xff]  }
 0x561   : > { %v6195_v59 = vor.u32 %v6193_v56, %v13398_v9  ;;  %v6135_v12 = vmax.f32 %v6103_v17, 0.0  ;;  %6608 = vmatpush1.bf16.msra.mxu0 %v9862_v23  ;;  %9070 = vmatpush3.bf16.msra.mxu1 %v9861_v27  ;;  %v6341_v35 = vor.u32 %v6339_v0, %v6190_v33  ;;  %v9867_v27 = vld [vmem:[%s14244_s2 + $0x1d0] ss:$12 sps:$4 sm:$0xff]  }
 0x562   : > { %v6187_v62 = vor.u32 %v6185_v44, %v6184_v60  ;;  %v6133_v37 = vmax.f32 %v6101_v54, 0.0  ;;  %v9049_v8 = vpop.f32.mrb[252].mxu0  ;;  %6609 = vmatprep.subr.bf16.mxu0 %v9863_v5  ;;  %9071 = vmatprep.subr.bf16.mxu1 %v9864_v15  ;;  %v13419_v40 = vsel %vm14929_vm9, %v6335_v26, %v6336_v24  ;;  %v6338_v51 = vor.u32 %v6336_v24, %v6182_v57 }
 0x563   : > { %v13421_v4 = vpack.c.bf16 %v6135_v12, %v6134_v16  ;;  %v5992_v22 = vadd.f32 %v9049_v8, %v13325_v38  ;;  %v5983_v33 = vpop.f32.mrb[253].mxu0  ;;  %v13425_v56 = vsel %vm14930_vm0, %v6184_v60, %v6195_v59  ;;  %vm14933_vm9 = vnez %v14845_v28  ;;  %v9865_v28 = vld [vmem:[%s14244_s2 + $0x1b0] ss:$12 sps:$4 sm:$0xff]  }
 0x564   : > { %v13427_v43 = vpack.c.bf16 %v6133_v37, %v6132_v30  ;;  %v5984_v42 = vadd.f32 %v13321_v19, %v5983_v33  ;;  %v9050_v1 = vpop.f32.mrb[254].mxu0  ;;  %v6188_v10 = vsel %vm14931_vm12, %v13371_v14, %v6187_v62  ;;  %v13433_v26 = vsel %vm14932_vm4, %v6338_v51, %v6339_v0  ;;  %vm14934_vm12 = vmmov %vm14932_vm4 }
 0x565   : > { %v6206_v45 = vshrl.u32 %v13421_v4, 16  ;;  %v6209_v57 = vshll.u32 %v13421_v4, 16  ;;  %v6106_v38 = vadd.f32 %v13125_v58, %v5992_v22  ;;  %v5995_v44 = vadd.f32 %v9050_v1, %v13327_v39  ;;  %v5986_v63 = vpop.f32.mrb[255].mxu0  ;;  %8107 = vmatmul.mubr.msk.bf16.gmra.mrb[20].mxu0 %vm14933_vm9, %v6188_v10  ;;  %8139 = vmatmul.mubr.msk.bf16.gmra.mrb[4].mxu1 %vm14933_vm9, %v6188_v10  ;;  %vm14935_vm4 = vmmov %vm14930_vm0 }
 0x566   : > { %v6198_v19 = vshrl.u32 %v13427_v43, 16  ;;  %v6201_v14 = vshll.u32 %v13427_v43, 16  ;;  %v6104_v32 = vadd.f32 %v13103_v41, %v5984_v42  ;;  %v5987_v0 = vadd.f32 %v13323_v34, %v5986_v63  ;;  %6466 = vmatprep.mubr.bf16.mxu0 %v13378_v61  ;;  %6842 = vmatprep.mubr.bf16.mxu1 %v13378_v61  ;;  %v9866_v61 = vld [vmem:[%s14244_s2 + $0x1cc] ss:$12 sps:$4 sm:$0xff]   ;;  %v9870_v42 = vld [vmem:[%s14244_s2 + $0x1e8] ss:$12 sps:$4 sm:$0xff]  }
 0x567   : > { %v13449_v58 = vrot.slane %v6206_v45, 7  ;;  %v13451_v39 = vrot.slane %v6209_v57, 1  ;;  %v6107_v17 = vadd.f32 %v13130_v29, %v5995_v44  ;;  %6610 = vmatpush1.bf16.msra.mxu0 %v9865_v28  ;;  %9072 = vmatpush3.bf16.msra.mxu1 %v9864_v15  ;;  %v6138_v41 = vmax.f32 %v6106_v38, 0.0  ;;  %v9868_v15 = vld [vmem:[%s14244_s2 + $0x1c8] ss:$12 sps:$4 sm:$0xff]  }
 0x568   : > { %v6200_v48 = vrot.slane %v6198_v19, 7  ;;  %v6105_v34 = vadd.f32 %v13108_v25, %v5987_v0  ;;  %6611 = vmatprep.subr.bf16.mxu0 %v9866_v61  ;;  %9073 = vmatprep.subr.bf16.mxu1 %v9867_v27  ;;  %v6342_v29 = vrot.slane %v6201_v14, 1  ;;  %v6136_v16 = vmax.f32 %v6104_v32, 0.0 }
 0x569   : > { %v6211_v60 = vor.u32 %v6209_v57, %v13449_v58  ;;  %v6139_v54 = vmax.f32 %v6107_v17, 0.0  ;;  %v13466_v24 = vor.u32 %v13451_v39, %v6206_v45  ;;  %vm14936_vm9 = vnez %v14848_v55  ;;  %v9871_v55 = vld [vmem:[%s14244_s2 + $0x1e0] ss:$12 sps:$4 sm:$0xff]  }
 0x56a   : > { %v6203_v59 = vor.u32 %v6201_v14, %v6200_v48  ;;  %v6137_v25 = vmax.f32 %v6105_v34, 0.0  ;;  %v9053_v30 = vpop.f32.mrb[0].mxu0  ;;  %v13469_v12 = vsel %vm14934_vm12, %v6341_v35, %v6342_v29  ;;  %v6344_v23 = vor.u32 %v6342_v29, %v6198_v19 }
 0x56b   : > { %v13471_v62 = vpack.c.bf16 %v6139_v54, %v6138_v41  ;;  %v6008_v37 = vadd.f32 %v9053_v30, %v13333_v46  ;;  %v5999_v8 = vpop.f32.mrb[1].mxu0  ;;  %v13475_v5 = vsel %vm14935_vm4, %v6200_v48, %v6211_v60  ;;  %6612 = vmatpush1.bf16.msra.mxu0 %v9868_v15  ;;  %9074 = vmatpush3.bf16.msra.mxu1 %v9867_v27  ;;  %v9869_v46 = vld [vmem:[%s14244_s2 + $0x1e4] ss:$12 sps:$4 sm:$0xff]   ;;  %vm14937_vm4 = vmmov %vm14930_vm0 }
 0x56c   : > { %v13480_v51 = vpack.c.bf16 %v6137_v25, %v6136_v16  ;;  %v6000_v35 = vadd.f32 %v13329_v21, %v5999_v8  ;;  %v9054_v22 = vpop.f32.mrb[2].mxu0  ;;  %v6204_v33 = vsel %vm14930_vm0, %v13398_v9, %v6203_v59  ;;  %6613 = vmatprep.subr.bf16.mxu0 %v9869_v46  ;;  %9075 = vmatprep.subr.bf16.mxu1 %v9870_v42  ;;  %v9876_v25 = vld [vmem:[%s14244_s2 + $0x218] ss:$12 sps:$4 sm:$0xff]  }
 0x56d   : > { %v6222_v1 = vshrl.u32 %v13471_v62, 16  ;;  %v6225_v10 = vshll.u32 %v13471_v62, 16  ;;  %v6110_v21 = vadd.f32 %v13169_v47, %v6008_v37  ;;  %v6011_v45 = vadd.f32 %v9054_v22, %v13335_v31  ;;  %v6002_v57 = vpop.f32.mrb[3].mxu0  ;;  %8108 = vmatmul.mubr.msk.bf16.gmra.mrb[24].mxu0 %vm14936_vm9, %v13425_v56  ;;  %8140 = vmatmul.mubr.msk.bf16.gmra.mrb[8].mxu1 %vm14936_vm9, %v13425_v56 }
 0x56e   : > { %v6214_v9 = vshrl.u32 %v13480_v51, 16  ;;  %v6108_v38 = vadd.f32 %v13147_v20, %v6000_v35  ;;  %v6003_v44 = vadd.f32 %v13331_v49, %v6002_v57  ;;  %6476 = vmatprep.mubr.bf16.mxu0 %v13427_v43  ;;  %6850 = vmatprep.mubr.bf16.mxu1 %v13427_v43  ;;  %v6217_v49 = vshll.u32 %v13480_v51, 16  ;;  %v9872_v43 = vld [vmem:[%s14244_s2 + $0x1fc] ss:$12 sps:$4 sm:$0xff]  }
 0x56f   : > { %v13506_v47 = vrot.slane %v6222_v1, 7  ;;  %v13508_v31 = vrot.slane %v6225_v10, 1  ;;  %v6111_v63 = vadd.f32 %v13174_v11, %v6011_v45  ;;  %6614 = vmatpush1.bf16.msra.mxu0 %v9871_v55  ;;  %9076 = vmatpush3.bf16.msra.mxu1 %v9870_v42  ;;  %v9873_v11 = vld [vmem:[%s14244_s2 + $0x200] ss:$12 sps:$4 sm:$0xff]   ;;  %v13526_v19 = vsel %vm14934_vm12, %v6344_v23, %v13451_v39  ;;  %v9874_v39 = vld [vmem:[%s14244_s2 + $0x1f8] ss:$12 sps:$4 sm:$0xff]  }
 0x570   : > { %v6216_v20 = vrot.slane %v6214_v9, 7  ;;  %v6109_v56 = vadd.f32 %v13152_v2, %v6003_v44  ;;  %6615 = vmatprep.subr.bf16.mxu0 %v9872_v43  ;;  %9077 = vmatprep.subr.bf16.mxu1 %v9873_v11  ;;  %v6142_v32 = vmax.f32 %v6110_v21, 0.0  ;;  %v6140_v28 = vmax.f32 %v6108_v38, 0.0 }
 0x571   : > { %v6227_v14 = vor.u32 %v6225_v10, %v13506_v47  ;;  %v6143_v0 = vmax.f32 %v6111_v63, 0.0  ;;  %v13530_v2 = vor.u32 %v13508_v31, %v6222_v1  ;;  %v6348_v30 = vrot.slane %v6217_v49, 1 }
 0x572   : > { %v6219_v17 = vor.u32 %v6217_v49, %v6216_v20  ;;  %v6141_v48 = vmax.f32 %v6109_v56, 0.0  ;;  %v9057_v41 = vpop.f32.mrb[4].mxu0  ;;  %vm14938_vm9 = vnez %v14851_v18  ;;  %v9877_v18 = vld [vmem:[%s14244_s2 + $0x210] ss:$12 sps:$4 sm:$0xff]  }
 0x573   : > { %v13532_v34 = vpack.c.bf16 %v6143_v0, %v6142_v32  ;;  %v6024_v61 = vadd.f32 %v9057_v41, %v13341_v13  ;;  %v6015_v27 = vpop.f32.mrb[5].mxu0  ;;  %v13536_v29 = vsel %vm14937_vm4, %v6216_v20, %v6227_v14  ;;  %6616 = vmatpush1.bf16.msra.mxu0 %v9874_v39  ;;  %9078 = vmatpush3.bf16.msra.mxu1 %v9873_v11  ;;  %v9875_v13 = vld [vmem:[%s14244_s2 + $0x214] ss:$12 sps:$4 sm:$0xff]   ;;  %vm14940_vm4 = vmmov %vm14930_vm0  ;;  %v14941_v32 = vld [vmem:[#allocation64_spill] sm:$0xff] }
 0x574   : > { %v13541_v60 = vpack.c.bf16 %v6141_v48, %v6140_v28  ;;  %v6016_v16 = vadd.f32 %v13337_v6, %v6015_v27  ;;  %v9058_v54 = vpop.f32.mrb[6].mxu0  ;;  %v13546_v59 = vsel %vm14930_vm0, %v13449_v58, %v6219_v17  ;;  %6617 = vmatprep.subr.bf16.mxu0 %v9875_v13  ;;  %9079 = vmatprep.subr.bf16.mxu1 %v9876_v25  ;;  %v9880_v11 = vld [vmem:[%s14244_s2 + $0x228] ss:$12 sps:$4 sm:$0xff]   ;;  %v13616_v48 = vld [vmem:[%s14245_s3] sm:$0xff]   ;;  %v14945_v13 = vld [vmem:[#allocation12_spill] sm:$0xff] }
 0x575   : > { %v6238_v23 = vshrl.u32 %v13532_v34, 16  ;;  %v6241_v6 = vshll.u32 %v13532_v34, 16  ;;  %v6114_v37 = vadd.f32 %v13213_v3, %v6024_v61  ;;  %v6027_v58 = vadd.f32 %v9058_v54, %v13343_v7  ;;  %v6018_v8 = vpop.f32.mrb[7].mxu0  ;;  %8109 = vmatmul.mubr.msk.bf16.gmra.mrb[28].mxu0 %vm14938_vm9, %v6204_v33  ;;  %8141 = vmatmul.mubr.msk.bf16.gmra.mrb[12].mxu1 %vm14938_vm9, %v6204_v33  ;;  %vm14942_vm9 = vmmov %vm14934_vm12  ;;  %v14943_v27 = vld [vmem:[#allocation9_spill] sm:$0xff] }
 0x576   : > { %v6230_v15 = vshrl.u32 %v13541_v60, 16  ;;  %v6112_v35 = vadd.f32 %v13191_v52, %v6016_v16  ;;  %v6019_v22 = vadd.f32 %v13339_v36, %v6018_v8  ;;  %6486 = vmatprep.mubr.bf16.mxu0 %v13421_v4  ;;  %6858 = vmatprep.mubr.bf16.mxu1 %v13421_v4  ;;  %v6233_v46 = vshll.u32 %v13541_v60, 16  ;;  %v14939_v36 = vld [vmem:[#allocation43_spill] sm:$0xff]  ;;  %v9878_v4 = vld [vmem:[%s14244_s2 + $0x22c] ss:$12 sps:$4 sm:$0xff]  }
 0x577   : > { %v13567_v3 = vrot.slane %v6238_v23, 7  ;;  %v13569_v7 = vrot.slane %v6241_v6, 1  ;;  %v6115_v42 = vadd.f32 %v13218_v50, %v6027_v58  ;;  %6618 = vmatpush1.bf16.msra.mxu0 %v9877_v18  ;;  %9080 = vmatpush3.bf16.msra.mxu1 %v9876_v25  ;;  %v9879_v50 = vld [vmem:[%s14244_s2 + $0x230] ss:$12 sps:$4 sm:$0xff]   ;;  %v13587_v1 = vsel %vm14934_vm12, %v13466_v24, %v6348_v30  ;;  %v14950_v18 = vld [vmem:[#allocation46_spill] sm:$0xff] }
 0x578   : > { %v6232_v52 = vrot.slane %v6230_v15, 7  ;;  %v6113_v33 = vadd.f32 %v14939_v36, %v6019_v22  ;;  %6619 = vmatprep.subr.bf16.mxu0 %v9878_v4  ;;  %9081 = vmatprep.subr.bf16.mxu1 %v9879_v50  ;;  %v6146_v21 = vmax.f32 %v6114_v37, 0.0  ;;  %v6350_v57 = vor.u32 %v6348_v30, %v6214_v9  ;;  %v14944_v16 = vld [vmem:[#allocation68_spill] sm:$0xff] }
 0x579   : > { %v6243_v10 = vor.u32 %v6241_v6, %v13567_v3  ;;  %v6147_v45 = vmax.f32 %v6115_v42, 0.0  ;;  %v6144_v44 = vmax.f32 %v6112_v35, 0.0  ;;  %v6359_v20 = vor.u32 %v13569_v7, %v6238_v23  ;;  %v14947_v30 = vld [vmem:[#allocation8_spill] sm:$0xff]  ;;  %v14948_v6 = vld [vmem:[#allocation67_spill] sm:$0xff] }
 0x57a   : > { %v6235_v38 = vor.u32 %v6233_v46, %v6232_v52  ;;  %v6145_v63 = vmax.f32 %v6113_v33, 0.0  ;;  %v9061_v55 = vpop.f32.mrb[8].mxu0  ;;  %v6354_v9 = vrot.slane %v6233_v46, 1  ;;  %vm14946_vm12 = vnez %v14945_v13  ;;  %v14949_v35 = vld [vmem:[#allocation48_spill] sm:$0xff] }
 0x57b   : > { %v13593_v49 = vpack.c.bf16 %v6147_v45, %v6146_v21  ;;  %v6040_v56 = vadd.f32 %v9061_v55, %v13349_v53  ;;  %v6031_v43 = vpop.f32.mrb[9].mxu0  ;;  %v13597_v24 = vsel %vm14940_vm4, %v6232_v52, %v6243_v10  ;;  %6620 = vmatpush1.bf16.msra.mxu0 %v9880_v11  ;;  %9082 = vmatpush3.bf16.msra.mxu1 %v9879_v50  ;;  %vm14951_vm4 = vmmov %vm14942_vm9 }
 0x57c   : > { %v13602_v14 = vpack.c.bf16 %v6145_v63, %v6144_v44  ;;  %v6032_v0 = vadd.f32 %v14941_v32, %v6031_v43  ;;  %v9062_v17 = vpop.f32.mrb[10].mxu0  ;;  %v13607_v28 = vsel %vm14930_vm0, %v13506_v47, %v6235_v38  ;;  %v13611_v53 = vsel %vm14942_vm9, %v6350_v57, %v13508_v31  ;;  %9115 = vmatprep.subr.bf16.mxu0 %v13616_v48  ;;  %v14952_v44 = vld [vmem:[#allocation75_spill] sm:$0xff]  ;;  %vm14953_vm9 = vmmov %vm14951_vm4 }
 0x57d   : > { %v6254_v41 = vshrl.u32 %v13593_v49, 16  ;;  %v6257_v61 = vshll.u32 %v13593_v49, 16  ;;  %v6118_v39 = vadd.f32 %v14943_v27, %v6040_v56  ;;  %v6043_v47 = vadd.f32 %v9062_v17, %v14944_v16  ;;  %v6034_v54 = vpop.f32.mrb[11].mxu0  ;;  %8110 = vmatmul.mubr.msk.bf16.gmra.mrb[32].mxu0 %vm14946_vm12, %v13475_v5  ;;  %8142 = vmatmul.mubr.msk.bf16.gmra.mrb[16].mxu1 %vm14946_vm12, %v13475_v5  ;;  %vm14955_vm12 = vmmov %vm14930_vm0 }
 0x57e   : > { %v6246_v31 = vshrl.u32 %v13602_v14, 16  ;;  %v6249_v25 = vshll.u32 %v13602_v14, 16  ;;  %v6116_v23 = vadd.f32 %v14947_v30, %v6032_v0  ;;  %v6035_v37 = vadd.f32 %v14948_v6, %v6034_v54  ;;  %6496 = vmatprep.mubr.bf16.mxu0 %v13480_v51  ;;  %6866 = vmatprep.mubr.bf16.mxu1 %v13480_v51  ;;  %v14960_v54 = vld [vmem:[#allocation10_spill] sm:$0xff] }
 0x57f   : > { %v6256_v58 = vrot.slane %v6254_v41, 7  ;;  %v6363_v8 = vrot.slane %v6257_v61, 1  ;;  %v6119_v22 = vadd.f32 %v14949_v35, %v6043_v47  ;;  %v6150_v42 = vmax.f32 %v6118_v39, 0.0  ;;  %v14958_v47 = vld [vmem:[#allocation13_spill] sm:$0xff] }
 0x580   : > { %v6248_v46 = vrot.slane %v6246_v31, 7  ;;  %v6117_v5 = vadd.f32 %v14950_v18, %v6035_v37  ;;  %v13639_v52 = vsel %vm14951_vm4, %v13530_v2, %v6354_v9  ;;  %v6356_v4 = vor.u32 %v6354_v9, %v6230_v15  ;;  %v14954_v15 = vld [vmem:[#allocation71_spill] sm:$0xff] }
 0x581   : > { %v6259_v36 = vor.u32 %v6257_v61, %v6256_v58  ;;  %v6151_v33 = vmax.f32 %v6119_v22, 0.0  ;;  %v6360_v50 = vrot.slane %v6249_v25, 1  ;;  %v6148_v51 = vmax.f32 %v6116_v23, 0.0  ;;  %v14956_v61 = vld [vmem:[#allocation11_spill] sm:$0xff]  ;;  %v14962_v23 = vld [vmem:[#allocation60_spill] sm:$0xff] }
 0x582   : > { %v6251_v10 = vor.u32 %v6249_v25, %v6248_v46  ;;  %v6149_v21 = vmax.f32 %v6117_v5, 0.0  ;;  %v9065_v45 = vpop.f32.mrb[12].mxu0  ;;  %v6365_v57 = vor.u32 %v6363_v8, %v6254_v41  ;;  %v13651_v2 = vsel %vm14953_vm9, %v6356_v4, %v13569_v7  ;;  %v14957_v7 = vld [vmem:[#allocation41_spill] sm:$0xff]  ;;  %v14961_v25 = vld [vmem:[#allocation72_spill] sm:$0xff]  ;;  %vm14966_vm9 = vmmov %vm14951_vm4 }
 0x583   : > { %v13643_v38 = vpack.c.bf16 %v6151_v33, %v6150_v42  ;;  %v6056_v63 = vadd.f32 %v9065_v45, %v14952_v44  ;;  %v6047_v55 = vpop.f32.mrb[13].mxu0  ;;  %v13647_v56 = vsel %vm14930_vm0, %v6248_v46, %v6259_v36  ;;  %v13661_v0 = vsel %vm14951_vm4, %v6359_v20, %v6360_v50  ;;  %v14964_v46 = vld [vmem:[#allocation55_spill] sm:$0xff]  ;;  %v14965_v5 = vld [vmem:[#allocation52_spill] sm:$0xff] }
 0x584   : > { %v13653_v43 = vpack.c.bf16 %v6149_v21, %v6148_v51  ;;  %v6048_v11 = vadd.f32 %v14954_v15, %v6047_v55  ;;  %v9066_v9 = vpop.f32.mrb[14].mxu0  ;;  %v13658_v32 = vsel %vm14955_vm12, %v13567_v3, %v6251_v10  ;;  %vm14959_vm0 = vnez %v14958_v47 }
 0x585   : > { %v6270_v17 = vshrl.u32 %v13643_v38, 16  ;;  %v6273_v41 = vshll.u32 %v13643_v38, 16  ;;  %v6122_v27 = vadd.f32 %v14956_v61, %v6056_v63  ;;  %v6059_v39 = vadd.f32 %v9066_v9, %v14957_v7  ;;  %v6050_v16 = vpop.f32.mrb[15].mxu0  ;;  %8111 = vmatmul.mubr.msk.bf16.gmra.mrb[36].mxu0 %vm14959_vm0, %v13546_v59  ;;  %8143 = vmatmul.mubr.msk.bf16.gmra.mrb[20].mxu1 %vm14959_vm0, %v13546_v59  ;;  %vm14967_vm0 = vmmov %vm14955_vm12 }
 0x586   : > { %v6262_v3 = vshrl.u32 %v13653_v43, 16  ;;  %v6265_v20 = vshll.u32 %v13653_v43, 16  ;;  %v6120_v13 = vadd.f32 %v14960_v54, %v6048_v11  ;;  %v6051_v30 = vadd.f32 %v14961_v25, %v6050_v16  ;;  %6506 = vmatprep.mubr.bf16.mxu0 %v13471_v62  ;;  %6874 = vmatprep.mubr.bf16.mxu1 %v13471_v62 }
 0x587   : > { %v14963_v6 = vshrl.u32 %v14962_v23, 16  ;;  %v6272_v35 = vrot.slane %v6270_v17, 7  ;;  %v6369_v22 = vrot.slane %v6273_v41, 1  ;;  %v6123_v42 = vadd.f32 %v14964_v46, %v6059_v39 }
 0x588   : > { %v6264_v59 = vrot.slane %v6262_v3, 7  ;;  %v6154_v18 = vmax.f32 %v6122_v27, 0.0  ;;  %v6121_v36 = vadd.f32 %v14965_v5, %v6051_v30  ;;  %v6362_v33 = vor.u32 %v6360_v50, %v6246_v31 }
 0x589   : > { %v6296_v37 = vrot.slane %v14963_v6, 7  ;;  %v6275_v4 = vor.u32 %v6273_v41, %v6272_v35  ;;  %v6155_v10 = vmax.f32 %v6123_v42, 0.0  ;;  %v6366_v51 = vrot.slane %v6265_v20, 1  ;;  %v14979_v42 = vld [vmem:[#allocation15_spill] sm:$0xff] }
 0x58a   : > { %v6371_v21 = vor.u32 %v6369_v22, %v6270_v17  ;;  %v6267_v45 = vor.u32 %v6265_v20, %v6264_v59  ;;  %v6152_v44 = vmax.f32 %v6120_v13, 0.0  ;;  %v6153_v63 = vmax.f32 %v6121_v36, 0.0  ;;  %v14968_v17 = vld [vmem:[#allocation14_spill] sm:$0xff]  ;;  %v9884_v36 = vld [vmem:[%s14245_s3 + $0x18] sm:$0xff]  }
 0x58b   : > { %v13684_v62 = vsel %vm14966_vm9, %v6362_v33, %v6363_v8  ;;  %v6172_v55 = vpack.c.bf16 %v6155_v10, %v6154_v18  ;;  %v6276_v15 = vsel %vm14955_vm12, %v6264_v59, %v6275_v4  ;;  %v13688_v11 = vsel %vm14951_vm4, %v6365_v57, %v6366_v51  ;;  %vm14970_vm9 = vmmov %vm14951_vm4  ;;  %v9882_v18 = vld [vmem:[%s14245_s3 + $0x8] sm:$0xff]   ;;  %v14998_v33 = vld [vmem:[#allocation29_spill] sm:$0xff] }
 0x58c   : > { %v6368_v9 = vor.u32 %v6366_v51, %v6262_v3  ;;  %v6171_v61 = vpack.c.bf16 %v6153_v63, %v6152_v44  ;;  %v6268_v31 = vsel %vm14967_vm0, %v6256_v58, %v6267_v45  ;;  %vm14969_vm15 = vnez %v14968_v17  ;;  %vm14972_vm12 = vmmov %vm14967_vm0  ;;  %v15000_v4 = vld [vmem:[#allocation30_spill] sm:$0xff]  ;;  %v15002_v51 = vld [vmem:[#allocation31_spill] sm:$0xff] }
 0x58d   : > { %v6286_v50 = vshrl.u32 %v6172_v55, 16  ;;  %v6289_v41 = vshll.u32 %v6172_v55, 16  ;;  %8112 = vmatmul.mubr.msk.bf16.gmra.mrb[40].mxu0 %vm14969_vm15, %v13536_v29  ;;  %8144 = vmatmul.mubr.msk.bf16.gmra.mrb[24].mxu1 %vm14969_vm15, %v13536_v29  ;;  %v14971_v58 = vshll.u32 %v14962_v23, 16  ;;  %vm14973_vm15 = vmmov %vm14951_vm4  ;;  %v9886_v10 = vld [vmem:[%s14245_s3 + $0x28] sm:$0xff]   ;;  %v9888_v45 = vld [vmem:[%s14245_s3 + $0x38] sm:$0xff]  }
 0x58e   : > { %v13698_v8 = vsel %vm14970_vm9, %v6368_v9, %v6369_v22  ;;  %v6278_v27 = vshrl.u32 %v6171_v61, 16  ;;  %v6281_v57 = vshll.u32 %v6171_v61, 16  ;;  %6516 = vmatprep.mubr.bf16.mxu0 %v13541_v60  ;;  %6882 = vmatprep.mubr.bf16.mxu1 %v13541_v60  ;;  %vm14974_vm4 = vmmov %vm14967_vm0  ;;  %v14975_v22 = vld [vmem:[#allocation59_spill] sm:$0xff]  ;;  %v15008_v44 = vld [vmem:[#allocation34_spill] sm:$0xff] }
 0x58f   : > { %v6299_v7 = vor.u32 %v14971_v58, %v6296_v37  ;;  %v6288_v39 = vrot.slane %v6286_v50, 7  ;;  %v6375_v16 = vrot.slane %v6289_v41, 1  ;;  %vm14976_vm0 = vmmov %vm14970_vm9  ;;  %v15010_v63 = vld [vmem:[#allocation35_spill] sm:$0xff]  ;;  %v9891_v59 = vld [vmem:[%s10155_s23 + $0x84] sm:$0xf] }
 0x590   : > { %v6280_v47 = vrot.slane %v6278_v27, 7  ;;  %v6372_v3 = vrot.slane %v6281_v57, 1  ;;  %vm14977_vm9 = vmmov %vm14974_vm4  ;;  %v15019_v9 = vld [vmem:[#allocation39_spill] sm:$0xff] }
 0x591   : > { %v6291_v20 = vor.u32 %v6289_v41, %v6288_v39  ;;  %v6300_v54 = vsel %vm14972_vm12, %v6288_v39, %v6299_v7  ;;  %v6377_v29 = vor.u32 %v6375_v16, %v6286_v50  ;;  %vm14978_vm2 = vmmov %vm14976_vm0  ;;  %vm14980_vm12 = vnez %v14979_v42  ;;  %v9890_v42 = vld [vmem:[%s10155_s23 + $0x80] sm:$0xf] }
 0x592   : > { %v6283_v13 = vor.u32 %v6281_v57, %v6280_v47  ;;  %v13706_v25 = vsel %vm14973_vm15, %v6371_v21, %v6372_v3  ;;  %v6374_v30 = vor.u32 %v6372_v3, %v6278_v27  ;;  %v15004_v21 = vld [vmem:[#allocation32_spill] sm:$0xff] }
 0x593   : > { %v6292_v6 = vsel %vm14974_vm4, %v6280_v47, %v6291_v20  ;;  %v13711_v60 = vsel %vm14976_vm0, %v6377_v29, %v14975_v22  ;;  %vm15020_vm0 = vnez %v15019_v9  ;;  %v9897_v9 = vld [vmem:[%s10155_s23 + $0xb4] sm:$0xf] }
 0x594   : > { %v6284_v37 = vsel %vm14977_vm9, %v6272_v35, %v6283_v13  ;;  %v13715_v46 = vsel %vm14978_vm2, %v6374_v30, %v6375_v16  ;;  %v14982_v35 = vld [vmem:[#allocation17_spill] sm:$0xff] }
 0x595   : > { %8113 = vmatmul.mubr.msk.bf16.gmra.mrb[44].mxu0 %vm14980_vm12, %v13607_v28  ;;  %8145 = vmatmul.mubr.msk.bf16.gmra.mrb[28].mxu1 %vm14980_vm12, %v13607_v28  ;;  %vm14983_vm2 = vnez %v14982_v35  ;;  %v8170_v35 = vcombine.low %v9890_v42, %v9891_v59  ;;  %v9900_v42 = vld [vmem:[%s10155_s23 + $0xd0] sm:$0xf]  ;;  %v9901_v59 = vld [vmem:[%s10155_s23 + $0xd4] sm:$0xf] }
 0x596   : > { %6526 = vmatprep.mubr.bf16.mxu0 %v13532_v34  ;;  %6890 = vmatprep.mubr.bf16.mxu1 %v13532_v34 }
 0x59d   : > { %8114 = vmatmul.mubr.msk.bf16.gmra.mrb[48].mxu0 %vm14867_vm8, %v13597_v24  ;;  %8146 = vmatmul.mubr.msk.bf16.gmra.mrb[32].mxu1 %vm14867_vm8, %v13597_v24  ;;  %v14985_v24 = vld [vmem:[#allocation19_spill] sm:$0xff] }
 0x59e   : > { %6536 = vmatprep.mubr.bf16.mxu0 %v13602_v14  ;;  %6898 = vmatprep.mubr.bf16.mxu1 %v13602_v14  ;;  %vm14986_vm8 = vnez %v14985_v24 }
 0x5a5   : > { %8115 = vmatmul.mubr.msk.bf16.gmra.mrb[52].mxu0 %vm14983_vm2, %v13658_v32  ;;  %8147 = vmatmul.mubr.msk.bf16.gmra.mrb[36].mxu1 %vm14983_vm2, %v13658_v32 }
 0x5a6   : > { %6546 = vmatprep.mubr.bf16.mxu0 %v13593_v49  ;;  %6906 = vmatprep.mubr.bf16.mxu1 %v13593_v49 }
 0x5ad   : > { %8116 = vmatmul.mubr.msk.bf16.gmra.mrb[56].mxu0 %vm14873_vm5, %v13647_v56  ;;  %8148 = vmatmul.mubr.msk.bf16.gmra.mrb[40].mxu1 %vm14873_vm5, %v13647_v56  ;;  %vm15001_vm5 = vnez %v15000_v4  ;;  %v9893_v56 = vld [vmem:[%s10155_s23 + $0x94] sm:$0xf]  ;;  %v9894_v4 = vld [vmem:[%s10155_s23 + $0xa0] sm:$0xf] }
 0x5ae   : > { %6556 = vmatprep.mubr.bf16.mxu0 %v13653_v43  ;;  %6914 = vmatprep.mubr.bf16.mxu1 %v13653_v43  ;;  %v14992_v43 = vmov 0  }
 0x5b5   : > { %8117 = vmatmul.mubr.msk.bf16.gmra.mrb[60].mxu0 %vm14986_vm8, %v6268_v31  ;;  %8149 = vmatmul.mubr.msk.bf16.gmra.mrb[44].mxu1 %vm14986_vm8, %v6268_v31  ;;  %v15021_v31 = vld [vmem:[#allocation40_spill] sm:$0xff] }
 0x5b6   : > { %6566 = vmatprep.mubr.bf16.mxu0 %v13643_v38  ;;  %6922 = vmatprep.mubr.bf16.mxu1 %v13643_v38  ;;  %vm15022_vm9 = vnez %v15021_v31  ;;  %v9892_v38 = vld [vmem:[%s10155_s23 + $0x90] sm:$0xf] }
 0x5bd   : > { %8118 = vmatmul.mubr.msk.bf16.gmra.mrb[64].mxu0 %vm14879_vm13, %v6276_v15  ;;  %8150 = vmatmul.mubr.msk.bf16.gmra.mrb[48].mxu1 %vm14879_vm13, %v6276_v15  ;;  %vm15011_vm13 = vnez %v15010_v63  ;;  %v15018_v15 = vld [vmem:[#allocation63_spill] sm:$0xff] }
 0x5be   : > { %6576 = vmatprep.mubr.bf16.mxu0 %v6171_v61  ;;  %6930 = vmatprep.mubr.bf16.mxu1 %v6171_v61  ;;  %v6397_v61 = vsel %vm15020_vm0, %v15018_v15, 0  ;;  %v9896_v15 = vld [vmem:[%s10155_s23 + $0xb0] sm:$0xf] }
 0x5c5   : > { %8119 = vmatmul.mubr.msk.bf16.gmra.mrb[68].mxu0 %vm14882_vm11, %v6284_v37  ;;  %8151 = vmatmul.mubr.msk.bf16.gmra.mrb[52].mxu1 %vm14882_vm11, %v6284_v37  ;;  %vm14999_vm11 = vnez %v14998_v33 }
 0x5c6   : > { %6586 = vmatprep.mubr.bf16.mxu0 %v6172_v55  ;;  %6938 = vmatprep.mubr.bf16.mxu1 %v6172_v55  ;;  %v15014_v55 = vld [vmem:[#allocation37_spill] sm:$0xff] }
 0x5c7   : > { %vm15015_vm15 = vnez %v15014_v55 }
 0x5cd   : > { %8120 = vmatmul.mubr.msk.bf16.gmra.mrb[72].mxu0 %vm14763_vm14, %v6292_v6  ;;  %8152 = vmatmul.mubr.msk.bf16.gmra.mrb[56].mxu1 %vm14763_vm14, %v6292_v6 }
 0x5ce   : > { %6596 = vmatprep.mubr.bf16.mxu0 %v14962_v23  ;;  %6946 = vmatprep.mubr.bf16.mxu1 %v14962_v23  ;;  %v14994_v23 = vld [vmem:[#allocation26_spill] sm:$0xff] }
 0x5cf   : > { %vm14995_vm14 = vnez %v14994_v23 }
 0x5d5   : > { %8121 = vmatmul.mubr.msk.bf16.gmra.mrb[76].mxu0 %vm14655_vm3, %v6300_v54  ;;  %8153 = vmatmul.mubr.msk.bf16.gmra.mrb[60].mxu1 %vm14655_vm3, %v6300_v54  ;;  %vm15005_vm3 = vnez %v15004_v21 }
 0x5d6   : > { %9083 = vmatprep.mubr.msk.bf16.mxu1 %vm14657_vm7, %v13419_v40  ;;  %6637 = vmatprep.mubr.bf16.mxu0 %v14992_v43 }
 0x5dd   : > { %8122 = vmatmul.mubr.msk.bf16.vlgmr.msra.gmra.mrb[16].mxu0 %vm14657_vm7, %v13419_v40  ;;  %9084 = vmatmul.mubr.msk.bf16.vlgmr.msra.gmra.mrb[64].mxu1 %vm14660_vm6, %v13433_v26  ;;  %v9883_v40 = vld [vmem:[%s14245_s3 + $0x10] sm:$0xff]   ;;  %vm15003_vm7 = vnez %v15002_v51 }
 0x5de   : > { %9087 = vmatprep.mubr.msk.bf16.mxu1 %vm14995_vm14, %v13469_v12  ;;  %6647 = vmatprep.mubr.bf16.mxu0 %v14992_v43 }
 0x5df   : > { %9116 = vmatpush3.bf16.msra.mxu0 %v13616_v48 }
 0x5e0   : > { %9117 = vmatprep.subr.bf16.mxu0 %v9882_v18 }
 0x5e3   : > { %9118 = vmatpush3.bf16.msra.mxu0 %v9882_v18  ;;  %v15023_v18 = vld [vmem:[#allocation5_spill] sm:$0xff] }
 0x5e4   : > { %9119 = vmatprep.subr.bf16.mxu0 %v9883_v40 }
 0x5e5   : > { %8123 = vmatmul.mubr.msk.bf16.gmra.mrb[20].mxu0 %vm14660_vm6, %v13433_v26  ;;  %9088 = vmatmul.mubr.msk.bf16.gmra.mrb[68].mxu1 %vm10924_vm10, %v13526_v19  ;;  %v9885_v26 = vld [vmem:[%s14245_s3 + $0x20] sm:$0xff]   ;;  %vm15009_vm6 = vnez %v15008_v44 }
 0x5e6   : > { %9091 = vmatprep.mubr.msk.bf16.mxu1 %vm14897_vm1, %v13587_v1  ;;  %6657 = vmatprep.mubr.bf16.mxu0 %v14992_v43 }
 0x5e7   : > { %9120 = vmatpush3.bf16.msra.mxu0 %v9883_v40  ;;  %v15024_v40 = vld [vmem:[#allocation6_spill] sm:$0xff] }
 0x5e8   : > { %9121 = vmatprep.subr.bf16.mxu0 %v9884_v36  ;;  %v15025_v5 = vcombine.low %v15023_v18, %v15024_v40  ;;  %v9902_v40 = vld [vmem:[%s10155_s23 + $0xe0] sm:$0xf] }
 0x5eb   : > { %9122 = vmatpush3.bf16.msra.mxu0 %v9884_v36 }
 0x5ec   : > { %9123 = vmatprep.subr.bf16.mxu0 %v9885_v26 }
 0x5ed   : > { %8124 = vmatmul.mubr.msk.bf16.gmra.mrb[24].mxu0 %vm14995_vm14, %v13469_v12  ;;  %9092 = vmatmul.mubr.msk.bf16.gmra.mrb[72].mxu1 %vm14999_vm11, %v13611_v53  ;;  %v9887_v12 = vld [vmem:[%s14245_s3 + $0x30] sm:$0xff]  }
 0x5ee   : > { %9095 = vmatprep.mubr.msk.bf16.mxu1 %vm15001_vm5, %v13639_v52  ;;  %6667 = vmatprep.mubr.bf16.mxu0 %v14992_v43 }
 0x5ef   : > { %9124 = vmatpush3.bf16.msra.mxu0 %v9885_v26 }
 0x5f0   : > { %9125 = vmatprep.subr.bf16.mxu0 %v9886_v10 }
 0x5f3   : > { %9126 = vmatpush3.bf16.msra.mxu0 %v9886_v10  ;;  %v9895_v10 = vld [vmem:[%s10155_s23 + $0xa4] sm:$0xf] }
 0x5f4   : > { %9127 = vmatprep.subr.bf16.mxu0 %v9887_v12 }
 0x5f5   : > { %8125 = vmatmul.mubr.msk.bf16.gmra.mrb[28].mxu0 %vm10924_vm10, %v13526_v19  ;;  %9096 = vmatmul.mubr.msk.bf16.gmra.mrb[76].mxu1 %vm15003_vm7, %v13651_v2  ;;  %v15006_v19 = vld [vmem:[#allocation33_spill] sm:$0xff] }
 0x5f6   : > { %9099 = vmatprep.mubr.msk.bf16.mxu1 %vm15005_vm3, %v13661_v0  ;;  %6677 = vmatprep.mubr.bf16.mxu0 %v14992_v43  ;;  %vm15007_vm10 = vnez %v15006_v19  ;;  %v15027_v19 = vld [vmem:[#allocation45_spill] sm:$0xff] }
 0x5f7   : > { %9128 = vmatpush3.bf16.msra.mxu0 %v9887_v12  ;;  %v8174_v12 = vcombine.low %v9894_v4, %v9895_v10  ;;  %v15038_v4 = vld [vmem:[#allocation65_spill] sm:$0xff]  ;;  %v15039_v10 = vld [vmem:[#allocation66_spill] sm:$0xff] }
 0x5f8   : > { %9129 = vmatprep.subr.bf16.mxu0 %v9888_v45 }
 0x5fb   : > { %9130 = vmatpush3.bf16.msra.mxu0 %v9888_v45  ;;  %v15026_v45 = vld [vmem:[#allocation44_spill] sm:$0xff] }
 0x5fc   : > { %v15028_v44 = vcombine.low %v15026_v45, %v15027_v19 }
 0x5fd   : > { %8126 = vmatmul.mubr.msk.bf16.gmra.mrb[32].mxu0 %vm14897_vm1, %v13587_v1  ;;  %9100 = vmatmul.mubr.msk.bf16.gmra.mrb[80].mxu1 %vm15007_vm10, %v13684_v62  ;;  %v15012_v1 = vld [vmem:[#allocation36_spill] sm:$0xff] }
 0x5fe   : > { %9103 = vmatprep.mubr.msk.bf16.mxu1 %vm15009_vm6, %v13688_v11  ;;  %6687 = vmatprep.mubr.bf16.mxu0 %v14992_v43  ;;  %vm15013_vm1 = vnez %v15012_v1 }
 0x605   : > { %8127 = vmatmul.mubr.msk.bf16.gmra.mrb[36].mxu0 %vm14999_vm11, %v13611_v53  ;;  %9104 = vmatmul.mubr.msk.bf16.gmra.mrb[84].mxu1 %vm15011_vm13, %v13698_v8  ;;  %v15016_v53 = vld [vmem:[#allocation38_spill] sm:$0xff] }
 0x606   : > { %9107 = vmatprep.mubr.msk.bf16.mxu1 %vm15013_vm1, %v13706_v25  ;;  %6697 = vmatprep.mubr.bf16.mxu0 %v14992_v43  ;;  %vm15017_vm4 = vnez %v15016_v53 }
 0x60d   : > { %8128 = vmatmul.mubr.msk.bf16.gmra.mrb[40].mxu0 %vm15001_vm5, %v13639_v52  ;;  %9108 = vmatmul.mubr.msk.bf16.gmra.mrb[88].mxu1 %vm15015_vm15, %v13715_v46  ;;  %v9889_v52 = vld [vmem:[%s14246_s4 + $0x4] ss:$8 sps:$4 sm:$0xff]  }
 0x60e   : > { %9111 = vmatprep.mubr.msk.bf16.mxu1 %vm15017_vm4, %v13711_v60  ;;  %6707 = vmatprep.mubr.bf16.mxu0 %v14992_v43 }
 0x615   : > { %8129 = vmatmul.mubr.msk.bf16.gmra.mrb[44].mxu0 %vm15003_vm7, %v13651_v2  ;;  %9112 = vmatmul.mubr.msk.bf16.gmra.mrb[92].mxu1 %vm15022_vm9, %v6397_v61 }
 0x616   : > { %6717 = vmatprep.mubr.bf16.mxu0 %v14992_v43  ;;  %7515 = vmatprep.mubr.bf16.mxu1 %v9889_v52 }
 0x61d   : > { %8130 = vmatmul.mubr.msk.bf16.gmra.mrb[48].mxu0 %vm15005_vm3, %v13661_v0 }
 0x61e   : > { %6727 = vmatprep.mubr.bf16.mxu0 %v14992_v43 }
 0x625   : > { %8131 = vmatmul.mubr.msk.bf16.gmra.mrb[52].mxu0 %vm15007_vm10, %v13684_v62 }
 0x626   : > { %6737 = vmatprep.mubr.bf16.mxu0 %v14992_v43 }
 0x62d   : > { %8132 = vmatmul.mubr.msk.bf16.gmra.mrb[56].mxu0 %vm15009_vm6, %v13688_v11 }
 0x62e   : > { %6747 = vmatprep.mubr.bf16.mxu0 %v14992_v43 }
 0x62f   : > { %v8691_v2 = vpop.f32.mrb[0].mxu1 }
 0x630   : > { %v8692_v50 = vpop.f32.mrb[1].mxu1  ;;  %v15029_v2 = vld [vmem:[#allocation49_spill] sm:$0xff] }
 0x631   : > { %v8694_v41 = vpop.f32.mrb[2].mxu1  ;;  %v15030_v50 = vld [vmem:[#allocation50_spill] sm:$0xff] }
 0x632   : > { %v8695_v17 = vpop.f32.mrb[3].mxu1  ;;  %v15031_v41 = vcombine.low %v15029_v2, %v15030_v50 }
 0x635   : > { %8133 = vmatmul.mubr.msk.bf16.gmra.mrb[60].mxu0 %vm15011_vm13, %v13698_v8 }
 0x636   : > { %6757 = vmatprep.mubr.bf16.mxu0 %v14992_v43 }
 0x638   : > { %v8697_v0 = vpop.f32.mrb[4].mxu1 }
 0x639   : > { %v8698_v62 = vpop.f32.mrb[5].mxu1 }
 0x63a   : > { %v13897_v27 = vadd.f32 %v8698_v62, %v8697_v0  ;;  %v8700_v57 = vpop.f32.mrb[6].mxu1 }
 0x63b   : > { %v8701_v58 = vpop.f32.mrb[7].mxu1 }
 0x63c   : > { %v13899_v7 = vadd.f32 %v8701_v58, %v8700_v57  ;;  %v9898_v58 = vld [vmem:[%s10155_s23 + $0xc0] sm:$0xf] }
 0x63d   : > { %8134 = vmatmul.mubr.msk.bf16.gmra.mrb[64].mxu0 %vm15013_vm1, %v13706_v25 }
 0x63e   : > { %6767 = vmatprep.mubr.bf16.mxu0 %v14992_v43 }
 0x640   : > { %v8703_v11 = vpop.f32.mrb[8].mxu1 }
 0x641   : > { %v8704_v39 = vpop.f32.mrb[9].mxu1 }
 0x642   : > { %v13905_v16 = vadd.f32 %v8704_v39, %v8703_v11  ;;  %v8706_v8 = vpop.f32.mrb[10].mxu1  ;;  %v9899_v11 = vld [vmem:[%s10155_s23 + $0xc4] sm:$0xf] }
 0x643   : > { %v8707_v47 = vpop.f32.mrb[11].mxu1  ;;  %v8178_v39 = vcombine.low %v9898_v58, %v9899_v11  ;;  %v15044_v11 = vld [vmem:[#allocation73_spill] sm:$0xff] }
 0x644   : > { %v13907_v3 = vadd.f32 %v8707_v47, %v8706_v8 }
 0x645   : > { %8135 = vmatmul.mubr.msk.bf16.gmra.mrb[68].mxu0 %vm15015_vm15, %v13715_v46 }
 0x646   : > { %6777 = vmatprep.mubr.bf16.mxu0 %v14992_v43 }
 0x648   : > { %v8709_v20 = vpop.f32.mrb[12].mxu1 }
 0x649   : > { %v8710_v54 = vpop.f32.mrb[13].mxu1 }
 0x64a   : > { %v13913_v29 = vadd.f32 %v8710_v54, %v8709_v20  ;;  %v8712_v13 = vpop.f32.mrb[14].mxu1  ;;  %v15032_v20 = vld [vmem:[#allocation56_spill] sm:$0xff]  ;;  %v15033_v54 = vld [vmem:[#allocation57_spill] sm:$0xff] }
 0x64b   : > { %v8713_v25 = vpop.f32.mrb[15].mxu1 }
 0x64c   : > { %v13915_v30 = vadd.f32 %v8713_v25, %v8712_v13  ;;  %v15034_v13 = vcombine.low %v15032_v20, %v15033_v54 }
 0x64d   : > { %8136 = vmatmul.mubr.msk.bf16.gmra.mrb[72].mxu0 %vm15017_vm4, %v13711_v60 }
 0x64e   : > { %6787 = vmatprep.mubr.bf16.mxu0 %v14992_v43  ;;  %v8172_v43 = vcombine.low %v9892_v38, %v9893_v56 }
 0x650   : > { %v8715_v6 = vpop.f32.mrb[16].mxu1 }
 0x651   : > { %v8716_v22 = vpop.f32.mrb[17].mxu1 }
 0x652   : > { %v13921_v37 = vadd.f32 %v8716_v22, %v8715_v6  ;;  %v8718_v46 = vpop.f32.mrb[18].mxu1 }
 0x653   : > { %v8719_v34 = vpop.f32.mrb[19].mxu1 }
 0x654   : > { %v13925_v24 = vadd.f32 %v8719_v34, %v8718_v46 }
 0x655   : > { %8137 = vmatmul.mubr.msk.bf16.gmra.mrb[76].mxu0 %vm15022_vm9, %v6397_v61  ;;  %v8176_v61 = vcombine.low %v9896_v15, %v9897_v9 }
 0x656   : > { %9131 = vmatprep.mubr.bf16.mxu0 %v8170_v35  ;;  %v8180_v35 = vcombine.low %v9900_v42, %v9901_v59 }
 0x658   : > { %v8721_v60 = vpop.f32.mrb[20].mxu1 }
 0x659   : > { %v8722_v49 = vpop.f32.mrb[21].mxu1 }
 0x65a   : > { %v13929_v14 = vadd.f32 %v8722_v49, %v8721_v60  ;;  %v8724_v28 = vpop.f32.mrb[22].mxu1  ;;  %v15035_v49 = vld [vmem:[#allocation61_spill] sm:$0xff] }
 0x65b   : > { %v8725_v32 = vpop.f32.mrb[23].mxu1 }
 0x65c   : > { %v13933_v23 = vadd.f32 %v8725_v32, %v8724_v28  ;;  %v15036_v28 = vld [vmem:[#allocation62_spill] sm:$0xff] }
 0x65d   : > { %9132 = vmatmul.mubr.bf16.vlgmr.msra.gmra.mrb[80].mxu0 %v15025_v5  ;;  %v15037_v38 = vcombine.low %v15035_v49, %v15036_v28  ;;  %v9903_v5 = vld [vmem:[%s10155_s23 + $0xe4] sm:$0xf] }
 0x65e   : > { %9135 = vmatprep.mubr.bf16.mxu0 %v8172_v43 }
 0x660   : > { %v8727_v48 = vpop.f32.mrb[24].mxu1 }
 0x661   : > { %v8728_v36 = vpop.f32.mrb[25].mxu1 }
 0x662   : > { %v13938_v26 = vadd.f32 %v8728_v36, %v8727_v48  ;;  %v8730_v33 = vpop.f32.mrb[26].mxu1  ;;  %v8182_v48 = vcombine.low %v9902_v40, %v9903_v5 }
 0x663   : > { %v8731_v51 = vpop.f32.mrb[27].mxu1 }
 0x664   : > { %v13942_v21 = vadd.f32 %v8731_v51, %v8730_v33 }
 0x665   : > { %9136 = vmatmul.mubr.bf16.gmra.mrb[84].mxu0 %v15028_v44 }
 0x666   : > { %9139 = vmatprep.mubr.bf16.mxu0 %v8174_v12  ;;  %v15040_v12 = vcombine.low %v15038_v4, %v15039_v10 }
 0x668   : > { %v8733_v63 = vpop.f32.mrb[28].mxu1 }
 0x669   : > { %v8734_v1 = vpop.f32.mrb[29].mxu1 }
 0x66a   : > { %v13947_v55 = vadd.f32 %v8734_v1, %v8733_v63  ;;  %v8736_v53 = vpop.f32.mrb[30].mxu1  ;;  %v9904_v63 = vld [vmem:[%s10155_s23 + $0xf0] sm:$0xf]  ;;  %v9905_v1 = vld [vmem:[%s10155_s23 + $0xf4] sm:$0xf]  ;;  %s8202_s23 = sshll.u32 %s10033_s22, 11 }
 0x66b   : > { %v8737_v31 = vpop.f32.mrb[31].mxu1  ;;  %s14193_s10 = scalar_lea.hbm %s14247_s5, %s8202_s23  ;;  %s14201_s22 = scalar_lea.sflag [#allocation3], %s218_s16 }
 0x66c   : > { %v13951_v52 = vadd.f32 %v8737_v31, %v8736_v53  ;;  %v8184_v53 = vcombine.low %v9904_v63, %v9905_v1  ;;  %v15042_v31 = vld [vmem:[#allocation70_spill] sm:$0xff] }
 0x66d   : > { %9140 = vmatmul.mubr.bf16.gmra.mrb[88].mxu0 %v15031_v41 }
 0x66e   : > { %9143 = vmatprep.mubr.bf16.mxu0 %v8176_v61  ;;  %v15041_v61 = vld [vmem:[#allocation69_spill] sm:$0xff] }
 0x66f   : > { %v15043_v2 = vcombine.low %v15041_v61, %v15042_v31 }
 0x670   : > { %v8739_v17 = vpop.f32.mrb[32].mxu1 }
 0x671   : > { %v8740_v0 = vpop.f32.mrb[33].mxu1 }
 0x672   : > { %v13956_v62 = vadd.f32 %v8740_v0, %v8739_v17  ;;  %v8742_v57 = vpop.f32.mrb[34].mxu1 }
 0x673   : > { %v8743_v8 = vpop.f32.mrb[35].mxu1 }
 0x674   : > { %v13960_v47 = vadd.f32 %v8743_v8, %v8742_v57 }
 0x675   : > { %9144 = vmatmul.mubr.bf16.gmra.mrb[92].mxu0 %v15034_v13 }
 0x676   : > { %9147 = vmatprep.mubr.bf16.mxu0 %v8178_v39  ;;  %v15045_v39 = vld [vmem:[#allocation74_spill] sm:$0xff] }
 0x677   : > { %v15046_v8 = vcombine.low %v15044_v11, %v15045_v39 }
 0x678   : > { %v8745_v25 = vpop.f32.mrb[36].mxu1 }
 0x679   : > { %v8746_v6 = vpop.f32.mrb[37].mxu1 }
 0x67a   : > { %v13965_v22 = vadd.f32 %v8746_v6, %v8745_v25  ;;  %v8748_v46 = vpop.f32.mrb[38].mxu1 }
 0x67b   : > { %v8749_v34 = vpop.f32.mrb[39].mxu1 }
 0x67c   : > { %v13969_v60 = vadd.f32 %v8749_v34, %v8748_v46 }
 0x67d   : > { %9148 = vmatmul.mubr.bf16.gmra.mrb[96].mxu0 %v15037_v38 }
 0x67e   : > { %9151 = vmatprep.mubr.bf16.mxu0 %v8180_v35 }
 0x680   : > { %v8751_v56 = vpop.f32.mrb[40].mxu1 }
 0x681   : > { %v8752_v43 = vpop.f32.mrb[41].mxu1 }
 0x682   : > { %v13974_v32 = vadd.f32 %v8752_v43, %v8751_v56  ;;  %v8754_v18 = vpop.f32.mrb[42].mxu1 }
 0x683   : > { %v8755_v36 = vpop.f32.mrb[43].mxu1 }
 0x684   : > { %v13978_v33 = vadd.f32 %v8755_v36, %v8754_v18 }
 0x685   : > { %9152 = vmatmul.mubr.bf16.gmra.mrb[100].mxu0 %v15040_v12 }
 0x686   : > { %9155 = vmatprep.mubr.bf16.mxu0 %v8182_v48 }
 0x688   : > { %v8757_v51 = vpop.f32.mrb[44].mxu1 }
 0x689   : > { %v8758_v45 = vpop.f32.mrb[45].mxu1 }
 0x68a   : > { %v13983_v19 = vadd.f32 %v8758_v45, %v8757_v51  ;;  %v8760_v44 = vpop.f32.mrb[46].mxu1 }
 0x68b   : > { %v8761_v15 = vpop.f32.mrb[47].mxu1 }
 0x68c   : > { %v13987_v9 = vadd.f32 %v8761_v15, %v8760_v44 }
 0x68d   : > { %9156 = vmatmul.mubr.bf16.gmra.mrb[104].mxu0 %v15043_v2 }
 0x68e   : > { %9159 = vmatprep.mubr.bf16.mxu0 %v8184_v53 }
 0x690   : > { %v8763_v50 = vpop.f32.mrb[48].mxu1 }
 0x691   : > { %v8764_v41 = vpop.f32.mrb[49].mxu1 }
 0x692   : > { %v13992_v17 = vadd.f32 %v8764_v41, %v8763_v50  ;;  %v8766_v0 = vpop.f32.mrb[50].mxu1 }
 0x693   : > { %v8767_v57 = vpop.f32.mrb[51].mxu1 }
 0x694   : > { %v13994_v58 = vadd.f32 %v8767_v57, %v8766_v0 }
 0x695   : > { %9160 = vmatmul.mubr.bf16.gmra.mrb[108].mxu0 %v15046_v8 }
 0x698   : > { %v8769_v20 = vpop.f32.mrb[52].mxu1 }
 0x699   : > { %v8770_v54 = vpop.f32.mrb[53].mxu1 }
 0x69a   : > { %v13999_v13 = vadd.f32 %v8770_v54, %v8769_v20  ;;  %v8772_v25 = vpop.f32.mrb[54].mxu1 }
 0x69b   : > { %v8773_v6 = vpop.f32.mrb[55].mxu1 }
 0x69c   : > { %v14001_v46 = vadd.f32 %v8773_v6, %v8772_v25 }
 0x6a0   : > { %v8775_v42 = vpop.f32.mrb[56].mxu1 }
 0x6a1   : > { %v8776_v59 = vpop.f32.mrb[57].mxu1 }
 0x6a2   : > { %v14003_v35 = vadd.f32 %v8776_v59, %v8775_v42  ;;  %v8778_v34 = vpop.f32.mrb[58].mxu1 }
 0x6a3   : > { %v8779_v49 = vpop.f32.mrb[59].mxu1 }
 0x6a4   : > { %v14005_v28 = vadd.f32 %v8779_v49, %v8778_v34 }
 0x6a8   : > { %v8781_v38 = vpop.f32.mrb[60].mxu1 }
 0x6a9   : > { %v8782_v56 = vpop.f32.mrb[61].mxu1 }
 0x6aa   : > { %v14007_v43 = vadd.f32 %v8782_v56, %v8781_v38  ;;  %v8784_v18 = vpop.f32.mrb[62].mxu1 }
 0x6ab   : > { %v8785_v40 = vpop.f32.mrb[63].mxu1 }
 0x6ac   : > { %v14009_v5 = vadd.f32 %v8785_v40, %v8784_v18 }
 0x6b0   : > { %v6639_v48 = vpop.f32.mrb[16].mxu0  ;;  %v9085_v36 = vpop.f32.mrb[64].mxu1 }
 0x6b1   : > { %v6996_v4 = vadd.f32 %v9085_v36, %v13897_v27  ;;  %v6641_v10 = vpop.f32.mrb[17].mxu0  ;;  %v6989_v12 = vpop.f32.mrb[65].mxu1 }
 0x6b2   : > { %v6643_v51 = vpop.f32.mrb[18].mxu0  ;;  %v9086_v45 = vpop.f32.mrb[66].mxu1 }
 0x6b3   : > { %v14012_v44 = vadd.f32 %v6996_v4, %v6641_v10  ;;  %v6999_v63 = vadd.f32 %v9086_v45, %v13899_v7  ;;  %v6645_v1 = vpop.f32.mrb[19].mxu0  ;;  %v6991_v53 = vpop.f32.mrb[67].mxu1 }
 0x6b5   : > { %v14015_v15 = vadd.f32 %v6999_v63, %v6645_v1 }
 0x6b8   : > { %v6649_v61 = vpop.f32.mrb[20].mxu0  ;;  %v9089_v31 = vpop.f32.mrb[68].mxu1 }
 0x6b9   : > { %v7012_v2 = vadd.f32 %v9089_v31, %v13913_v29  ;;  %v6651_v50 = vpop.f32.mrb[21].mxu0  ;;  %v7003_v41 = vpop.f32.mrb[69].mxu1 }
 0x6ba   : > { %v7116_v0 = vadd.f32 %v6651_v50, %v6639_v48  ;;  %v7004_v27 = vadd.f32 %v13905_v16, %v7003_v41  ;;  %v6653_v57 = vpop.f32.mrb[22].mxu0  ;;  %v9090_v11 = vpop.f32.mrb[70].mxu1 }
 0x6bb   : > { %v7015_v39 = vadd.f32 %v9090_v11, %v13915_v30  ;;  %v6655_v8 = vpop.f32.mrb[23].mxu0  ;;  %v7006_v20 = vpop.f32.mrb[71].mxu1 }
 0x6bc   : > { %v7117_v7 = vadd.f32 %v6655_v8, %v6643_v51  ;;  %v7007_v54 = vadd.f32 %v13907_v3, %v7006_v20  ;;  %v14021_v25 = vadd.f32 %v7116_v0, %v7004_v27 }
 0x6be   : > { %v14023_v6 = vadd.f32 %v7117_v7, %v7007_v54 }
 0x6c0   : > { %v6659_v42 = vpop.f32.mrb[24].mxu0  ;;  %v9093_v29 = vpop.f32.mrb[72].mxu1 }
 0x6c1   : > { %v7028_v59 = vadd.f32 %v9093_v29, %v13929_v14  ;;  %v6661_v34 = vpop.f32.mrb[25].mxu0  ;;  %v7019_v49 = vpop.f32.mrb[73].mxu1 }
 0x6c2   : > { %v7118_v16 = vadd.f32 %v6661_v34, %v6649_v61  ;;  %v7020_v38 = vadd.f32 %v13921_v37, %v7019_v49  ;;  %v6663_v56 = vpop.f32.mrb[26].mxu0  ;;  %v9094_v30 = vpop.f32.mrb[74].mxu1 }
 0x6c3   : > { %v7031_v18 = vadd.f32 %v9094_v30, %v13933_v23  ;;  %v6665_v40 = vpop.f32.mrb[27].mxu0  ;;  %v7022_v48 = vpop.f32.mrb[75].mxu1 }
 0x6c4   : > { %v7119_v3 = vadd.f32 %v6665_v40, %v6653_v57  ;;  %v7023_v36 = vadd.f32 %v13925_v24, %v7022_v48  ;;  %v14029_v4 = vadd.f32 %v7118_v16, %v7012_v2 }
 0x6c6   : > { %v14031_v10 = vadd.f32 %v7119_v3, %v7015_v39 }
 0x6c8   : > { %v6669_v12 = vpop.f32.mrb[28].mxu0  ;;  %v9097_v14 = vpop.f32.mrb[76].mxu1 }
 0x6c9   : > { %v7044_v51 = vadd.f32 %v9097_v14, %v13947_v55  ;;  %v6671_v45 = vpop.f32.mrb[29].mxu0  ;;  %v7035_v63 = vpop.f32.mrb[77].mxu1 }
 0x6ca   : > { %v7120_v37 = vadd.f32 %v6671_v45, %v6659_v42  ;;  %v7036_v1 = vadd.f32 %v13938_v26, %v7035_v63  ;;  %v6673_v53 = vpop.f32.mrb[30].mxu0  ;;  %v9098_v23 = vpop.f32.mrb[78].mxu1 }
 0x6cb   : > { %v7047_v61 = vadd.f32 %v9098_v23, %v13951_v52  ;;  %v6675_v31 = vpop.f32.mrb[31].mxu0  ;;  %v7038_v50 = vpop.f32.mrb[79].mxu1 }
 0x6cc   : > { %v7121_v24 = vadd.f32 %v6675_v31, %v6663_v56  ;;  %v7039_v2 = vadd.f32 %v13942_v21, %v7038_v50  ;;  %v14037_v41 = vadd.f32 %v7120_v37, %v7020_v38 }
 0x6ce   : > { %v14039_v0 = vadd.f32 %v7121_v24, %v7023_v36 }
 0x6d0   : > { %v6679_v27 = vpop.f32.mrb[32].mxu0  ;;  %v9101_v55 = vpop.f32.mrb[80].mxu1 }
 0x6d1   : > { %v14042_v57 = vadd.f32 %v9101_v55, %v13965_v22  ;;  %v6681_v11 = vpop.f32.mrb[33].mxu0  ;;  %v7051_v26 = vpop.f32.mrb[81].mxu1 }
 0x6d2   : > { %v7122_v39 = vadd.f32 %v6681_v11, %v6669_v12  ;;  %v7052_v8 = vadd.f32 %v13956_v62, %v7051_v26  ;;  %v6683_v52 = vpop.f32.mrb[34].mxu0  ;;  %v9102_v20 = vpop.f32.mrb[82].mxu1 }
 0x6d3   : > { %v7063_v7 = vadd.f32 %v9102_v20, %v13969_v60  ;;  %v6685_v54 = vpop.f32.mrb[35].mxu0  ;;  %v7054_v21 = vpop.f32.mrb[83].mxu1 }
 0x6d4   : > { %v7123_v42 = vadd.f32 %v6685_v54, %v6673_v53  ;;  %v7055_v29 = vadd.f32 %v13960_v47, %v7054_v21  ;;  %v14047_v34 = vadd.f32 %v7122_v39, %v7028_v59 }
 0x6d6   : > { %v14049_v49 = vadd.f32 %v7123_v42, %v7031_v18 }
 0x6d8   : > { %v6689_v22 = vpop.f32.mrb[36].mxu0  ;;  %v9105_v16 = vpop.f32.mrb[84].mxu1 }
 0x6d9   : > { %v14052_v38 = vadd.f32 %v9105_v16, %v13983_v19  ;;  %v6691_v56 = vpop.f32.mrb[37].mxu0  ;;  %v7067_v62 = vpop.f32.mrb[85].mxu1 }
 0x6da   : > { %v7124_v30 = vadd.f32 %v6691_v56, %v6679_v27  ;;  %v7068_v40 = vadd.f32 %v13974_v32, %v7067_v62  ;;  %v6693_v60 = vpop.f32.mrb[38].mxu0  ;;  %v9106_v48 = vpop.f32.mrb[86].mxu1 }
 0x6db   : > { %v7079_v3 = vadd.f32 %v9106_v48, %v13987_v9  ;;  %v6695_v36 = vpop.f32.mrb[39].mxu0  ;;  %v7070_v47 = vpop.f32.mrb[87].mxu1 }
 0x6dc   : > { %v7125_v59 = vadd.f32 %v6695_v36, %v6683_v52  ;;  %v7071_v18 = vadd.f32 %v13978_v33, %v7070_v47  ;;  %v14057_v12 = vadd.f32 %v7124_v30, %v7036_v1 }
 0x6de   : > { %v14059_v14 = vadd.f32 %v7125_v59, %v7039_v2 }
 0x6e0   : > { %v6699_v19 = vpop.f32.mrb[40].mxu0  ;;  %v9109_v45 = vpop.f32.mrb[88].mxu1 }
 0x6e1   : > { %v14062_v63 = vadd.f32 %v9109_v45, %v13999_v13  ;;  %v6701_v37 = vpop.f32.mrb[41].mxu0  ;;  %v7083_v32 = vpop.f32.mrb[89].mxu1 }
 0x6e2   : > { %v7126_v53 = vadd.f32 %v6701_v37, %v6689_v22  ;;  %v7084_v23 = vadd.f32 %v13992_v17, %v7083_v32  ;;  %v6703_v9 = vpop.f32.mrb[42].mxu0  ;;  %v9110_v31 = vpop.f32.mrb[90].mxu1 }
 0x6e3   : > { %v7095_v50 = vadd.f32 %v9110_v31, %v14001_v46  ;;  %v6705_v24 = vpop.f32.mrb[43].mxu0  ;;  %v7086_v33 = vpop.f32.mrb[91].mxu1 }
 0x6e4   : > { %v7127_v1 = vadd.f32 %v6705_v24, %v6693_v60  ;;  %v7087_v2 = vadd.f32 %v13994_v58, %v7086_v33  ;;  %v14067_v27 = vadd.f32 %v7126_v53, %v7044_v51 }
 0x6e6   : > { %v14069_v55 = vadd.f32 %v7127_v1, %v7047_v61 }
 0x6e8   : > { %v6709_v13 = vpop.f32.mrb[44].mxu0  ;;  %v9113_v11 = vpop.f32.mrb[92].mxu1 }
 0x6e9   : > { %v14072_v26 = vadd.f32 %v9113_v11, %v14007_v43  ;;  %v6711_v39 = vpop.f32.mrb[45].mxu0  ;;  %v7099_v17 = vpop.f32.mrb[93].mxu1 }
 0x6ea   : > { %v7128_v52 = vadd.f32 %v6711_v39, %v6699_v19  ;;  %v7100_v20 = vadd.f32 %v14003_v35, %v7099_v17  ;;  %v6713_v46 = vpop.f32.mrb[46].mxu0  ;;  %v9114_v54 = vpop.f32.mrb[94].mxu1 }
 0x6eb   : > { %v7111_v21 = vadd.f32 %v9114_v54, %v14009_v5  ;;  %v6715_v42 = vpop.f32.mrb[47].mxu0  ;;  %v7102_v58 = vpop.f32.mrb[95].mxu1 }
 0x6ec   : > { %v7129_v51 = vadd.f32 %v6715_v42, %v6703_v9  ;;  %v7103_v61 = vadd.f32 %v14005_v28, %v7102_v58  ;;  %v14077_v22 = vadd.f32 %v7128_v52, %v7052_v8 }
 0x6ee   : > { %v14079_v16 = vadd.f32 %v7129_v51, %v7055_v29 }
 0x6f0   : > { %v6719_v43 = vpop.f32.mrb[48].mxu0 }
 0x6f1   : > { %v6721_v56 = vpop.f32.mrb[49].mxu0 }
 0x6f2   : > { %v7130_v62 = vadd.f32 %v6721_v56, %v6709_v13  ;;  %v6723_v30 = vpop.f32.mrb[50].mxu0 }
 0x6f3   : > { %v6725_v60 = vpop.f32.mrb[51].mxu0 }
 0x6f4   : > { %v7131_v48 = vadd.f32 %v6725_v60, %v6713_v46  ;;  %v14082_v35 = vadd.f32 %v7130_v62, %v14042_v57 }
 0x6f6   : > { %v14084_v36 = vadd.f32 %v7131_v48, %v7063_v7 }
 0x6f8   : > { %v6729_v5 = vpop.f32.mrb[52].mxu0 }
 0x6f9   : > { %v6731_v47 = vpop.f32.mrb[53].mxu0 }
 0x6fa   : > { %v7132_v59 = vadd.f32 %v6731_v47, %v6719_v43  ;;  %v6733_v19 = vpop.f32.mrb[54].mxu0 }
 0x6fb   : > { %v6735_v28 = vpop.f32.mrb[55].mxu0 }
 0x6fc   : > { %v7133_v8 = vadd.f32 %v6735_v28, %v6723_v30  ;;  %v14086_v45 = vadd.f32 %v7132_v59, %v7068_v40 }
 0x6fe   : > { %v14088_v29 = vadd.f32 %v7133_v8, %v7071_v18 }
 0x700   : > { %v6739_v37 = vpop.f32.mrb[56].mxu0 }
 0x701   : > { %v6741_v32 = vpop.f32.mrb[57].mxu0 }
 0x702   : > { %v7134_v53 = vadd.f32 %v6741_v32, %v6729_v5  ;;  %v6743_v9 = vpop.f32.mrb[58].mxu0 }
 0x703   : > { %v6745_v31 = vpop.f32.mrb[59].mxu0 }
 0x704   : > { %v7135_v24 = vadd.f32 %v6745_v31, %v6733_v19  ;;  %v14091_v57 = vadd.f32 %v7134_v53, %v14052_v38 }
 0x706   : > { %v14093_v7 = vadd.f32 %v7135_v24, %v7079_v3 }
 0x708   : > { %v6749_v33 = vpop.f32.mrb[60].mxu0 }
 0x709   : > { %v6751_v1 = vpop.f32.mrb[61].mxu0 }
 0x70a   : > { %v7136_v13 = vadd.f32 %v6751_v1, %v6739_v37  ;;  %v6753_v11 = vpop.f32.mrb[62].mxu0 }
 0x70b   : > { %v6755_v39 = vpop.f32.mrb[63].mxu0 }
 0x70c   : > { %v7137_v40 = vadd.f32 %v6755_v39, %v6743_v9  ;;  %v14095_v17 = vadd.f32 %v7136_v13, %v7084_v23 }
 0x70e   : > { %v14097_v18 = vadd.f32 %v7137_v40, %v7087_v2 }
 0x710   : > { %v6759_v52 = vpop.f32.mrb[64].mxu0 }
 0x711   : > { %v6761_v46 = vpop.f32.mrb[65].mxu0 }
 0x712   : > { %v7138_v54 = vadd.f32 %v6761_v46, %v6749_v33  ;;  %v6763_v42 = vpop.f32.mrb[66].mxu0 }
 0x713   : > { %v6765_v58 = vpop.f32.mrb[67].mxu0 }
 0x714   : > { %v7139_v51 = vadd.f32 %v6765_v58, %v6753_v11  ;;  %v14100_v38 = vadd.f32 %v7138_v54, %v14062_v63 }
 0x716   : > { %v14102_v3 = vadd.f32 %v7139_v51, %v7095_v50 }
 0x718   : > { %v6769_v43 = vpop.f32.mrb[68].mxu0 }
 0x719   : > { %v6771_v56 = vpop.f32.mrb[69].mxu0 }
 0x71a   : > { %v7140_v62 = vadd.f32 %v6771_v56, %v6759_v52  ;;  %v6773_v30 = vpop.f32.mrb[70].mxu0 }
 0x71b   : > { %v6775_v60 = vpop.f32.mrb[71].mxu0 }
 0x71c   : > { %v7141_v23 = vadd.f32 %v6775_v60, %v6763_v42  ;;  %v14104_v48 = vadd.f32 %v7140_v62, %v7100_v20 }
 0x71e   : > { %v14106_v2 = vadd.f32 %v7141_v23, %v7103_v61 }
 0x720   : > { %v6779_v5 = vpop.f32.mrb[72].mxu0 }
 0x721   : > { %v6781_v47 = vpop.f32.mrb[73].mxu0 }
 0x722   : > { %v7142_v59 = vadd.f32 %v6781_v47, %v6769_v43  ;;  %v6783_v19 = vpop.f32.mrb[74].mxu0 }
 0x723   : > { %v6785_v28 = vpop.f32.mrb[75].mxu0 }
 0x724   : > { %v7143_v8 = vadd.f32 %v6785_v28, %v6773_v30  ;;  %v14109_v63 = vadd.f32 %v7142_v59, %v14072_v26 }
 0x726   : > { %v14111_v50 = vadd.f32 %v7143_v8, %v7111_v21 }
 0x728   : > { %v6789_v37 = vpop.f32.mrb[76].mxu0 }
 0x729   : > { %v6790_v32 = vpop.f32.mrb[77].mxu0 }
 0x72a   : > { %v14113_v53 = vadd.f32 %v6790_v32, %v6779_v5  ;;  %v6792_v9 = vpop.f32.mrb[78].mxu0 }
 0x72b   : > { %v6793_v20 = vpop.f32.mrb[79].mxu0 }
 0x72c   : > { %v14115_v31 = vadd.f32 %v6793_v20, %v6783_v19 }
 0x730   : > { %v9133_v61 = vpop.f32.mrb[80].mxu0 }
 0x731   : > { %v7437_v24 = vadd.f32 %v9133_v61, %v14021_v25  ;;  %v7308_v33 = vpop.f32.mrb[81].mxu0 }
 0x732   : > { %v7435_v1 = vadd.f32 %v7308_v33, %v14012_v44  ;;  %v9134_v13 = vpop.f32.mrb[82].mxu0 }
 0x733   : > { %v7438_v26 = vadd.f32 %v9134_v13, %v14023_v6  ;;  %v7311_v11 = vpop.f32.mrb[83].mxu0 }
 0x734   : > { %v7436_v21 = vadd.f32 %v7311_v11, %v14015_v15 }
 0x735   : > { %v7468_v39 = vpack.c.bf16 %v7438_v26, %v7437_v24 }
 0x736   : > { %v7467_v40 = vpack.c.bf16 %v7436_v21, %v7435_v1 }
 0x738   : > { %v9137_v52 = vpop.f32.mrb[84].mxu0 }
 0x739   : > { %v14122_v46 = vadd.f32 %v9137_v52, %v14037_v41  ;;  %v7324_v54 = vpop.f32.mrb[85].mxu0 }
 0x73a   : > { %v7439_v42 = vadd.f32 %v7324_v54, %v14029_v4  ;;  %v9138_v58 = vpop.f32.mrb[86].mxu0 }
 0x73b   : > { %v7442_v25 = vadd.f32 %v9138_v58, %v14039_v0  ;;  %v7327_v51 = vpop.f32.mrb[87].mxu0 }
 0x73c   : > { %v7440_v44 = vadd.f32 %v7327_v51, %v14031_v10 }
 0x73d   : > { %v7470_v6 = vpack.c.bf16 %v7442_v25, %v14122_v46 }
 0x73e   : > { %v7469_v43 = vpack.c.bf16 %v7440_v44, %v7439_v42 }
 0x740   : > { %v9141_v56 = vpop.f32.mrb[88].mxu0 }
 0x741   : > { %v14129_v15 = vadd.f32 %v9141_v56, %v14057_v12  ;;  %v7340_v62 = vpop.f32.mrb[89].mxu0 }
 0x742   : > { %v7443_v41 = vadd.f32 %v7340_v62, %v14047_v34  ;;  %v9142_v30 = vpop.f32.mrb[90].mxu0  ;;  %v9912_v62 = vld [vmem:[%s14246_s4 + $0x30] ss:$8 sps:$4 sm:$0xff]  }
 0x743   : > { %v14133_v60 = vadd.f32 %v9142_v30, %v14059_v14  ;;  %v7343_v4 = vpop.f32.mrb[91].mxu0 }
 0x744   : > { %v7444_v0 = vadd.f32 %v7343_v4, %v14049_v49 }
 0x745   : > { %v7472_v10 = vpack.c.bf16 %v14133_v60, %v14129_v15  ;;  %v9911_v15 = vld [vmem:[%s14246_s4 + $0x34] ss:$8 sps:$4 sm:$0xff]  }
 0x746   : > { %v7471_v23 = vpack.c.bf16 %v7444_v0, %v7443_v41 }
 0x748   : > { %v9145_v5 = vpop.f32.mrb[92].mxu0 }
 0x749   : > { %v14139_v47 = vadd.f32 %v9145_v5, %v14077_v22  ;;  %v7356_v12 = vpop.f32.mrb[93].mxu0 }
 0x74a   : > { %v7447_v59 = vadd.f32 %v7356_v12, %v14067_v27  ;;  %v9146_v19 = vpop.f32.mrb[94].mxu0 }
 0x74b   : > { %v7450_v34 = vadd.f32 %v9146_v19, %v14079_v16  ;;  %v7359_v28 = vpop.f32.mrb[95].mxu0 }
 0x74c   : > { %v7448_v14 = vadd.f32 %v7359_v28, %v14069_v55 }
 0x74d   : > { %v7474_v8 = vpack.c.bf16 %v7450_v34, %v14139_v47 }
 0x74e   : > { %v7473_v49 = vpack.c.bf16 %v7448_v14, %v7447_v59 }
 0x750   : > { %v9149_v37 = vpop.f32.mrb[96].mxu0 }
 0x751   : > { %v7453_v32 = vadd.f32 %v9149_v37, %v14086_v45  ;;  %v7372_v9 = vpop.f32.mrb[97].mxu0 }
 0x752   : > { %v7451_v20 = vadd.f32 %v7372_v9, %v14082_v35  ;;  %v9150_v22 = vpop.f32.mrb[98].mxu0 }
 0x753   : > { %v7454_v61 = vadd.f32 %v9150_v22, %v14088_v29  ;;  %v7375_v24 = vpop.f32.mrb[99].mxu0 }
 0x754   : > { %v7452_v27 = vadd.f32 %v7375_v24, %v14084_v36 }
 0x755   : > { %v7476_v33 = vpack.c.bf16 %v7454_v61, %v7453_v32 }
 0x756   : > { %v7475_v16 = vpack.c.bf16 %v7452_v27, %v7451_v20 }
 0x758   : > { %v9153_v1 = vpop.f32.mrb[100].mxu0  ;;  %8835 = vmatprep.subr.bf16.mxu1 %v7475_v16 }
 0x759   : > { %v7457_v55 = vadd.f32 %v9153_v1, %v14095_v17  ;;  %v7388_v13 = vpop.f32.mrb[101].mxu0  ;;  %8836 = vmatpush3.bf16.msra.mxu1 %v7467_v40 }
 0x75a   : > { %v7455_v26 = vadd.f32 %v7388_v13, %v14091_v57  ;;  %v9154_v45 = vpop.f32.mrb[102].mxu0  ;;  %8837 = vmatprep.subr.bf16.mxu1 %v7476_v33 }
 0x75b   : > { %v7458_v35 = vadd.f32 %v9154_v45, %v14097_v18  ;;  %v7391_v11 = vpop.f32.mrb[103].mxu0 }
 0x75c   : > { %v7456_v29 = vadd.f32 %v7391_v11, %v14093_v7 }
 0x75d   : > { %v7478_v21 = vpack.c.bf16 %v7458_v35, %v7457_v55  ;;  %8838 = vmatpush3.bf16.msra.mxu1 %v7468_v39 }
 0x75e   : > { %v7477_v36 = vpack.c.bf16 %v7456_v29, %v7455_v26 }
 0x760   : > { %v9157_v52 = vpop.f32.mrb[104].mxu0  ;;  %8839 = vmatprep.subr.bf16.mxu1 %v7477_v36 }
 0x761   : > { %v7461_v46 = vadd.f32 %v9157_v52, %v14104_v48  ;;  %v7404_v54 = vpop.f32.mrb[105].mxu0  ;;  %8840 = vmatpush3.bf16.msra.mxu1 %v7469_v43 }
 0x762   : > { %v7459_v17 = vadd.f32 %v7404_v54, %v14100_v38  ;;  %v9158_v40 = vpop.f32.mrb[106].mxu0  ;;  %8841 = vmatprep.subr.bf16.mxu1 %v7478_v21 }
 0x763   : > { %v7462_v57 = vadd.f32 %v9158_v40, %v14106_v2  ;;  %v7407_v42 = vpop.f32.mrb[107].mxu0 }
 0x764   : > { %v7460_v18 = vadd.f32 %v7407_v42, %v14102_v3 }
 0x765   : > { %v7480_v58 = vpack.c.bf16 %v7462_v57, %v7461_v46  ;;  %8842 = vmatpush3.bf16.msra.mxu1 %v7470_v6  ;;  %v9910_v6 = vld [vmem:[%s14246_s4 + $0x20] ss:$8 sps:$4 sm:$0xff]  }
 0x766   : > { %v7479_v7 = vpack.c.bf16 %v7460_v18, %v7459_v17 }
 0x768   : > { %v9161_v39 = vpop.f32.mrb[108].mxu0  ;;  %8843 = vmatprep.subr.bf16.mxu1 %v7479_v7 }
 0x769   : > { %v7465_v25 = vadd.f32 %v9161_v39, %v14113_v53  ;;  %v7420_v51 = vpop.f32.mrb[109].mxu0  ;;  %8844 = vmatpush3.bf16.msra.mxu1 %v7471_v23  ;;  %v9906_v53 = vld [vmem:[%s14246_s4] ss:$8 sps:$4 sm:$0xff]  }
 0x76a   : > { %v7463_v48 = vadd.f32 %v7420_v51, %v14109_v63  ;;  %v9162_v44 = vpop.f32.mrb[110].mxu0  ;;  %8845 = vmatprep.subr.bf16.mxu1 %v7480_v58  ;;  %v9907_v63 = vld [vmem:[%s14246_s4 + $0x14] ss:$8 sps:$4 sm:$0xff]  }
 0x76b   : > { %v7466_v38 = vadd.f32 %v9162_v44, %v14115_v31  ;;  %v7423_v43 = vpop.f32.mrb[111].mxu0  ;;  %v9909_v31 = vld [vmem:[%s14246_s4 + $0x24] ss:$8 sps:$4 sm:$0xff]  }
 0x76c   : > { %v7464_v2 = vadd.f32 %v7423_v43, %v14111_v50  ;;  %v9908_v50 = vld [vmem:[%s14246_s4 + $0x10] ss:$8 sps:$4 sm:$0xff]  }
 0x76d   : > { %v7482_v56 = vpack.c.bf16 %v7466_v38, %v7465_v25  ;;  %8846 = vmatpush3.bf16.msra.mxu1 %v7472_v10 }
 0x76e   : > { %v7481_v3 = vpack.c.bf16 %v7464_v2, %v7463_v48 }
 0x770   : > { %8847 = vmatprep.subr.bf16.mxu1 %v7481_v3 }
 0x771   : > { %8848 = vmatpush3.bf16.msra.mxu1 %v7473_v49 }
 0x772   : > { %8849 = vmatprep.subr.bf16.mxu1 %v7482_v56 }
 0x775   : > { %8850 = vmatpush3.bf16.msra.mxu1 %v7474_v8 }
 0x778   : > { %7516 = vmatmul.mubr.bf16.vlgmr.msra.gmra.mrb[96].mxu1 %v9906_v53 }
 0x779   : > { %7523 = vmatprep.mubr.bf16.mxu1 %v9907_v63 }
 0x780   : > { %7524 = vmatmul.mubr.bf16.gmra.mrb[100].mxu1 %v9908_v50 }
 0x781   : > { %7531 = vmatprep.mubr.bf16.mxu1 %v9909_v31 }
 0x788   : > { %7532 = vmatmul.mubr.bf16.gmra.mrb[104].mxu1 %v9910_v6 }
 0x789   : > { %7539 = vmatprep.mubr.bf16.mxu1 %v9911_v15 }
 0x790   : > { %7540 = vmatmul.mubr.bf16.gmra.mrb[108].mxu1 %v9912_v62 }
 0x84b   : > { %v8851_v41 = vpop.f32.mrb[96].mxu1 }
 0x84c   : > { %v8852_v30 = vpop.f32.mrb[97].mxu1 }
 0x84d   : > { %v8853_v60 = vadd.f32 %v8852_v30, %v8851_v41  ;;  %v8854_v4 = vpop.f32.mrb[98].mxu1 }
 0x84e   : > { %v8855_v0 = vpop.f32.mrb[99].mxu1 }
 0x84f   : > { %8186 = vst [vmem:[%s13251_s13 + $0x40] sm:$0xff] %v8853_v60  ;;  %v8856_v10 = vadd.f32 %v8855_v0, %v8854_v4 }
 0x851   : > { %8187 = vst [vmem:[%s13251_s13 + $0x48] sm:$0xff] %v8856_v10 }
 0x853   : > { %v8857_v23 = vpop.f32.mrb[100].mxu1 }
 0x854   : > { %v8858_v5 = vpop.f32.mrb[101].mxu1 }
 0x855   : > { %v8859_v47 = vadd.f32 %v8858_v5, %v8857_v23  ;;  %v8860_v12 = vpop.f32.mrb[102].mxu1 }
 0x856   : > { %v8861_v59 = vpop.f32.mrb[103].mxu1 }
 0x857   : > { %8188 = vst [vmem:[%s13251_s13 + $0x50] sm:$0xff] %v8859_v47  ;;  %v8862_v19 = vadd.f32 %v8861_v59, %v8860_v12 }
 0x859   : > { %8189 = vst [vmem:[%s13251_s13 + $0x58] sm:$0xff] %v8862_v19 }
 0x85b   : > { %v8863_v34 = vpop.f32.mrb[104].mxu1 }
 0x85c   : > { %v8864_v28 = vpop.f32.mrb[105].mxu1 }
 0x85d   : > { %v8865_v14 = vadd.f32 %v8864_v28, %v8863_v34  ;;  %v8866_v8 = vpop.f32.mrb[106].mxu1 }
 0x85e   : > { %v8867_v49 = vpop.f32.mrb[107].mxu1 }
 0x85f   : > { %8190 = vst [vmem:[%s13251_s13 + $0x60] sm:$0xff] %v8865_v14  ;;  %v8868_v37 = vadd.f32 %v8867_v49, %v8866_v8 }
 0x861   : > { %8191 = vst [vmem:[%s13251_s13 + $0x68] sm:$0xff] %v8868_v37 }
 0x863   : > { %v8869_v32 = vpop.f32.mrb[108].mxu1 }
 0x864   : > { %v8870_v9 = vpop.f32.mrb[109].mxu1 }
 0x865   : > { %v8871_v20 = vadd.f32 %v8870_v9, %v8869_v32  ;;  %v8872_v22 = vpop.f32.mrb[110].mxu1 }
 0x866   : > { %v8873_v61 = vpop.f32.mrb[111].mxu1 }
 0x867   : > { %8192 = vst [vmem:[%s13251_s13 + $0x70] sm:$0xff] %v8871_v20  ;;  %v8874_v24 = vadd.f32 %v8873_v61, %v8872_v22 }
 0x869   : > { %8193 = vst [vmem:[%s13251_s13 + $0x78] sm:$0xff] %v8874_v24 }
 0x86a   : > { %9926 = shalt.err (!%p9923_p3)
}
 0x86b   : > { %s9927_s16 = scalar_lea.hbm %s14193_s10, 2048  ;;  %s9931_s8 = scalar_lea.hbm %s14247_s5, 4096 }
 0x86c   : > { %p9928_p4 = scmp.ne.s32.totalorder %s14193_s10, %s9927_s16  ;;  %p9932_p9 = scmp.lt.u32.totalorder %s14193_s10, %s14247_s5 }
 0x86d   : > { %p9933_p10 = scmp.lt.u32.totalorder %s9931_s8, %s9927_s16  ;;  %p9935_p12 = scmp.lt.u32.totalorder %s9927_s16, %s14193_s10 }
 0x86e   : > { %p9929_p7 = pnand %p9928_p4, %p10050_p5 }
 0x86f   : > { %p9934_p11 = por %p9933_p10, %p9932_p9 }
 0x870   : > { %p9930_p8 = pneg %p9929_p7 }
 0x871   : > { %p9936_p13 = por %p9935_p12, %p9934_p11 }
 0x873   : > { %p9937_p0 = pnand %p9936_p13, %p9930_p8 }
 0x875   : > { %9940 = shalt.err (!%p9937_p0)
}
 0x876   : > { %s9980_s6 = smov 128   ;;  %s9981_s23 = smov 8  }
 0x877   : > { %9419 = dma.vmem_to_hbm [thread:$0]  (%p10050_p5), %s14195_s7, 2048, %s14193_s10, %s14201_s22, %s9980_s6, %s9980_s6, %s9981_s23  }
 0x878 PF: > { %p9425_p1 = scmp.ge.s32.totalorder %s9975_s21, 2  ;;  %s7587_s30 = sand.u32 1, %s9963_s18  }
 0x879   : > { %s7588_s9 = scalar_lea.sflag [#allocation3], %s7587_s30 }
 0x87a   : > { %p9422_p2 = pnand %p9425_p1, %p10054_p6 }
 0x87c   : > { %9958 = dma.done.wait (!%p9422_p2), %s7588_s9, 2048  }
 0x87d   : > { %9960 = vsyncadd (!%p9422_p2), %s7588_s9, 4294965248  ;;  %p15_p3 = scmp.ge.s32.totalorder %s10037_s24, 4   ;;  %s15047_s18 = smov %s9967_s19 }
 0x87e   : > { %s15048_s19 = smov %s9971_s20  ;;  %s15049_s20 = smov %s10048_s27 }
 0x87f   : > { %s15050_s21 = smov %s10037_s24  ;;  %17 = sbr.rel (!%p15_p3) target bundleno = 3 (0x3), region = 77 }
 0x886   :  { %7593 = vsyncpa [#allocation3], 1 }
 0x887   :  { %7595 = vsyncpa [#allocation3 + $0x1], 1 }

</bundles_post_ra>
